<compile_context>
chip_gen: v7x
topology: tpu7x:2x2x1
jax: 0.10.0
libtpu: 0.0.40
codegen_flags: <defaults>
</compile_context>

<pallas_src>
import math
import functools

import jax
import jax.numpy as jnp
import numpy as np
from jax import lax
from jax.experimental import pallas as pl
from jax.experimental.pallas import tpu as pltpu

NEG = -1e30          # plain python float -> jaxpr literal (not a captured const)
EPS = 1e-5
BF16 = jnp.bfloat16
F32 = jnp.float32


# ----------------------------- in-kernel helpers -----------------------------

def _layernorm(x, g, b):
    mu = jnp.mean(x, axis=-1, keepdims=True)
    var = jnp.mean(jnp.square(x - mu), axis=-1, keepdims=True)
    return (x - mu) * lax.rsqrt(var + EPS) * g + b


def _mha(x_q, x_kv, wq, wk, wv, bq, bk, bv, wo, bo, bias, num_heads):
    """Head-batched attention: every matmul is a 3-D batched einsum over heads.

    x_q: (Lq, D) f32; x_kv: (Lk, D) f32
    wq/wk/wv: (H, D, Dh) bf16; bq/bk/bv: (H, 1, Dh) f32
    wo: (H, Dh, D) bf16; bo: (1, D) f32
    bias: additive (Lq, Lk) f32 or None
    """
    Lq, D = x_q.shape
    Dh = D // num_heads
    scale = 1.0 / math.sqrt(Dh)

    xq = jnp.broadcast_to(x_q.astype(BF16)[None], (num_heads,) + x_q.shape)
    xk = jnp.broadcast_to(x_kv.astype(BF16)[None], (num_heads,) + x_kv.shape)

    q = jnp.einsum('hld,hdk->hlk', xq, wq, preferred_element_type=F32) + bq
    k = jnp.einsum('hld,hdk->hlk', xk, wk, preferred_element_type=F32) + bk
    v = jnp.einsum('hld,hdk->hlk', xk, wv, preferred_element_type=F32) + bv

    s = jnp.einsum('hlk,hmk->hlm', q.astype(BF16), k.astype(BF16),
                   preferred_element_type=F32) * scale
    if bias is not None:
        s = s + bias[None]
    s = s - jnp.max(s, axis=-1, keepdims=True)                  # f32 softmax
    p = jnp.exp(s)
    p = p * pl.reciprocal(jnp.sum(p, axis=-1, keepdims=True), approx=True)

    o = jnp.einsum('hlm,hmk->hlk', p.astype(BF16), v.astype(BF16),
                   preferred_element_type=F32)                  # (H, Lq, Dh)
    out = jnp.einsum('hlk,hkd->hld', o.astype(BF16), wo,
                     preferred_element_type=F32)                # (H, Lq, D)
    return jnp.sum(out, axis=0) + bo                            # (Lq, D)


# --------------------------------- the kernel ---------------------------------

def _transformer_kernel(*refs, B, L, S, num_heads, num_enc, num_dec):
    (patches, tgt_emb, kpad,
     patch_w, patch_b, pos,
     e_wqkv, e_bqkv, e_wo, e_bo, e_ln1g, e_ln1b,
     e_w1, e_b1, e_w2, e_b2, e_ln2g, e_ln2b,
     d_wqkv, d_bqkv, d_wos, d_bos, d_ln1g, d_ln1b,
     d_cwqkv, d_cbqkv, d_woc, d_boc, d_ln2g, d_ln2b,
     d_w1, d_b1, d_w2, d_b2, d_ln3g, d_ln3b,
     out_w, out_b, logits_ref) = refs

    # ---- patch embedding + positional embedding (memory is batch-flat (B*L, D)) ----
    mem = jnp.dot(patches[...], patch_w[...], preferred_element_type=F32)
    mem = mem + patch_b[...] + pos[...]

    # ---- encoder stack (unrolled; activations stay resident in VMEM) ----
    for li in range(num_enc):
        wq, wk, wv = e_wqkv[3 * li], e_wqkv[3 * li + 1], e_wqkv[3 * li + 2]
        bq, bk, bv = e_bqkv[3 * li], e_bqkv[3 * li + 1], e_bqkv[3 * li + 2]
        wo, bo = e_wo[li], e_bo[li]
        attn = jnp.concatenate(
            [_mha(mem[b * L:(b + 1) * L], mem[b * L:(b + 1) * L],
                  wq, wk, wv, bq, bk, bv, wo, bo, None, num_heads)
             for b in range(B)], axis=0)
        mem = _layernorm(mem + attn, e_ln1g[li], e_ln1b[li])
        h = jnp.maximum(jnp.dot(mem.astype(BF16), e_w1[li],
                                preferred_element_type=F32) + e_b1[li], 0.0)
        h = jnp.dot(h.astype(BF16), e_w2[li], preferred_element_type=F32) + e_b2[li]
        mem = _layernorm(mem + h, e_ln2g[li], e_ln2b[li])

    # ---- decoder masks generated in-kernel (no O(L^2) mask tensors DMA'd) ----
    r = lax.broadcasted_iota(jnp.int32, (S, S), 0)
    c = lax.broadcasted_iota(jnp.int32, (S, S), 1)
    causal = jnp.where(r >= c, 0.0, NEG).astype(F32)             # (S, S)
    rm = lax.broadcasted_iota(jnp.int32, (S, L), 0)
    cm = lax.broadcasted_iota(jnp.int32, (S, L), 1)
    mem_bias = jnp.where(rm >= cm, 0.0, NEG).astype(F32)         # (S, L)

    kpad_all = kpad[...]                                         # (B, 1, S)
    y = tgt_emb[...]                                             # (B*S, D)

    # ---- decoder stack (unrolled) ----
    for li in range(num_dec):
        # masked self-attention + residual + LN
        wq, wk, wv = d_wqkv[3 * li], d_wqkv[3 * li + 1], d_wqkv[3 * li + 2]
        bq, bk, bv = d_bqkv[3 * li], d_bqkv[3 * li + 1], d_bqkv[3 * li + 2]
        wo, bo = d_wos[li], d_bos[li]
        attn = jnp.concatenate(
            [_mha(y[b * S:(b + 1) * S], y[b * S:(b + 1) * S],
                  wq, wk, wv, bq, bk, bv, wo, bo,
                  causal + kpad_all[b], num_heads)
             for b in range(B)], axis=0)
        y = _layernorm(y + attn, d_ln1g[li], d_ln1b[li])

        # cross-attention over encoder memory (memory-subsequent mask) + LN
        wq, wk, wv = d_cwqkv[3 * li], d_cwqkv[3 * li + 1], d_cwqkv[3 * li + 2]
        bq, bk, bv = d_cbqkv[3 * li], d_cbqkv[3 * li + 1], d_cbqkv[3 * li + 2]
        wo, bo = d_woc[li], d_boc[li]
        attn = jnp.concatenate(
            [_mha(y[b * S:(b + 1) * S], mem[b * L:(b + 1) * L],
                  wq, wk, wv, bq, bk, bv, wo, bo, mem_bias, num_heads)
             for b in range(B)], axis=0)
        y = _layernorm(y + attn, d_ln2g[li], d_ln2b[li])

        # FFN + residual + LN
        h = jnp.maximum(jnp.dot(y.astype(BF16), d_w1[li],
                                preferred_element_type=F32) + d_b1[li], 0.0)
        h = jnp.dot(h.astype(BF16), d_w2[li], preferred_element_type=F32) + d_b2[li]
        y = _layernorm(y + h, d_ln3g[li], d_ln3b[li])

    # ---- fused, lane-dense (Vp = multiple of 128) vocab projection ----
    logits_ref[...] = (jnp.dot(y.astype(BF16), out_w[...],
                               preferred_element_type=F32) + out_b[...])


# --------------------------------- forward ---------------------------------

def transformer_forward(params, src, tgt, cfg):
    b, t, c, hh, ww = src.shape
    p1 = cfg["patch_size"]
    d = cfg["d_model"]
    H = cfg["num_heads"]
    V = cfg["vocab_size"]
    Vp = cfg["vocab_padded"]
    NE = cfg["num_encoder_layers"]
    ND = cfg["num_decoder_layers"]

    nh, nw = hh // p1, ww // p1
    n = nh * nw
    L = t * n
    S = tgt.shape[1]

    # Rearrange 'b c (h p1) (w p2) -> b (h w) (p1 p2 c)' per frame (JAX glue).
    x = src.astype(F32).reshape(b * t, c, nh, p1, nw, p1)
    x = x.transpose(0, 2, 4, 3, 5, 1)                    # (bt, nh, nw, p1, p2, c)
    patches = x.reshape(b * L, p1 * p1 * c).astype(BF16)

    # target embedding + sinusoidal PE (gather = JAX glue); pad-key bias (B,1,S)
    tgt_emb = (jnp.take(params["embedding"], tgt, axis=0)
               + params["pe_table"][:S][None]).reshape(b * S, d).astype(F32)
    kpad = jnp.where(tgt != 0, 0.0, NEG).astype(F32).reshape(b, 1, S)
    pos = jnp.tile(params["pos_embedding"][0], (b, 1)).astype(F32)     # (b*L, d)

    ops = [patches, tgt_emb, kpad,
           params["patch_w"], params["patch_b"], pos,
           params["e_wqkv"], params["e_bqkv"], params["e_wo"], params["e_bo"],
           params["e_ln1g"], params["e_ln1b"],
           params["e_w1"], params["e_b1"], params["e_w2"], params["e_b2"],
           params["e_ln2g"], params["e_ln2b"],
           params["d_wqkv"], params["d_bqkv"], params["d_wos"], params["d_bos"],
           params["d_ln1g"], params["d_ln1b"],
           params["d_cwqkv"], params["d_cbqkv"], params["d_woc"], params["d_boc"],
           params["d_ln2g"], params["d_ln2b"],
           params["d_w1"], params["d_b1"], params["d_w2"], params["d_b2"],
           params["d_ln3g"], params["d_ln3b"],
           params["out_w"], params["out_b"]]

    vmem = pl.BlockSpec(memory_space=pltpu.MemorySpace.VMEM)
    logits = pl.pallas_call(
        functools.partial(_transformer_kernel, B=b, L=L, S=S,
                          num_heads=H, num_enc=NE, num_dec=ND),
        out_shape=jax.ShapeDtypeStruct((b * S, Vp), F32),
        in_specs=[vmem for _ in ops],
        out_specs=pl.BlockSpec(memory_space=pltpu.MemorySpace.VMEM),
    )(*ops)

    logits = logits[:, :V].reshape(b, S, V)
    return logits.transpose(1, 0, 2)                     # (S, b, vocab) seq-first


# ------------------------------ parameter init ------------------------------

class KeyGen:
    def __init__(self, key):
        self.key = key

    def __call__(self):
        self.key, sub = jax.random.split(self.key)
        return sub


def xavier(key, shape):
    limit = math.sqrt(6.0 / (shape[0] + shape[1]))
    return jax.random.uniform(key, shape, F32, -limit, limit)


def sinusoidal_pe(max_len, d_model):
    pos = np.arange(max_len)[:, None].astype(np.float32)
    div = np.exp(np.arange(0, d_model, 2).astype(np.float32)
                 * (-math.log(10000.0) / d_model))
    pe = np.zeros((max_len, d_model), np.float32)
    pe[:, 0::2] = np.sin(pos * div)
    pe[:, 1::2] = np.cos(pos * div)
    return jnp.asarray(pe)


def init_params(key, cfg):
    kg = KeyGen(key)
    d = cfg["d_model"]
    ff = cfg["dim_feedforward"]
    H = cfg["num_heads"]
    Dh = d // H
    V = cfg["vocab_size"]
    Vp = cfg["vocab_padded"]
    patch_dim = cfg["channels"] * cfg["patch_size"] ** 2
    n = (cfg["image_size"] // cfg["patch_size"]) ** 2
    t = cfg["t"]
    NE = cfg["num_encoder_layers"]
    ND = cfg["num_decoder_layers"]

    ones = lambda s: jnp.ones(s, F32)
    zeros = lambda s: jnp.zeros(s, F32)

    def head_split_in(w):          # (d, d) -> (H, d, Dh); head h uses cols h*Dh:(h+1)*Dh
        return w.reshape(d, H, Dh).transpose(1, 0, 2)

    def qkv_stack(nl):             # (nl*3, H, d, Dh) bf16, order [q,k,v] per layer
        mats = [head_split_in(xavier(kg(), (d, d))) for _ in range(nl * 3)]
        return jnp.stack(mats).astype(BF16)

    def wo_stack(nl):              # (nl, H, Dh, d) bf16
        return jnp.stack([xavier(kg(), (d, d)).reshape(H, Dh, d)
                          for _ in range(nl)]).astype(BF16)

    def ffn_stack(nl, din, dout):  # (nl, din, dout) bf16
        return jnp.stack([xavier(kg(), (din, dout)) for _ in range(nl)]).astype(BF16)

    out_w = jnp.zeros((d, Vp), F32).at[:, :V].set(xavier(kg(), (d, V))).astype(BF16)

    return dict(
        patch_w=xavier(kg(), (patch_dim, d)).astype(BF16),
        patch_b=zeros((1, d)),
        pos_embedding=jax.random.normal(kg(), (1, t * n, d), F32),
        embedding=xavier(kg(), (V, d)),
        pe_table=sinusoidal_pe(V, d),
        # encoder stack (stacked along a leading layer axis)
        e_wqkv=qkv_stack(NE), e_bqkv=zeros((NE * 3, H, 1, Dh)),
        e_wo=wo_stack(NE), e_bo=zeros((NE, 1, d)),
        e_ln1g=ones((NE, 1, d)), e_ln1b=zeros((NE, 1, d)),
        e_w1=ffn_stack(NE, d, ff), e_b1=zeros((NE, 1, ff)),
        e_w2=ffn_stack(NE, ff, d), e_b2=zeros((NE, 1, d)),
        e_ln2g=ones((NE, 1, d)), e_ln2b=zeros((NE, 1, d)),
        # decoder stack
        d_wqkv=qkv_stack(ND), d_bqkv=zeros((ND * 3, H, 1, Dh)),
        d_wos=wo_stack(ND), d_bos=zeros((ND, 1, d)),
        d_ln1g=ones((ND, 1, d)), d_ln1b=zeros((ND, 1, d)),
        d_cwqkv=qkv_stack(ND), d_cbqkv=zeros((ND * 3, H, 1, Dh)),
        d_woc=wo_stack(ND), d_boc=zeros((ND, 1, d)),
        d_ln2g=ones((ND, 1, d)), d_ln2b=zeros((ND, 1, d)),
        d_w1=ffn_stack(ND, d, ff), d_b1=zeros((ND, 1, ff)),
        d_w2=ffn_stack(ND, ff, d), d_b2=zeros((ND, 1, d)),
        d_ln3g=ones((ND, 1, d)), d_ln3b=zeros((ND, 1, d)),
        out_w=out_w, out_b=zeros((1, Vp)),
    )


# ----------------------------------- main -----------------------------------

if __name__ == "__main__":
    V = 50
    cfg = dict(image_size=32, patch_size=16, channels=3,
               d_model=32, embed_dim=32, num_heads=4,
               num_encoder_layers=2, num_decoder_layers=2,
               dim_feedforward=64, vocab_size=V,
               vocab_padded=((V + 127) // 128) * 128, t=2)

    key = jax.random.PRNGKey(0)
    kparam, ksrc, ktgt = jax.random.split(key, 3)
    params = init_params(kparam, cfg)

    b, t, S = 2, cfg["t"], 8
    src = jax.random.normal(
        ksrc, (b, t, cfg["channels"], cfg["image_size"], cfg["image_size"]), jnp.float32)
    tgt = jax.random.randint(ktgt, (b, S), 1, cfg["vocab_size"])
    tgt = tgt.at[1, -2:].set(0)          # a couple of pad tokens in batch 1

    fwd = jax.jit(functools.partial(transformer_forward, cfg=cfg))
    out = jax.block_until_ready(fwd(params, src, tgt))

    assert out.shape == (S, b, cfg["vocab_size"]), out.shape
    assert bool(jnp.all(jnp.isfinite(out)))
    print("KERNEL_OK")
</pallas_src>

<mosaic_0001>
module attributes {stable_mosaic.version = 11 : i64} {
  func.func @_transformer_kernel(%arg0: memref<16x768xbf16, #tpu.memory_space<vmem>>, %arg1: memref<16x32xf32, #tpu.memory_space<vmem>>, %arg2: memref<2x1x8xf32, #tpu.memory_space<vmem>>, %arg3: memref<768x32xbf16, #tpu.memory_space<vmem>>, %arg4: memref<1x32xf32, #tpu.memory_space<vmem>>, %arg5: memref<16x32xf32, #tpu.memory_space<vmem>>, %arg6: memref<6x4x32x8xbf16, #tpu.memory_space<vmem>>, %arg7: memref<6x4x1x8xf32, #tpu.memory_space<vmem>>, %arg8: memref<2x4x8x32xbf16, #tpu.memory_space<vmem>>, %arg9: memref<2x1x32xf32, #tpu.memory_space<vmem>>, %arg10: memref<2x1x32xf32, #tpu.memory_space<vmem>>, %arg11: memref<2x1x32xf32, #tpu.memory_space<vmem>>, %arg12: memref<2x32x64xbf16, #tpu.memory_space<vmem>>, %arg13: memref<2x1x64xf32, #tpu.memory_space<vmem>>, %arg14: memref<2x64x32xbf16, #tpu.memory_space<vmem>>, %arg15: memref<2x1x32xf32, #tpu.memory_space<vmem>>, %arg16: memref<2x1x32xf32, #tpu.memory_space<vmem>>, %arg17: memref<2x1x32xf32, #tpu.memory_space<vmem>>, %arg18: memref<6x4x32x8xbf16, #tpu.memory_space<vmem>>, %arg19: memref<6x4x1x8xf32, #tpu.memory_space<vmem>>, %arg20: memref<2x4x8x32xbf16, #tpu.memory_space<vmem>>, %arg21: memref<2x1x32xf32, #tpu.memory_space<vmem>>, %arg22: memref<2x1x32xf32, #tpu.memory_space<vmem>>, %arg23: memref<2x1x32xf32, #tpu.memory_space<vmem>>, %arg24: memref<6x4x32x8xbf16, #tpu.memory_space<vmem>>, %arg25: memref<6x4x1x8xf32, #tpu.memory_space<vmem>>, %arg26: memref<2x4x8x32xbf16, #tpu.memory_space<vmem>>, %arg27: memref<2x1x32xf32, #tpu.memory_space<vmem>>, %arg28: memref<2x1x32xf32, #tpu.memory_space<vmem>>, %arg29: memref<2x1x32xf32, #tpu.memory_space<vmem>>, %arg30: memref<2x32x64xbf16, #tpu.memory_space<vmem>>, %arg31: memref<2x1x64xf32, #tpu.memory_space<vmem>>, %arg32: memref<2x64x32xbf16, #tpu.memory_space<vmem>>, %arg33: memref<2x1x32xf32, #tpu.memory_space<vmem>>, %arg34: memref<2x1x32xf32, #tpu.memory_space<vmem>>, %arg35: memref<2x1x32xf32, #tpu.memory_space<vmem>>, %arg36: memref<32x128xbf16, #tpu.memory_space<vmem>>, %arg37: memref<1x128xf32, #tpu.memory_space<vmem>>, %arg38: memref<16x128xf32, #tpu.memory_space<vmem>>) attributes {dimension_semantics = [], scalar_prefetch = 0 : i64, scratch_operands = 0 : i64, tpu.core_type = #tpu.core_type<tc>} {
    %c0 = arith.constant 0 : index
    %c0_0 = arith.constant 0 : index
    %0 = vector.load %arg0[%c0, %c0_0] : memref<16x768xbf16, #tpu.memory_space<vmem>>, vector<16x768xbf16>
    %c0_1 = arith.constant 0 : index
    %c0_2 = arith.constant 0 : index
    %1 = vector.load %arg3[%c0_1, %c0_2] : memref<768x32xbf16, #tpu.memory_space<vmem>>, vector<768x32xbf16>
    %cst = arith.constant dense<0.000000e+00> : vector<16x32xf32>
    %2 = tpu.matmul %0, %1, %cst {dimension_numbers = #tpu.dot_dimension_numbers<[1], [0], [0], [1], [0, 0, 1, 1], [], []>} : vector<16x768xbf16>, vector<768x32xbf16>, vector<16x32xf32> -> vector<16x32xf32>
    %c0_3 = arith.constant 0 : index
    %c0_4 = arith.constant 0 : index
    %3 = vector.load %arg4[%c0_3, %c0_4] : memref<1x32xf32, #tpu.memory_space<vmem>>, vector<1x32xf32>
    %4 = vector.broadcast %3 : vector<1x32xf32> to vector<16x32xf32>
    %5 = arith.addf %2, %4 : vector<16x32xf32>
    %c0_5 = arith.constant 0 : index
    %c0_6 = arith.constant 0 : index
    %6 = vector.load %arg5[%c0_5, %c0_6] : memref<16x32xf32, #tpu.memory_space<vmem>>, vector<16x32xf32>
    %7 = arith.addf %5, %6 : vector<16x32xf32>
    %c0_7 = arith.constant 0 : index
    %c0_8 = arith.constant 0 : index
    %c0_9 = arith.constant 0 : index
    %c0_10 = arith.constant 0 : index
    %8 = vector.load %arg6[%c0_7, %c0_8, %c0_9, %c0_10] : memref<6x4x32x8xbf16, #tpu.memory_space<vmem>>, vector<1x4x32x8xbf16>
    %9 = vector.shape_cast %8 : vector<1x4x32x8xbf16> to vector<4x32x8xbf16>
    %c1 = arith.constant 1 : index
    %c0_11 = arith.constant 0 : index
    %c0_12 = arith.constant 0 : index
    %c0_13 = arith.constant 0 : index
    %10 = vector.load %arg6[%c1, %c0_11, %c0_12, %c0_13] : memref<6x4x32x8xbf16, #tpu.memory_space<vmem>>, vector<1x4x32x8xbf16>
    %11 = vector.shape_cast %10 : vector<1x4x32x8xbf16> to vector<4x32x8xbf16>
    %c2 = arith.constant 2 : index
    %c0_14 = arith.constant 0 : index
    %c0_15 = arith.constant 0 : index
    %c0_16 = arith.constant 0 : index
    %12 = vector.load %arg6[%c2, %c0_14, %c0_15, %c0_16] : memref<6x4x32x8xbf16, #tpu.memory_space<vmem>>, vector<1x4x32x8xbf16>
    %13 = vector.shape_cast %12 : vector<1x4x32x8xbf16> to vector<4x32x8xbf16>
    %c0_17 = arith.constant 0 : index
    %c0_18 = arith.constant 0 : index
    %c0_19 = arith.constant 0 : index
    %c0_20 = arith.constant 0 : index
    %14 = vector.load %arg7[%c0_17, %c0_18, %c0_19, %c0_20] : memref<6x4x1x8xf32, #tpu.memory_space<vmem>>, vector<1x4x1x8xf32>
    %15 = vector.shape_cast %14 : vector<1x4x1x8xf32> to vector<4x1x8xf32>
    %c1_21 = arith.constant 1 : index
    %c0_22 = arith.constant 0 : index
    %c0_23 = arith.constant 0 : index
    %c0_24 = arith.constant 0 : index
    %16 = vector.load %arg7[%c1_21, %c0_22, %c0_23, %c0_24] : memref<6x4x1x8xf32, #tpu.memory_space<vmem>>, vector<1x4x1x8xf32>
    %17 = vector.shape_cast %16 : vector<1x4x1x8xf32> to vector<4x1x8xf32>
    %c2_25 = arith.constant 2 : index
    %c0_26 = arith.constant 0 : index
    %c0_27 = arith.constant 0 : index
    %c0_28 = arith.constant 0 : index
    %18 = vector.load %arg7[%c2_25, %c0_26, %c0_27, %c0_28] : memref<6x4x1x8xf32, #tpu.memory_space<vmem>>, vector<1x4x1x8xf32>
    %19 = vector.shape_cast %18 : vector<1x4x1x8xf32> to vector<4x1x8xf32>
    %c0_29 = arith.constant 0 : index
    %c0_30 = arith.constant 0 : index
    %c0_31 = arith.constant 0 : index
    %c0_32 = arith.constant 0 : index
    %20 = vector.load %arg8[%c0_29, %c0_30, %c0_31, %c0_32] : memref<2x4x8x32xbf16, #tpu.memory_space<vmem>>, vector<1x4x8x32xbf16>
    %21 = vector.shape_cast %20 : vector<1x4x8x32xbf16> to vector<4x8x32xbf16>
    %c0_33 = arith.constant 0 : index
    %c0_34 = arith.constant 0 : index
    %c0_35 = arith.constant 0 : index
    %22 = vector.load %arg9[%c0_33, %c0_34, %c0_35] : memref<2x1x32xf32, #tpu.memory_space<vmem>>, vector<1x1x32xf32>
    %23 = vector.shape_cast %22 : vector<1x1x32xf32> to vector<1x32xf32>
    %24 = vector.extract_strided_slice %7 {offsets = [0, 0], sizes = [8, 32], strides = [1, 1]} : vector<16x32xf32> to vector<8x32xf32>
    %25 = vector.extract_strided_slice %7 {offsets = [0, 0], sizes = [8, 32], strides = [1, 1]} : vector<16x32xf32> to vector<8x32xf32>
    %26 = arith.truncf %24 : vector<8x32xf32> to vector<8x32xbf16>
    %27 = vector.shape_cast %26 : vector<8x32xbf16> to vector<1x8x32xbf16>
    %28 = vector.shape_cast %27 : vector<1x8x32xbf16> to vector<1x8x32xbf16>
    %29 = vector.broadcast %28 : vector<1x8x32xbf16> to vector<4x8x32xbf16>
    %30 = arith.truncf %25 : vector<8x32xf32> to vector<8x32xbf16>
    %31 = vector.shape_cast %30 : vector<8x32xbf16> to vector<1x8x32xbf16>
    %32 = vector.shape_cast %31 : vector<1x8x32xbf16> to vector<1x8x32xbf16>
    %33 = vector.broadcast %32 : vector<1x8x32xbf16> to vector<4x8x32xbf16>
    "tpu.trace_start"() <{level = 10 : i32, message = "hld,hdk->hlk"}> : () -> ()
    %cst_36 = arith.constant dense<0.000000e+00> : vector<4x8x8xf32>
    %34 = tpu.matmul %29, %9, %cst_36 {dimension_numbers = #tpu.dot_dimension_numbers<[2], [1], [1], [2], [0, 0, 0, 1, 1, 2], [0], [0]>} : vector<4x8x32xbf16>, vector<4x32x8xbf16>, vector<4x8x8xf32> -> vector<4x8x8xf32>
    "tpu.trace_stop"() : () -> ()
    %35 = vector.broadcast %15 : vector<4x1x8xf32> to vector<4x8x8xf32>
    %36 = arith.addf %34, %35 : vector<4x8x8xf32>
    "tpu.trace_start"() <{level = 10 : i32, message = "hld,hdk->hlk"}> : () -> ()
    %cst_37 = arith.constant dense<0.000000e+00> : vector<4x8x8xf32>
    %37 = tpu.matmul %33, %11, %cst_37 {dimension_numbers = #tpu.dot_dimension_numbers<[2], [1], [1], [2], [0, 0, 0, 1, 1, 2], [0], [0]>} : vector<4x8x32xbf16>, vector<4x32x8xbf16>, vector<4x8x8xf32> -> vector<4x8x8xf32>
    "tpu.trace_stop"() : () -> ()
    %38 = vector.broadcast %17 : vector<4x1x8xf32> to vector<4x8x8xf32>
    %39 = arith.addf %37, %38 : vector<4x8x8xf32>
    "tpu.trace_start"() <{level = 10 : i32, message = "hld,hdk->hlk"}> : () -> ()
    %cst_38 = arith.constant dense<0.000000e+00> : vector<4x8x8xf32>
    %40 = tpu.matmul %33, %13, %cst_38 {dimension_numbers = #tpu.dot_dimension_numbers<[2], [1], [1], [2], [0, 0, 0, 1, 1, 2], [0], [0]>} : vector<4x8x32xbf16>, vector<4x32x8xbf16>, vector<4x8x8xf32> -> vector<4x8x8xf32>
    "tpu.trace_stop"() : () -> ()
    %41 = vector.broadcast %19 : vector<4x1x8xf32> to vector<4x8x8xf32>
    %42 = arith.addf %40, %41 : vector<4x8x8xf32>
    %43 = arith.truncf %36 : vector<4x8x8xf32> to vector<4x8x8xbf16>
    %44 = arith.truncf %39 : vector<4x8x8xf32> to vector<4x8x8xbf16>
    "tpu.trace_start"() <{level = 10 : i32, message = "hlk,hmk->hlm"}> : () -> ()
    %cst_39 = arith.constant dense<0.000000e+00> : vector<4x8x8xf32>
    %45 = tpu.matmul %43, %44, %cst_39 {dimension_numbers = #tpu.dot_dimension_numbers<[2], [2], [1], [1], [0, 0, 0, 1, 1, 1], [0], [0]>} : vector<4x8x8xbf16>, vector<4x8x8xbf16>, vector<4x8x8xf32> -> vector<4x8x8xf32>
    "tpu.trace_stop"() : () -> ()
    %cst_40 = arith.constant 0.353553385 : f32
    %46 = vector.broadcast %cst_40 : f32 to vector<4x8x8xf32>
    %47 = arith.mulf %45, %46 : vector<4x8x8xf32>
    %cst_41 = arith.constant dense<0xFF800000> : vector<4x8xf32>
    %48 = vector.multi_reduction <maximumf>, %47, %cst_41 [2] : vector<4x8x8xf32> to vector<4x8xf32>
    %49 = vector.shape_cast %48 : vector<4x8xf32> to vector<4x8x1xf32>
    %50 = vector.broadcast %49 : vector<4x8x1xf32> to vector<4x8x8xf32>
    %51 = arith.subf %47, %50 : vector<4x8x8xf32>
    %52 = math.exp %51 : vector<4x8x8xf32>
    %cst_42 = arith.constant dense<0.000000e+00> : vector<4x8xf32>
    %53 = vector.multi_reduction <add>, %52, %cst_42 [2] : vector<4x8x8xf32> to vector<4x8xf32>
    %54 = vector.shape_cast %53 : vector<4x8xf32> to vector<4x8x1xf32>
    %55 = tpu.reciprocal %54 {approx = true} : vector<4x8x1xf32> -> vector<4x8x1xf32>
    %56 = vector.broadcast %55 : vector<4x8x1xf32> to vector<4x8x8xf32>
    %57 = arith.mulf %52, %56 : vector<4x8x8xf32>
    %58 = arith.truncf %57 : vector<4x8x8xf32> to vector<4x8x8xbf16>
    %59 = arith.truncf %42 : vector<4x8x8xf32> to vector<4x8x8xbf16>
    "tpu.trace_start"() <{level = 10 : i32, message = "hlm,hmk->hlk"}> : () -> ()
    %cst_43 = arith.constant dense<0.000000e+00> : vector<4x8x8xf32>
    %60 = tpu.matmul %58, %59, %cst_43 {dimension_numbers = #tpu.dot_dimension_numbers<[2], [1], [1], [2], [0, 0, 0, 1, 1, 2], [0], [0]>} : vector<4x8x8xbf16>, vector<4x8x8xbf16>, vector<4x8x8xf32> -> vector<4x8x8xf32>
    "tpu.trace_stop"() : () -> ()
    %61 = arith.truncf %60 : vector<4x8x8xf32> to vector<4x8x8xbf16>
    "tpu.trace_start"() <{level = 10 : i32, message = "hlk,hkd->hld"}> : () -> ()
    %cst_44 = arith.constant dense<0.000000e+00> : vector<4x8x32xf32>
    %62 = tpu.matmul %61, %21, %cst_44 {dimension_numbers = #tpu.dot_dimension_numbers<[2], [1], [1], [2], [0, 0, 0, 1, 1, 2], [0], [0]>} : vector<4x8x8xbf16>, vector<4x8x32xbf16>, vector<4x8x32xf32> -> vector<4x8x32xf32>
    "tpu.trace_stop"() : () -> ()
    %cst_45 = arith.constant dense<0.000000e+00> : vector<8x32xf32>
    %63 = vector.multi_reduction <add>, %62, %cst_45 [0] : vector<4x8x32xf32> to vector<8x32xf32>
    %64 = vector.broadcast %23 : vector<1x32xf32> to vector<8x32xf32>
    %65 = arith.addf %63, %64 : vector<8x32xf32>
    %66 = vector.extract_strided_slice %7 {offsets = [8, 0], sizes = [8, 32], strides = [1, 1]} : vector<16x32xf32> to vector<8x32xf32>
    %67 = vector.extract_strided_slice %7 {offsets = [8, 0], sizes = [8, 32], strides = [1, 1]} : vector<16x32xf32> to vector<8x32xf32>
    %68 = arith.truncf %66 : vector<8x32xf32> to vector<8x32xbf16>
    %69 = vector.shape_cast %68 : vector<8x32xbf16> to vector<1x8x32xbf16>
    %70 = vector.shape_cast %69 : vector<1x8x32xbf16> to vector<1x8x32xbf16>
    %71 = vector.broadcast %70 : vector<1x8x32xbf16> to vector<4x8x32xbf16>
    %72 = arith.truncf %67 : vector<8x32xf32> to vector<8x32xbf16>
    %73 = vector.shape_cast %72 : vector<8x32xbf16> to vector<1x8x32xbf16>
    %74 = vector.shape_cast %73 : vector<1x8x32xbf16> to vector<1x8x32xbf16>
    %75 = vector.broadcast %74 : vector<1x8x32xbf16> to vector<4x8x32xbf16>
    "tpu.trace_start"() <{level = 10 : i32, message = "hld,hdk->hlk"}> : () -> ()
    %cst_46 = arith.constant dense<0.000000e+00> : vector<4x8x8xf32>
    %76 = tpu.matmul %71, %9, %cst_46 {dimension_numbers = #tpu.dot_dimension_numbers<[2], [1], [1], [2], [0, 0, 0, 1, 1, 2], [0], [0]>} : vector<4x8x32xbf16>, vector<4x32x8xbf16>, vector<4x8x8xf32> -> vector<4x8x8xf32>
    "tpu.trace_stop"() : () -> ()
    %77 = vector.broadcast %15 : vector<4x1x8xf32> to vector<4x8x8xf32>
    %78 = arith.addf %76, %77 : vector<4x8x8xf32>
    "tpu.trace_start"() <{level = 10 : i32, message = "hld,hdk->hlk"}> : () -> ()
    %cst_47 = arith.constant dense<0.000000e+00> : vector<4x8x8xf32>
    %79 = tpu.matmul %75, %11, %cst_47 {dimension_numbers = #tpu.dot_dimension_numbers<[2], [1], [1], [2], [0, 0, 0, 1, 1, 2], [0], [0]>} : vector<4x8x32xbf16>, vector<4x32x8xbf16>, vector<4x8x8xf32> -> vector<4x8x8xf32>
    "tpu.trace_stop"() : () -> ()
    %80 = vector.broadcast %17 : vector<4x1x8xf32> to vector<4x8x8xf32>
    %81 = arith.addf %79, %80 : vector<4x8x8xf32>
    "tpu.trace_start"() <{level = 10 : i32, message = "hld,hdk->hlk"}> : () -> ()
    %cst_48 = arith.constant dense<0.000000e+00> : vector<4x8x8xf32>
    %82 = tpu.matmul %75, %13, %cst_48 {dimension_numbers = #tpu.dot_dimension_numbers<[2], [1], [1], [2], [0, 0, 0, 1, 1, 2], [0], [0]>} : vector<4x8x32xbf16>, vector<4x32x8xbf16>, vector<4x8x8xf32> -> vector<4x8x8xf32>
    "tpu.trace_stop"() : () -> ()
    %83 = vector.broadcast %19 : vector<4x1x8xf32> to vector<4x8x8xf32>
    %84 = arith.addf %82, %83 : vector<4x8x8xf32>
    %85 = arith.truncf %78 : vector<4x8x8xf32> to vector<4x8x8xbf16>
    %86 = arith.truncf %81 : vector<4x8x8xf32> to vector<4x8x8xbf16>
    "tpu.trace_start"() <{level = 10 : i32, message = "hlk,hmk->hlm"}> : () -> ()
    %cst_49 = arith.constant dense<0.000000e+00> : vector<4x8x8xf32>
    %87 = tpu.matmul %85, %86, %cst_49 {dimension_numbers = #tpu.dot_dimension_numbers<[2], [2], [1], [1], [0, 0, 0, 1, 1, 1], [0], [0]>} : vector<4x8x8xbf16>, vector<4x8x8xbf16>, vector<4x8x8xf32> -> vector<4x8x8xf32>
    "tpu.trace_stop"() : () -> ()
    %cst_50 = arith.constant 0.353553385 : f32
    %88 = vector.broadcast %cst_50 : f32 to vector<4x8x8xf32>
    %89 = arith.mulf %87, %88 : vector<4x8x8xf32>
    %cst_51 = arith.constant dense<0xFF800000> : vector<4x8xf32>
    %90 = vector.multi_reduction <maximumf>, %89, %cst_51 [2] : vector<4x8x8xf32> to vector<4x8xf32>
    %91 = vector.shape_cast %90 : vector<4x8xf32> to vector<4x8x1xf32>
    %92 = vector.broadcast %91 : vector<4x8x1xf32> to vector<4x8x8xf32>
    %93 = arith.subf %89, %92 : vector<4x8x8xf32>
    %94 = math.exp %93 : vector<4x8x8xf32>
    %cst_52 = arith.constant dense<0.000000e+00> : vector<4x8xf32>
    %95 = vector.multi_reduction <add>, %94, %cst_52 [2] : vector<4x8x8xf32> to vector<4x8xf32>
    %96 = vector.shape_cast %95 : vector<4x8xf32> to vector<4x8x1xf32>
    %97 = tpu.reciprocal %96 {approx = true} : vector<4x8x1xf32> -> vector<4x8x1xf32>
    %98 = vector.broadcast %97 : vector<4x8x1xf32> to vector<4x8x8xf32>
    %99 = arith.mulf %94, %98 : vector<4x8x8xf32>
    %100 = arith.truncf %99 : vector<4x8x8xf32> to vector<4x8x8xbf16>
    %101 = arith.truncf %84 : vector<4x8x8xf32> to vector<4x8x8xbf16>
    "tpu.trace_start"() <{level = 10 : i32, message = "hlm,hmk->hlk"}> : () -> ()
    %cst_53 = arith.constant dense<0.000000e+00> : vector<4x8x8xf32>
    %102 = tpu.matmul %100, %101, %cst_53 {dimension_numbers = #tpu.dot_dimension_numbers<[2], [1], [1], [2], [0, 0, 0, 1, 1, 2], [0], [0]>} : vector<4x8x8xbf16>, vector<4x8x8xbf16>, vector<4x8x8xf32> -> vector<4x8x8xf32>
    "tpu.trace_stop"() : () -> ()
    %103 = arith.truncf %102 : vector<4x8x8xf32> to vector<4x8x8xbf16>
    "tpu.trace_start"() <{level = 10 : i32, message = "hlk,hkd->hld"}> : () -> ()
    %cst_54 = arith.constant dense<0.000000e+00> : vector<4x8x32xf32>
    %104 = tpu.matmul %103, %21, %cst_54 {dimension_numbers = #tpu.dot_dimension_numbers<[2], [1], [1], [2], [0, 0, 0, 1, 1, 2], [0], [0]>} : vector<4x8x8xbf16>, vector<4x8x32xbf16>, vector<4x8x32xf32> -> vector<4x8x32xf32>
    "tpu.trace_stop"() : () -> ()
    %cst_55 = arith.constant dense<0.000000e+00> : vector<8x32xf32>
    %105 = vector.multi_reduction <add>, %104, %cst_55 [0] : vector<4x8x32xf32> to vector<8x32xf32>
    %106 = vector.broadcast %23 : vector<1x32xf32> to vector<8x32xf32>
    %107 = arith.addf %105, %106 : vector<8x32xf32>
    %108 = tpu.concatenate %65, %107 in 0 : vector<8x32xf32>, vector<8x32xf32> -> vector<16x32xf32>
    %109 = arith.addf %7, %108 : vector<16x32xf32>
    %c0_56 = arith.constant 0 : index
    %c0_57 = arith.constant 0 : index
    %c0_58 = arith.constant 0 : index
    %110 = vector.load %arg10[%c0_56, %c0_57, %c0_58] : memref<2x1x32xf32, #tpu.memory_space<vmem>>, vector<1x1x32xf32>
    %111 = vector.shape_cast %110 : vector<1x1x32xf32> to vector<1x32xf32>
    %c0_59 = arith.constant 0 : index
    %c0_60 = arith.constant 0 : index
    %c0_61 = arith.constant 0 : index
    %112 = vector.load %arg11[%c0_59, %c0_60, %c0_61] : memref<2x1x32xf32, #tpu.memory_space<vmem>>, vector<1x1x32xf32>
    %113 = vector.shape_cast %112 : vector<1x1x32xf32> to vector<1x32xf32>
    %cst_62 = arith.constant dense<0.000000e+00> : vector<16xf32>
    %114 = vector.multi_reduction <add>, %109, %cst_62 [1] : vector<16x32xf32> to vector<16xf32>
    %115 = vector.shape_cast %114 : vector<16xf32> to vector<16x1xf32>
    %cst_63 = arith.constant 3.200000e+01 : f32
    %116 = vector.broadcast %cst_63 : f32 to vector<16x1xf32>
    %117 = arith.divf %115, %116 : vector<16x1xf32>
    %118 = vector.broadcast %117 : vector<16x1xf32> to vector<16x32xf32>
    %119 = arith.subf %109, %118 : vector<16x32xf32>
    %120 = arith.mulf %119, %119 : vector<16x32xf32>
    %cst_64 = arith.constant dense<0.000000e+00> : vector<16xf32>
    %121 = vector.multi_reduction <add>, %120, %cst_64 [1] : vector<16x32xf32> to vector<16xf32>
    %122 = vector.shape_cast %121 : vector<16xf32> to vector<16x1xf32>
    %cst_65 = arith.constant 3.200000e+01 : f32
    %123 = vector.broadcast %cst_65 : f32 to vector<16x1xf32>
    %124 = arith.divf %122, %123 : vector<16x1xf32>
    %125 = vector.broadcast %117 : vector<16x1xf32> to vector<16x32xf32>
    %126 = arith.subf %109, %125 : vector<16x32xf32>
    %cst_66 = arith.constant 9.99999974E-6 : f32
    %127 = vector.broadcast %cst_66 : f32 to vector<16x1xf32>
    %128 = arith.addf %124, %127 : vector<16x1xf32>
    %129 = math.rsqrt %128 : vector<16x1xf32>
    %130 = vector.broadcast %129 : vector<16x1xf32> to vector<16x32xf32>
    %131 = arith.mulf %126, %130 : vector<16x32xf32>
    %132 = vector.broadcast %111 : vector<1x32xf32> to vector<16x32xf32>
    %133 = arith.mulf %131, %132 : vector<16x32xf32>
    %134 = vector.broadcast %113 : vector<1x32xf32> to vector<16x32xf32>
    %135 = arith.addf %133, %134 : vector<16x32xf32>
    %136 = arith.truncf %135 : vector<16x32xf32> to vector<16x32xbf16>
    %c0_67 = arith.constant 0 : index
    %c0_68 = arith.constant 0 : index
    %c0_69 = arith.constant 0 : index
    %137 = vector.load %arg12[%c0_67, %c0_68, %c0_69] : memref<2x32x64xbf16, #tpu.memory_space<vmem>>, vector<1x32x64xbf16>
    %138 = vector.shape_cast %137 : vector<1x32x64xbf16> to vector<32x64xbf16>
    %cst_70 = arith.constant dense<0.000000e+00> : vector<16x64xf32>
    %139 = tpu.matmul %136, %138, %cst_70 {dimension_numbers = #tpu.dot_dimension_numbers<[1], [0], [0], [1], [0, 0, 1, 1], [], []>} : vector<16x32xbf16>, vector<32x64xbf16>, vector<16x64xf32> -> vector<16x64xf32>
    %c0_71 = arith.constant 0 : index
    %c0_72 = arith.constant 0 : index
    %c0_73 = arith.constant 0 : index
    %140 = vector.load %arg13[%c0_71, %c0_72, %c0_73] : memref<2x1x64xf32, #tpu.memory_space<vmem>>, vector<1x1x64xf32>
    %141 = vector.shape_cast %140 : vector<1x1x64xf32> to vector<1x64xf32>
    %142 = vector.broadcast %141 : vector<1x64xf32> to vector<16x64xf32>
    %143 = arith.addf %139, %142 : vector<16x64xf32>
    %cst_74 = arith.constant 0.000000e+00 : f32
    %144 = vector.broadcast %cst_74 : f32 to vector<16x64xf32>
    %145 = arith.maximumf %143, %144 : vector<16x64xf32>
    %146 = arith.truncf %145 : vector<16x64xf32> to vector<16x64xbf16>
    %c0_75 = arith.constant 0 : index
    %c0_76 = arith.constant 0 : index
    %c0_77 = arith.constant 0 : index
    %147 = vector.load %arg14[%c0_75, %c0_76, %c0_77] : memref<2x64x32xbf16, #tpu.memory_space<vmem>>, vector<1x64x32xbf16>
    %148 = vector.shape_cast %147 : vector<1x64x32xbf16> to vector<64x32xbf16>
    %cst_78 = arith.constant dense<0.000000e+00> : vector<16x32xf32>
    %149 = tpu.matmul %146, %148, %cst_78 {dimension_numbers = #tpu.dot_dimension_numbers<[1], [0], [0], [1], [0, 0, 1, 1], [], []>} : vector<16x64xbf16>, vector<64x32xbf16>, vector<16x32xf32> -> vector<16x32xf32>
    %c0_79 = arith.constant 0 : index
    %c0_80 = arith.constant 0 : index
    %c0_81 = arith.constant 0 : index
    %150 = vector.load %arg15[%c0_79, %c0_80, %c0_81] : memref<2x1x32xf32, #tpu.memory_space<vmem>>, vector<1x1x32xf32>
    %151 = vector.shape_cast %150 : vector<1x1x32xf32> to vector<1x32xf32>
    %152 = vector.broadcast %151 : vector<1x32xf32> to vector<16x32xf32>
    %153 = arith.addf %149, %152 : vector<16x32xf32>
    %154 = arith.addf %135, %153 : vector<16x32xf32>
    %c0_82 = arith.constant 0 : index
    %c0_83 = arith.constant 0 : index
    %c0_84 = arith.constant 0 : index
    %155 = vector.load %arg16[%c0_82, %c0_83, %c0_84] : memref<2x1x32xf32, #tpu.memory_space<vmem>>, vector<1x1x32xf32>
    %156 = vector.shape_cast %155 : vector<1x1x32xf32> to vector<1x32xf32>
    %c0_85 = arith.constant 0 : index
    %c0_86 = arith.constant 0 : index
    %c0_87 = arith.constant 0 : index
    %157 = vector.load %arg17[%c0_85, %c0_86, %c0_87] : memref<2x1x32xf32, #tpu.memory_space<vmem>>, vector<1x1x32xf32>
    %158 = vector.shape_cast %157 : vector<1x1x32xf32> to vector<1x32xf32>
    %cst_88 = arith.constant dense<0.000000e+00> : vector<16xf32>
    %159 = vector.multi_reduction <add>, %154, %cst_88 [1] : vector<16x32xf32> to vector<16xf32>
    %160 = vector.shape_cast %159 : vector<16xf32> to vector<16x1xf32>
    %cst_89 = arith.constant 3.200000e+01 : f32
    %161 = vector.broadcast %cst_89 : f32 to vector<16x1xf32>
    %162 = arith.divf %160, %161 : vector<16x1xf32>
    %163 = vector.broadcast %162 : vector<16x1xf32> to vector<16x32xf32>
    %164 = arith.subf %154, %163 : vector<16x32xf32>
    %165 = arith.mulf %164, %164 : vector<16x32xf32>
    %cst_90 = arith.constant dense<0.000000e+00> : vector<16xf32>
    %166 = vector.multi_reduction <add>, %165, %cst_90 [1] : vector<16x32xf32> to vector<16xf32>
    %167 = vector.shape_cast %166 : vector<16xf32> to vector<16x1xf32>
    %cst_91 = arith.constant 3.200000e+01 : f32
    %168 = vector.broadcast %cst_91 : f32 to vector<16x1xf32>
    %169 = arith.divf %167, %168 : vector<16x1xf32>
    %170 = vector.broadcast %162 : vector<16x1xf32> to vector<16x32xf32>
    %171 = arith.subf %154, %170 : vector<16x32xf32>
    %cst_92 = arith.constant 9.99999974E-6 : f32
    %172 = vector.broadcast %cst_92 : f32 to vector<16x1xf32>
    %173 = arith.addf %169, %172 : vector<16x1xf32>
    %174 = math.rsqrt %173 : vector<16x1xf32>
    %175 = vector.broadcast %174 : vector<16x1xf32> to vector<16x32xf32>
    %176 = arith.mulf %171, %175 : vector<16x32xf32>
    %177 = vector.broadcast %156 : vector<1x32xf32> to vector<16x32xf32>
    %178 = arith.mulf %176, %177 : vector<16x32xf32>
    %179 = vector.broadcast %158 : vector<1x32xf32> to vector<16x32xf32>
    %180 = arith.addf %178, %179 : vector<16x32xf32>
    %c3 = arith.constant 3 : index
    %c0_93 = arith.constant 0 : index
    %c0_94 = arith.constant 0 : index
    %c0_95 = arith.constant 0 : index
    %181 = vector.load %arg6[%c3, %c0_93, %c0_94, %c0_95] : memref<6x4x32x8xbf16, #tpu.memory_space<vmem>>, vector<1x4x32x8xbf16>
    %182 = vector.shape_cast %181 : vector<1x4x32x8xbf16> to vector<4x32x8xbf16>
    %c4 = arith.constant 4 : index
    %c0_96 = arith.constant 0 : index
    %c0_97 = arith.constant 0 : index
    %c0_98 = arith.constant 0 : index
    %183 = vector.load %arg6[%c4, %c0_96, %c0_97, %c0_98] : memref<6x4x32x8xbf16, #tpu.memory_space<vmem>>, vector<1x4x32x8xbf16>
    %184 = vector.shape_cast %183 : vector<1x4x32x8xbf16> to vector<4x32x8xbf16>
    %c5 = arith.constant 5 : index
    %c0_99 = arith.constant 0 : index
    %c0_100 = arith.constant 0 : index
    %c0_101 = arith.constant 0 : index
    %185 = vector.load %arg6[%c5, %c0_99, %c0_100, %c0_101] : memref<6x4x32x8xbf16, #tpu.memory_space<vmem>>, vector<1x4x32x8xbf16>
    %186 = vector.shape_cast %185 : vector<1x4x32x8xbf16> to vector<4x32x8xbf16>
    %c3_102 = arith.constant 3 : index
    %c0_103 = arith.constant 0 : index
    %c0_104 = arith.constant 0 : index
    %c0_105 = arith.constant 0 : index
    %187 = vector.load %arg7[%c3_102, %c0_103, %c0_104, %c0_105] : memref<6x4x1x8xf32, #tpu.memory_space<vmem>>, vector<1x4x1x8xf32>
    %188 = vector.shape_cast %187 : vector<1x4x1x8xf32> to vector<4x1x8xf32>
    %c4_106 = arith.constant 4 : index
    %c0_107 = arith.constant 0 : index
    %c0_108 = arith.constant 0 : index
    %c0_109 = arith.constant 0 : index
    %189 = vector.load %arg7[%c4_106, %c0_107, %c0_108, %c0_109] : memref<6x4x1x8xf32, #tpu.memory_space<vmem>>, vector<1x4x1x8xf32>
    %190 = vector.shape_cast %189 : vector<1x4x1x8xf32> to vector<4x1x8xf32>
    %c5_110 = arith.constant 5 : index
    %c0_111 = arith.constant 0 : index
    %c0_112 = arith.constant 0 : index
    %c0_113 = arith.constant 0 : index
    %191 = vector.load %arg7[%c5_110, %c0_111, %c0_112, %c0_113] : memref<6x4x1x8xf32, #tpu.memory_space<vmem>>, vector<1x4x1x8xf32>
    %192 = vector.shape_cast %191 : vector<1x4x1x8xf32> to vector<4x1x8xf32>
    %c1_114 = arith.constant 1 : index
    %c0_115 = arith.constant 0 : index
    %c0_116 = arith.constant 0 : index
    %c0_117 = arith.constant 0 : index
    %193 = vector.load %arg8[%c1_114, %c0_115, %c0_116, %c0_117] : memref<2x4x8x32xbf16, #tpu.memory_space<vmem>>, vector<1x4x8x32xbf16>
    %194 = vector.shape_cast %193 : vector<1x4x8x32xbf16> to vector<4x8x32xbf16>
    %c1_118 = arith.constant 1 : index
    %c0_119 = arith.constant 0 : index
    %c0_120 = arith.constant 0 : index
    %195 = vector.load %arg9[%c1_118, %c0_119, %c0_120] : memref<2x1x32xf32, #tpu.memory_space<vmem>>, vector<1x1x32xf32>
    %196 = vector.shape_cast %195 : vector<1x1x32xf32> to vector<1x32xf32>
    %197 = vector.extract_strided_slice %180 {offsets = [0, 0], sizes = [8, 32], strides = [1, 1]} : vector<16x32xf32> to vector<8x32xf32>
    %198 = vector.extract_strided_slice %180 {offsets = [0, 0], sizes = [8, 32], strides = [1, 1]} : vector<16x32xf32> to vector<8x32xf32>
    %199 = arith.truncf %197 : vector<8x32xf32> to vector<8x32xbf16>
    %200 = vector.shape_cast %199 : vector<8x32xbf16> to vector<1x8x32xbf16>
    %201 = vector.shape_cast %200 : vector<1x8x32xbf16> to vector<1x8x32xbf16>
    %202 = vector.broadcast %201 : vector<1x8x32xbf16> to vector<4x8x32xbf16>
    %203 = arith.truncf %198 : vector<8x32xf32> to vector<8x32xbf16>
    %204 = vector.shape_cast %203 : vector<8x32xbf16> to vector<1x8x32xbf16>
    %205 = vector.shape_cast %204 : vector<1x8x32xbf16> to vector<1x8x32xbf16>
    %206 = vector.broadcast %205 : vector<1x8x32xbf16> to vector<4x8x32xbf16>
    "tpu.trace_start"() <{level = 10 : i32, message = "hld,hdk->hlk"}> : () -> ()
    %cst_121 = arith.constant dense<0.000000e+00> : vector<4x8x8xf32>
    %207 = tpu.matmul %202, %182, %cst_121 {dimension_numbers = #tpu.dot_dimension_numbers<[2], [1], [1], [2], [0, 0, 0, 1, 1, 2], [0], [0]>} : vector<4x8x32xbf16>, vector<4x32x8xbf16>, vector<4x8x8xf32> -> vector<4x8x8xf32>
    "tpu.trace_stop"() : () -> ()
    %208 = vector.broadcast %188 : vector<4x1x8xf32> to vector<4x8x8xf32>
    %209 = arith.addf %207, %208 : vector<4x8x8xf32>
    "tpu.trace_start"() <{level = 10 : i32, message = "hld,hdk->hlk"}> : () -> ()
    %cst_122 = arith.constant dense<0.000000e+00> : vector<4x8x8xf32>
    %210 = tpu.matmul %206, %184, %cst_122 {dimension_numbers = #tpu.dot_dimension_numbers<[2], [1], [1], [2], [0, 0, 0, 1, 1, 2], [0], [0]>} : vector<4x8x32xbf16>, vector<4x32x8xbf16>, vector<4x8x8xf32> -> vector<4x8x8xf32>
    "tpu.trace_stop"() : () -> ()
    %211 = vector.broadcast %190 : vector<4x1x8xf32> to vector<4x8x8xf32>
    %212 = arith.addf %210, %211 : vector<4x8x8xf32>
    "tpu.trace_start"() <{level = 10 : i32, message = "hld,hdk->hlk"}> : () -> ()
    %cst_123 = arith.constant dense<0.000000e+00> : vector<4x8x8xf32>
    %213 = tpu.matmul %206, %186, %cst_123 {dimension_numbers = #tpu.dot_dimension_numbers<[2], [1], [1], [2], [0, 0, 0, 1, 1, 2], [0], [0]>} : vector<4x8x32xbf16>, vector<4x32x8xbf16>, vector<4x8x8xf32> -> vector<4x8x8xf32>
    "tpu.trace_stop"() : () -> ()
    %214 = vector.broadcast %192 : vector<4x1x8xf32> to vector<4x8x8xf32>
    %215 = arith.addf %213, %214 : vector<4x8x8xf32>
    %216 = arith.truncf %209 : vector<4x8x8xf32> to vector<4x8x8xbf16>
    %217 = arith.truncf %212 : vector<4x8x8xf32> to vector<4x8x8xbf16>
    "tpu.trace_start"() <{level = 10 : i32, message = "hlk,hmk->hlm"}> : () -> ()
    %cst_124 = arith.constant dense<0.000000e+00> : vector<4x8x8xf32>
    %218 = tpu.matmul %216, %217, %cst_124 {dimension_numbers = #tpu.dot_dimension_numbers<[2], [2], [1], [1], [0, 0, 0, 1, 1, 1], [0], [0]>} : vector<4x8x8xbf16>, vector<4x8x8xbf16>, vector<4x8x8xf32> -> vector<4x8x8xf32>
    "tpu.trace_stop"() : () -> ()
    %cst_125 = arith.constant 0.353553385 : f32
    %219 = vector.broadcast %cst_125 : f32 to vector<4x8x8xf32>
    %220 = arith.mulf %218, %219 : vector<4x8x8xf32>
    %cst_126 = arith.constant dense<0xFF800000> : vector<4x8xf32>
    %221 = vector.multi_reduction <maximumf>, %220, %cst_126 [2] : vector<4x8x8xf32> to vector<4x8xf32>
    %222 = vector.shape_cast %221 : vector<4x8xf32> to vector<4x8x1xf32>
    %223 = vector.broadcast %222 : vector<4x8x1xf32> to vector<4x8x8xf32>
    %224 = arith.subf %220, %223 : vector<4x8x8xf32>
    %225 = math.exp %224 : vector<4x8x8xf32>
    %cst_127 = arith.constant dense<0.000000e+00> : vector<4x8xf32>
    %226 = vector.multi_reduction <add>, %225, %cst_127 [2] : vector<4x8x8xf32> to vector<4x8xf32>
    %227 = vector.shape_cast %226 : vector<4x8xf32> to vector<4x8x1xf32>
    %228 = tpu.reciprocal %227 {approx = true} : vector<4x8x1xf32> -> vector<4x8x1xf32>
    %229 = vector.broadcast %228 : vector<4x8x1xf32> to vector<4x8x8xf32>
    %230 = arith.mulf %225, %229 : vector<4x8x8xf32>
    %231 = arith.truncf %230 : vector<4x8x8xf32> to vector<4x8x8xbf16>
    %232 = arith.truncf %215 : vector<4x8x8xf32> to vector<4x8x8xbf16>
    "tpu.trace_start"() <{level = 10 : i32, message = "hlm,hmk->hlk"}> : () -> ()
    %cst_128 = arith.constant dense<0.000000e+00> : vector<4x8x8xf32>
    %233 = tpu.matmul %231, %232, %cst_128 {dimension_numbers = #tpu.dot_dimension_numbers<[2], [1], [1], [2], [0, 0, 0, 1, 1, 2], [0], [0]>} : vector<4x8x8xbf16>, vector<4x8x8xbf16>, vector<4x8x8xf32> -> vector<4x8x8xf32>
    "tpu.trace_stop"() : () -> ()
    %234 = arith.truncf %233 : vector<4x8x8xf32> to vector<4x8x8xbf16>
    "tpu.trace_start"() <{level = 10 : i32, message = "hlk,hkd->hld"}> : () -> ()
    %cst_129 = arith.constant dense<0.000000e+00> : vector<4x8x32xf32>
    %235 = tpu.matmul %234, %194, %cst_129 {dimension_numbers = #tpu.dot_dimension_numbers<[2], [1], [1], [2], [0, 0, 0, 1, 1, 2], [0], [0]>} : vector<4x8x8xbf16>, vector<4x8x32xbf16>, vector<4x8x32xf32> -> vector<4x8x32xf32>
    "tpu.trace_stop"() : () -> ()
    %cst_130 = arith.constant dense<0.000000e+00> : vector<8x32xf32>
    %236 = vector.multi_reduction <add>, %235, %cst_130 [0] : vector<4x8x32xf32> to vector<8x32xf32>
    %237 = vector.broadcast %196 : vector<1x32xf32> to vector<8x32xf32>
    %238 = arith.addf %236, %237 : vector<8x32xf32>
    %239 = vector.extract_strided_slice %180 {offsets = [8, 0], sizes = [8, 32], strides = [1, 1]} : vector<16x32xf32> to vector<8x32xf32>
    %240 = vector.extract_strided_slice %180 {offsets = [8, 0], sizes = [8, 32], strides = [1, 1]} : vector<16x32xf32> to vector<8x32xf32>
    %241 = arith.truncf %239 : vector<8x32xf32> to vector<8x32xbf16>
    %242 = vector.shape_cast %241 : vector<8x32xbf16> to vector<1x8x32xbf16>
    %243 = vector.shape_cast %242 : vector<1x8x32xbf16> to vector<1x8x32xbf16>
    %244 = vector.broadcast %243 : vector<1x8x32xbf16> to vector<4x8x32xbf16>
    %245 = arith.truncf %240 : vector<8x32xf32> to vector<8x32xbf16>
    %246 = vector.shape_cast %245 : vector<8x32xbf16> to vector<1x8x32xbf16>
    %247 = vector.shape_cast %246 : vector<1x8x32xbf16> to vector<1x8x32xbf16>
    %248 = vector.broadcast %247 : vector<1x8x32xbf16> to vector<4x8x32xbf16>
    "tpu.trace_start"() <{level = 10 : i32, message = "hld,hdk->hlk"}> : () -> ()
    %cst_131 = arith.constant dense<0.000000e+00> : vector<4x8x8xf32>
    %249 = tpu.matmul %244, %182, %cst_131 {dimension_numbers = #tpu.dot_dimension_numbers<[2], [1], [1], [2], [0, 0, 0, 1, 1, 2], [0], [0]>} : vector<4x8x32xbf16>, vector<4x32x8xbf16>, vector<4x8x8xf32> -> vector<4x8x8xf32>
    "tpu.trace_stop"() : () -> ()
    %250 = vector.broadcast %188 : vector<4x1x8xf32> to vector<4x8x8xf32>
    %251 = arith.addf %249, %250 : vector<4x8x8xf32>
    "tpu.trace_start"() <{level = 10 : i32, message = "hld,hdk->hlk"}> : () -> ()
    %cst_132 = arith.constant dense<0.000000e+00> : vector<4x8x8xf32>
    %252 = tpu.matmul %248, %184, %cst_132 {dimension_numbers = #tpu.dot_dimension_numbers<[2], [1], [1], [2], [0, 0, 0, 1, 1, 2], [0], [0]>} : vector<4x8x32xbf16>, vector<4x32x8xbf16>, vector<4x8x8xf32> -> vector<4x8x8xf32>
    "tpu.trace_stop"() : () -> ()
    %253 = vector.broadcast %190 : vector<4x1x8xf32> to vector<4x8x8xf32>
    %254 = arith.addf %252, %253 : vector<4x8x8xf32>
    "tpu.trace_start"() <{level = 10 : i32, message = "hld,hdk->hlk"}> : () -> ()
    %cst_133 = arith.constant dense<0.000000e+00> : vector<4x8x8xf32>
    %255 = tpu.matmul %248, %186, %cst_133 {dimension_numbers = #tpu.dot_dimension_numbers<[2], [1], [1], [2], [0, 0, 0, 1, 1, 2], [0], [0]>} : vector<4x8x32xbf16>, vector<4x32x8xbf16>, vector<4x8x8xf32> -> vector<4x8x8xf32>
    "tpu.trace_stop"() : () -> ()
    %256 = vector.broadcast %192 : vector<4x1x8xf32> to vector<4x8x8xf32>
    %257 = arith.addf %255, %256 : vector<4x8x8xf32>
    %258 = arith.truncf %251 : vector<4x8x8xf32> to vector<4x8x8xbf16>
    %259 = arith.truncf %254 : vector<4x8x8xf32> to vector<4x8x8xbf16>
    "tpu.trace_start"() <{level = 10 : i32, message = "hlk,hmk->hlm"}> : () -> ()
    %cst_134 = arith.constant dense<0.000000e+00> : vector<4x8x8xf32>
    %260 = tpu.matmul %258, %259, %cst_134 {dimension_numbers = #tpu.dot_dimension_numbers<[2], [2], [1], [1], [0, 0, 0, 1, 1, 1], [0], [0]>} : vector<4x8x8xbf16>, vector<4x8x8xbf16>, vector<4x8x8xf32> -> vector<4x8x8xf32>
    "tpu.trace_stop"() : () -> ()
    %cst_135 = arith.constant 0.353553385 : f32
    %261 = vector.broadcast %cst_135 : f32 to vector<4x8x8xf32>
    %262 = arith.mulf %260, %261 : vector<4x8x8xf32>
    %cst_136 = arith.constant dense<0xFF800000> : vector<4x8xf32>
    %263 = vector.multi_reduction <maximumf>, %262, %cst_136 [2] : vector<4x8x8xf32> to vector<4x8xf32>
    %264 = vector.shape_cast %263 : vector<4x8xf32> to vector<4x8x1xf32>
    %265 = vector.broadcast %264 : vector<4x8x1xf32> to vector<4x8x8xf32>
    %266 = arith.subf %262, %265 : vector<4x8x8xf32>
    %267 = math.exp %266 : vector<4x8x8xf32>
    %cst_137 = arith.constant dense<0.000000e+00> : vector<4x8xf32>
    %268 = vector.multi_reduction <add>, %267, %cst_137 [2] : vector<4x8x8xf32> to vector<4x8xf32>
    %269 = vector.shape_cast %268 : vector<4x8xf32> to vector<4x8x1xf32>
    %270 = tpu.reciprocal %269 {approx = true} : vector<4x8x1xf32> -> vector<4x8x1xf32>
    %271 = vector.broadcast %270 : vector<4x8x1xf32> to vector<4x8x8xf32>
    %272 = arith.mulf %267, %271 : vector<4x8x8xf32>
    %273 = arith.truncf %272 : vector<4x8x8xf32> to vector<4x8x8xbf16>
    %274 = arith.truncf %257 : vector<4x8x8xf32> to vector<4x8x8xbf16>
    "tpu.trace_start"() <{level = 10 : i32, message = "hlm,hmk->hlk"}> : () -> ()
    %cst_138 = arith.constant dense<0.000000e+00> : vector<4x8x8xf32>
    %275 = tpu.matmul %273, %274, %cst_138 {dimension_numbers = #tpu.dot_dimension_numbers<[2], [1], [1], [2], [0, 0, 0, 1, 1, 2], [0], [0]>} : vector<4x8x8xbf16>, vector<4x8x8xbf16>, vector<4x8x8xf32> -> vector<4x8x8xf32>
    "tpu.trace_stop"() : () -> ()
    %276 = arith.truncf %275 : vector<4x8x8xf32> to vector<4x8x8xbf16>
    "tpu.trace_start"() <{level = 10 : i32, message = "hlk,hkd->hld"}> : () -> ()
    %cst_139 = arith.constant dense<0.000000e+00> : vector<4x8x32xf32>
    %277 = tpu.matmul %276, %194, %cst_139 {dimension_numbers = #tpu.dot_dimension_numbers<[2], [1], [1], [2], [0, 0, 0, 1, 1, 2], [0], [0]>} : vector<4x8x8xbf16>, vector<4x8x32xbf16>, vector<4x8x32xf32> -> vector<4x8x32xf32>
    "tpu.trace_stop"() : () -> ()
    %cst_140 = arith.constant dense<0.000000e+00> : vector<8x32xf32>
    %278 = vector.multi_reduction <add>, %277, %cst_140 [0] : vector<4x8x32xf32> to vector<8x32xf32>
    %279 = vector.broadcast %196 : vector<1x32xf32> to vector<8x32xf32>
    %280 = arith.addf %278, %279 : vector<8x32xf32>
    %281 = tpu.concatenate %238, %280 in 0 : vector<8x32xf32>, vector<8x32xf32> -> vector<16x32xf32>
    %282 = arith.addf %180, %281 : vector<16x32xf32>
    %c1_141 = arith.constant 1 : index
    %c0_142 = arith.constant 0 : index
    %c0_143 = arith.constant 0 : index
    %283 = vector.load %arg10[%c1_141, %c0_142, %c0_143] : memref<2x1x32xf32, #tpu.memory_space<vmem>>, vector<1x1x32xf32>
    %284 = vector.shape_cast %283 : vector<1x1x32xf32> to vector<1x32xf32>
    %c1_144 = arith.constant 1 : index
    %c0_145 = arith.constant 0 : index
    %c0_146 = arith.constant 0 : index
    %285 = vector.load %arg11[%c1_144, %c0_145, %c0_146] : memref<2x1x32xf32, #tpu.memory_space<vmem>>, vector<1x1x32xf32>
    %286 = vector.shape_cast %285 : vector<1x1x32xf32> to vector<1x32xf32>
    %cst_147 = arith.constant dense<0.000000e+00> : vector<16xf32>
    %287 = vector.multi_reduction <add>, %282, %cst_147 [1] : vector<16x32xf32> to vector<16xf32>
    %288 = vector.shape_cast %287 : vector<16xf32> to vector<16x1xf32>
    %cst_148 = arith.constant 3.200000e+01 : f32
    %289 = vector.broadcast %cst_148 : f32 to vector<16x1xf32>
    %290 = arith.divf %288, %289 : vector<16x1xf32>
    %291 = vector.broadcast %290 : vector<16x1xf32> to vector<16x32xf32>
    %292 = arith.subf %282, %291 : vector<16x32xf32>
    %293 = arith.mulf %292, %292 : vector<16x32xf32>
    %cst_149 = arith.constant dense<0.000000e+00> : vector<16xf32>
    %294 = vector.multi_reduction <add>, %293, %cst_149 [1] : vector<16x32xf32> to vector<16xf32>
    %295 = vector.shape_cast %294 : vector<16xf32> to vector<16x1xf32>
    %cst_150 = arith.constant 3.200000e+01 : f32
    %296 = vector.broadcast %cst_150 : f32 to vector<16x1xf32>
    %297 = arith.divf %295, %296 : vector<16x1xf32>
    %298 = vector.broadcast %290 : vector<16x1xf32> to vector<16x32xf32>
    %299 = arith.subf %282, %298 : vector<16x32xf32>
    %cst_151 = arith.constant 9.99999974E-6 : f32
    %300 = vector.broadcast %cst_151 : f32 to vector<16x1xf32>
    %301 = arith.addf %297, %300 : vector<16x1xf32>
    %302 = math.rsqrt %301 : vector<16x1xf32>
    %303 = vector.broadcast %302 : vector<16x1xf32> to vector<16x32xf32>
    %304 = arith.mulf %299, %303 : vector<16x32xf32>
    %305 = vector.broadcast %284 : vector<1x32xf32> to vector<16x32xf32>
    %306 = arith.mulf %304, %305 : vector<16x32xf32>
    %307 = vector.broadcast %286 : vector<1x32xf32> to vector<16x32xf32>
    %308 = arith.addf %306, %307 : vector<16x32xf32>
    %309 = arith.truncf %308 : vector<16x32xf32> to vector<16x32xbf16>
    %c1_152 = arith.constant 1 : index
    %c0_153 = arith.constant 0 : index
    %c0_154 = arith.constant 0 : index
    %310 = vector.load %arg12[%c1_152, %c0_153, %c0_154] : memref<2x32x64xbf16, #tpu.memory_space<vmem>>, vector<1x32x64xbf16>
    %311 = vector.shape_cast %310 : vector<1x32x64xbf16> to vector<32x64xbf16>
    %cst_155 = arith.constant dense<0.000000e+00> : vector<16x64xf32>
    %312 = tpu.matmul %309, %311, %cst_155 {dimension_numbers = #tpu.dot_dimension_numbers<[1], [0], [0], [1], [0, 0, 1, 1], [], []>} : vector<16x32xbf16>, vector<32x64xbf16>, vector<16x64xf32> -> vector<16x64xf32>
    %c1_156 = arith.constant 1 : index
    %c0_157 = arith.constant 0 : index
    %c0_158 = arith.constant 0 : index
    %313 = vector.load %arg13[%c1_156, %c0_157, %c0_158] : memref<2x1x64xf32, #tpu.memory_space<vmem>>, vector<1x1x64xf32>
    %314 = vector.shape_cast %313 : vector<1x1x64xf32> to vector<1x64xf32>
    %315 = vector.broadcast %314 : vector<1x64xf32> to vector<16x64xf32>
    %316 = arith.addf %312, %315 : vector<16x64xf32>
    %cst_159 = arith.constant 0.000000e+00 : f32
    %317 = vector.broadcast %cst_159 : f32 to vector<16x64xf32>
    %318 = arith.maximumf %316, %317 : vector<16x64xf32>
    %319 = arith.truncf %318 : vector<16x64xf32> to vector<16x64xbf16>
    %c1_160 = arith.constant 1 : index
    %c0_161 = arith.constant 0 : index
    %c0_162 = arith.constant 0 : index
    %320 = vector.load %arg14[%c1_160, %c0_161, %c0_162] : memref<2x64x32xbf16, #tpu.memory_space<vmem>>, vector<1x64x32xbf16>
    %321 = vector.shape_cast %320 : vector<1x64x32xbf16> to vector<64x32xbf16>
    %cst_163 = arith.constant dense<0.000000e+00> : vector<16x32xf32>
    %322 = tpu.matmul %319, %321, %cst_163 {dimension_numbers = #tpu.dot_dimension_numbers<[1], [0], [0], [1], [0, 0, 1, 1], [], []>} : vector<16x64xbf16>, vector<64x32xbf16>, vector<16x32xf32> -> vector<16x32xf32>
    %c1_164 = arith.constant 1 : index
    %c0_165 = arith.constant 0 : index
    %c0_166 = arith.constant 0 : index
    %323 = vector.load %arg15[%c1_164, %c0_165, %c0_166] : memref<2x1x32xf32, #tpu.memory_space<vmem>>, vector<1x1x32xf32>
    %324 = vector.shape_cast %323 : vector<1x1x32xf32> to vector<1x32xf32>
    %325 = vector.broadcast %324 : vector<1x32xf32> to vector<16x32xf32>
    %326 = arith.addf %322, %325 : vector<16x32xf32>
    %327 = arith.addf %308, %326 : vector<16x32xf32>
    %c1_167 = arith.constant 1 : index
    %c0_168 = arith.constant 0 : index
    %c0_169 = arith.constant 0 : index
    %328 = vector.load %arg16[%c1_167, %c0_168, %c0_169] : memref<2x1x32xf32, #tpu.memory_space<vmem>>, vector<1x1x32xf32>
    %329 = vector.shape_cast %328 : vector<1x1x32xf32> to vector<1x32xf32>
    %c1_170 = arith.constant 1 : index
    %c0_171 = arith.constant 0 : index
    %c0_172 = arith.constant 0 : index
    %330 = vector.load %arg17[%c1_170, %c0_171, %c0_172] : memref<2x1x32xf32, #tpu.memory_space<vmem>>, vector<1x1x32xf32>
    %331 = vector.shape_cast %330 : vector<1x1x32xf32> to vector<1x32xf32>
    %cst_173 = arith.constant dense<0.000000e+00> : vector<16xf32>
    %332 = vector.multi_reduction <add>, %327, %cst_173 [1] : vector<16x32xf32> to vector<16xf32>
    %333 = vector.shape_cast %332 : vector<16xf32> to vector<16x1xf32>
    %cst_174 = arith.constant 3.200000e+01 : f32
    %334 = vector.broadcast %cst_174 : f32 to vector<16x1xf32>
    %335 = arith.divf %333, %334 : vector<16x1xf32>
    %336 = vector.broadcast %335 : vector<16x1xf32> to vector<16x32xf32>
    %337 = arith.subf %327, %336 : vector<16x32xf32>
    %338 = arith.mulf %337, %337 : vector<16x32xf32>
    %cst_175 = arith.constant dense<0.000000e+00> : vector<16xf32>
    %339 = vector.multi_reduction <add>, %338, %cst_175 [1] : vector<16x32xf32> to vector<16xf32>
    %340 = vector.shape_cast %339 : vector<16xf32> to vector<16x1xf32>
    %cst_176 = arith.constant 3.200000e+01 : f32
    %341 = vector.broadcast %cst_176 : f32 to vector<16x1xf32>
    %342 = arith.divf %340, %341 : vector<16x1xf32>
    %343 = vector.broadcast %335 : vector<16x1xf32> to vector<16x32xf32>
    %344 = arith.subf %327, %343 : vector<16x32xf32>
    %cst_177 = arith.constant 9.99999974E-6 : f32
    %345 = vector.broadcast %cst_177 : f32 to vector<16x1xf32>
    %346 = arith.addf %342, %345 : vector<16x1xf32>
    %347 = math.rsqrt %346 : vector<16x1xf32>
    %348 = vector.broadcast %347 : vector<16x1xf32> to vector<16x32xf32>
    %349 = arith.mulf %344, %348 : vector<16x32xf32>
    %350 = vector.broadcast %329 : vector<1x32xf32> to vector<16x32xf32>
    %351 = arith.mulf %349, %350 : vector<16x32xf32>
    %352 = vector.broadcast %331 : vector<1x32xf32> to vector<16x32xf32>
    %353 = arith.addf %351, %352 : vector<16x32xf32>
    %354 = tpu.iota {dimensions = array<i32: 0>} : vector<8x8xi32>
    %355 = tpu.iota {dimensions = array<i32: 1>} : vector<8x8xi32>
    %356 = arith.cmpi sge, %354, %355 : vector<8x8xi32>
    %cst_178 = arith.constant 0.000000e+00 : f32
    %cst_179 = arith.constant -1.000000e+30 : f32
    %357 = vector.broadcast %cst_178 : f32 to vector<8x8xf32>
    %358 = vector.broadcast %cst_179 : f32 to vector<8x8xf32>
    %359 = arith.select %356, %357, %358 : vector<8x8xi1>, vector<8x8xf32>
    %360 = tpu.iota {dimensions = array<i32: 0>} : vector<8x8xi32>
    %361 = tpu.iota {dimensions = array<i32: 1>} : vector<8x8xi32>
    %362 = arith.cmpi sge, %360, %361 : vector<8x8xi32>
    %cst_180 = arith.constant 0.000000e+00 : f32
    %cst_181 = arith.constant -1.000000e+30 : f32
    %363 = vector.broadcast %cst_180 : f32 to vector<8x8xf32>
    %364 = vector.broadcast %cst_181 : f32 to vector<8x8xf32>
    %365 = arith.select %362, %363, %364 : vector<8x8xi1>, vector<8x8xf32>
    %c0_182 = arith.constant 0 : index
    %c0_183 = arith.constant 0 : index
    %c0_184 = arith.constant 0 : index
    %366 = vector.load %arg2[%c0_182, %c0_183, %c0_184] : memref<2x1x8xf32, #tpu.memory_space<vmem>>, vector<2x1x8xf32>
    %c0_185 = arith.constant 0 : index
    %c0_186 = arith.constant 0 : index
    %367 = vector.load %arg1[%c0_185, %c0_186] : memref<16x32xf32, #tpu.memory_space<vmem>>, vector<16x32xf32>
    %c0_187 = arith.constant 0 : index
    %c0_188 = arith.constant 0 : index
    %c0_189 = arith.constant 0 : index
    %c0_190 = arith.constant 0 : index
    %368 = vector.load %arg18[%c0_187, %c0_188, %c0_189, %c0_190] : memref<6x4x32x8xbf16, #tpu.memory_space<vmem>>, vector<1x4x32x8xbf16>
    %369 = vector.shape_cast %368 : vector<1x4x32x8xbf16> to vector<4x32x8xbf16>
    %c1_191 = arith.constant 1 : index
    %c0_192 = arith.constant 0 : index
    %c0_193 = arith.constant 0 : index
    %c0_194 = arith.constant 0 : index
    %370 = vector.load %arg18[%c1_191, %c0_192, %c0_193, %c0_194] : memref<6x4x32x8xbf16, #tpu.memory_space<vmem>>, vector<1x4x32x8xbf16>
    %371 = vector.shape_cast %370 : vector<1x4x32x8xbf16> to vector<4x32x8xbf16>
    %c2_195 = arith.constant 2 : index
    %c0_196 = arith.constant 0 : index
    %c0_197 = arith.constant 0 : index
    %c0_198 = arith.constant 0 : index
    %372 = vector.load %arg18[%c2_195, %c0_196, %c0_197, %c0_198] : memref<6x4x32x8xbf16, #tpu.memory_space<vmem>>, vector<1x4x32x8xbf16>
    %373 = vector.shape_cast %372 : vector<1x4x32x8xbf16> to vector<4x32x8xbf16>
    %c0_199 = arith.constant 0 : index
    %c0_200 = arith.constant 0 : index
    %c0_201 = arith.constant 0 : index
    %c0_202 = arith.constant 0 : index
    %374 = vector.load %arg19[%c0_199, %c0_200, %c0_201, %c0_202] : memref<6x4x1x8xf32, #tpu.memory_space<vmem>>, vector<1x4x1x8xf32>
    %375 = vector.shape_cast %374 : vector<1x4x1x8xf32> to vector<4x1x8xf32>
    %c1_203 = arith.constant 1 : index
    %c0_204 = arith.constant 0 : index
    %c0_205 = arith.constant 0 : index
    %c0_206 = arith.constant 0 : index
    %376 = vector.load %arg19[%c1_203, %c0_204, %c0_205, %c0_206] : memref<6x4x1x8xf32, #tpu.memory_space<vmem>>, vector<1x4x1x8xf32>
    %377 = vector.shape_cast %376 : vector<1x4x1x8xf32> to vector<4x1x8xf32>
    %c2_207 = arith.constant 2 : index
    %c0_208 = arith.constant 0 : index
    %c0_209 = arith.constant 0 : index
    %c0_210 = arith.constant 0 : index
    %378 = vector.load %arg19[%c2_207, %c0_208, %c0_209, %c0_210] : memref<6x4x1x8xf32, #tpu.memory_space<vmem>>, vector<1x4x1x8xf32>
    %379 = vector.shape_cast %378 : vector<1x4x1x8xf32> to vector<4x1x8xf32>
    %c0_211 = arith.constant 0 : index
    %c0_212 = arith.constant 0 : index
    %c0_213 = arith.constant 0 : index
    %c0_214 = arith.constant 0 : index
    %380 = vector.load %arg20[%c0_211, %c0_212, %c0_213, %c0_214] : memref<2x4x8x32xbf16, #tpu.memory_space<vmem>>, vector<1x4x8x32xbf16>
    %381 = vector.shape_cast %380 : vector<1x4x8x32xbf16> to vector<4x8x32xbf16>
    %c0_215 = arith.constant 0 : index
    %c0_216 = arith.constant 0 : index
    %c0_217 = arith.constant 0 : index
    %382 = vector.load %arg21[%c0_215, %c0_216, %c0_217] : memref<2x1x32xf32, #tpu.memory_space<vmem>>, vector<1x1x32xf32>
    %383 = vector.shape_cast %382 : vector<1x1x32xf32> to vector<1x32xf32>
    %384 = vector.extract_strided_slice %367 {offsets = [0, 0], sizes = [8, 32], strides = [1, 1]} : vector<16x32xf32> to vector<8x32xf32>
    %385 = vector.extract_strided_slice %367 {offsets = [0, 0], sizes = [8, 32], strides = [1, 1]} : vector<16x32xf32> to vector<8x32xf32>
    %386 = vector.extract_strided_slice %366 {offsets = [0, 0, 0], sizes = [1, 1, 8], strides = [1, 1, 1]} : vector<2x1x8xf32> to vector<1x1x8xf32>
    %387 = vector.shape_cast %386 : vector<1x1x8xf32> to vector<1x8xf32>
    %388 = vector.broadcast %387 : vector<1x8xf32> to vector<8x8xf32>
    %389 = arith.addf %359, %388 : vector<8x8xf32>
    %390 = arith.truncf %384 : vector<8x32xf32> to vector<8x32xbf16>
    %391 = vector.shape_cast %390 : vector<8x32xbf16> to vector<1x8x32xbf16>
    %392 = vector.shape_cast %391 : vector<1x8x32xbf16> to vector<1x8x32xbf16>
    %393 = vector.broadcast %392 : vector<1x8x32xbf16> to vector<4x8x32xbf16>
    %394 = arith.truncf %385 : vector<8x32xf32> to vector<8x32xbf16>
    %395 = vector.shape_cast %394 : vector<8x32xbf16> to vector<1x8x32xbf16>
    %396 = vector.shape_cast %395 : vector<1x8x32xbf16> to vector<1x8x32xbf16>
    %397 = vector.broadcast %396 : vector<1x8x32xbf16> to vector<4x8x32xbf16>
    "tpu.trace_start"() <{level = 10 : i32, message = "hld,hdk->hlk"}> : () -> ()
    %cst_218 = arith.constant dense<0.000000e+00> : vector<4x8x8xf32>
    %398 = tpu.matmul %393, %369, %cst_218 {dimension_numbers = #tpu.dot_dimension_numbers<[2], [1], [1], [2], [0, 0, 0, 1, 1, 2], [0], [0]>} : vector<4x8x32xbf16>, vector<4x32x8xbf16>, vector<4x8x8xf32> -> vector<4x8x8xf32>
    "tpu.trace_stop"() : () -> ()
    %399 = vector.broadcast %375 : vector<4x1x8xf32> to vector<4x8x8xf32>
    %400 = arith.addf %398, %399 : vector<4x8x8xf32>
    "tpu.trace_start"() <{level = 10 : i32, message = "hld,hdk->hlk"}> : () -> ()
    %cst_219 = arith.constant dense<0.000000e+00> : vector<4x8x8xf32>
    %401 = tpu.matmul %397, %371, %cst_219 {dimension_numbers = #tpu.dot_dimension_numbers<[2], [1], [1], [2], [0, 0, 0, 1, 1, 2], [0], [0]>} : vector<4x8x32xbf16>, vector<4x32x8xbf16>, vector<4x8x8xf32> -> vector<4x8x8xf32>
    "tpu.trace_stop"() : () -> ()
    %402 = vector.broadcast %377 : vector<4x1x8xf32> to vector<4x8x8xf32>
    %403 = arith.addf %401, %402 : vector<4x8x8xf32>
    "tpu.trace_start"() <{level = 10 : i32, message = "hld,hdk->hlk"}> : () -> ()
    %cst_220 = arith.constant dense<0.000000e+00> : vector<4x8x8xf32>
    %404 = tpu.matmul %397, %373, %cst_220 {dimension_numbers = #tpu.dot_dimension_numbers<[2], [1], [1], [2], [0, 0, 0, 1, 1, 2], [0], [0]>} : vector<4x8x32xbf16>, vector<4x32x8xbf16>, vector<4x8x8xf32> -> vector<4x8x8xf32>
    "tpu.trace_stop"() : () -> ()
    %405 = vector.broadcast %379 : vector<4x1x8xf32> to vector<4x8x8xf32>
    %406 = arith.addf %404, %405 : vector<4x8x8xf32>
    %407 = arith.truncf %400 : vector<4x8x8xf32> to vector<4x8x8xbf16>
    %408 = arith.truncf %403 : vector<4x8x8xf32> to vector<4x8x8xbf16>
    "tpu.trace_start"() <{level = 10 : i32, message = "hlk,hmk->hlm"}> : () -> ()
    %cst_221 = arith.constant dense<0.000000e+00> : vector<4x8x8xf32>
    %409 = tpu.matmul %407, %408, %cst_221 {dimension_numbers = #tpu.dot_dimension_numbers<[2], [2], [1], [1], [0, 0, 0, 1, 1, 1], [0], [0]>} : vector<4x8x8xbf16>, vector<4x8x8xbf16>, vector<4x8x8xf32> -> vector<4x8x8xf32>
    "tpu.trace_stop"() : () -> ()
    %cst_222 = arith.constant 0.353553385 : f32
    %410 = vector.broadcast %cst_222 : f32 to vector<4x8x8xf32>
    %411 = arith.mulf %409, %410 : vector<4x8x8xf32>
    %412 = vector.shape_cast %389 : vector<8x8xf32> to vector<1x8x8xf32>
    %413 = vector.broadcast %412 : vector<1x8x8xf32> to vector<4x8x8xf32>
    %414 = arith.addf %411, %413 : vector<4x8x8xf32>
    %cst_223 = arith.constant dense<0xFF800000> : vector<4x8xf32>
    %415 = vector.multi_reduction <maximumf>, %414, %cst_223 [2] : vector<4x8x8xf32> to vector<4x8xf32>
    %416 = vector.shape_cast %415 : vector<4x8xf32> to vector<4x8x1xf32>
    %417 = vector.broadcast %416 : vector<4x8x1xf32> to vector<4x8x8xf32>
    %418 = arith.subf %414, %417 : vector<4x8x8xf32>
    %419 = math.exp %418 : vector<4x8x8xf32>
    %cst_224 = arith.constant dense<0.000000e+00> : vector<4x8xf32>
    %420 = vector.multi_reduction <add>, %419, %cst_224 [2] : vector<4x8x8xf32> to vector<4x8xf32>
    %421 = vector.shape_cast %420 : vector<4x8xf32> to vector<4x8x1xf32>
    %422 = tpu.reciprocal %421 {approx = true} : vector<4x8x1xf32> -> vector<4x8x1xf32>
    %423 = vector.broadcast %422 : vector<4x8x1xf32> to vector<4x8x8xf32>
    %424 = arith.mulf %419, %423 : vector<4x8x8xf32>
    %425 = arith.truncf %424 : vector<4x8x8xf32> to vector<4x8x8xbf16>
    %426 = arith.truncf %406 : vector<4x8x8xf32> to vector<4x8x8xbf16>
    "tpu.trace_start"() <{level = 10 : i32, message = "hlm,hmk->hlk"}> : () -> ()
    %cst_225 = arith.constant dense<0.000000e+00> : vector<4x8x8xf32>
    %427 = tpu.matmul %425, %426, %cst_225 {dimension_numbers = #tpu.dot_dimension_numbers<[2], [1], [1], [2], [0, 0, 0, 1, 1, 2], [0], [0]>} : vector<4x8x8xbf16>, vector<4x8x8xbf16>, vector<4x8x8xf32> -> vector<4x8x8xf32>
    "tpu.trace_stop"() : () -> ()
    %428 = arith.truncf %427 : vector<4x8x8xf32> to vector<4x8x8xbf16>
    "tpu.trace_start"() <{level = 10 : i32, message = "hlk,hkd->hld"}> : () -> ()
    %cst_226 = arith.constant dense<0.000000e+00> : vector<4x8x32xf32>
    %429 = tpu.matmul %428, %381, %cst_226 {dimension_numbers = #tpu.dot_dimension_numbers<[2], [1], [1], [2], [0, 0, 0, 1, 1, 2], [0], [0]>} : vector<4x8x8xbf16>, vector<4x8x32xbf16>, vector<4x8x32xf32> -> vector<4x8x32xf32>
    "tpu.trace_stop"() : () -> ()
    %cst_227 = arith.constant dense<0.000000e+00> : vector<8x32xf32>
    %430 = vector.multi_reduction <add>, %429, %cst_227 [0] : vector<4x8x32xf32> to vector<8x32xf32>
    %431 = vector.broadcast %383 : vector<1x32xf32> to vector<8x32xf32>
    %432 = arith.addf %430, %431 : vector<8x32xf32>
    %433 = vector.extract_strided_slice %367 {offsets = [8, 0], sizes = [8, 32], strides = [1, 1]} : vector<16x32xf32> to vector<8x32xf32>
    %434 = vector.extract_strided_slice %367 {offsets = [8, 0], sizes = [8, 32], strides = [1, 1]} : vector<16x32xf32> to vector<8x32xf32>
    %435 = vector.extract_strided_slice %366 {offsets = [1, 0, 0], sizes = [1, 1, 8], strides = [1, 1, 1]} : vector<2x1x8xf32> to vector<1x1x8xf32>
    %436 = vector.shape_cast %435 : vector<1x1x8xf32> to vector<1x8xf32>
    %437 = vector.broadcast %436 : vector<1x8xf32> to vector<8x8xf32>
    %438 = arith.addf %359, %437 : vector<8x8xf32>
    %439 = arith.truncf %433 : vector<8x32xf32> to vector<8x32xbf16>
    %440 = vector.shape_cast %439 : vector<8x32xbf16> to vector<1x8x32xbf16>
    %441 = vector.shape_cast %440 : vector<1x8x32xbf16> to vector<1x8x32xbf16>
    %442 = vector.broadcast %441 : vector<1x8x32xbf16> to vector<4x8x32xbf16>
    %443 = arith.truncf %434 : vector<8x32xf32> to vector<8x32xbf16>
    %444 = vector.shape_cast %443 : vector<8x32xbf16> to vector<1x8x32xbf16>
    %445 = vector.shape_cast %444 : vector<1x8x32xbf16> to vector<1x8x32xbf16>
    %446 = vector.broadcast %445 : vector<1x8x32xbf16> to vector<4x8x32xbf16>
    "tpu.trace_start"() <{level = 10 : i32, message = "hld,hdk->hlk"}> : () -> ()
    %cst_228 = arith.constant dense<0.000000e+00> : vector<4x8x8xf32>
    %447 = tpu.matmul %442, %369, %cst_228 {dimension_numbers = #tpu.dot_dimension_numbers<[2], [1], [1], [2], [0, 0, 0, 1, 1, 2], [0], [0]>} : vector<4x8x32xbf16>, vector<4x32x8xbf16>, vector<4x8x8xf32> -> vector<4x8x8xf32>
    "tpu.trace_stop"() : () -> ()
    %448 = vector.broadcast %375 : vector<4x1x8xf32> to vector<4x8x8xf32>
    %449 = arith.addf %447, %448 : vector<4x8x8xf32>
    "tpu.trace_start"() <{level = 10 : i32, message = "hld,hdk->hlk"}> : () -> ()
    %cst_229 = arith.constant dense<0.000000e+00> : vector<4x8x8xf32>
    %450 = tpu.matmul %446, %371, %cst_229 {dimension_numbers = #tpu.dot_dimension_numbers<[2], [1], [1], [2], [0, 0, 0, 1, 1, 2], [0], [0]>} : vector<4x8x32xbf16>, vector<4x32x8xbf16>, vector<4x8x8xf32> -> vector<4x8x8xf32>
    "tpu.trace_stop"() : () -> ()
    %451 = vector.broadcast %377 : vector<4x1x8xf32> to vector<4x8x8xf32>
    %452 = arith.addf %450, %451 : vector<4x8x8xf32>
    "tpu.trace_start"() <{level = 10 : i32, message = "hld,hdk->hlk"}> : () -> ()
    %cst_230 = arith.constant dense<0.000000e+00> : vector<4x8x8xf32>
    %453 = tpu.matmul %446, %373, %cst_230 {dimension_numbers = #tpu.dot_dimension_numbers<[2], [1], [1], [2], [0, 0, 0, 1, 1, 2], [0], [0]>} : vector<4x8x32xbf16>, vector<4x32x8xbf16>, vector<4x8x8xf32> -> vector<4x8x8xf32>
    "tpu.trace_stop"() : () -> ()
    %454 = vector.broadcast %379 : vector<4x1x8xf32> to vector<4x8x8xf32>
    %455 = arith.addf %453, %454 : vector<4x8x8xf32>
    %456 = arith.truncf %449 : vector<4x8x8xf32> to vector<4x8x8xbf16>
    %457 = arith.truncf %452 : vector<4x8x8xf32> to vector<4x8x8xbf16>
    "tpu.trace_start"() <{level = 10 : i32, message = "hlk,hmk->hlm"}> : () -> ()
    %cst_231 = arith.constant dense<0.000000e+00> : vector<4x8x8xf32>
    %458 = tpu.matmul %456, %457, %cst_231 {dimension_numbers = #tpu.dot_dimension_numbers<[2], [2], [1], [1], [0, 0, 0, 1, 1, 1], [0], [0]>} : vector<4x8x8xbf16>, vector<4x8x8xbf16>, vector<4x8x8xf32> -> vector<4x8x8xf32>
    "tpu.trace_stop"() : () -> ()
    %cst_232 = arith.constant 0.353553385 : f32
    %459 = vector.broadcast %cst_232 : f32 to vector<4x8x8xf32>
    %460 = arith.mulf %458, %459 : vector<4x8x8xf32>
    %461 = vector.shape_cast %438 : vector<8x8xf32> to vector<1x8x8xf32>
    %462 = vector.broadcast %461 : vector<1x8x8xf32> to vector<4x8x8xf32>
    %463 = arith.addf %460, %462 : vector<4x8x8xf32>
    %cst_233 = arith.constant dense<0xFF800000> : vector<4x8xf32>
    %464 = vector.multi_reduction <maximumf>, %463, %cst_233 [2] : vector<4x8x8xf32> to vector<4x8xf32>
    %465 = vector.shape_cast %464 : vector<4x8xf32> to vector<4x8x1xf32>
    %466 = vector.broadcast %465 : vector<4x8x1xf32> to vector<4x8x8xf32>
    %467 = arith.subf %463, %466 : vector<4x8x8xf32>
    %468 = math.exp %467 : vector<4x8x8xf32>
    %cst_234 = arith.constant dense<0.000000e+00> : vector<4x8xf32>
    %469 = vector.multi_reduction <add>, %468, %cst_234 [2] : vector<4x8x8xf32> to vector<4x8xf32>
    %470 = vector.shape_cast %469 : vector<4x8xf32> to vector<4x8x1xf32>
    %471 = tpu.reciprocal %470 {approx = true} : vector<4x8x1xf32> -> vector<4x8x1xf32>
    %472 = vector.broadcast %471 : vector<4x8x1xf32> to vector<4x8x8xf32>
    %473 = arith.mulf %468, %472 : vector<4x8x8xf32>
    %474 = arith.truncf %473 : vector<4x8x8xf32> to vector<4x8x8xbf16>
    %475 = arith.truncf %455 : vector<4x8x8xf32> to vector<4x8x8xbf16>
    "tpu.trace_start"() <{level = 10 : i32, message = "hlm,hmk->hlk"}> : () -> ()
    %cst_235 = arith.constant dense<0.000000e+00> : vector<4x8x8xf32>
    %476 = tpu.matmul %474, %475, %cst_235 {dimension_numbers = #tpu.dot_dimension_numbers<[2], [1], [1], [2], [0, 0, 0, 1, 1, 2], [0], [0]>} : vector<4x8x8xbf16>, vector<4x8x8xbf16>, vector<4x8x8xf32> -> vector<4x8x8xf32>
    "tpu.trace_stop"() : () -> ()
    %477 = arith.truncf %476 : vector<4x8x8xf32> to vector<4x8x8xbf16>
    "tpu.trace_start"() <{level = 10 : i32, message = "hlk,hkd->hld"}> : () -> ()
    %cst_236 = arith.constant dense<0.000000e+00> : vector<4x8x32xf32>
    %478 = tpu.matmul %477, %381, %cst_236 {dimension_numbers = #tpu.dot_dimension_numbers<[2], [1], [1], [2], [0, 0, 0, 1, 1, 2], [0], [0]>} : vector<4x8x8xbf16>, vector<4x8x32xbf16>, vector<4x8x32xf32> -> vector<4x8x32xf32>
    "tpu.trace_stop"() : () -> ()
    %cst_237 = arith.constant dense<0.000000e+00> : vector<8x32xf32>
    %479 = vector.multi_reduction <add>, %478, %cst_237 [0] : vector<4x8x32xf32> to vector<8x32xf32>
    %480 = vector.broadcast %383 : vector<1x32xf32> to vector<8x32xf32>
    %481 = arith.addf %479, %480 : vector<8x32xf32>
    %482 = tpu.concatenate %432, %481 in 0 : vector<8x32xf32>, vector<8x32xf32> -> vector<16x32xf32>
    %483 = arith.addf %367, %482 : vector<16x32xf32>
    %c0_238 = arith.constant 0 : index
    %c0_239 = arith.constant 0 : index
    %c0_240 = arith.constant 0 : index
    %484 = vector.load %arg22[%c0_238, %c0_239, %c0_240] : memref<2x1x32xf32, #tpu.memory_space<vmem>>, vector<1x1x32xf32>
    %485 = vector.shape_cast %484 : vector<1x1x32xf32> to vector<1x32xf32>
    %c0_241 = arith.constant 0 : index
    %c0_242 = arith.constant 0 : index
    %c0_243 = arith.constant 0 : index
    %486 = vector.load %arg23[%c0_241, %c0_242, %c0_243] : memref<2x1x32xf32, #tpu.memory_space<vmem>>, vector<1x1x32xf32>
    %487 = vector.shape_cast %486 : vector<1x1x32xf32> to vector<1x32xf32>
    %cst_244 = arith.constant dense<0.000000e+00> : vector<16xf32>
    %488 = vector.multi_reduction <add>, %483, %cst_244 [1] : vector<16x32xf32> to vector<16xf32>
    %489 = vector.shape_cast %488 : vector<16xf32> to vector<16x1xf32>
    %cst_245 = arith.constant 3.200000e+01 : f32
    %490 = vector.broadcast %cst_245 : f32 to vector<16x1xf32>
    %491 = arith.divf %489, %490 : vector<16x1xf32>
    %492 = vector.broadcast %491 : vector<16x1xf32> to vector<16x32xf32>
    %493 = arith.subf %483, %492 : vector<16x32xf32>
    %494 = arith.mulf %493, %493 : vector<16x32xf32>
    %cst_246 = arith.constant dense<0.000000e+00> : vector<16xf32>
    %495 = vector.multi_reduction <add>, %494, %cst_246 [1] : vector<16x32xf32> to vector<16xf32>
    %496 = vector.shape_cast %495 : vector<16xf32> to vector<16x1xf32>
    %cst_247 = arith.constant 3.200000e+01 : f32
    %497 = vector.broadcast %cst_247 : f32 to vector<16x1xf32>
    %498 = arith.divf %496, %497 : vector<16x1xf32>
    %499 = vector.broadcast %491 : vector<16x1xf32> to vector<16x32xf32>
    %500 = arith.subf %483, %499 : vector<16x32xf32>
    %cst_248 = arith.constant 9.99999974E-6 : f32
    %501 = vector.broadcast %cst_248 : f32 to vector<16x1xf32>
    %502 = arith.addf %498, %501 : vector<16x1xf32>
    %503 = math.rsqrt %502 : vector<16x1xf32>
    %504 = vector.broadcast %503 : vector<16x1xf32> to vector<16x32xf32>
    %505 = arith.mulf %500, %504 : vector<16x32xf32>
    %506 = vector.broadcast %485 : vector<1x32xf32> to vector<16x32xf32>
    %507 = arith.mulf %505, %506 : vector<16x32xf32>
    %508 = vector.broadcast %487 : vector<1x32xf32> to vector<16x32xf32>
    %509 = arith.addf %507, %508 : vector<16x32xf32>
    %c0_249 = arith.constant 0 : index
    %c0_250 = arith.constant 0 : index
    %c0_251 = arith.constant 0 : index
    %c0_252 = arith.constant 0 : index
    %510 = vector.load %arg24[%c0_249, %c0_250, %c0_251, %c0_252] : memref<6x4x32x8xbf16, #tpu.memory_space<vmem>>, vector<1x4x32x8xbf16>
    %511 = vector.shape_cast %510 : vector<1x4x32x8xbf16> to vector<4x32x8xbf16>
    %c1_253 = arith.constant 1 : index
    %c0_254 = arith.constant 0 : index
    %c0_255 = arith.constant 0 : index
    %c0_256 = arith.constant 0 : index
    %512 = vector.load %arg24[%c1_253, %c0_254, %c0_255, %c0_256] : memref<6x4x32x8xbf16, #tpu.memory_space<vmem>>, vector<1x4x32x8xbf16>
    %513 = vector.shape_cast %512 : vector<1x4x32x8xbf16> to vector<4x32x8xbf16>
    %c2_257 = arith.constant 2 : index
    %c0_258 = arith.constant 0 : index
    %c0_259 = arith.constant 0 : index
    %c0_260 = arith.constant 0 : index
    %514 = vector.load %arg24[%c2_257, %c0_258, %c0_259, %c0_260] : memref<6x4x32x8xbf16, #tpu.memory_space<vmem>>, vector<1x4x32x8xbf16>
    %515 = vector.shape_cast %514 : vector<1x4x32x8xbf16> to vector<4x32x8xbf16>
    %c0_261 = arith.constant 0 : index
    %c0_262 = arith.constant 0 : index
    %c0_263 = arith.constant 0 : index
    %c0_264 = arith.constant 0 : index
    %516 = vector.load %arg25[%c0_261, %c0_262, %c0_263, %c0_264] : memref<6x4x1x8xf32, #tpu.memory_space<vmem>>, vector<1x4x1x8xf32>
    %517 = vector.shape_cast %516 : vector<1x4x1x8xf32> to vector<4x1x8xf32>
    %c1_265 = arith.constant 1 : index
    %c0_266 = arith.constant 0 : index
    %c0_267 = arith.constant 0 : index
    %c0_268 = arith.constant 0 : index
    %518 = vector.load %arg25[%c1_265, %c0_266, %c0_267, %c0_268] : memref<6x4x1x8xf32, #tpu.memory_space<vmem>>, vector<1x4x1x8xf32>
    %519 = vector.shape_cast %518 : vector<1x4x1x8xf32> to vector<4x1x8xf32>
    %c2_269 = arith.constant 2 : index
    %c0_270 = arith.constant 0 : index
    %c0_271 = arith.constant 0 : index
    %c0_272 = arith.constant 0 : index
    %520 = vector.load %arg25[%c2_269, %c0_270, %c0_271, %c0_272] : memref<6x4x1x8xf32, #tpu.memory_space<vmem>>, vector<1x4x1x8xf32>
    %521 = vector.shape_cast %520 : vector<1x4x1x8xf32> to vector<4x1x8xf32>
    %c0_273 = arith.constant 0 : index
    %c0_274 = arith.constant 0 : index
    %c0_275 = arith.constant 0 : index
    %c0_276 = arith.constant 0 : index
    %522 = vector.load %arg26[%c0_273, %c0_274, %c0_275, %c0_276] : memref<2x4x8x32xbf16, #tpu.memory_space<vmem>>, vector<1x4x8x32xbf16>
    %523 = vector.shape_cast %522 : vector<1x4x8x32xbf16> to vector<4x8x32xbf16>
    %c0_277 = arith.constant 0 : index
    %c0_278 = arith.constant 0 : index
    %c0_279 = arith.constant 0 : index
    %524 = vector.load %arg27[%c0_277, %c0_278, %c0_279] : memref<2x1x32xf32, #tpu.memory_space<vmem>>, vector<1x1x32xf32>
    %525 = vector.shape_cast %524 : vector<1x1x32xf32> to vector<1x32xf32>
    %526 = vector.extract_strided_slice %509 {offsets = [0, 0], sizes = [8, 32], strides = [1, 1]} : vector<16x32xf32> to vector<8x32xf32>
    %527 = vector.extract_strided_slice %353 {offsets = [0, 0], sizes = [8, 32], strides = [1, 1]} : vector<16x32xf32> to vector<8x32xf32>
    %528 = arith.truncf %526 : vector<8x32xf32> to vector<8x32xbf16>
    %529 = vector.shape_cast %528 : vector<8x32xbf16> to vector<1x8x32xbf16>
    %530 = vector.shape_cast %529 : vector<1x8x32xbf16> to vector<1x8x32xbf16>
    %531 = vector.broadcast %530 : vector<1x8x32xbf16> to vector<4x8x32xbf16>
    %532 = arith.truncf %527 : vector<8x32xf32> to vector<8x32xbf16>
    %533 = vector.shape_cast %532 : vector<8x32xbf16> to vector<1x8x32xbf16>
    %534 = vector.shape_cast %533 : vector<1x8x32xbf16> to vector<1x8x32xbf16>
    %535 = vector.broadcast %534 : vector<1x8x32xbf16> to vector<4x8x32xbf16>
    "tpu.trace_start"() <{level = 10 : i32, message = "hld,hdk->hlk"}> : () -> ()
    %cst_280 = arith.constant dense<0.000000e+00> : vector<4x8x8xf32>
    %536 = tpu.matmul %531, %511, %cst_280 {dimension_numbers = #tpu.dot_dimension_numbers<[2], [1], [1], [2], [0, 0, 0, 1, 1, 2], [0], [0]>} : vector<4x8x32xbf16>, vector<4x32x8xbf16>, vector<4x8x8xf32> -> vector<4x8x8xf32>
    "tpu.trace_stop"() : () -> ()
    %537 = vector.broadcast %517 : vector<4x1x8xf32> to vector<4x8x8xf32>
    %538 = arith.addf %536, %537 : vector<4x8x8xf32>
    "tpu.trace_start"() <{level = 10 : i32, message = "hld,hdk->hlk"}> : () -> ()
    %cst_281 = arith.constant dense<0.000000e+00> : vector<4x8x8xf32>
    %539 = tpu.matmul %535, %513, %cst_281 {dimension_numbers = #tpu.dot_dimension_numbers<[2], [1], [1], [2], [0, 0, 0, 1, 1, 2], [0], [0]>} : vector<4x8x32xbf16>, vector<4x32x8xbf16>, vector<4x8x8xf32> -> vector<4x8x8xf32>
    "tpu.trace_stop"() : () -> ()
    %540 = vector.broadcast %519 : vector<4x1x8xf32> to vector<4x8x8xf32>
    %541 = arith.addf %539, %540 : vector<4x8x8xf32>
    "tpu.trace_start"() <{level = 10 : i32, message = "hld,hdk->hlk"}> : () -> ()
    %cst_282 = arith.constant dense<0.000000e+00> : vector<4x8x8xf32>
    %542 = tpu.matmul %535, %515, %cst_282 {dimension_numbers = #tpu.dot_dimension_numbers<[2], [1], [1], [2], [0, 0, 0, 1, 1, 2], [0], [0]>} : vector<4x8x32xbf16>, vector<4x32x8xbf16>, vector<4x8x8xf32> -> vector<4x8x8xf32>
    "tpu.trace_stop"() : () -> ()
    %543 = vector.broadcast %521 : vector<4x1x8xf32> to vector<4x8x8xf32>
    %544 = arith.addf %542, %543 : vector<4x8x8xf32>
    %545 = arith.truncf %538 : vector<4x8x8xf32> to vector<4x8x8xbf16>
    %546 = arith.truncf %541 : vector<4x8x8xf32> to vector<4x8x8xbf16>
    "tpu.trace_start"() <{level = 10 : i32, message = "hlk,hmk->hlm"}> : () -> ()
    %cst_283 = arith.constant dense<0.000000e+00> : vector<4x8x8xf32>
    %547 = tpu.matmul %545, %546, %cst_283 {dimension_numbers = #tpu.dot_dimension_numbers<[2], [2], [1], [1], [0, 0, 0, 1, 1, 1], [0], [0]>} : vector<4x8x8xbf16>, vector<4x8x8xbf16>, vector<4x8x8xf32> -> vector<4x8x8xf32>
    "tpu.trace_stop"() : () -> ()
    %cst_284 = arith.constant 0.353553385 : f32
    %548 = vector.broadcast %cst_284 : f32 to vector<4x8x8xf32>
    %549 = arith.mulf %547, %548 : vector<4x8x8xf32>
    %550 = vector.shape_cast %365 : vector<8x8xf32> to vector<1x8x8xf32>
    %551 = vector.broadcast %550 : vector<1x8x8xf32> to vector<4x8x8xf32>
    %552 = arith.addf %549, %551 : vector<4x8x8xf32>
    %cst_285 = arith.constant dense<0xFF800000> : vector<4x8xf32>
    %553 = vector.multi_reduction <maximumf>, %552, %cst_285 [2] : vector<4x8x8xf32> to vector<4x8xf32>
    %554 = vector.shape_cast %553 : vector<4x8xf32> to vector<4x8x1xf32>
    %555 = vector.broadcast %554 : vector<4x8x1xf32> to vector<4x8x8xf32>
    %556 = arith.subf %552, %555 : vector<4x8x8xf32>
    %557 = math.exp %556 : vector<4x8x8xf32>
    %cst_286 = arith.constant dense<0.000000e+00> : vector<4x8xf32>
    %558 = vector.multi_reduction <add>, %557, %cst_286 [2] : vector<4x8x8xf32> to vector<4x8xf32>
    %559 = vector.shape_cast %558 : vector<4x8xf32> to vector<4x8x1xf32>
    %560 = tpu.reciprocal %559 {approx = true} : vector<4x8x1xf32> -> vector<4x8x1xf32>
    %561 = vector.broadcast %560 : vector<4x8x1xf32> to vector<4x8x8xf32>
    %562 = arith.mulf %557, %561 : vector<4x8x8xf32>
    %563 = arith.truncf %562 : vector<4x8x8xf32> to vector<4x8x8xbf16>
    %564 = arith.truncf %544 : vector<4x8x8xf32> to vector<4x8x8xbf16>
    "tpu.trace_start"() <{level = 10 : i32, message = "hlm,hmk->hlk"}> : () -> ()
    %cst_287 = arith.constant dense<0.000000e+00> : vector<4x8x8xf32>
    %565 = tpu.matmul %563, %564, %cst_287 {dimension_numbers = #tpu.dot_dimension_numbers<[2], [1], [1], [2], [0, 0, 0, 1, 1, 2], [0], [0]>} : vector<4x8x8xbf16>, vector<4x8x8xbf16>, vector<4x8x8xf32> -> vector<4x8x8xf32>
    "tpu.trace_stop"() : () -> ()
    %566 = arith.truncf %565 : vector<4x8x8xf32> to vector<4x8x8xbf16>
    "tpu.trace_start"() <{level = 10 : i32, message = "hlk,hkd->hld"}> : () -> ()
    %cst_288 = arith.constant dense<0.000000e+00> : vector<4x8x32xf32>
    %567 = tpu.matmul %566, %523, %cst_288 {dimension_numbers = #tpu.dot_dimension_numbers<[2], [1], [1], [2], [0, 0, 0, 1, 1, 2], [0], [0]>} : vector<4x8x8xbf16>, vector<4x8x32xbf16>, vector<4x8x32xf32> -> vector<4x8x32xf32>
    "tpu.trace_stop"() : () -> ()
    %cst_289 = arith.constant dense<0.000000e+00> : vector<8x32xf32>
    %568 = vector.multi_reduction <add>, %567, %cst_289 [0] : vector<4x8x32xf32> to vector<8x32xf32>
    %569 = vector.broadcast %525 : vector<1x32xf32> to vector<8x32xf32>
    %570 = arith.addf %568, %569 : vector<8x32xf32>
    %571 = vector.extract_strided_slice %509 {offsets = [8, 0], sizes = [8, 32], strides = [1, 1]} : vector<16x32xf32> to vector<8x32xf32>
    %572 = vector.extract_strided_slice %353 {offsets = [8, 0], sizes = [8, 32], strides = [1, 1]} : vector<16x32xf32> to vector<8x32xf32>
    %573 = arith.truncf %571 : vector<8x32xf32> to vector<8x32xbf16>
    %574 = vector.shape_cast %573 : vector<8x32xbf16> to vector<1x8x32xbf16>
    %575 = vector.shape_cast %574 : vector<1x8x32xbf16> to vector<1x8x32xbf16>
    %576 = vector.broadcast %575 : vector<1x8x32xbf16> to vector<4x8x32xbf16>
    %577 = arith.truncf %572 : vector<8x32xf32> to vector<8x32xbf16>
    %578 = vector.shape_cast %577 : vector<8x32xbf16> to vector<1x8x32xbf16>
    %579 = vector.shape_cast %578 : vector<1x8x32xbf16> to vector<1x8x32xbf16>
    %580 = vector.broadcast %579 : vector<1x8x32xbf16> to vector<4x8x32xbf16>
    "tpu.trace_start"() <{level = 10 : i32, message = "hld,hdk->hlk"}> : () -> ()
    %cst_290 = arith.constant dense<0.000000e+00> : vector<4x8x8xf32>
    %581 = tpu.matmul %576, %511, %cst_290 {dimension_numbers = #tpu.dot_dimension_numbers<[2], [1], [1], [2], [0, 0, 0, 1, 1, 2], [0], [0]>} : vector<4x8x32xbf16>, vector<4x32x8xbf16>, vector<4x8x8xf32> -> vector<4x8x8xf32>
    "tpu.trace_stop"() : () -> ()
    %582 = vector.broadcast %517 : vector<4x1x8xf32> to vector<4x8x8xf32>
    %583 = arith.addf %581, %582 : vector<4x8x8xf32>
    "tpu.trace_start"() <{level = 10 : i32, message = "hld,hdk->hlk"}> : () -> ()
    %cst_291 = arith.constant dense<0.000000e+00> : vector<4x8x8xf32>
    %584 = tpu.matmul %580, %513, %cst_291 {dimension_numbers = #tpu.dot_dimension_numbers<[2], [1], [1], [2], [0, 0, 0, 1, 1, 2], [0], [0]>} : vector<4x8x32xbf16>, vector<4x32x8xbf16>, vector<4x8x8xf32> -> vector<4x8x8xf32>
    "tpu.trace_stop"() : () -> ()
    %585 = vector.broadcast %519 : vector<4x1x8xf32> to vector<4x8x8xf32>
    %586 = arith.addf %584, %585 : vector<4x8x8xf32>
    "tpu.trace_start"() <{level = 10 : i32, message = "hld,hdk->hlk"}> : () -> ()
    %cst_292 = arith.constant dense<0.000000e+00> : vector<4x8x8xf32>
    %587 = tpu.matmul %580, %515, %cst_292 {dimension_numbers = #tpu.dot_dimension_numbers<[2], [1], [1], [2], [0, 0, 0, 1, 1, 2], [0], [0]>} : vector<4x8x32xbf16>, vector<4x32x8xbf16>, vector<4x8x8xf32> -> vector<4x8x8xf32>
    "tpu.trace_stop"() : () -> ()
    %588 = vector.broadcast %521 : vector<4x1x8xf32> to vector<4x8x8xf32>
    %589 = arith.addf %587, %588 : vector<4x8x8xf32>
    %590 = arith.truncf %583 : vector<4x8x8xf32> to vector<4x8x8xbf16>
    %591 = arith.truncf %586 : vector<4x8x8xf32> to vector<4x8x8xbf16>
    "tpu.trace_start"() <{level = 10 : i32, message = "hlk,hmk->hlm"}> : () -> ()
    %cst_293 = arith.constant dense<0.000000e+00> : vector<4x8x8xf32>
    %592 = tpu.matmul %590, %591, %cst_293 {dimension_numbers = #tpu.dot_dimension_numbers<[2], [2], [1], [1], [0, 0, 0, 1, 1, 1], [0], [0]>} : vector<4x8x8xbf16>, vector<4x8x8xbf16>, vector<4x8x8xf32> -> vector<4x8x8xf32>
    "tpu.trace_stop"() : () -> ()
    %cst_294 = arith.constant 0.353553385 : f32
    %593 = vector.broadcast %cst_294 : f32 to vector<4x8x8xf32>
    %594 = arith.mulf %592, %593 : vector<4x8x8xf32>
    %595 = vector.shape_cast %365 : vector<8x8xf32> to vector<1x8x8xf32>
    %596 = vector.broadcast %595 : vector<1x8x8xf32> to vector<4x8x8xf32>
    %597 = arith.addf %594, %596 : vector<4x8x8xf32>
    %cst_295 = arith.constant dense<0xFF800000> : vector<4x8xf32>
    %598 = vector.multi_reduction <maximumf>, %597, %cst_295 [2] : vector<4x8x8xf32> to vector<4x8xf32>
    %599 = vector.shape_cast %598 : vector<4x8xf32> to vector<4x8x1xf32>
    %600 = vector.broadcast %599 : vector<4x8x1xf32> to vector<4x8x8xf32>
    %601 = arith.subf %597, %600 : vector<4x8x8xf32>
    %602 = math.exp %601 : vector<4x8x8xf32>
    %cst_296 = arith.constant dense<0.000000e+00> : vector<4x8xf32>
    %603 = vector.multi_reduction <add>, %602, %cst_296 [2] : vector<4x8x8xf32> to vector<4x8xf32>
    %604 = vector.shape_cast %603 : vector<4x8xf32> to vector<4x8x1xf32>
    %605 = tpu.reciprocal %604 {approx = true} : vector<4x8x1xf32> -> vector<4x8x1xf32>
    %606 = vector.broadcast %605 : vector<4x8x1xf32> to vector<4x8x8xf32>
    %607 = arith.mulf %602, %606 : vector<4x8x8xf32>
    %608 = arith.truncf %607 : vector<4x8x8xf32> to vector<4x8x8xbf16>
    %609 = arith.truncf %589 : vector<4x8x8xf32> to vector<4x8x8xbf16>
    "tpu.trace_start"() <{level = 10 : i32, message = "hlm,hmk->hlk"}> : () -> ()
    %cst_297 = arith.constant dense<0.000000e+00> : vector<4x8x8xf32>
    %610 = tpu.matmul %608, %609, %cst_297 {dimension_numbers = #tpu.dot_dimension_numbers<[2], [1], [1], [2], [0, 0, 0, 1, 1, 2], [0], [0]>} : vector<4x8x8xbf16>, vector<4x8x8xbf16>, vector<4x8x8xf32> -> vector<4x8x8xf32>
    "tpu.trace_stop"() : () -> ()
    %611 = arith.truncf %610 : vector<4x8x8xf32> to vector<4x8x8xbf16>
    "tpu.trace_start"() <{level = 10 : i32, message = "hlk,hkd->hld"}> : () -> ()
    %cst_298 = arith.constant dense<0.000000e+00> : vector<4x8x32xf32>
    %612 = tpu.matmul %611, %523, %cst_298 {dimension_numbers = #tpu.dot_dimension_numbers<[2], [1], [1], [2], [0, 0, 0, 1, 1, 2], [0], [0]>} : vector<4x8x8xbf16>, vector<4x8x32xbf16>, vector<4x8x32xf32> -> vector<4x8x32xf32>
    "tpu.trace_stop"() : () -> ()
    %cst_299 = arith.constant dense<0.000000e+00> : vector<8x32xf32>
    %613 = vector.multi_reduction <add>, %612, %cst_299 [0] : vector<4x8x32xf32> to vector<8x32xf32>
    %614 = vector.broadcast %525 : vector<1x32xf32> to vector<8x32xf32>
    %615 = arith.addf %613, %614 : vector<8x32xf32>
    %616 = tpu.concatenate %570, %615 in 0 : vector<8x32xf32>, vector<8x32xf32> -> vector<16x32xf32>
    %617 = arith.addf %509, %616 : vector<16x32xf32>
    %c0_300 = arith.constant 0 : index
    %c0_301 = arith.constant 0 : index
    %c0_302 = arith.constant 0 : index
    %618 = vector.load %arg28[%c0_300, %c0_301, %c0_302] : memref<2x1x32xf32, #tpu.memory_space<vmem>>, vector<1x1x32xf32>
    %619 = vector.shape_cast %618 : vector<1x1x32xf32> to vector<1x32xf32>
    %c0_303 = arith.constant 0 : index
    %c0_304 = arith.constant 0 : index
    %c0_305 = arith.constant 0 : index
    %620 = vector.load %arg29[%c0_303, %c0_304, %c0_305] : memref<2x1x32xf32, #tpu.memory_space<vmem>>, vector<1x1x32xf32>
    %621 = vector.shape_cast %620 : vector<1x1x32xf32> to vector<1x32xf32>
    %cst_306 = arith.constant dense<0.000000e+00> : vector<16xf32>
    %622 = vector.multi_reduction <add>, %617, %cst_306 [1] : vector<16x32xf32> to vector<16xf32>
    %623 = vector.shape_cast %622 : vector<16xf32> to vector<16x1xf32>
    %cst_307 = arith.constant 3.200000e+01 : f32
    %624 = vector.broadcast %cst_307 : f32 to vector<16x1xf32>
    %625 = arith.divf %623, %624 : vector<16x1xf32>
    %626 = vector.broadcast %625 : vector<16x1xf32> to vector<16x32xf32>
    %627 = arith.subf %617, %626 : vector<16x32xf32>
    %628 = arith.mulf %627, %627 : vector<16x32xf32>
    %cst_308 = arith.constant dense<0.000000e+00> : vector<16xf32>
    %629 = vector.multi_reduction <add>, %628, %cst_308 [1] : vector<16x32xf32> to vector<16xf32>
    %630 = vector.shape_cast %629 : vector<16xf32> to vector<16x1xf32>
    %cst_309 = arith.constant 3.200000e+01 : f32
    %631 = vector.broadcast %cst_309 : f32 to vector<16x1xf32>
    %632 = arith.divf %630, %631 : vector<16x1xf32>
    %633 = vector.broadcast %625 : vector<16x1xf32> to vector<16x32xf32>
    %634 = arith.subf %617, %633 : vector<16x32xf32>
    %cst_310 = arith.constant 9.99999974E-6 : f32
    %635 = vector.broadcast %cst_310 : f32 to vector<16x1xf32>
    %636 = arith.addf %632, %635 : vector<16x1xf32>
    %637 = math.rsqrt %636 : vector<16x1xf32>
    %638 = vector.broadcast %637 : vector<16x1xf32> to vector<16x32xf32>
    %639 = arith.mulf %634, %638 : vector<16x32xf32>
    %640 = vector.broadcast %619 : vector<1x32xf32> to vector<16x32xf32>
    %641 = arith.mulf %639, %640 : vector<16x32xf32>
    %642 = vector.broadcast %621 : vector<1x32xf32> to vector<16x32xf32>
    %643 = arith.addf %641, %642 : vector<16x32xf32>
    %644 = arith.truncf %643 : vector<16x32xf32> to vector<16x32xbf16>
    %c0_311 = arith.constant 0 : index
    %c0_312 = arith.constant 0 : index
    %c0_313 = arith.constant 0 : index
    %645 = vector.load %arg30[%c0_311, %c0_312, %c0_313] : memref<2x32x64xbf16, #tpu.memory_space<vmem>>, vector<1x32x64xbf16>
    %646 = vector.shape_cast %645 : vector<1x32x64xbf16> to vector<32x64xbf16>
    %cst_314 = arith.constant dense<0.000000e+00> : vector<16x64xf32>
    %647 = tpu.matmul %644, %646, %cst_314 {dimension_numbers = #tpu.dot_dimension_numbers<[1], [0], [0], [1], [0, 0, 1, 1], [], []>} : vector<16x32xbf16>, vector<32x64xbf16>, vector<16x64xf32> -> vector<16x64xf32>
    %c0_315 = arith.constant 0 : index
    %c0_316 = arith.constant 0 : index
    %c0_317 = arith.constant 0 : index
    %648 = vector.load %arg31[%c0_315, %c0_316, %c0_317] : memref<2x1x64xf32, #tpu.memory_space<vmem>>, vector<1x1x64xf32>
    %649 = vector.shape_cast %648 : vector<1x1x64xf32> to vector<1x64xf32>
    %650 = vector.broadcast %649 : vector<1x64xf32> to vector<16x64xf32>
    %651 = arith.addf %647, %650 : vector<16x64xf32>
    %cst_318 = arith.constant 0.000000e+00 : f32
    %652 = vector.broadcast %cst_318 : f32 to vector<16x64xf32>
    %653 = arith.maximumf %651, %652 : vector<16x64xf32>
    %654 = arith.truncf %653 : vector<16x64xf32> to vector<16x64xbf16>
    %c0_319 = arith.constant 0 : index
    %c0_320 = arith.constant 0 : index
    %c0_321 = arith.constant 0 : index
    %655 = vector.load %arg32[%c0_319, %c0_320, %c0_321] : memref<2x64x32xbf16, #tpu.memory_space<vmem>>, vector<1x64x32xbf16>
    %656 = vector.shape_cast %655 : vector<1x64x32xbf16> to vector<64x32xbf16>
    %cst_322 = arith.constant dense<0.000000e+00> : vector<16x32xf32>
    %657 = tpu.matmul %654, %656, %cst_322 {dimension_numbers = #tpu.dot_dimension_numbers<[1], [0], [0], [1], [0, 0, 1, 1], [], []>} : vector<16x64xbf16>, vector<64x32xbf16>, vector<16x32xf32> -> vector<16x32xf32>
    %c0_323 = arith.constant 0 : index
    %c0_324 = arith.constant 0 : index
    %c0_325 = arith.constant 0 : index
    %658 = vector.load %arg33[%c0_323, %c0_324, %c0_325] : memref<2x1x32xf32, #tpu.memory_space<vmem>>, vector<1x1x32xf32>
    %659 = vector.shape_cast %658 : vector<1x1x32xf32> to vector<1x32xf32>
    %660 = vector.broadcast %659 : vector<1x32xf32> to vector<16x32xf32>
    %661 = arith.addf %657, %660 : vector<16x32xf32>
    %662 = arith.addf %643, %661 : vector<16x32xf32>
    %c0_326 = arith.constant 0 : index
    %c0_327 = arith.constant 0 : index
    %c0_328 = arith.constant 0 : index
    %663 = vector.load %arg34[%c0_326, %c0_327, %c0_328] : memref<2x1x32xf32, #tpu.memory_space<vmem>>, vector<1x1x32xf32>
    %664 = vector.shape_cast %663 : vector<1x1x32xf32> to vector<1x32xf32>
    %c0_329 = arith.constant 0 : index
    %c0_330 = arith.constant 0 : index
    %c0_331 = arith.constant 0 : index
    %665 = vector.load %arg35[%c0_329, %c0_330, %c0_331] : memref<2x1x32xf32, #tpu.memory_space<vmem>>, vector<1x1x32xf32>
    %666 = vector.shape_cast %665 : vector<1x1x32xf32> to vector<1x32xf32>
    %cst_332 = arith.constant dense<0.000000e+00> : vector<16xf32>
    %667 = vector.multi_reduction <add>, %662, %cst_332 [1] : vector<16x32xf32> to vector<16xf32>
    %668 = vector.shape_cast %667 : vector<16xf32> to vector<16x1xf32>
    %cst_333 = arith.constant 3.200000e+01 : f32
    %669 = vector.broadcast %cst_333 : f32 to vector<16x1xf32>
    %670 = arith.divf %668, %669 : vector<16x1xf32>
    %671 = vector.broadcast %670 : vector<16x1xf32> to vector<16x32xf32>
    %672 = arith.subf %662, %671 : vector<16x32xf32>
    %673 = arith.mulf %672, %672 : vector<16x32xf32>
    %cst_334 = arith.constant dense<0.000000e+00> : vector<16xf32>
    %674 = vector.multi_reduction <add>, %673, %cst_334 [1] : vector<16x32xf32> to vector<16xf32>
    %675 = vector.shape_cast %674 : vector<16xf32> to vector<16x1xf32>
    %cst_335 = arith.constant 3.200000e+01 : f32
    %676 = vector.broadcast %cst_335 : f32 to vector<16x1xf32>
    %677 = arith.divf %675, %676 : vector<16x1xf32>
    %678 = vector.broadcast %670 : vector<16x1xf32> to vector<16x32xf32>
    %679 = arith.subf %662, %678 : vector<16x32xf32>
    %cst_336 = arith.constant 9.99999974E-6 : f32
    %680 = vector.broadcast %cst_336 : f32 to vector<16x1xf32>
    %681 = arith.addf %677, %680 : vector<16x1xf32>
    %682 = math.rsqrt %681 : vector<16x1xf32>
    %683 = vector.broadcast %682 : vector<16x1xf32> to vector<16x32xf32>
    %684 = arith.mulf %679, %683 : vector<16x32xf32>
    %685 = vector.broadcast %664 : vector<1x32xf32> to vector<16x32xf32>
    %686 = arith.mulf %684, %685 : vector<16x32xf32>
    %687 = vector.broadcast %666 : vector<1x32xf32> to vector<16x32xf32>
    %688 = arith.addf %686, %687 : vector<16x32xf32>
    %c3_337 = arith.constant 3 : index
    %c0_338 = arith.constant 0 : index
    %c0_339 = arith.constant 0 : index
    %c0_340 = arith.constant 0 : index
    %689 = vector.load %arg18[%c3_337, %c0_338, %c0_339, %c0_340] : memref<6x4x32x8xbf16, #tpu.memory_space<vmem>>, vector<1x4x32x8xbf16>
    %690 = vector.shape_cast %689 : vector<1x4x32x8xbf16> to vector<4x32x8xbf16>
    %c4_341 = arith.constant 4 : index
    %c0_342 = arith.constant 0 : index
    %c0_343 = arith.constant 0 : index
    %c0_344 = arith.constant 0 : index
    %691 = vector.load %arg18[%c4_341, %c0_342, %c0_343, %c0_344] : memref<6x4x32x8xbf16, #tpu.memory_space<vmem>>, vector<1x4x32x8xbf16>
    %692 = vector.shape_cast %691 : vector<1x4x32x8xbf16> to vector<4x32x8xbf16>
    %c5_345 = arith.constant 5 : index
    %c0_346 = arith.constant 0 : index
    %c0_347 = arith.constant 0 : index
    %c0_348 = arith.constant 0 : index
    %693 = vector.load %arg18[%c5_345, %c0_346, %c0_347, %c0_348] : memref<6x4x32x8xbf16, #tpu.memory_space<vmem>>, vector<1x4x32x8xbf16>
    %694 = vector.shape_cast %693 : vector<1x4x32x8xbf16> to vector<4x32x8xbf16>
    %c3_349 = arith.constant 3 : index
    %c0_350 = arith.constant 0 : index
    %c0_351 = arith.constant 0 : index
    %c0_352 = arith.constant 0 : index
    %695 = vector.load %arg19[%c3_349, %c0_350, %c0_351, %c0_352] : memref<6x4x1x8xf32, #tpu.memory_space<vmem>>, vector<1x4x1x8xf32>
    %696 = vector.shape_cast %695 : vector<1x4x1x8xf32> to vector<4x1x8xf32>
    %c4_353 = arith.constant 4 : index
    %c0_354 = arith.constant 0 : index
    %c0_355 = arith.constant 0 : index
    %c0_356 = arith.constant 0 : index
    %697 = vector.load %arg19[%c4_353, %c0_354, %c0_355, %c0_356] : memref<6x4x1x8xf32, #tpu.memory_space<vmem>>, vector<1x4x1x8xf32>
    %698 = vector.shape_cast %697 : vector<1x4x1x8xf32> to vector<4x1x8xf32>
    %c5_357 = arith.constant 5 : index
    %c0_358 = arith.constant 0 : index
    %c0_359 = arith.constant 0 : index
    %c0_360 = arith.constant 0 : index
    %699 = vector.load %arg19[%c5_357, %c0_358, %c0_359, %c0_360] : memref<6x4x1x8xf32, #tpu.memory_space<vmem>>, vector<1x4x1x8xf32>
    %700 = vector.shape_cast %699 : vector<1x4x1x8xf32> to vector<4x1x8xf32>
    %c1_361 = arith.constant 1 : index
    %c0_362 = arith.constant 0 : index
    %c0_363 = arith.constant 0 : index
    %c0_364 = arith.constant 0 : index
    %701 = vector.load %arg20[%c1_361, %c0_362, %c0_363, %c0_364] : memref<2x4x8x32xbf16, #tpu.memory_space<vmem>>, vector<1x4x8x32xbf16>
    %702 = vector.shape_cast %701 : vector<1x4x8x32xbf16> to vector<4x8x32xbf16>
    %c1_365 = arith.constant 1 : index
    %c0_366 = arith.constant 0 : index
    %c0_367 = arith.constant 0 : index
    %703 = vector.load %arg21[%c1_365, %c0_366, %c0_367] : memref<2x1x32xf32, #tpu.memory_space<vmem>>, vector<1x1x32xf32>
    %704 = vector.shape_cast %703 : vector<1x1x32xf32> to vector<1x32xf32>
    %705 = vector.extract_strided_slice %688 {offsets = [0, 0], sizes = [8, 32], strides = [1, 1]} : vector<16x32xf32> to vector<8x32xf32>
    %706 = vector.extract_strided_slice %688 {offsets = [0, 0], sizes = [8, 32], strides = [1, 1]} : vector<16x32xf32> to vector<8x32xf32>
    %707 = vector.extract_strided_slice %366 {offsets = [0, 0, 0], sizes = [1, 1, 8], strides = [1, 1, 1]} : vector<2x1x8xf32> to vector<1x1x8xf32>
    %708 = vector.shape_cast %707 : vector<1x1x8xf32> to vector<1x8xf32>
    %709 = vector.broadcast %708 : vector<1x8xf32> to vector<8x8xf32>
    %710 = arith.addf %359, %709 : vector<8x8xf32>
    %711 = arith.truncf %705 : vector<8x32xf32> to vector<8x32xbf16>
    %712 = vector.shape_cast %711 : vector<8x32xbf16> to vector<1x8x32xbf16>
    %713 = vector.shape_cast %712 : vector<1x8x32xbf16> to vector<1x8x32xbf16>
    %714 = vector.broadcast %713 : vector<1x8x32xbf16> to vector<4x8x32xbf16>
    %715 = arith.truncf %706 : vector<8x32xf32> to vector<8x32xbf16>
    %716 = vector.shape_cast %715 : vector<8x32xbf16> to vector<1x8x32xbf16>
    %717 = vector.shape_cast %716 : vector<1x8x32xbf16> to vector<1x8x32xbf16>
    %718 = vector.broadcast %717 : vector<1x8x32xbf16> to vector<4x8x32xbf16>
    "tpu.trace_start"() <{level = 10 : i32, message = "hld,hdk->hlk"}> : () -> ()
    %cst_368 = arith.constant dense<0.000000e+00> : vector<4x8x8xf32>
    %719 = tpu.matmul %714, %690, %cst_368 {dimension_numbers = #tpu.dot_dimension_numbers<[2], [1], [1], [2], [0, 0, 0, 1, 1, 2], [0], [0]>} : vector<4x8x32xbf16>, vector<4x32x8xbf16>, vector<4x8x8xf32> -> vector<4x8x8xf32>
    "tpu.trace_stop"() : () -> ()
    %720 = vector.broadcast %696 : vector<4x1x8xf32> to vector<4x8x8xf32>
    %721 = arith.addf %719, %720 : vector<4x8x8xf32>
    "tpu.trace_start"() <{level = 10 : i32, message = "hld,hdk->hlk"}> : () -> ()
    %cst_369 = arith.constant dense<0.000000e+00> : vector<4x8x8xf32>
    %722 = tpu.matmul %718, %692, %cst_369 {dimension_numbers = #tpu.dot_dimension_numbers<[2], [1], [1], [2], [0, 0, 0, 1, 1, 2], [0], [0]>} : vector<4x8x32xbf16>, vector<4x32x8xbf16>, vector<4x8x8xf32> -> vector<4x8x8xf32>
    "tpu.trace_stop"() : () -> ()
    %723 = vector.broadcast %698 : vector<4x1x8xf32> to vector<4x8x8xf32>
    %724 = arith.addf %722, %723 : vector<4x8x8xf32>
    "tpu.trace_start"() <{level = 10 : i32, message = "hld,hdk->hlk"}> : () -> ()
    %cst_370 = arith.constant dense<0.000000e+00> : vector<4x8x8xf32>
    %725 = tpu.matmul %718, %694, %cst_370 {dimension_numbers = #tpu.dot_dimension_numbers<[2], [1], [1], [2], [0, 0, 0, 1, 1, 2], [0], [0]>} : vector<4x8x32xbf16>, vector<4x32x8xbf16>, vector<4x8x8xf32> -> vector<4x8x8xf32>
    "tpu.trace_stop"() : () -> ()
    %726 = vector.broadcast %700 : vector<4x1x8xf32> to vector<4x8x8xf32>
    %727 = arith.addf %725, %726 : vector<4x8x8xf32>
    %728 = arith.truncf %721 : vector<4x8x8xf32> to vector<4x8x8xbf16>
    %729 = arith.truncf %724 : vector<4x8x8xf32> to vector<4x8x8xbf16>
    "tpu.trace_start"() <{level = 10 : i32, message = "hlk,hmk->hlm"}> : () -> ()
    %cst_371 = arith.constant dense<0.000000e+00> : vector<4x8x8xf32>
    %730 = tpu.matmul %728, %729, %cst_371 {dimension_numbers = #tpu.dot_dimension_numbers<[2], [2], [1], [1], [0, 0, 0, 1, 1, 1], [0], [0]>} : vector<4x8x8xbf16>, vector<4x8x8xbf16>, vector<4x8x8xf32> -> vector<4x8x8xf32>
    "tpu.trace_stop"() : () -> ()
    %cst_372 = arith.constant 0.353553385 : f32
    %731 = vector.broadcast %cst_372 : f32 to vector<4x8x8xf32>
    %732 = arith.mulf %730, %731 : vector<4x8x8xf32>
    %733 = vector.shape_cast %710 : vector<8x8xf32> to vector<1x8x8xf32>
    %734 = vector.broadcast %733 : vector<1x8x8xf32> to vector<4x8x8xf32>
    %735 = arith.addf %732, %734 : vector<4x8x8xf32>
    %cst_373 = arith.constant dense<0xFF800000> : vector<4x8xf32>
    %736 = vector.multi_reduction <maximumf>, %735, %cst_373 [2] : vector<4x8x8xf32> to vector<4x8xf32>
    %737 = vector.shape_cast %736 : vector<4x8xf32> to vector<4x8x1xf32>
    %738 = vector.broadcast %737 : vector<4x8x1xf32> to vector<4x8x8xf32>
    %739 = arith.subf %735, %738 : vector<4x8x8xf32>
    %740 = math.exp %739 : vector<4x8x8xf32>
    %cst_374 = arith.constant dense<0.000000e+00> : vector<4x8xf32>
    %741 = vector.multi_reduction <add>, %740, %cst_374 [2] : vector<4x8x8xf32> to vector<4x8xf32>
    %742 = vector.shape_cast %741 : vector<4x8xf32> to vector<4x8x1xf32>
    %743 = tpu.reciprocal %742 {approx = true} : vector<4x8x1xf32> -> vector<4x8x1xf32>
    %744 = vector.broadcast %743 : vector<4x8x1xf32> to vector<4x8x8xf32>
    %745 = arith.mulf %740, %744 : vector<4x8x8xf32>
    %746 = arith.truncf %745 : vector<4x8x8xf32> to vector<4x8x8xbf16>
    %747 = arith.truncf %727 : vector<4x8x8xf32> to vector<4x8x8xbf16>
    "tpu.trace_start"() <{level = 10 : i32, message = "hlm,hmk->hlk"}> : () -> ()
    %cst_375 = arith.constant dense<0.000000e+00> : vector<4x8x8xf32>
    %748 = tpu.matmul %746, %747, %cst_375 {dimension_numbers = #tpu.dot_dimension_numbers<[2], [1], [1], [2], [0, 0, 0, 1, 1, 2], [0], [0]>} : vector<4x8x8xbf16>, vector<4x8x8xbf16>, vector<4x8x8xf32> -> vector<4x8x8xf32>
    "tpu.trace_stop"() : () -> ()
    %749 = arith.truncf %748 : vector<4x8x8xf32> to vector<4x8x8xbf16>
    "tpu.trace_start"() <{level = 10 : i32, message = "hlk,hkd->hld"}> : () -> ()
    %cst_376 = arith.constant dense<0.000000e+00> : vector<4x8x32xf32>
    %750 = tpu.matmul %749, %702, %cst_376 {dimension_numbers = #tpu.dot_dimension_numbers<[2], [1], [1], [2], [0, 0, 0, 1, 1, 2], [0], [0]>} : vector<4x8x8xbf16>, vector<4x8x32xbf16>, vector<4x8x32xf32> -> vector<4x8x32xf32>
    "tpu.trace_stop"() : () -> ()
    %cst_377 = arith.constant dense<0.000000e+00> : vector<8x32xf32>
    %751 = vector.multi_reduction <add>, %750, %cst_377 [0] : vector<4x8x32xf32> to vector<8x32xf32>
    %752 = vector.broadcast %704 : vector<1x32xf32> to vector<8x32xf32>
    %753 = arith.addf %751, %752 : vector<8x32xf32>
    %754 = vector.extract_strided_slice %688 {offsets = [8, 0], sizes = [8, 32], strides = [1, 1]} : vector<16x32xf32> to vector<8x32xf32>
    %755 = vector.extract_strided_slice %688 {offsets = [8, 0], sizes = [8, 32], strides = [1, 1]} : vector<16x32xf32> to vector<8x32xf32>
    %756 = vector.extract_strided_slice %366 {offsets = [1, 0, 0], sizes = [1, 1, 8], strides = [1, 1, 1]} : vector<2x1x8xf32> to vector<1x1x8xf32>
    %757 = vector.shape_cast %756 : vector<1x1x8xf32> to vector<1x8xf32>
    %758 = vector.broadcast %757 : vector<1x8xf32> to vector<8x8xf32>
    %759 = arith.addf %359, %758 : vector<8x8xf32>
    %760 = arith.truncf %754 : vector<8x32xf32> to vector<8x32xbf16>
    %761 = vector.shape_cast %760 : vector<8x32xbf16> to vector<1x8x32xbf16>
    %762 = vector.shape_cast %761 : vector<1x8x32xbf16> to vector<1x8x32xbf16>
    %763 = vector.broadcast %762 : vector<1x8x32xbf16> to vector<4x8x32xbf16>
    %764 = arith.truncf %755 : vector<8x32xf32> to vector<8x32xbf16>
    %765 = vector.shape_cast %764 : vector<8x32xbf16> to vector<1x8x32xbf16>
    %766 = vector.shape_cast %765 : vector<1x8x32xbf16> to vector<1x8x32xbf16>
    %767 = vector.broadcast %766 : vector<1x8x32xbf16> to vector<4x8x32xbf16>
    "tpu.trace_start"() <{level = 10 : i32, message = "hld,hdk->hlk"}> : () -> ()
    %cst_378 = arith.constant dense<0.000000e+00> : vector<4x8x8xf32>
    %768 = tpu.matmul %763, %690, %cst_378 {dimension_numbers = #tpu.dot_dimension_numbers<[2], [1], [1], [2], [0, 0, 0, 1, 1, 2], [0], [0]>} : vector<4x8x32xbf16>, vector<4x32x8xbf16>, vector<4x8x8xf32> -> vector<4x8x8xf32>
    "tpu.trace_stop"() : () -> ()
    %769 = vector.broadcast %696 : vector<4x1x8xf32> to vector<4x8x8xf32>
    %770 = arith.addf %768, %769 : vector<4x8x8xf32>
    "tpu.trace_start"() <{level = 10 : i32, message = "hld,hdk->hlk"}> : () -> ()
    %cst_379 = arith.constant dense<0.000000e+00> : vector<4x8x8xf32>
    %771 = tpu.matmul %767, %692, %cst_379 {dimension_numbers = #tpu.dot_dimension_numbers<[2], [1], [1], [2], [0, 0, 0, 1, 1, 2], [0], [0]>} : vector<4x8x32xbf16>, vector<4x32x8xbf16>, vector<4x8x8xf32> -> vector<4x8x8xf32>
    "tpu.trace_stop"() : () -> ()
    %772 = vector.broadcast %698 : vector<4x1x8xf32> to vector<4x8x8xf32>
    %773 = arith.addf %771, %772 : vector<4x8x8xf32>
    "tpu.trace_start"() <{level = 10 : i32, message = "hld,hdk->hlk"}> : () -> ()
    %cst_380 = arith.constant dense<0.000000e+00> : vector<4x8x8xf32>
    %774 = tpu.matmul %767, %694, %cst_380 {dimension_numbers = #tpu.dot_dimension_numbers<[2], [1], [1], [2], [0, 0, 0, 1, 1, 2], [0], [0]>} : vector<4x8x32xbf16>, vector<4x32x8xbf16>, vector<4x8x8xf32> -> vector<4x8x8xf32>
    "tpu.trace_stop"() : () -> ()
    %775 = vector.broadcast %700 : vector<4x1x8xf32> to vector<4x8x8xf32>
    %776 = arith.addf %774, %775 : vector<4x8x8xf32>
    %777 = arith.truncf %770 : vector<4x8x8xf32> to vector<4x8x8xbf16>
    %778 = arith.truncf %773 : vector<4x8x8xf32> to vector<4x8x8xbf16>
    "tpu.trace_start"() <{level = 10 : i32, message = "hlk,hmk->hlm"}> : () -> ()
    %cst_381 = arith.constant dense<0.000000e+00> : vector<4x8x8xf32>
    %779 = tpu.matmul %777, %778, %cst_381 {dimension_numbers = #tpu.dot_dimension_numbers<[2], [2], [1], [1], [0, 0, 0, 1, 1, 1], [0], [0]>} : vector<4x8x8xbf16>, vector<4x8x8xbf16>, vector<4x8x8xf32> -> vector<4x8x8xf32>
    "tpu.trace_stop"() : () -> ()
    %cst_382 = arith.constant 0.353553385 : f32
    %780 = vector.broadcast %cst_382 : f32 to vector<4x8x8xf32>
    %781 = arith.mulf %779, %780 : vector<4x8x8xf32>
    %782 = vector.shape_cast %759 : vector<8x8xf32> to vector<1x8x8xf32>
    %783 = vector.broadcast %782 : vector<1x8x8xf32> to vector<4x8x8xf32>
    %784 = arith.addf %781, %783 : vector<4x8x8xf32>
    %cst_383 = arith.constant dense<0xFF800000> : vector<4x8xf32>
    %785 = vector.multi_reduction <maximumf>, %784, %cst_383 [2] : vector<4x8x8xf32> to vector<4x8xf32>
    %786 = vector.shape_cast %785 : vector<4x8xf32> to vector<4x8x1xf32>
    %787 = vector.broadcast %786 : vector<4x8x1xf32> to vector<4x8x8xf32>
    %788 = arith.subf %784, %787 : vector<4x8x8xf32>
    %789 = math.exp %788 : vector<4x8x8xf32>
    %cst_384 = arith.constant dense<0.000000e+00> : vector<4x8xf32>
    %790 = vector.multi_reduction <add>, %789, %cst_384 [2] : vector<4x8x8xf32> to vector<4x8xf32>
    %791 = vector.shape_cast %790 : vector<4x8xf32> to vector<4x8x1xf32>
    %792 = tpu.reciprocal %791 {approx = true} : vector<4x8x1xf32> -> vector<4x8x1xf32>
    %793 = vector.broadcast %792 : vector<4x8x1xf32> to vector<4x8x8xf32>
    %794 = arith.mulf %789, %793 : vector<4x8x8xf32>
    %795 = arith.truncf %794 : vector<4x8x8xf32> to vector<4x8x8xbf16>
    %796 = arith.truncf %776 : vector<4x8x8xf32> to vector<4x8x8xbf16>
    "tpu.trace_start"() <{level = 10 : i32, message = "hlm,hmk->hlk"}> : () -> ()
    %cst_385 = arith.constant dense<0.000000e+00> : vector<4x8x8xf32>
    %797 = tpu.matmul %795, %796, %cst_385 {dimension_numbers = #tpu.dot_dimension_numbers<[2], [1], [1], [2], [0, 0, 0, 1, 1, 2], [0], [0]>} : vector<4x8x8xbf16>, vector<4x8x8xbf16>, vector<4x8x8xf32> -> vector<4x8x8xf32>
    "tpu.trace_stop"() : () -> ()
    %798 = arith.truncf %797 : vector<4x8x8xf32> to vector<4x8x8xbf16>
    "tpu.trace_start"() <{level = 10 : i32, message = "hlk,hkd->hld"}> : () -> ()
    %cst_386 = arith.constant dense<0.000000e+00> : vector<4x8x32xf32>
    %799 = tpu.matmul %798, %702, %cst_386 {dimension_numbers = #tpu.dot_dimension_numbers<[2], [1], [1], [2], [0, 0, 0, 1, 1, 2], [0], [0]>} : vector<4x8x8xbf16>, vector<4x8x32xbf16>, vector<4x8x32xf32> -> vector<4x8x32xf32>
    "tpu.trace_stop"() : () -> ()
    %cst_387 = arith.constant dense<0.000000e+00> : vector<8x32xf32>
    %800 = vector.multi_reduction <add>, %799, %cst_387 [0] : vector<4x8x32xf32> to vector<8x32xf32>
    %801 = vector.broadcast %704 : vector<1x32xf32> to vector<8x32xf32>
    %802 = arith.addf %800, %801 : vector<8x32xf32>
    %803 = tpu.concatenate %753, %802 in 0 : vector<8x32xf32>, vector<8x32xf32> -> vector<16x32xf32>
    %804 = arith.addf %688, %803 : vector<16x32xf32>
    %c1_388 = arith.constant 1 : index
    %c0_389 = arith.constant 0 : index
    %c0_390 = arith.constant 0 : index
    %805 = vector.load %arg22[%c1_388, %c0_389, %c0_390] : memref<2x1x32xf32, #tpu.memory_space<vmem>>, vector<1x1x32xf32>
    %806 = vector.shape_cast %805 : vector<1x1x32xf32> to vector<1x32xf32>
    %c1_391 = arith.constant 1 : index
    %c0_392 = arith.constant 0 : index
    %c0_393 = arith.constant 0 : index
    %807 = vector.load %arg23[%c1_391, %c0_392, %c0_393] : memref<2x1x32xf32, #tpu.memory_space<vmem>>, vector<1x1x32xf32>
    %808 = vector.shape_cast %807 : vector<1x1x32xf32> to vector<1x32xf32>
    %cst_394 = arith.constant dense<0.000000e+00> : vector<16xf32>
    %809 = vector.multi_reduction <add>, %804, %cst_394 [1] : vector<16x32xf32> to vector<16xf32>
    %810 = vector.shape_cast %809 : vector<16xf32> to vector<16x1xf32>
    %cst_395 = arith.constant 3.200000e+01 : f32
    %811 = vector.broadcast %cst_395 : f32 to vector<16x1xf32>
    %812 = arith.divf %810, %811 : vector<16x1xf32>
    %813 = vector.broadcast %812 : vector<16x1xf32> to vector<16x32xf32>
    %814 = arith.subf %804, %813 : vector<16x32xf32>
    %815 = arith.mulf %814, %814 : vector<16x32xf32>
    %cst_396 = arith.constant dense<0.000000e+00> : vector<16xf32>
    %816 = vector.multi_reduction <add>, %815, %cst_396 [1] : vector<16x32xf32> to vector<16xf32>
    %817 = vector.shape_cast %816 : vector<16xf32> to vector<16x1xf32>
    %cst_397 = arith.constant 3.200000e+01 : f32
    %818 = vector.broadcast %cst_397 : f32 to vector<16x1xf32>
    %819 = arith.divf %817, %818 : vector<16x1xf32>
    %820 = vector.broadcast %812 : vector<16x1xf32> to vector<16x32xf32>
    %821 = arith.subf %804, %820 : vector<16x32xf32>
    %cst_398 = arith.constant 9.99999974E-6 : f32
    %822 = vector.broadcast %cst_398 : f32 to vector<16x1xf32>
    %823 = arith.addf %819, %822 : vector<16x1xf32>
    %824 = math.rsqrt %823 : vector<16x1xf32>
    %825 = vector.broadcast %824 : vector<16x1xf32> to vector<16x32xf32>
    %826 = arith.mulf %821, %825 : vector<16x32xf32>
    %827 = vector.broadcast %806 : vector<1x32xf32> to vector<16x32xf32>
    %828 = arith.mulf %826, %827 : vector<16x32xf32>
    %829 = vector.broadcast %808 : vector<1x32xf32> to vector<16x32xf32>
    %830 = arith.addf %828, %829 : vector<16x32xf32>
    %c3_399 = arith.constant 3 : index
    %c0_400 = arith.constant 0 : index
    %c0_401 = arith.constant 0 : index
    %c0_402 = arith.constant 0 : index
    %831 = vector.load %arg24[%c3_399, %c0_400, %c0_401, %c0_402] : memref<6x4x32x8xbf16, #tpu.memory_space<vmem>>, vector<1x4x32x8xbf16>
    %832 = vector.shape_cast %831 : vector<1x4x32x8xbf16> to vector<4x32x8xbf16>
    %c4_403 = arith.constant 4 : index
    %c0_404 = arith.constant 0 : index
    %c0_405 = arith.constant 0 : index
    %c0_406 = arith.constant 0 : index
    %833 = vector.load %arg24[%c4_403, %c0_404, %c0_405, %c0_406] : memref<6x4x32x8xbf16, #tpu.memory_space<vmem>>, vector<1x4x32x8xbf16>
    %834 = vector.shape_cast %833 : vector<1x4x32x8xbf16> to vector<4x32x8xbf16>
    %c5_407 = arith.constant 5 : index
    %c0_408 = arith.constant 0 : index
    %c0_409 = arith.constant 0 : index
    %c0_410 = arith.constant 0 : index
    %835 = vector.load %arg24[%c5_407, %c0_408, %c0_409, %c0_410] : memref<6x4x32x8xbf16, #tpu.memory_space<vmem>>, vector<1x4x32x8xbf16>
    %836 = vector.shape_cast %835 : vector<1x4x32x8xbf16> to vector<4x32x8xbf16>
    %c3_411 = arith.constant 3 : index
    %c0_412 = arith.constant 0 : index
    %c0_413 = arith.constant 0 : index
    %c0_414 = arith.constant 0 : index
    %837 = vector.load %arg25[%c3_411, %c0_412, %c0_413, %c0_414] : memref<6x4x1x8xf32, #tpu.memory_space<vmem>>, vector<1x4x1x8xf32>
    %838 = vector.shape_cast %837 : vector<1x4x1x8xf32> to vector<4x1x8xf32>
    %c4_415 = arith.constant 4 : index
    %c0_416 = arith.constant 0 : index
    %c0_417 = arith.constant 0 : index
    %c0_418 = arith.constant 0 : index
    %839 = vector.load %arg25[%c4_415, %c0_416, %c0_417, %c0_418] : memref<6x4x1x8xf32, #tpu.memory_space<vmem>>, vector<1x4x1x8xf32>
    %840 = vector.shape_cast %839 : vector<1x4x1x8xf32> to vector<4x1x8xf32>
    %c5_419 = arith.constant 5 : index
    %c0_420 = arith.constant 0 : index
    %c0_421 = arith.constant 0 : index
    %c0_422 = arith.constant 0 : index
    %841 = vector.load %arg25[%c5_419, %c0_420, %c0_421, %c0_422] : memref<6x4x1x8xf32, #tpu.memory_space<vmem>>, vector<1x4x1x8xf32>
    %842 = vector.shape_cast %841 : vector<1x4x1x8xf32> to vector<4x1x8xf32>
    %c1_423 = arith.constant 1 : index
    %c0_424 = arith.constant 0 : index
    %c0_425 = arith.constant 0 : index
    %c0_426 = arith.constant 0 : index
    %843 = vector.load %arg26[%c1_423, %c0_424, %c0_425, %c0_426] : memref<2x4x8x32xbf16, #tpu.memory_space<vmem>>, vector<1x4x8x32xbf16>
    %844 = vector.shape_cast %843 : vector<1x4x8x32xbf16> to vector<4x8x32xbf16>
    %c1_427 = arith.constant 1 : index
    %c0_428 = arith.constant 0 : index
    %c0_429 = arith.constant 0 : index
    %845 = vector.load %arg27[%c1_427, %c0_428, %c0_429] : memref<2x1x32xf32, #tpu.memory_space<vmem>>, vector<1x1x32xf32>
    %846 = vector.shape_cast %845 : vector<1x1x32xf32> to vector<1x32xf32>
    %847 = vector.extract_strided_slice %830 {offsets = [0, 0], sizes = [8, 32], strides = [1, 1]} : vector<16x32xf32> to vector<8x32xf32>
    %848 = vector.extract_strided_slice %353 {offsets = [0, 0], sizes = [8, 32], strides = [1, 1]} : vector<16x32xf32> to vector<8x32xf32>
    %849 = arith.truncf %847 : vector<8x32xf32> to vector<8x32xbf16>
    %850 = vector.shape_cast %849 : vector<8x32xbf16> to vector<1x8x32xbf16>
    %851 = vector.shape_cast %850 : vector<1x8x32xbf16> to vector<1x8x32xbf16>
    %852 = vector.broadcast %851 : vector<1x8x32xbf16> to vector<4x8x32xbf16>
    %853 = arith.truncf %848 : vector<8x32xf32> to vector<8x32xbf16>
    %854 = vector.shape_cast %853 : vector<8x32xbf16> to vector<1x8x32xbf16>
    %855 = vector.shape_cast %854 : vector<1x8x32xbf16> to vector<1x8x32xbf16>
    %856 = vector.broadcast %855 : vector<1x8x32xbf16> to vector<4x8x32xbf16>
    "tpu.trace_start"() <{level = 10 : i32, message = "hld,hdk->hlk"}> : () -> ()
    %cst_430 = arith.constant dense<0.000000e+00> : vector<4x8x8xf32>
    %857 = tpu.matmul %852, %832, %cst_430 {dimension_numbers = #tpu.dot_dimension_numbers<[2], [1], [1], [2], [0, 0, 0, 1, 1, 2], [0], [0]>} : vector<4x8x32xbf16>, vector<4x32x8xbf16>, vector<4x8x8xf32> -> vector<4x8x8xf32>
    "tpu.trace_stop"() : () -> ()
    %858 = vector.broadcast %838 : vector<4x1x8xf32> to vector<4x8x8xf32>
    %859 = arith.addf %857, %858 : vector<4x8x8xf32>
    "tpu.trace_start"() <{level = 10 : i32, message = "hld,hdk->hlk"}> : () -> ()
    %cst_431 = arith.constant dense<0.000000e+00> : vector<4x8x8xf32>
    %860 = tpu.matmul %856, %834, %cst_431 {dimension_numbers = #tpu.dot_dimension_numbers<[2], [1], [1], [2], [0, 0, 0, 1, 1, 2], [0], [0]>} : vector<4x8x32xbf16>, vector<4x32x8xbf16>, vector<4x8x8xf32> -> vector<4x8x8xf32>
    "tpu.trace_stop"() : () -> ()
    %861 = vector.broadcast %840 : vector<4x1x8xf32> to vector<4x8x8xf32>
    %862 = arith.addf %860, %861 : vector<4x8x8xf32>
    "tpu.trace_start"() <{level = 10 : i32, message = "hld,hdk->hlk"}> : () -> ()
    %cst_432 = arith.constant dense<0.000000e+00> : vector<4x8x8xf32>
    %863 = tpu.matmul %856, %836, %cst_432 {dimension_numbers = #tpu.dot_dimension_numbers<[2], [1], [1], [2], [0, 0, 0, 1, 1, 2], [0], [0]>} : vector<4x8x32xbf16>, vector<4x32x8xbf16>, vector<4x8x8xf32> -> vector<4x8x8xf32>
    "tpu.trace_stop"() : () -> ()
    %864 = vector.broadcast %842 : vector<4x1x8xf32> to vector<4x8x8xf32>
    %865 = arith.addf %863, %864 : vector<4x8x8xf32>
    %866 = arith.truncf %859 : vector<4x8x8xf32> to vector<4x8x8xbf16>
    %867 = arith.truncf %862 : vector<4x8x8xf32> to vector<4x8x8xbf16>
    "tpu.trace_start"() <{level = 10 : i32, message = "hlk,hmk->hlm"}> : () -> ()
    %cst_433 = arith.constant dense<0.000000e+00> : vector<4x8x8xf32>
    %868 = tpu.matmul %866, %867, %cst_433 {dimension_numbers = #tpu.dot_dimension_numbers<[2], [2], [1], [1], [0, 0, 0, 1, 1, 1], [0], [0]>} : vector<4x8x8xbf16>, vector<4x8x8xbf16>, vector<4x8x8xf32> -> vector<4x8x8xf32>
    "tpu.trace_stop"() : () -> ()
    %cst_434 = arith.constant 0.353553385 : f32
    %869 = vector.broadcast %cst_434 : f32 to vector<4x8x8xf32>
    %870 = arith.mulf %868, %869 : vector<4x8x8xf32>
    %871 = vector.shape_cast %365 : vector<8x8xf32> to vector<1x8x8xf32>
    %872 = vector.broadcast %871 : vector<1x8x8xf32> to vector<4x8x8xf32>
    %873 = arith.addf %870, %872 : vector<4x8x8xf32>
    %cst_435 = arith.constant dense<0xFF800000> : vector<4x8xf32>
    %874 = vector.multi_reduction <maximumf>, %873, %cst_435 [2] : vector<4x8x8xf32> to vector<4x8xf32>
    %875 = vector.shape_cast %874 : vector<4x8xf32> to vector<4x8x1xf32>
    %876 = vector.broadcast %875 : vector<4x8x1xf32> to vector<4x8x8xf32>
    %877 = arith.subf %873, %876 : vector<4x8x8xf32>
    %878 = math.exp %877 : vector<4x8x8xf32>
    %cst_436 = arith.constant dense<0.000000e+00> : vector<4x8xf32>
    %879 = vector.multi_reduction <add>, %878, %cst_436 [2] : vector<4x8x8xf32> to vector<4x8xf32>
    %880 = vector.shape_cast %879 : vector<4x8xf32> to vector<4x8x1xf32>
    %881 = tpu.reciprocal %880 {approx = true} : vector<4x8x1xf32> -> vector<4x8x1xf32>
    %882 = vector.broadcast %881 : vector<4x8x1xf32> to vector<4x8x8xf32>
    %883 = arith.mulf %878, %882 : vector<4x8x8xf32>
    %884 = arith.truncf %883 : vector<4x8x8xf32> to vector<4x8x8xbf16>
    %885 = arith.truncf %865 : vector<4x8x8xf32> to vector<4x8x8xbf16>
    "tpu.trace_start"() <{level = 10 : i32, message = "hlm,hmk->hlk"}> : () -> ()
    %cst_437 = arith.constant dense<0.000000e+00> : vector<4x8x8xf32>
    %886 = tpu.matmul %884, %885, %cst_437 {dimension_numbers = #tpu.dot_dimension_numbers<[2], [1], [1], [2], [0, 0, 0, 1, 1, 2], [0], [0]>} : vector<4x8x8xbf16>, vector<4x8x8xbf16>, vector<4x8x8xf32> -> vector<4x8x8xf32>
    "tpu.trace_stop"() : () -> ()
    %887 = arith.truncf %886 : vector<4x8x8xf32> to vector<4x8x8xbf16>
    "tpu.trace_start"() <{level = 10 : i32, message = "hlk,hkd->hld"}> : () -> ()
    %cst_438 = arith.constant dense<0.000000e+00> : vector<4x8x32xf32>
    %888 = tpu.matmul %887, %844, %cst_438 {dimension_numbers = #tpu.dot_dimension_numbers<[2], [1], [1], [2], [0, 0, 0, 1, 1, 2], [0], [0]>} : vector<4x8x8xbf16>, vector<4x8x32xbf16>, vector<4x8x32xf32> -> vector<4x8x32xf32>
    "tpu.trace_stop"() : () -> ()
    %cst_439 = arith.constant dense<0.000000e+00> : vector<8x32xf32>
    %889 = vector.multi_reduction <add>, %888, %cst_439 [0] : vector<4x8x32xf32> to vector<8x32xf32>
    %890 = vector.broadcast %846 : vector<1x32xf32> to vector<8x32xf32>
    %891 = arith.addf %889, %890 : vector<8x32xf32>
    %892 = vector.extract_strided_slice %830 {offsets = [8, 0], sizes = [8, 32], strides = [1, 1]} : vector<16x32xf32> to vector<8x32xf32>
    %893 = vector.extract_strided_slice %353 {offsets = [8, 0], sizes = [8, 32], strides = [1, 1]} : vector<16x32xf32> to vector<8x32xf32>
    %894 = arith.truncf %892 : vector<8x32xf32> to vector<8x32xbf16>
    %895 = vector.shape_cast %894 : vector<8x32xbf16> to vector<1x8x32xbf16>
    %896 = vector.shape_cast %895 : vector<1x8x32xbf16> to vector<1x8x32xbf16>
    %897 = vector.broadcast %896 : vector<1x8x32xbf16> to vector<4x8x32xbf16>
    %898 = arith.truncf %893 : vector<8x32xf32> to vector<8x32xbf16>
    %899 = vector.shape_cast %898 : vector<8x32xbf16> to vector<1x8x32xbf16>
    %900 = vector.shape_cast %899 : vector<1x8x32xbf16> to vector<1x8x32xbf16>
    %901 = vector.broadcast %900 : vector<1x8x32xbf16> to vector<4x8x32xbf16>
    "tpu.trace_start"() <{level = 10 : i32, message = "hld,hdk->hlk"}> : () -> ()
    %cst_440 = arith.constant dense<0.000000e+00> : vector<4x8x8xf32>
    %902 = tpu.matmul %897, %832, %cst_440 {dimension_numbers = #tpu.dot_dimension_numbers<[2], [1], [1], [2], [0, 0, 0, 1, 1, 2], [0], [0]>} : vector<4x8x32xbf16>, vector<4x32x8xbf16>, vector<4x8x8xf32> -> vector<4x8x8xf32>
    "tpu.trace_stop"() : () -> ()
    %903 = vector.broadcast %838 : vector<4x1x8xf32> to vector<4x8x8xf32>
    %904 = arith.addf %902, %903 : vector<4x8x8xf32>
    "tpu.trace_start"() <{level = 10 : i32, message = "hld,hdk->hlk"}> : () -> ()
    %cst_441 = arith.constant dense<0.000000e+00> : vector<4x8x8xf32>
    %905 = tpu.matmul %901, %834, %cst_441 {dimension_numbers = #tpu.dot_dimension_numbers<[2], [1], [1], [2], [0, 0, 0, 1, 1, 2], [0], [0]>} : vector<4x8x32xbf16>, vector<4x32x8xbf16>, vector<4x8x8xf32> -> vector<4x8x8xf32>
    "tpu.trace_stop"() : () -> ()
    %906 = vector.broadcast %840 : vector<4x1x8xf32> to vector<4x8x8xf32>
    %907 = arith.addf %905, %906 : vector<4x8x8xf32>
    "tpu.trace_start"() <{level = 10 : i32, message = "hld,hdk->hlk"}> : () -> ()
    %cst_442 = arith.constant dense<0.000000e+00> : vector<4x8x8xf32>
    %908 = tpu.matmul %901, %836, %cst_442 {dimension_numbers = #tpu.dot_dimension_numbers<[2], [1], [1], [2], [0, 0, 0, 1, 1, 2], [0], [0]>} : vector<4x8x32xbf16>, vector<4x32x8xbf16>, vector<4x8x8xf32> -> vector<4x8x8xf32>
    "tpu.trace_stop"() : () -> ()
    %909 = vector.broadcast %842 : vector<4x1x8xf32> to vector<4x8x8xf32>
    %910 = arith.addf %908, %909 : vector<4x8x8xf32>
    %911 = arith.truncf %904 : vector<4x8x8xf32> to vector<4x8x8xbf16>
    %912 = arith.truncf %907 : vector<4x8x8xf32> to vector<4x8x8xbf16>
    "tpu.trace_start"() <{level = 10 : i32, message = "hlk,hmk->hlm"}> : () -> ()
    %cst_443 = arith.constant dense<0.000000e+00> : vector<4x8x8xf32>
    %913 = tpu.matmul %911, %912, %cst_443 {dimension_numbers = #tpu.dot_dimension_numbers<[2], [2], [1], [1], [0, 0, 0, 1, 1, 1], [0], [0]>} : vector<4x8x8xbf16>, vector<4x8x8xbf16>, vector<4x8x8xf32> -> vector<4x8x8xf32>
    "tpu.trace_stop"() : () -> ()
    %cst_444 = arith.constant 0.353553385 : f32
    %914 = vector.broadcast %cst_444 : f32 to vector<4x8x8xf32>
    %915 = arith.mulf %913, %914 : vector<4x8x8xf32>
    %916 = vector.shape_cast %365 : vector<8x8xf32> to vector<1x8x8xf32>
    %917 = vector.broadcast %916 : vector<1x8x8xf32> to vector<4x8x8xf32>
    %918 = arith.addf %915, %917 : vector<4x8x8xf32>
    %cst_445 = arith.constant dense<0xFF800000> : vector<4x8xf32>
    %919 = vector.multi_reduction <maximumf>, %918, %cst_445 [2] : vector<4x8x8xf32> to vector<4x8xf32>
    %920 = vector.shape_cast %919 : vector<4x8xf32> to vector<4x8x1xf32>
    %921 = vector.broadcast %920 : vector<4x8x1xf32> to vector<4x8x8xf32>
    %922 = arith.subf %918, %921 : vector<4x8x8xf32>
    %923 = math.exp %922 : vector<4x8x8xf32>
    %cst_446 = arith.constant dense<0.000000e+00> : vector<4x8xf32>
    %924 = vector.multi_reduction <add>, %923, %cst_446 [2] : vector<4x8x8xf32> to vector<4x8xf32>
    %925 = vector.shape_cast %924 : vector<4x8xf32> to vector<4x8x1xf32>
    %926 = tpu.reciprocal %925 {approx = true} : vector<4x8x1xf32> -> vector<4x8x1xf32>
    %927 = vector.broadcast %926 : vector<4x8x1xf32> to vector<4x8x8xf32>
    %928 = arith.mulf %923, %927 : vector<4x8x8xf32>
    %929 = arith.truncf %928 : vector<4x8x8xf32> to vector<4x8x8xbf16>
    %930 = arith.truncf %910 : vector<4x8x8xf32> to vector<4x8x8xbf16>
    "tpu.trace_start"() <{level = 10 : i32, message = "hlm,hmk->hlk"}> : () -> ()
    %cst_447 = arith.constant dense<0.000000e+00> : vector<4x8x8xf32>
    %931 = tpu.matmul %929, %930, %cst_447 {dimension_numbers = #tpu.dot_dimension_numbers<[2], [1], [1], [2], [0, 0, 0, 1, 1, 2], [0], [0]>} : vector<4x8x8xbf16>, vector<4x8x8xbf16>, vector<4x8x8xf32> -> vector<4x8x8xf32>
    "tpu.trace_stop"() : () -> ()
    %932 = arith.truncf %931 : vector<4x8x8xf32> to vector<4x8x8xbf16>
    "tpu.trace_start"() <{level = 10 : i32, message = "hlk,hkd->hld"}> : () -> ()
    %cst_448 = arith.constant dense<0.000000e+00> : vector<4x8x32xf32>
    %933 = tpu.matmul %932, %844, %cst_448 {dimension_numbers = #tpu.dot_dimension_numbers<[2], [1], [1], [2], [0, 0, 0, 1, 1, 2], [0], [0]>} : vector<4x8x8xbf16>, vector<4x8x32xbf16>, vector<4x8x32xf32> -> vector<4x8x32xf32>
    "tpu.trace_stop"() : () -> ()
    %cst_449 = arith.constant dense<0.000000e+00> : vector<8x32xf32>
    %934 = vector.multi_reduction <add>, %933, %cst_449 [0] : vector<4x8x32xf32> to vector<8x32xf32>
    %935 = vector.broadcast %846 : vector<1x32xf32> to vector<8x32xf32>
    %936 = arith.addf %934, %935 : vector<8x32xf32>
    %937 = tpu.concatenate %891, %936 in 0 : vector<8x32xf32>, vector<8x32xf32> -> vector<16x32xf32>
    %938 = arith.addf %830, %937 : vector<16x32xf32>
    %c1_450 = arith.constant 1 : index
    %c0_451 = arith.constant 0 : index
    %c0_452 = arith.constant 0 : index
    %939 = vector.load %arg28[%c1_450, %c0_451, %c0_452] : memref<2x1x32xf32, #tpu.memory_space<vmem>>, vector<1x1x32xf32>
    %940 = vector.shape_cast %939 : vector<1x1x32xf32> to vector<1x32xf32>
    %c1_453 = arith.constant 1 : index
    %c0_454 = arith.constant 0 : index
    %c0_455 = arith.constant 0 : index
    %941 = vector.load %arg29[%c1_453, %c0_454, %c0_455] : memref<2x1x32xf32, #tpu.memory_space<vmem>>, vector<1x1x32xf32>
    %942 = vector.shape_cast %941 : vector<1x1x32xf32> to vector<1x32xf32>
    %cst_456 = arith.constant dense<0.000000e+00> : vector<16xf32>
    %943 = vector.multi_reduction <add>, %938, %cst_456 [1] : vector<16x32xf32> to vector<16xf32>
    %944 = vector.shape_cast %943 : vector<16xf32> to vector<16x1xf32>
    %cst_457 = arith.constant 3.200000e+01 : f32
    %945 = vector.broadcast %cst_457 : f32 to vector<16x1xf32>
    %946 = arith.divf %944, %945 : vector<16x1xf32>
    %947 = vector.broadcast %946 : vector<16x1xf32> to vector<16x32xf32>
    %948 = arith.subf %938, %947 : vector<16x32xf32>
    %949 = arith.mulf %948, %948 : vector<16x32xf32>
    %cst_458 = arith.constant dense<0.000000e+00> : vector<16xf32>
    %950 = vector.multi_reduction <add>, %949, %cst_458 [1] : vector<16x32xf32> to vector<16xf32>
    %951 = vector.shape_cast %950 : vector<16xf32> to vector<16x1xf32>
    %cst_459 = arith.constant 3.200000e+01 : f32
    %952 = vector.broadcast %cst_459 : f32 to vector<16x1xf32>
    %953 = arith.divf %951, %952 : vector<16x1xf32>
    %954 = vector.broadcast %946 : vector<16x1xf32> to vector<16x32xf32>
    %955 = arith.subf %938, %954 : vector<16x32xf32>
    %cst_460 = arith.constant 9.99999974E-6 : f32
    %956 = vector.broadcast %cst_460 : f32 to vector<16x1xf32>
    %957 = arith.addf %953, %956 : vector<16x1xf32>
    %958 = math.rsqrt %957 : vector<16x1xf32>
    %959 = vector.broadcast %958 : vector<16x1xf32> to vector<16x32xf32>
    %960 = arith.mulf %955, %959 : vector<16x32xf32>
    %961 = vector.broadcast %940 : vector<1x32xf32> to vector<16x32xf32>
    %962 = arith.mulf %960, %961 : vector<16x32xf32>
    %963 = vector.broadcast %942 : vector<1x32xf32> to vector<16x32xf32>
    %964 = arith.addf %962, %963 : vector<16x32xf32>
    %965 = arith.truncf %964 : vector<16x32xf32> to vector<16x32xbf16>
    %c1_461 = arith.constant 1 : index
    %c0_462 = arith.constant 0 : index
    %c0_463 = arith.constant 0 : index
    %966 = vector.load %arg30[%c1_461, %c0_462, %c0_463] : memref<2x32x64xbf16, #tpu.memory_space<vmem>>, vector<1x32x64xbf16>
    %967 = vector.shape_cast %966 : vector<1x32x64xbf16> to vector<32x64xbf16>
    %cst_464 = arith.constant dense<0.000000e+00> : vector<16x64xf32>
    %968 = tpu.matmul %965, %967, %cst_464 {dimension_numbers = #tpu.dot_dimension_numbers<[1], [0], [0], [1], [0, 0, 1, 1], [], []>} : vector<16x32xbf16>, vector<32x64xbf16>, vector<16x64xf32> -> vector<16x64xf32>
    %c1_465 = arith.constant 1 : index
    %c0_466 = arith.constant 0 : index
    %c0_467 = arith.constant 0 : index
    %969 = vector.load %arg31[%c1_465, %c0_466, %c0_467] : memref<2x1x64xf32, #tpu.memory_space<vmem>>, vector<1x1x64xf32>
    %970 = vector.shape_cast %969 : vector<1x1x64xf32> to vector<1x64xf32>
    %971 = vector.broadcast %970 : vector<1x64xf32> to vector<16x64xf32>
    %972 = arith.addf %968, %971 : vector<16x64xf32>
    %cst_468 = arith.constant 0.000000e+00 : f32
    %973 = vector.broadcast %cst_468 : f32 to vector<16x64xf32>
    %974 = arith.maximumf %972, %973 : vector<16x64xf32>
    %975 = arith.truncf %974 : vector<16x64xf32> to vector<16x64xbf16>
    %c1_469 = arith.constant 1 : index
    %c0_470 = arith.constant 0 : index
    %c0_471 = arith.constant 0 : index
    %976 = vector.load %arg32[%c1_469, %c0_470, %c0_471] : memref<2x64x32xbf16, #tpu.memory_space<vmem>>, vector<1x64x32xbf16>
    %977 = vector.shape_cast %976 : vector<1x64x32xbf16> to vector<64x32xbf16>
    %cst_472 = arith.constant dense<0.000000e+00> : vector<16x32xf32>
    %978 = tpu.matmul %975, %977, %cst_472 {dimension_numbers = #tpu.dot_dimension_numbers<[1], [0], [0], [1], [0, 0, 1, 1], [], []>} : vector<16x64xbf16>, vector<64x32xbf16>, vector<16x32xf32> -> vector<16x32xf32>
    %c1_473 = arith.constant 1 : index
    %c0_474 = arith.constant 0 : index
    %c0_475 = arith.constant 0 : index
    %979 = vector.load %arg33[%c1_473, %c0_474, %c0_475] : memref<2x1x32xf32, #tpu.memory_space<vmem>>, vector<1x1x32xf32>
    %980 = vector.shape_cast %979 : vector<1x1x32xf32> to vector<1x32xf32>
    %981 = vector.broadcast %980 : vector<1x32xf32> to vector<16x32xf32>
    %982 = arith.addf %978, %981 : vector<16x32xf32>
    %983 = arith.addf %964, %982 : vector<16x32xf32>
    %c1_476 = arith.constant 1 : index
    %c0_477 = arith.constant 0 : index
    %c0_478 = arith.constant 0 : index
    %984 = vector.load %arg34[%c1_476, %c0_477, %c0_478] : memref<2x1x32xf32, #tpu.memory_space<vmem>>, vector<1x1x32xf32>
    %985 = vector.shape_cast %984 : vector<1x1x32xf32> to vector<1x32xf32>
    %c1_479 = arith.constant 1 : index
    %c0_480 = arith.constant 0 : index
    %c0_481 = arith.constant 0 : index
    %986 = vector.load %arg35[%c1_479, %c0_480, %c0_481] : memref<2x1x32xf32, #tpu.memory_space<vmem>>, vector<1x1x32xf32>
    %987 = vector.shape_cast %986 : vector<1x1x32xf32> to vector<1x32xf32>
    %cst_482 = arith.constant dense<0.000000e+00> : vector<16xf32>
    %988 = vector.multi_reduction <add>, %983, %cst_482 [1] : vector<16x32xf32> to vector<16xf32>
    %989 = vector.shape_cast %988 : vector<16xf32> to vector<16x1xf32>
    %cst_483 = arith.constant 3.200000e+01 : f32
    %990 = vector.broadcast %cst_483 : f32 to vector<16x1xf32>
    %991 = arith.divf %989, %990 : vector<16x1xf32>
    %992 = vector.broadcast %991 : vector<16x1xf32> to vector<16x32xf32>
    %993 = arith.subf %983, %992 : vector<16x32xf32>
    %994 = arith.mulf %993, %993 : vector<16x32xf32>
    %cst_484 = arith.constant dense<0.000000e+00> : vector<16xf32>
    %995 = vector.multi_reduction <add>, %994, %cst_484 [1] : vector<16x32xf32> to vector<16xf32>
    %996 = vector.shape_cast %995 : vector<16xf32> to vector<16x1xf32>
    %cst_485 = arith.constant 3.200000e+01 : f32
    %997 = vector.broadcast %cst_485 : f32 to vector<16x1xf32>
    %998 = arith.divf %996, %997 : vector<16x1xf32>
    %999 = vector.broadcast %991 : vector<16x1xf32> to vector<16x32xf32>
    %1000 = arith.subf %983, %999 : vector<16x32xf32>
    %cst_486 = arith.constant 9.99999974E-6 : f32
    %1001 = vector.broadcast %cst_486 : f32 to vector<16x1xf32>
    %1002 = arith.addf %998, %1001 : vector<16x1xf32>
    %1003 = math.rsqrt %1002 : vector<16x1xf32>
    %1004 = vector.broadcast %1003 : vector<16x1xf32> to vector<16x32xf32>
    %1005 = arith.mulf %1000, %1004 : vector<16x32xf32>
    %1006 = vector.broadcast %985 : vector<1x32xf32> to vector<16x32xf32>
    %1007 = arith.mulf %1005, %1006 : vector<16x32xf32>
    %1008 = vector.broadcast %987 : vector<1x32xf32> to vector<16x32xf32>
    %1009 = arith.addf %1007, %1008 : vector<16x32xf32>
    %1010 = arith.truncf %1009 : vector<16x32xf32> to vector<16x32xbf16>
    %c0_487 = arith.constant 0 : index
    %c0_488 = arith.constant 0 : index
    %1011 = vector.load %arg36[%c0_487, %c0_488] : memref<32x128xbf16, #tpu.memory_space<vmem>>, vector<32x128xbf16>
    %cst_489 = arith.constant dense<0.000000e+00> : vector<16x128xf32>
    %1012 = tpu.matmul %1010, %1011, %cst_489 {dimension_numbers = #tpu.dot_dimension_numbers<[1], [0], [0], [1], [0, 0, 1, 1], [], []>} : vector<16x32xbf16>, vector<32x128xbf16>, vector<16x128xf32> -> vector<16x128xf32>
    %c0_490 = arith.constant 0 : index
    %c0_491 = arith.constant 0 : index
    %1013 = vector.load %arg37[%c0_490, %c0_491] : memref<1x128xf32, #tpu.memory_space<vmem>>, vector<1x128xf32>
    %1014 = vector.broadcast %1013 : vector<1x128xf32> to vector<16x128xf32>
    %1015 = arith.addf %1012, %1014 : vector<16x128xf32>
    %c0_492 = arith.constant 0 : index
    %c0_493 = arith.constant 0 : index
    %1016 = vector.load %arg38[%c0_492, %c0_493] : memref<16x128xf32, #tpu.memory_space<vmem>>, vector<16x128xf32>
    tpu.vector_store %arg38[%c0_492, %c0_493], %1015 {strides = array<i32>} : memref<16x128xf32, #tpu.memory_space<vmem>>, vector<16x128xf32>,
    return
  }
}

</mosaic_0001>

<bundles_post_ra>
// kernel: transformer_forward.1
= control target key start
LH: loop header
LB: loop body
LE: loop exit
PB: predicated region body
PF: predicated region fallthrough
CT: control target
= control target key end

     0   :  { %s21430_s3 = smov 3   ;;  %s21431_s10 = smov 6   ;;  %v25126_v55 = vmov 0.0   ;;  %vm21433_vm0 = vmmov 0   ;;  %vm819_vm1 = vcmask 261120   ;;  %vm1491_vm2 = vcmask 64512   ;;  %s25125_s0 = inlined_call_operand.smem [shape: u32[39], index: -1, kind: input, shape index: {}] }
   0x1   :  { %s21479_s6 = sld [smem:[%s25125_s0 + %s21430_s3]]   ;;  %s21434_s14 = smov 4   ;;  %vm1735_vm3 = vcmask 1043456   ;;  %vm3376_vm4 = vcmask 523264  }
   0x2   :  { %s21508_s9 = sld [smem:[%s25125_s0]]   ;;  %s21435_s18 = smov 5  }
   0x3   :  { %s21543_s13 = sld [smem:[%s25125_s0 + %s21431_s10]]   ;;  %s21436_s22 = smov 7  }
   0x4   :  { %s16983_s17 = sld [smem:[%s25125_s0 + %s21434_s14]]   ;;  %s21437_s26 = smov 8  }
   0x5   :  { %s16984_s21 = sld [smem:[%s25125_s0 + %s21435_s18]]   ;;  %s21438_s30 = smov 9  }
   0x6   :  { %s21736_s25 = sld [smem:[%s25125_s0 + %s21436_s22]]   ;;  %s21439_s4 = smov 12  }
   0x7   :  { %v20968_v0 = vld [vmem:[%s21479_s6 + $0x40] sm:$0xff]   ;;  %v20972_v4 = vld [vmem:[%s21479_s6 + $0x48] sm:$0xff]   ;;  %v20976_v8 = vld [vmem:[%s21479_s6 + $0x50] sm:$0xff]   ;;  %s21843_s29 = sld [smem:[%s25125_s0 + %s21437_s26]]   ;;  %s21440_s8 = smov 14  }
   0x8   :  { %v20969_v1 = vld [vmem:[%s21479_s6] sm:$0xff]   ;;  %18002 = vmatprep.subr.bf16.mxu0 %v20968_v0  ;;  %v20973_v5 = vld [vmem:[%s21479_s6 + $0x8] sm:$0xff]   ;;  %v20977_v9 = vld [vmem:[%s21479_s6 + $0x10] sm:$0xff]   ;;  %s22032_s3 = sld [smem:[%s25125_s0 + %s21438_s30]]   ;;  %s21441_s12 = smov 10  }
   0x9   :  { %v20970_v2 = vld [vmem:[%s21479_s6 + $0xc0] sm:$0xff]   ;;  %18003 = vmatpush3.bf16.msra.mxu0 %v20969_v1  ;;  %v20974_v6 = vld [vmem:[%s21479_s6 + $0xc8] sm:$0xff]   ;;  %v20978_v10 = vld [vmem:[%s21479_s6 + $0xd0] sm:$0xff]   ;;  %s22101_s7 = sld [smem:[%s25125_s0 + %s21439_s4]]   ;;  %s21444_s26 = smov 15  }
   0xa   :  { %v20971_v3 = vld [vmem:[%s21479_s6 + $0x80] sm:$0xff]   ;;  %18024 = vmatprep.subr.bf16.mxu1 %v20970_v2  ;;  %18004 = vmatprep.subr.bf16.mxu0 %v20972_v4  ;;  %v20975_v7 = vld [vmem:[%s21479_s6 + $0x88] sm:$0xff]   ;;  %v20979_v11 = vld [vmem:[%s21479_s6 + $0x90] sm:$0xff]   ;;  %s22110_s11 = sld [smem:[%s25125_s0 + %s21440_s8]]   ;;  %s21445_s1 = smov 16  }
   0xb   :  { %18025 = vmatpush3.bf16.msra.mxu1 %v20971_v3  ;;  %v20980_v12 = vld [vmem:[%s21479_s6 + $0x58] sm:$0xff]   ;;  %v20984_v16 = vld [vmem:[%s21479_s6 + $0x60] sm:$0xff]   ;;  %v20988_v20 = vld [vmem:[%s21479_s6 + $0x68] sm:$0xff]   ;;  %s22119_s16 = sld [smem:[%s25125_s0 + %s21441_s12]]   ;;  %s21450_s19 = smov 2  }
   0xc   :  { %18026 = vmatprep.subr.bf16.mxu1 %v20974_v6  ;;  %v20981_v13 = vld [vmem:[%s21479_s6 + $0x18] sm:$0xff]   ;;  %v20985_v17 = vld [vmem:[%s21479_s6 + $0x20] sm:$0xff]   ;;  %v20989_v21 = vld [vmem:[%s21479_s6 + $0x28] sm:$0xff]   ;;  %s22151_s30 = sld [smem:[%s25125_s0 + %s21444_s26]]   ;;  %s21452_s23 = smov 20  }
   0xd   :  { %18005 = vmatpush3.bf16.msra.mxu0 %v20973_v5  ;;  %v20982_v14 = vld [vmem:[%s21479_s6 + $0xd8] sm:$0xff]   ;;  %v20986_v18 = vld [vmem:[%s21479_s6 + $0xe0] sm:$0xff]   ;;  %v20990_v22 = vld [vmem:[%s21479_s6 + $0xe8] sm:$0xff]   ;;  %s22181_s5 = sld [smem:[%s25125_s0 + %s21445_s1]]   ;;  %s21453_s28 = smov 21  }
   0xe   :  { %18006 = vmatprep.subr.bf16.mxu0 %v20976_v8  ;;  %v20983_v15 = vld [vmem:[%s21479_s6 + $0x98] sm:$0xff]   ;;  %v20987_v19 = vld [vmem:[%s21479_s6 + $0xa0] sm:$0xff]   ;;  %v20991_v23 = vld [vmem:[%s21479_s6 + $0xa8] sm:$0xff]   ;;  %s22979_s22 = sld [smem:[%s25125_s0 + %s21450_s19]]   ;;  %s21454_s4 = smov 24  }
   0xf   :  { %18027 = vmatpush3.bf16.msra.mxu1 %v20975_v7  ;;  %v20992_v24 = vld [vmem:[%s21479_s6 + $0x70] sm:$0xff]   ;;  %v20996_v28 = vld [vmem:[%s21479_s6 + $0x78] sm:$0xff]   ;;  %v21003_v34 = vld [vmem:[%s21479_s6 + $0x140] sm:$0xff]   ;;  %s23043_s27 = sld [smem:[%s25125_s0 + %s21452_s23]]   ;;  %s21456_s12 = smov 23  }
  0x10   :  { %18028 = vmatprep.subr.bf16.mxu1 %v20978_v10  ;;  %v20993_v25 = vld [vmem:[%s21479_s6 + $0x30] sm:$0xff]   ;;  %v20997_v29 = vld [vmem:[%s21479_s6 + $0x38] sm:$0xff]   ;;  %v21004_v35 = vld [vmem:[%s21508_s9 + $0x8] ss:$24 sps:$4 sm:$0xff]   ;;  %s23284_s2 = sld [smem:[%s25125_s0 + %s21453_s28]]   ;;  %s21459_s23 = smov 27  }
  0x11   :  { %18007 = vmatpush3.bf16.msra.mxu0 %v20977_v9  ;;  %v20994_v26 = vld [vmem:[%s21479_s6 + $0xf0] sm:$0xff]   ;;  %v20998_v30 = vld [vmem:[%s21479_s6 + $0xf8] sm:$0xff]   ;;  %v21006_v36 = vld [vmem:[%s21508_s9 + $0xc] ss:$24 sps:$4 sm:$0xff]   ;;  %s23875_s28 = sld [smem:[%s25125_s0 + %s21459_s23]]   ;;  %s21461_s8 = smov 32  }
  0x12   :  { %18008 = vmatprep.subr.bf16.mxu0 %v20980_v12  ;;  %v20995_v27 = vld [vmem:[%s21479_s6 + $0xb0] sm:$0xff]   ;;  %v20999_v31 = vld [vmem:[%s21508_s9] ss:$24 sps:$4 sm:$0xff]   ;;  %v21001_v32 = vld [vmem:[%s21508_s9 + $0x4] ss:$24 sps:$4 sm:$0xff]   ;;  %659 = vmatprep.mubr.bf16.mxu1 %v21006_v36 }
  0x13   :  { %18029 = vmatpush3.bf16.msra.mxu1 %v20979_v11  ;;  %v21002_v33 = vld [vmem:[%s21479_s6 + $0xb8] sm:$0xff]   ;;  %618 = vmatprep.mubr.bf16.mxu0 %v21001_v32  ;;  %v21007_v37 = vld [vmem:[%s21479_s6 + $0x100] sm:$0xff]   ;;  %v21008_v38 = vld [vmem:[%s21479_s6 + $0x148] sm:$0xff]  }
  0x14   :  { %18030 = vmatprep.subr.bf16.mxu1 %v20982_v14  ;;  %v21009_v39 = vld [vmem:[%s21479_s6 + $0x108] sm:$0xff]   ;;  %v21010_v40 = vld [vmem:[%s21479_s6 + $0x150] sm:$0xff]   ;;  %v21012_v42 = vld [vmem:[%s21479_s6 + $0x158] sm:$0xff]  }
  0x15   :  { %18009 = vmatpush3.bf16.msra.mxu0 %v20981_v13  ;;  %v21011_v41 = vld [vmem:[%s21479_s6 + $0x110] sm:$0xff]   ;;  %v21013_v43 = vld [vmem:[%s21479_s6 + $0x118] sm:$0xff]   ;;  %v21014_v44 = vld [vmem:[%s21479_s6 + $0x160] sm:$0xff]  }
  0x16   :  { %18010 = vmatprep.subr.bf16.mxu0 %v20984_v16  ;;  %v21015_v45 = vld [vmem:[%s21479_s6 + $0x120] sm:$0xff]   ;;  %v21016_v46 = vld [vmem:[%s21479_s6 + $0x168] sm:$0xff]   ;;  %v21018_v49 = vld [vmem:[%s21479_s6 + $0x170] sm:$0xff]  }
  0x17   :  { %18031 = vmatpush3.bf16.msra.mxu1 %v20983_v15  ;;  %v21024_v47 = vld [vmem:[%s21508_s9 + $0x14] ss:$24 sps:$4 sm:$0xff]   ;;  %v21020_v51 = vld [vmem:[%s21479_s6 + $0x178] sm:$0xff]   ;;  %v21022_v53 = vld [vmem:[%s21508_s9 + $0x10] ss:$24 sps:$4 sm:$0xff]   ;;  %s23319_s9 = sld [smem:[%s25125_s0 + %s21454_s4]]  }
  0x18   :  { %18032 = vmatprep.subr.bf16.mxu1 %v20986_v18  ;;  %v21017_v48 = vld [vmem:[%s21479_s6 + $0x128] sm:$0xff]   ;;  %v21019_v50 = vld [vmem:[%s21479_s6 + $0x130] sm:$0xff]   ;;  %v21021_v52 = vld [vmem:[%s21479_s6 + $0x138] sm:$0xff]   ;;  %s21446_s6 = smov 17  }
  0x19   :  { %18011 = vmatpush3.bf16.msra.mxu0 %v20985_v17  ;;  %v21546_v54 = vld [vmem:[%s21543_s13] sm:$0xff]   ;;  %v21558_v57 = vld [vmem:[%s21543_s13 + $0x8] sm:$0xff]   ;;  %s22186_s10 = sld [smem:[%s25125_s0 + %s21446_s6]]  }
  0x1a   :  { %18012 = vmatprep.subr.bf16.mxu0 %v20988_v20  ;;  %v21551_v56 = vld [vmem:[%s21543_s13 + $0x40] sm:$0xff]   ;;  %v21561_v58 = vld [vmem:[%s21543_s13 + $0x48] sm:$0xff]  }
  0x1b   :  { %18033 = vmatpush3.bf16.msra.mxu1 %v20987_v19  ;;  %v17018_v60 = vld [vmem:[%s16983_s17] ss:$0 sm:$0xff]  ;;  %v710_v20 = vld [vmem:[%s16984_s21 + $0x8] sm:$0xff]  ;;  %s21442_s17 = smov 11  }
  0x1c   :  { %18034 = vmatprep.subr.bf16.mxu1 %v20990_v22  ;;  %v709_v16 = vld [vmem:[%s16984_s21] sm:$0xff]  ;;  %v21629_v32 = vld [vmem:[%s21543_s13 + $0x88] sm:$0xff]   ;;  %s22124_s20 = sld [smem:[%s25125_s0 + %s21442_s17]]   ;;  %s21443_s21 = smov 13  }
  0x1d   :  { %18013 = vmatpush3.bf16.msra.mxu0 %v20989_v21  ;;  %v21657_v36 = vld [vmem:[%s21543_s13 + $0xa8] sm:$0xff]   ;;  %s22142_s24 = sld [smem:[%s25125_s0 + %s21443_s21]]   ;;  %s21464_s21 = smov 31  }
  0x1e   :  { %18014 = vmatprep.subr.bf16.mxu0 %v20992_v24  ;;  %v21583_v24 = vld [vmem:[%s21543_s13 + $0x60] sm:$0xff]   ;;  %s23983_s26 = sld [smem:[%s25125_s0 + %s21464_s21]]  }
  0x1f   :  { %18035 = vmatpush3.bf16.msra.mxu1 %v20991_v23  ;;  %v21580_v23 = vld [vmem:[%s21543_s13 + $0x10] sm:$0xff]  }
  0x20   :  { %18036 = vmatprep.subr.bf16.mxu1 %v20994_v26 }
  0x21   :  { %18015 = vmatpush3.bf16.msra.mxu0 %v20993_v25 }
  0x22   :  { %18016 = vmatprep.subr.bf16.mxu0 %v20996_v28  ;;  %v21601_v28 = vld [vmem:[%s21543_s13 + $0x68] sm:$0xff]  }
  0x23   :  { %18037 = vmatpush3.bf16.msra.mxu1 %v20995_v27  ;;  %v21598_v27 = vld [vmem:[%s21543_s13 + $0x18] sm:$0xff]  }
  0x24   :  { %18038 = vmatprep.subr.bf16.mxu1 %v20998_v30  ;;  %v21615_v30 = vld [vmem:[%s21543_s13 + $0x80] sm:$0xff]  }
  0x25   :  { %18017 = vmatpush3.bf16.msra.mxu0 %v20997_v29  ;;  %v21612_v29 = vld [vmem:[%s21543_s13 + $0x20] sm:$0xff]  }
  0x26   :  { %18046 = vmatprep.subr.bf16.mxu0 %v21003_v34  ;;  %v21643_v34 = vld [vmem:[%s21543_s13 + $0xa0] sm:$0xff]  }
  0x27   :  { %18039 = vmatpush3.bf16.msra.mxu1 %v21002_v33  ;;  %v21640_v33 = vld [vmem:[%s21543_s13 + $0x30] sm:$0xff]  }
  0x28   :  { %619 = vmatmul.mubr.bf16.vlgmr.msra.gmra.mrb[0].mxu0 %v20999_v31  ;;  %18823 = vmatprep.subr.bf16.mxu1 %v25126_v55  ;;  %v21626_v31 = vld [vmem:[%s21543_s13 + $0x28] sm:$0xff]  }
  0x29   :  { %18047 = vmatpush3.bf16.msra.mxu0 %v21007_v37  ;;  %700 = vmatprep.mubr.bf16.mxu0 %v21024_v47  ;;  %v21668_v37 = vld [vmem:[%s21543_s13 + $0x50] sm:$0xff]  }
  0x2a   :  { %660 = vmatmul.mubr.bf16.vlgmr.msra.gmra.mrb[0].mxu1 %v21004_v35  ;;  %18048 = vmatprep.subr.bf16.mxu0 %v21008_v38  ;;  %v21654_v35 = vld [vmem:[%s21543_s13 + $0x38] sm:$0xff]  }
  0x2b   :  { %18824 = vmatpush3.bf16.msra.mxu1 %v21546_v54  ;;  %18827 = vmatprep.mubr.msk.bf16.mxu1 %vm21433_vm0, %v25126_v55  ;;  %v21678_v38 = vld [vmem:[%s21543_s13 + $0x58] sm:$0xff]  }
  0x2c   :  { %18825 = vmatprep.subr.bf16.mxu1 %v25126_v55 }
  0x2d   :  { %18049 = vmatpush3.bf16.msra.mxu0 %v21009_v39  ;;  %v21687_v39 = vld [vmem:[%s21543_s13 + $0x70] sm:$0xff]  }
  0x2e   :  { %18050 = vmatprep.subr.bf16.mxu0 %v21010_v40  ;;  %v21694_v40 = vld [vmem:[%s21543_s13 + $0x78] sm:$0xff]  }
  0x2f   :  { %18826 = vmatpush3.bf16.msra.mxu1 %v21558_v57 }
  0x30   :  { %18831 = vmatprep.subr.bf16.mxu1 %v25126_v55 }
  0x31   :  { %18051 = vmatpush3.bf16.msra.mxu0 %v21011_v41  ;;  %v21701_v41 = vld [vmem:[%s21543_s13 + $0x90] sm:$0xff]  }
  0x32   :  { %18052 = vmatprep.subr.bf16.mxu0 %v21012_v42  ;;  %v21708_v42 = vld [vmem:[%s21543_s13 + $0x98] sm:$0xff]  }
  0x35   :  { %18053 = vmatpush3.bf16.msra.mxu0 %v21013_v43  ;;  %v21715_v43 = vld [vmem:[%s21543_s13 + $0xb0] sm:$0xff]  }
  0x36   :  { %18054 = vmatprep.subr.bf16.mxu0 %v21014_v44  ;;  %v21722_v44 = vld [vmem:[%s21543_s13 + $0xb8] sm:$0xff]  }
  0x39   :  { %18055 = vmatpush3.bf16.msra.mxu0 %v21015_v45  ;;  %v21739_v45 = vld [vmem:[%s21736_s25 + $0x4] ss:$0 sm:$0xff] }
  0x3a   :  { %18056 = vmatprep.subr.bf16.mxu0 %v21016_v46 }
  0x3d   :  { %18057 = vmatpush3.bf16.msra.mxu0 %v21017_v48 }
  0x3e   :  { %18058 = vmatprep.subr.bf16.mxu0 %v21018_v49 }
  0x41   :  { %18059 = vmatpush3.bf16.msra.mxu0 %v21019_v50 }
  0x42   :  { %18060 = vmatprep.subr.bf16.mxu0 %v21020_v51 }
  0x45   :  { %18061 = vmatpush3.bf16.msra.mxu0 %v21021_v52 }
  0x46   :  { %18855 = vmatprep.subr.bf16.mxu0 %v25126_v55 }
  0x48   :  { %701 = vmatmul.mubr.bf16.vlgmr.msra.gmra.mrb[4].mxu0 %v21022_v53 }
  0x49   :  { %18856 = vmatpush3.bf16.msra.mxu0 %v21551_v56  ;;  %18859 = vmatprep.mubr.msk.bf16.mxu0 %vm21433_vm0, %v25126_v55 }
  0x4a   :  { %18857 = vmatprep.subr.bf16.mxu0 %v25126_v55 }
  0x4d   :  { %18858 = vmatpush3.bf16.msra.mxu0 %v21561_v58 }
  0x4e   :  { %18871 = vmatprep.subr.bf16.mxu0 %v25126_v55 }
  0xfb   :  { %v18018_v59 = vpop.f32.mrb[0].mxu0 }
  0xfc   :  { %v18019_v61 = vpop.f32.mrb[1].mxu0 }
  0xfd   :  { %v18020_v62 = vadd.f32 %v18019_v61, %v18018_v59  ;;  %v18021_v63 = vpop.f32.mrb[2].mxu0  ;;  %v18040_v0 = vpop.f32.mrb[0].mxu1  ;;  %v21743_v61 = vld [vmem:[%s21736_s25] ss:$0 sm:$0xff] }
  0xfe   :  { %v18022_v1 = vpop.f32.mrb[3].mxu0  ;;  %v18041_v4 = vpop.f32.mrb[1].mxu1 }
  0xff   :  { %v621_v2 = vadd.f32 %v18020_v62, %v17018_v60  ;;  %v18023_v3 = vadd.f32 %v18022_v1, %v18021_v63  ;;  %v18042_v5 = vadd.f32 %v18041_v4, %v18040_v0  ;;  %v18043_v6 = vpop.f32.mrb[2].mxu1  ;;  %v21747_v63 = vld [vmem:[%s21736_s25 + $0x6] ss:$0 sm:$0xff] }
 0x100   :  { %v18044_v8 = vpop.f32.mrb[3].mxu1 }
 0x101   :  { %v624_v7 = vadd.f32 %v18023_v3, %v17018_v60  ;;  %v662_v9 = vadd.f32 %v18042_v5, %v621_v2  ;;  %v18045_v10 = vadd.f32 %v18044_v8, %v18043_v6 }
 0x103   :  { %v665_v11 = vadd.f32 %v18045_v10, %v624_v7 }
 0x11b   :  { %v18062_v12 = vpop.f32.mrb[4].mxu0 }
 0x11c   :  { %v18063_v13 = vpop.f32.mrb[5].mxu0 }
 0x11d   :  { %v18064_v14 = vadd.f32 %v18063_v13, %v18062_v12  ;;  %v18065_v15 = vpop.f32.mrb[6].mxu0  ;;  %v21755_v13 = vld [vmem:[%s21736_s25 + $0x2] ss:$0 sm:$0xff] }
 0x11e   :  { %v18066_v17 = vpop.f32.mrb[7].mxu0 }
 0x11f   :  { %v703_v18 = vadd.f32 %v18064_v14, %v662_v9  ;;  %v18067_v19 = vadd.f32 %v18066_v17, %v18065_v15  ;;  %v21758_v14 = vld [vmem:[%s21736_s25 + $0x8] ss:$0 sm:$0xff] }
 0x121   :  { %v21577_v21 = vadd.f32 %v709_v16, %v703_v18  ;;  %v706_v22 = vadd.f32 %v18067_v19, %v665_v11 }
 0x123   :  { %v21587_v25 = vpack.c.bf16 %v21577_v21, %v21577_v21  ;;  %v21589_v26 = vadd.f32 %v710_v20, %v706_v22 }
 0x125   :  { %18828 = vmatmul.mubr.msk.bf16.vlgmr.msra.gmra.mrb[4].mxu1 %vm819_vm1, %v21587_v25  ;;  %18860 = vmatmul.mubr.msk.bf16.vlgmr.msra.gmra.mrb[8].mxu0 %vm819_vm1, %v21587_v25 }
 0x126   :  { %18832 = vmatpush3.bf16.msra.mxu1 %v21580_v23  ;;  %18872 = vmatpush3.bf16.msra.mxu0 %v21583_v24 }
 0x127   :  { %18833 = vmatprep.subr.bf16.mxu1 %v25126_v55  ;;  %18873 = vmatprep.subr.bf16.mxu0 %v25126_v55 }
 0x128   :  { %18835 = vmatprep.mubr.msk.bf16.mxu1 %vm21433_vm0, %v25126_v55  ;;  %18875 = vmatprep.mubr.msk.bf16.mxu0 %vm21433_vm0, %v25126_v55 }
 0x12a   :  { %18834 = vmatpush3.bf16.msra.mxu1 %v21598_v27  ;;  %18874 = vmatpush3.bf16.msra.mxu0 %v21601_v28 }
 0x12b   :  { %18839 = vmatprep.subr.bf16.mxu1 %v25126_v55  ;;  %18887 = vmatprep.subr.bf16.mxu0 %v25126_v55 }
 0x12d   :  { %18836 = vmatmul.mubr.msk.bf16.vlgmr.msra.gmra.mrb[8].mxu1 %vm819_vm1, %v21587_v25  ;;  %18876 = vmatmul.mubr.msk.bf16.vlgmr.msra.gmra.mrb[12].mxu0 %vm819_vm1, %v21587_v25 }
 0x12e   :  { %18840 = vmatpush3.bf16.msra.mxu1 %v21612_v29  ;;  %18888 = vmatpush3.bf16.msra.mxu0 %v21615_v30 }
 0x12f   :  { %18841 = vmatprep.subr.bf16.mxu1 %v25126_v55  ;;  %18889 = vmatprep.subr.bf16.mxu0 %v25126_v55 }
 0x130   :  { %18843 = vmatprep.mubr.msk.bf16.mxu1 %vm21433_vm0, %v25126_v55  ;;  %18891 = vmatprep.mubr.msk.bf16.mxu0 %vm21433_vm0, %v25126_v55 }
 0x132   :  { %18842 = vmatpush3.bf16.msra.mxu1 %v21626_v31  ;;  %18890 = vmatpush3.bf16.msra.mxu0 %v21629_v32 }
 0x133   :  { %18847 = vmatprep.subr.bf16.mxu1 %v25126_v55  ;;  %18903 = vmatprep.subr.bf16.mxu0 %v25126_v55 }
 0x135   :  { %18844 = vmatmul.mubr.msk.bf16.vlgmr.msra.gmra.mrb[12].mxu1 %vm819_vm1, %v21587_v25  ;;  %18892 = vmatmul.mubr.msk.bf16.vlgmr.msra.gmra.mrb[16].mxu0 %vm819_vm1, %v21587_v25 }
 0x136   :  { %18848 = vmatpush3.bf16.msra.mxu1 %v21640_v33  ;;  %18904 = vmatpush3.bf16.msra.mxu0 %v21643_v34 }
 0x137   :  { %18849 = vmatprep.subr.bf16.mxu1 %v25126_v55  ;;  %18905 = vmatprep.subr.bf16.mxu0 %v25126_v55 }
 0x138   :  { %18851 = vmatprep.mubr.msk.bf16.mxu1 %vm21433_vm0, %v25126_v55  ;;  %18907 = vmatprep.mubr.msk.bf16.mxu0 %vm21433_vm0, %v25126_v55 }
 0x13a   :  { %18850 = vmatpush3.bf16.msra.mxu1 %v21654_v35  ;;  %18906 = vmatpush3.bf16.msra.mxu0 %v21657_v36 }
 0x13b   :  { %18863 = vmatprep.subr.bf16.mxu1 %v25126_v55  ;;  %18919 = vmatprep.subr.bf16.mxu0 %v25126_v55 }
 0x13d   :  { %18852 = vmatmul.mubr.msk.bf16.vlgmr.msra.gmra.mrb[16].mxu1 %vm819_vm1, %v21587_v25  ;;  %18908 = vmatmul.mubr.msk.bf16.vlgmr.msra.gmra.mrb[20].mxu0 %vm819_vm1, %v21587_v25 }
 0x13e   :  { %18864 = vmatpush3.bf16.msra.mxu1 %v21668_v37  ;;  %18867 = vmatprep.mubr.msk.bf16.mxu1 %vm21433_vm0, %v25126_v55 }
 0x13f   :  { %18865 = vmatprep.subr.bf16.mxu1 %v25126_v55  ;;  %18921 = vmatprep.mubr.msk.bf16.mxu0 %vm21433_vm0, %v25126_v55 }
 0x142   :  { %18866 = vmatpush3.bf16.msra.mxu1 %v21678_v38 }
 0x143   :  { %18879 = vmatprep.subr.bf16.mxu1 %v25126_v55 }
 0x145   :  { %18868 = vmatmul.mubr.msk.bf16.vlgmr.msra.gmra.mrb[20].mxu1 %vm819_vm1, %v21587_v25 }
 0x146   :  { %18880 = vmatpush3.bf16.msra.mxu1 %v21687_v39  ;;  %18883 = vmatprep.mubr.msk.bf16.mxu1 %vm21433_vm0, %v25126_v55 }
 0x147   :  { %18881 = vmatprep.subr.bf16.mxu1 %v25126_v55 }
 0x14a   :  { %18882 = vmatpush3.bf16.msra.mxu1 %v21694_v40 }
 0x14b   :  { %18895 = vmatprep.subr.bf16.mxu1 %v25126_v55 }
 0x14d   :  { %18884 = vmatmul.mubr.msk.bf16.vlgmr.msra.gmra.mrb[24].mxu1 %vm819_vm1, %v21587_v25 }
 0x14e   :  { %18896 = vmatpush3.bf16.msra.mxu1 %v21701_v41  ;;  %18899 = vmatprep.mubr.msk.bf16.mxu1 %vm21433_vm0, %v25126_v55 }
 0x14f   :  { %18897 = vmatprep.subr.bf16.mxu1 %v25126_v55 }
 0x152   :  { %18898 = vmatpush3.bf16.msra.mxu1 %v21708_v42 }
 0x153   :  { %18911 = vmatprep.subr.bf16.mxu1 %v25126_v55 }
 0x155   :  { %18900 = vmatmul.mubr.msk.bf16.vlgmr.msra.gmra.mrb[28].mxu1 %vm819_vm1, %v21587_v25 }
 0x156   :  { %18912 = vmatpush3.bf16.msra.mxu1 %v21715_v43  ;;  %18915 = vmatprep.mubr.msk.bf16.mxu1 %vm21433_vm0, %v25126_v55 }
 0x157   :  { %18913 = vmatprep.subr.bf16.mxu1 %v25126_v55 }
 0x15a   :  { %18914 = vmatpush3.bf16.msra.mxu1 %v21722_v44 }
 0x15b   :  { %18925 = vmatprep.subr.bf16.mxu1 %v25126_v55 }
 0x15d   :  { %18916 = vmatmul.mubr.msk.bf16.vlgmr.msra.gmra.mrb[32].mxu1 %vm819_vm1, %v21587_v25 }
 0x15e   :  { %18927 = vmatprep.mubr.msk.bf16.mxu1 %vm21433_vm0, %v25126_v55 }
 0x1f8   :  { %v857_v46 = vpop.f32.mrb[4].mxu1  ;;  %v1089_v47 = vpop.f32.mrb[8].mxu0 }
 0x1f9   :  { %v1090_v48 = vadd.f32 %v21739_v45, %v1089_v47  ;;  %v18829_v49 = vpop.f32.mrb[5].mxu1  ;;  %v18861_v50 = vpop.f32.mrb[9].mxu0  ;;  %v858_v0 = vadd.f32 %v21743_v61, %v857_v46 }
 0x1fa   :  { %v860_v51 = vpop.f32.mrb[6].mxu1  ;;  %v1092_v52 = vpop.f32.mrb[10].mxu0 }
 0x1fb   :  { %v1487_v53 = vpack.c.bf16 %v1090_v48, %v1090_v48  ;;  %v18830_v59 = vpop.f32.mrb[7].mxu1  ;;  %v18862_v60 = vpop.f32.mrb[11].mxu0  ;;  %v1483_v8 = vpack.c.bf16 %v858_v0, %v858_v0 }
 0x1fd   :  { %v1496_v62 = vsel %vm1491_vm2, %v1487_v53, 0 }
 0x1fe   :  { %18920 = vmatpush3.bf16.xpose.msra.mxu0 %v1496_v62 }
 0x1ff   :  { %18931 = vmatprep.subr.bf16.mxu0 %v25126_v55 }
 0x200   :  { %v909_v1 = vpop.f32.mrb[8].mxu1  ;;  %v1193_v2 = vpop.f32.mrb[12].mxu0 }
 0x201   :  { %v1194_v3 = vadd.f32 %v21747_v63, %v1193_v2  ;;  %v18837_v4 = vpop.f32.mrb[9].mxu1  ;;  %v18877_v5 = vpop.f32.mrb[13].mxu0 }
 0x202   :  { %v912_v6 = vpop.f32.mrb[10].mxu1  ;;  %v1196_v7 = vpop.f32.mrb[14].mxu0 }
 0x203   :  { %v1489_v9 = vpack.c.bf16 %v1194_v3, %v1194_v3  ;;  %v18838_v10 = vpop.f32.mrb[11].mxu1  ;;  %v18878_v11 = vpop.f32.mrb[15].mxu0  ;;  %v21773_v3 = vld [vmem:[%s21736_s25 + $0x5] ss:$0 sm:$0xff] }
 0x204   :  { %v21777_v10 = vld [vmem:[%s21736_s25 + $0x1] ss:$0 sm:$0xff] }
 0x205   :  { %18922 = vmatmul.mubr.msk.bf16.vlgmr.msra.gmra.mrb[24].mxu0 %vm1491_vm2, %v1483_v8  ;;  %v1588_v12 = vsel %vm1491_vm2, %v1489_v9, 0 }
 0x206   :  { %18932 = vmatpush3.bf16.xpose.msra.mxu0 %v1588_v12  ;;  %18933 = vmatprep.mubr.msk.bf16.mxu0 %vm21433_vm0, %v25126_v55  ;;  %v21781_v12 = vld [vmem:[%s21736_s25 + $0x7] ss:$0 sm:$0xff] }
 0x207   :  { %18943 = vmatprep.subr.bf16.mxu0 %v25126_v55 }
 0x208   :  { %v961_v15 = vpop.f32.mrb[12].mxu1  ;;  %v1321_v16 = vpop.f32.mrb[16].mxu0 }
 0x209   :  { %v962_v17 = vadd.f32 %v21755_v13, %v961_v15  ;;  %v1322_v18 = vadd.f32 %v21758_v14, %v1321_v16  ;;  %v18845_v19 = vpop.f32.mrb[13].mxu1  ;;  %v18893_v20 = vpop.f32.mrb[17].mxu0  ;;  %v910_v15 = vadd.f32 %v21777_v10, %v909_v1 }
 0x20a   :  { %v964_v22 = vpop.f32.mrb[14].mxu1  ;;  %v1324_v25 = vpop.f32.mrb[18].mxu0 }
 0x20b   :  { %v1485_v46 = vpack.c.bf16 %v962_v17, %v962_v17  ;;  %v1728_v47 = vpack.c.bf16 %v1322_v18, %v1322_v18  ;;  %v18846_v48 = vpop.f32.mrb[15].mxu1  ;;  %v18894_v49 = vpop.f32.mrb[19].mxu0  ;;  %v1484_v20 = vpack.c.bf16 %v910_v15, %v910_v15 }
 0x20c   :  { %v21792_v48 = vld [vmem:[%s21736_s25 + $0x9] ss:$0 sm:$0xff] }
 0x20d   :  { %18934 = vmatmul.mubr.msk.bf16.vlgmr.msra.gmra.mrb[28].mxu0 %vm1491_vm2, %v1485_v46  ;;  %v1737_v50 = vsel %vm1735_vm3, %v1728_v47, 0  ;;  %v21787_v46 = vld [vmem:[%s21736_s25 + $0x3] ss:$0 sm:$0xff] }
 0x20e   :  { %18944 = vmatpush3.bf16.msra.mxu0 %v1737_v50  ;;  %18945 = vmatprep.mubr.msk.bf16.mxu0 %vm21433_vm0, %v25126_v55 }
 0x20f   :  { %18955 = vmatprep.subr.bf16.mxu0 %v25126_v55 }
 0x210   :  { %v1013_v51 = vpop.f32.mrb[16].mxu1  ;;  %v21770_v52 = vpop.f32.mrb[20].mxu0 }
 0x211   :  { %v18853_v53 = vpop.f32.mrb[17].mxu1  ;;  %v18909_v59 = vpop.f32.mrb[21].mxu0  ;;  %v1014_v1 = vadd.f32 %v21787_v46, %v1013_v51 }
 0x212   :  { %v1016_v60 = vpop.f32.mrb[18].mxu1  ;;  %v1428_v62 = vpop.f32.mrb[22].mxu0 }
 0x213   :  { %v18854_v0 = vpop.f32.mrb[19].mxu1  ;;  %v18910_v2 = vpop.f32.mrb[23].mxu0  ;;  %v1486_v60 = vpack.c.bf16 %v1014_v1, %v1014_v1 }
 0x218   :  { %v1141_v4 = vpop.f32.mrb[20].mxu1 }
 0x219   :  { %v1142_v5 = vadd.f32 %v21773_v3, %v1141_v4  ;;  %v18869_v6 = vpop.f32.mrb[21].mxu1 }
 0x21a   :  { %v1144_v7 = vpop.f32.mrb[22].mxu1 }
 0x21b   :  { %v1488_v8 = vpack.c.bf16 %v1142_v5, %v1142_v5  ;;  %v18870_v9 = vpop.f32.mrb[23].mxu1 }
 0x21d   :  { %v1542_v11 = vsel %vm1491_vm2, %v1488_v8, 0 }
 0x21e   :  { %18926 = vmatpush3.bf16.xpose.msra.mxu1 %v1542_v11 }
 0x21f   :  { %18937 = vmatprep.subr.bf16.mxu1 %v25126_v55 }
 0x220   :  { %v1245_v16 = vpop.f32.mrb[24].mxu1 }
 0x221   :  { %v1246_v17 = vadd.f32 %v21781_v12, %v1245_v16  ;;  %v18885_v18 = vpop.f32.mrb[25].mxu1 }
 0x222   :  { %v1248_v19 = vpop.f32.mrb[26].mxu1 }
 0x223   :  { %v1490_v22 = vpack.c.bf16 %v1246_v17, %v1246_v17  ;;  %v18886_v25 = vpop.f32.mrb[27].mxu1 }
 0x225   :  { %18928 = vmatmul.mubr.msk.bf16.vlgmr.msra.gmra.mrb[36].mxu1 %vm1491_vm2, %v1484_v20  ;;  %v1634_v47 = vsel %vm1491_vm2, %v1490_v22, 0 }
 0x226   :  { %18938 = vmatpush3.bf16.xpose.msra.mxu1 %v1634_v47  ;;  %18939 = vmatprep.mubr.msk.bf16.mxu1 %vm21433_vm0, %v25126_v55 }
 0x227   :  { %18949 = vmatprep.subr.bf16.mxu1 %v25126_v55 }
 0x228   :  { %v1373_v49 = vpop.f32.mrb[28].mxu1 }
 0x229   :  { %v1374_v50 = vadd.f32 %v21792_v48, %v1373_v49  ;;  %v18901_v53 = vpop.f32.mrb[29].mxu1 }
 0x22a   :  { %v1376_v59 = vpop.f32.mrb[30].mxu1 }
 0x22b   :  { %v1729_v62 = vpack.c.bf16 %v1374_v50, %v1374_v50  ;;  %v18902_v0 = vpop.f32.mrb[31].mxu1 }
 0x22d   :  { %18940 = vmatmul.mubr.msk.bf16.vlgmr.msra.gmra.mrb[40].mxu1 %vm1491_vm2, %v1486_v60  ;;  %v1783_v2 = vsel %vm1735_vm3, %v1729_v62, 0 }
 0x22e   :  { %18950 = vmatpush3.bf16.msra.mxu1 %v1783_v2  ;;  %18951 = vmatprep.mubr.msk.bf16.mxu1 %vm21433_vm0, %v25126_v55 }
 0x22f   :  { %18961 = vmatprep.subr.bf16.mxu1 %v25126_v55 }
 0x230   :  { %v21804_v51 = vpop.f32.mrb[32].mxu1 }
 0x231   :  { %v18917_v4 = vpop.f32.mrb[33].mxu1 }
 0x232   :  { %v1480_v5 = vpop.f32.mrb[34].mxu1 }
 0x233   :  { %v18918_v6 = vpop.f32.mrb[35].mxu1 }
 0x2d8   :  { %v1532_v7 = vpop.f32.mrb[24].mxu0 }
 0x2d9   :  { %v18923_v8 = vpop.f32.mrb[25].mxu0  ;;  %v1676_v9 = vmul.f32 0.35355338, %v1532_v7 }
 0x2da   :  { %v1535_v11 = vpop.f32.mrb[26].mxu0 }
 0x2db   :  { %v18924_v15 = vpop.f32.mrb[27].mxu0  ;;  %v1680_v16 = vsel %vm1491_vm2, %v1676_v9, -inf }
 0x2dc   :  { %1681 = vmax.xlane.f32.xlu0 %v1680_v16 }
 0x2e0   :  { %v1624_v17 = vpop.f32.mrb[28].mxu0 }
 0x2e1   :  { %v18935_v18 = vpop.f32.mrb[29].mxu0  ;;  %v1678_v19 = vmul.f32 0.35355338, %v1624_v17 }
 0x2e2   :  { %v1627_v20 = vpop.f32.mrb[30].mxu0 }
 0x2e3   :  { %v18936_v22 = vpop.f32.mrb[31].mxu0  ;;  %v1686_v25 = vsel %vm1491_vm2, %v1678_v19, -inf }
 0x2e4   :  { %1687 = vmax.xlane.f32.xlu1 %v1686_v25 }
 0x2f8   :  { %v1578_v47 = vpop.f32.mrb[36].mxu1 }
 0x2f9   :  { %v18929_v1 = vpop.f32.mrb[37].mxu1  ;;  %v1677_v49 = vmul.f32 0.35355338, %v1578_v47 }
 0x2fa   :  { %v1581_v50 = vpop.f32.mrb[38].mxu1 }
 0x2fb   :  { %v18930_v53 = vpop.f32.mrb[39].mxu1  ;;  %v1683_v59 = vsel %vm1491_vm2, %v1677_v49, -inf }
 0x2fc   :  { %1684 = vmax.xlane.f32.xlu0 %v1683_v59 }
 0x300   :  { %v1670_v60 = vpop.f32.mrb[40].mxu1 }
 0x301   :  { %v18941_v62 = vpop.f32.mrb[41].mxu1  ;;  %v1679_v0 = vmul.f32 0.35355338, %v1670_v60 }
 0x302   :  { %v1673_v2 = vpop.f32.mrb[42].mxu1 }
 0x303   :  { %v18942_v4 = vpop.f32.mrb[43].mxu1  ;;  %v1689_v5 = vsel %vm1491_vm2, %v1679_v0, -inf }
 0x304   :  { %1690 = vmax.xlane.f32.xlu1 %v1689_v5  ;;  %v21815_v4 = vld [vmem:[%s21736_s25 + $0xa] ss:$0 sm:$0xff] }
 0x369   :  { %v1682_v6 = vpop.xlane.xlu0 %1681 }
 0x36a   :  { %v1692_v7 = vsub.f32 %v1676_v9, %v1682_v6 }
 0x36c   :  { %v1696_v8 = vmul.f32 1.442695, %v1692_v7 }
 0x36e   :  { %21195 = vpow2.f32 %v1696_v8 }
 0x371   :  { %v1688_v11 = vpop.xlane.xlu1 %1687 }
 0x372   :  { %v1694_v15 = vsub.f32 %v1678_v19, %v1688_v11 }
 0x374   :  { %v1700_v16 = vmul.f32 1.442695, %v1694_v15 }
 0x376   :  { %21197 = vpow2.f32 %v1700_v16 }
 0x378   :  { %v21196_v17 = vpop.eup %21195 }
 0x379   :  { %v1704_v18 = vsel %vm1491_vm2, %v21196_v17, 0.0 }
 0x37a   :  { %1705 = vadd.xlane.f32.xlu0 %v1704_v18  ;;  %v21828_v18 = vld [vmem:[%s21736_s25 + $0xb] ss:$0 sm:$0xff] }
 0x380   :  { %v21198_v20 = vpop.eup %21197 }
 0x381   :  { %v1710_v22 = vsel %vm1491_vm2, %v21198_v20, 0.0 }
 0x382   :  { %1711 = vadd.xlane.f32.xlu0 %v1710_v22  ;;  %v1478_v22 = vadd.f32 %v21828_v18, %v21804_v51  ;;  %v777_v51 = vld [vmem:[%s21843_s29] sm:$0xf] }
 0x389   :  { %v1685_v25 = vpop.xlane.xlu0 %1684 }
 0x38a   :  { %v1693_v47 = vsub.f32 %v1677_v49, %v1685_v25  ;;  %v1426_v49 = vadd.f32 %v21815_v4, %v21770_v52 }
 0x38c   :  { %v1698_v1 = vmul.f32 1.442695, %v1693_v47  ;;  %v1730_v6 = vpack.c.bf16 %v1426_v49, %v1426_v49  ;;  %v779_v49 = vld [vmem:[%s21843_s29 + $0x8] sm:$0xf] }
 0x38e   :  { %21199 = vpow2.f32 %v1698_v1  ;;  %v1829_v11 = vsel %vm1735_vm3, %v1730_v6, 0  ;;  %v1731_v1 = vpack.c.bf16 %v1478_v22, %v1478_v22 }
 0x391   :  { %v1691_v9 = vpop.xlane.xlu1 %1690 }
 0x392   :  { %v1695_v50 = vsub.f32 %v1679_v0, %v1691_v9 }
 0x394   :  { %v1702_v53 = vmul.f32 1.442695, %v1695_v50 }
 0x396   :  { %21201 = vpow2.f32 %v1702_v53 }
 0x398   :  { %v21200_v19 = vpop.eup %21199 }
 0x399   :  { %v1707_v59 = vsel %vm1491_vm2, %v21200_v19, 0.0 }
 0x39a   :  { %1708 = vadd.xlane.f32.xlu1 %v1707_v59 }
 0x3a0   :  { %v21202_v60 = vpop.eup %21201 }
 0x3a1   :  { %v1713_v62 = vsel %vm1491_vm2, %v21202_v60, 0.0 }
 0x3a2   :  { %1714 = vadd.xlane.f32.xlu1 %v1713_v62 }
 0x407   :  { %v1706_v2 = vpop.xlane.xlu0 %1705 }
 0x408   :  { %21203 = vrcp.f32 %v1706_v2 }
 0x40f   :  { %v1712_v5 = vpop.xlane.xlu0 %1711 }
 0x410   :  { %21205 = vrcp.f32 %v1712_v5 }
 0x412   :  { %v21204_v0 = vpop.eup %21203 }
 0x413   :  { %v1720_v7 = vmul.f32 %v21204_v0, %v21196_v17 }
 0x415   :  { %v1724_v8 = vpack.c.bf16 %v1720_v7, %v1720_v7  ;;  %v21859_v7 = vsel %vm1735_vm3, %v779_v49, 0 }
 0x417   :  { %18946 = vmatmul.mubr.msk.bf16.vlgmr.msra.gmra.mrb[32].mxu0 %vm1491_vm2, %v1724_v8 }
 0x418   :  { %18956 = vmatpush3.bf16.msra.mxu0 %v1829_v11  ;;  %18957 = vmatprep.mubr.msk.bf16.mxu0 %vm21433_vm0, %v25126_v55 }
 0x419   :  { %18967 = vmatprep.subr.bf16.mxu0 %v25126_v55 }
 0x41a   :  { %v21206_v15 = vpop.eup %21205 }
 0x41b   :  { %v1722_v16 = vmul.f32 %v21206_v15, %v21198_v20  ;;  %v1875_v20 = vsel %vm1735_vm3, %v1731_v1, 0 }
 0x41d   :  { %v1726_v52 = vpack.c.bf16 %v1722_v16, %v1722_v16 }
 0x41f   :  { %18958 = vmatmul.mubr.msk.bf16.vlgmr.msra.gmra.mrb[36].mxu0 %vm1491_vm2, %v1726_v52 }
 0x420   :  { %18969 = vmatprep.mubr.msk.bf16.mxu0 %vm21433_vm0, %v25126_v55 }
 0x427   :  { %v1709_v17 = vpop.xlane.xlu1 %1708 }
 0x428   :  { %21207 = vrcp.f32 %v1709_v17 }
 0x42f   :  { %v1715_v25 = vpop.xlane.xlu1 %1714 }
 0x430   :  { %21209 = vrcp.f32 %v1715_v25  ;;  %v21874_v25 = vpack.c.bf16 %v21589_v26, %v21589_v26 }
 0x432   :  { %v21208_v47 = vpop.eup %21207 }
 0x433   :  { %v1721_v9 = vmul.f32 %v21208_v47, %v21200_v19  ;;  %v21847_v19 = vsel %vm1735_vm3, %v777_v51, 0 }
 0x434   :  { %18968 = vmatpush3.bf16.msra.mxu0 %v21847_v19 }
 0x435   :  { %v1725_v50 = vpack.c.bf16 %v1721_v9, %v1721_v9  ;;  %18979 = vmatprep.subr.bf16.mxu0 %v25126_v55 }
 0x437   :  { %18952 = vmatmul.mubr.msk.bf16.vlgmr.msra.gmra.mrb[44].mxu1 %vm1491_vm2, %v1725_v50 }
 0x438   :  { %18962 = vmatpush3.bf16.msra.mxu1 %v1875_v20  ;;  %18963 = vmatprep.mubr.msk.bf16.mxu1 %vm21433_vm0, %v25126_v55 }
 0x439   :  { %18973 = vmatprep.subr.bf16.mxu1 %v25126_v55 }
 0x43a   :  { %v21210_v53 = vpop.eup %21209 }
 0x43b   :  { %v1723_v59 = vmul.f32 %v21210_v53, %v21202_v60  ;;  %v778_v60 = vld [vmem:[%s21843_s29 + $0x4] sm:$0xf] }
 0x43c   :  { %v21853_v2 = vsel %vm1735_vm3, %v778_v60, 0 }
 0x43d   :  { %v1727_v62 = vpack.c.bf16 %v1723_v59, %v1723_v59 }
 0x43f   :  { %18964 = vmatmul.mubr.msk.bf16.vlgmr.msra.gmra.mrb[48].mxu1 %vm1491_vm2, %v1727_v62 }
 0x440   :  { %18975 = vmatprep.mubr.msk.bf16.mxu1 %vm21433_vm0, %v25126_v55  ;;  %18974 = vmatpush3.bf16.msra.mxu1 %v21853_v2 }
 0x441   :  { %18985 = vmatprep.subr.bf16.mxu1 %v25126_v55 }
 0x4ea   :  { %v1773_v5 = vpop.f32.mrb[32].mxu0 }
 0x4eb   :  { %v1917_v0 = vpack.c.bf16 %v1773_v5, %v1773_v5  ;;  %v18947_v6 = vpop.f32.mrb[33].mxu0 }
 0x4ec   :  { %v1776_v8 = vpop.f32.mrb[34].mxu0 }
 0x4ed   :  { %v18948_v11 = vpop.f32.mrb[35].mxu0  ;;  %18970 = vmatmul.mubr.msk.bf16.vlgmr.msra.gmra.mrb[40].mxu0 %vm1491_vm2, %v1917_v0 }
 0x4ee   :  { %18980 = vmatpush3.bf16.msra.mxu0 %v21859_v7  ;;  %18981 = vmatprep.mubr.msk.bf16.mxu0 %vm21433_vm0, %v25126_v55 }
 0x4ef   :  { %18991 = vmatprep.subr.bf16.mxu0 %v25126_v55 }
 0x4f2   :  { %v1865_v15 = vpop.f32.mrb[36].mxu0 }
 0x4f3   :  { %v1919_v16 = vpack.c.bf16 %v1865_v15, %v1865_v15  ;;  %v18959_v52 = vpop.f32.mrb[37].mxu0 }
 0x4f4   :  { %v1868_v17 = vpop.f32.mrb[38].mxu0 }
 0x4f5   :  { %v18960_v22 = vpop.f32.mrb[39].mxu0  ;;  %18982 = vmatmul.mubr.msk.bf16.vlgmr.msra.gmra.mrb[44].mxu0 %vm1491_vm2, %v1919_v16 }
 0x4f6   :  { %18992 = vmatpush3.bf16.msra.mxu0 %v21546_v54  ;;  %18995 = vmatprep.mubr.msk.bf16.mxu0 %vm21433_vm0, %v25126_v55  ;;  %v780_v54 = vld [vmem:[%s21843_s29 + $0xc] sm:$0xf] }
 0x4f7   :  { %18993 = vmatprep.subr.bf16.mxu0 %v25126_v55 }
 0x4fa   :  { %18994 = vmatpush3.bf16.msra.mxu0 %v21558_v57 }
 0x4fb   :  { %19007 = vmatprep.subr.bf16.mxu0 %v25126_v55 }
 0x4fd   :  { %18996 = vmatmul.mubr.msk.bf16.vlgmr.msra.gmra.mrb[48].mxu0 %vm819_vm1, %v21874_v25 }
 0x4fe   :  { %19008 = vmatpush3.bf16.msra.mxu0 %v21612_v29  ;;  %19011 = vmatprep.mubr.msk.bf16.mxu0 %vm21433_vm0, %v25126_v55 }
 0x4ff   :  { %19009 = vmatprep.subr.bf16.mxu0 %v25126_v55 }
 0x502   :  { %19010 = vmatpush3.bf16.msra.mxu0 %v21626_v31  ;;  %v21895_v31 = vsel %vm1735_vm3, %v780_v54, 0 }
 0x503   :  { %19023 = vmatprep.subr.bf16.mxu0 %v25126_v55 }
 0x505   :  { %19012 = vmatmul.mubr.msk.bf16.vlgmr.msra.gmra.mrb[52].mxu0 %vm819_vm1, %v21874_v25 }
 0x506   :  { %19024 = vmatpush3.bf16.msra.mxu0 %v21551_v56  ;;  %19027 = vmatprep.mubr.msk.bf16.mxu0 %vm21433_vm0, %v25126_v55 }
 0x507   :  { %19025 = vmatprep.subr.bf16.mxu0 %v25126_v55 }
 0x50a   :  { %v1819_v57 = vpop.f32.mrb[44].mxu1  ;;  %19026 = vmatpush3.bf16.msra.mxu0 %v21561_v58 }
 0x50b   :  { %v1918_v29 = vpack.c.bf16 %v1819_v57, %v1819_v57  ;;  %v18953_v47 = vpop.f32.mrb[45].mxu1  ;;  %19039 = vmatprep.subr.bf16.mxu0 %v25126_v55 }
 0x50c   :  { %v1822_v1 = vpop.f32.mrb[46].mxu1 }
 0x50d   :  { %v18954_v9 = vpop.f32.mrb[47].mxu1  ;;  %18976 = vmatmul.mubr.msk.bf16.vlgmr.msra.gmra.mrb[52].mxu1 %vm1491_vm2, %v1918_v29  ;;  %19028 = vmatmul.mubr.msk.bf16.vlgmr.msra.gmra.mrb[56].mxu0 %vm819_vm1, %v21874_v25 }
 0x50e   :  { %18986 = vmatpush3.bf16.msra.mxu1 %v21895_v31  ;;  %19040 = vmatpush3.bf16.msra.mxu0 %v21583_v24 }
 0x50f   :  { %19041 = vmatprep.subr.bf16.mxu0 %v25126_v55  ;;  %18987 = vmatprep.mubr.msk.bf16.mxu1 %vm21433_vm0, %v25126_v55 }
 0x510   :  { %19043 = vmatprep.mubr.msk.bf16.mxu0 %vm21433_vm0, %v25126_v55  ;;  %18999 = vmatprep.subr.bf16.mxu1 %v25126_v55 }
 0x512   :  { %v1911_v56 = vpop.f32.mrb[48].mxu1  ;;  %19042 = vmatpush3.bf16.msra.mxu0 %v21601_v28 }
 0x513   :  { %v1920_v58 = vpack.c.bf16 %v1911_v56, %v1911_v56  ;;  %v18965_v50 = vpop.f32.mrb[49].mxu1  ;;  %19055 = vmatprep.subr.bf16.mxu0 %v25126_v55 }
 0x514   :  { %v1914_v20 = vpop.f32.mrb[50].mxu1 }
 0x515   :  { %v18966_v53 = vpop.f32.mrb[51].mxu1  ;;  %18988 = vmatmul.mubr.msk.bf16.vlgmr.msra.gmra.mrb[56].mxu1 %vm1491_vm2, %v1920_v58  ;;  %19044 = vmatmul.mubr.msk.bf16.vlgmr.msra.gmra.mrb[60].mxu0 %vm819_vm1, %v21874_v25 }
 0x516   :  { %19000 = vmatpush3.bf16.msra.mxu1 %v21580_v23  ;;  %19056 = vmatpush3.bf16.msra.mxu0 %v21615_v30 }
 0x517   :  { %19001 = vmatprep.subr.bf16.mxu1 %v25126_v55  ;;  %19057 = vmatprep.subr.bf16.mxu0 %v25126_v55 }
 0x518   :  { %19003 = vmatprep.mubr.msk.bf16.mxu1 %vm21433_vm0, %v25126_v55  ;;  %19059 = vmatprep.mubr.msk.bf16.mxu0 %vm21433_vm0, %v25126_v55 }
 0x51a   :  { %19002 = vmatpush3.bf16.msra.mxu1 %v21598_v27  ;;  %19058 = vmatpush3.bf16.msra.mxu0 %v21629_v32 }
 0x51b   :  { %19015 = vmatprep.subr.bf16.mxu1 %v25126_v55  ;;  %19071 = vmatprep.subr.bf16.mxu0 %v25126_v55 }
 0x51d   :  { %19004 = vmatmul.mubr.msk.bf16.vlgmr.msra.gmra.mrb[60].mxu1 %vm819_vm1, %v21874_v25  ;;  %19060 = vmatmul.mubr.msk.bf16.vlgmr.msra.gmra.mrb[64].mxu0 %vm819_vm1, %v21874_v25 }
 0x51e   :  { %19016 = vmatpush3.bf16.msra.mxu1 %v21640_v33  ;;  %19072 = vmatpush3.bf16.msra.mxu0 %v21643_v34 }
 0x51f   :  { %19017 = vmatprep.subr.bf16.mxu1 %v25126_v55  ;;  %19073 = vmatprep.subr.bf16.mxu0 %v25126_v55 }
 0x520   :  { %19019 = vmatprep.mubr.msk.bf16.mxu1 %vm21433_vm0, %v25126_v55  ;;  %19075 = vmatprep.mubr.msk.bf16.mxu0 %vm21433_vm0, %v25126_v55 }
 0x522   :  { %19018 = vmatpush3.bf16.msra.mxu1 %v21654_v35  ;;  %19074 = vmatpush3.bf16.msra.mxu0 %v21657_v36 }
 0x523   :  { %19031 = vmatprep.subr.bf16.mxu1 %v25126_v55  ;;  %19087 = vmatprep.subr.bf16.mxu0 %v25126_v55 }
 0x525   :  { %19020 = vmatmul.mubr.msk.bf16.vlgmr.msra.gmra.mrb[64].mxu1 %vm819_vm1, %v21874_v25  ;;  %19076 = vmatmul.mubr.msk.bf16.vlgmr.msra.gmra.mrb[68].mxu0 %vm819_vm1, %v21874_v25 }
 0x526   :  { %19032 = vmatpush3.bf16.msra.mxu1 %v21668_v37  ;;  %19035 = vmatprep.mubr.msk.bf16.mxu1 %vm21433_vm0, %v25126_v55 }
 0x527   :  { %19033 = vmatprep.subr.bf16.mxu1 %v25126_v55  ;;  %19089 = vmatprep.mubr.msk.bf16.mxu0 %vm21433_vm0, %v25126_v55 }
 0x52a   :  { %19034 = vmatpush3.bf16.msra.mxu1 %v21678_v38 }
 0x52b   :  { %19047 = vmatprep.subr.bf16.mxu1 %v25126_v55 }
 0x52d   :  { %19036 = vmatmul.mubr.msk.bf16.vlgmr.msra.gmra.mrb[68].mxu1 %vm819_vm1, %v21874_v25 }
 0x52e   :  { %19048 = vmatpush3.bf16.msra.mxu1 %v21687_v39  ;;  %19051 = vmatprep.mubr.msk.bf16.mxu1 %vm21433_vm0, %v25126_v55 }
 0x52f   :  { %19049 = vmatprep.subr.bf16.mxu1 %v25126_v55 }
 0x532   :  { %19050 = vmatpush3.bf16.msra.mxu1 %v21694_v40 }
 0x533   :  { %19063 = vmatprep.subr.bf16.mxu1 %v25126_v55 }
 0x535   :  { %19052 = vmatmul.mubr.msk.bf16.vlgmr.msra.gmra.mrb[72].mxu1 %vm819_vm1, %v21874_v25 }
 0x536   :  { %19064 = vmatpush3.bf16.msra.mxu1 %v21701_v41  ;;  %19067 = vmatprep.mubr.msk.bf16.mxu1 %vm21433_vm0, %v25126_v55 }
 0x537   :  { %19065 = vmatprep.subr.bf16.mxu1 %v25126_v55 }
 0x53a   :  { %19066 = vmatpush3.bf16.msra.mxu1 %v21708_v42 }
 0x53b   :  { %19079 = vmatprep.subr.bf16.mxu1 %v25126_v55 }
 0x53d   :  { %19068 = vmatmul.mubr.msk.bf16.vlgmr.msra.gmra.mrb[76].mxu1 %vm819_vm1, %v21874_v25 }
 0x53e   :  { %19080 = vmatpush3.bf16.msra.mxu1 %v21715_v43  ;;  %19083 = vmatprep.mubr.msk.bf16.mxu1 %vm21433_vm0, %v25126_v55 }
 0x53f   :  { %19081 = vmatprep.subr.bf16.mxu1 %v25126_v55 }
 0x542   :  { %19082 = vmatpush3.bf16.msra.mxu1 %v21722_v44 }
 0x543   :  { %19093 = vmatprep.subr.bf16.mxu1 %v25126_v55 }
 0x545   :  { %19084 = vmatmul.mubr.msk.bf16.vlgmr.msra.gmra.mrb[80].mxu1 %vm819_vm1, %v21874_v25 }
 0x546   :  { %19095 = vmatprep.mubr.msk.bf16.mxu1 %vm21433_vm0, %v25126_v55 }
 0x5c0   :  { %v1961_v23 = vpop.f32.mrb[40].mxu0 }
 0x5c1   :  { %v18971_v24 = vpop.f32.mrb[41].mxu0  ;;  %v2105_v59 = vsel %vm819_vm1, %v1961_v23, 0.0 }
 0x5c2   :  { %v1964_v27 = vpop.f32.mrb[42].mxu0 }
 0x5c3   :  { %v18972_v28 = vpop.f32.mrb[43].mxu0 }
 0x5c8   :  { %v2053_v30 = vpop.f32.mrb[44].mxu0 }
 0x5c9   :  { %v18983_v32 = vpop.f32.mrb[45].mxu0  ;;  %v2108_v8 = vsel %vm819_vm1, %v2053_v30, 0.0 }
 0x5ca   :  { %v2056_v33 = vpop.f32.mrb[46].mxu0 }
 0x5cb   :  { %v18984_v34 = vpop.f32.mrb[47].mxu0 }
 0x5d0   :  { %v2157_v35 = vpop.f32.mrb[48].mxu0 }
 0x5d1   :  { %v18997_v36 = vpop.f32.mrb[49].mxu0  ;;  %v2158_v22 = vadd.f32 %v21743_v61, %v2157_v35 }
 0x5d2   :  { %v2160_v37 = vpop.f32.mrb[50].mxu0 }
 0x5d3   :  { %v18998_v38 = vpop.f32.mrb[51].mxu0  ;;  %v2603_v58 = vpack.c.bf16 %v2158_v22, %v2158_v22 }
 0x5d8   :  { %v2237_v39 = vpop.f32.mrb[52].mxu0 }
 0x5d9   :  { %v19013_v40 = vpop.f32.mrb[53].mxu0 }
 0x5da   :  { %v2240_v41 = vpop.f32.mrb[54].mxu0 }
 0x5db   :  { %v19014_v42 = vpop.f32.mrb[55].mxu0 }
 0x5e0   :  { %v2007_v43 = vpop.f32.mrb[52].mxu1  ;;  %v2317_v44 = vpop.f32.mrb[56].mxu0 }
 0x5e1   :  { %v2106_v62 = vsel %vm819_vm1, %v2007_v43, 0.0  ;;  %v2318_v51 = vadd.f32 %v21739_v45, %v2317_v44  ;;  %v18977_v60 = vpop.f32.mrb[53].mxu1  ;;  %v19029_v49 = vpop.f32.mrb[57].mxu0 }
 0x5e2   :  { %v2107_v5 = vadd.f32 %v2106_v62, %v2105_v59  ;;  %v2010_v0 = vpop.f32.mrb[54].mxu1  ;;  %v2320_v6 = vpop.f32.mrb[58].mxu0 }
 0x5e3   :  { %v2607_v11 = vpack.c.bf16 %v2318_v51, %v2318_v51  ;;  %v18978_v15 = vpop.f32.mrb[55].mxu1  ;;  %v19030_v16 = vpop.f32.mrb[59].mxu0 }
 0x5e4   :  { %v2109_v52 = vadd.f32 %v2108_v8, %v2107_v5 }
 0x5e5   :  { %v2615_v17 = vsel %vm1491_vm2, %v2607_v11, 0 }
 0x5e6   :  { %19088 = vmatpush3.bf16.xpose.msra.mxu0 %v2615_v17 }
 0x5e7   :  { %19099 = vmatprep.subr.bf16.mxu0 %v25126_v55 }
 0x5e8   :  { %v2099_v25 = vpop.f32.mrb[56].mxu1  ;;  %v2397_v45 = vpop.f32.mrb[60].mxu0 }
 0x5e9   :  { %v2110_v54 = vsel %vm819_vm1, %v2099_v25, 0.0  ;;  %v2398_v57 = vadd.f32 %v21747_v63, %v2397_v45  ;;  %v18989_v29 = vpop.f32.mrb[57].mxu1  ;;  %v19045_v47 = vpop.f32.mrb[61].mxu0  ;;  %v2238_v63 = vadd.f32 %v21755_v13, %v2237_v39 }
 0x5ea   :  { %v21990_v1 = vadd.f32 %v2110_v54, %v2109_v52  ;;  %v2102_v9 = vpop.f32.mrb[58].mxu1  ;;  %v2400_v56 = vpop.f32.mrb[62].mxu0 }
 0x5eb   :  { %v2609_v50 = vpack.c.bf16 %v2398_v57, %v2398_v57  ;;  %v18990_v20 = vpop.f32.mrb[59].mxu1  ;;  %v19046_v53 = vpop.f32.mrb[63].mxu0  ;;  %v2605_v34 = vpack.c.bf16 %v2238_v63, %v2238_v63 }
 0x5ed   :  { %19090 = vmatmul.mubr.msk.bf16.vlgmr.msra.gmra.mrb[72].mxu0 %vm1491_vm2, %v2603_v58  ;;  %v2707_v61 = vsel %vm1491_vm2, %v2609_v50, 0 }
 0x5ee   :  { %19100 = vmatpush3.bf16.xpose.msra.mxu0 %v2707_v61  ;;  %19101 = vmatprep.mubr.msk.bf16.mxu0 %vm21433_vm0, %v25126_v55 }
 0x5ef   :  { %19111 = vmatprep.subr.bf16.mxu0 %v25126_v55 }
 0x5f0   :  { %v2197_v23 = vpop.f32.mrb[60].mxu1  ;;  %v2477_v24 = vpop.f32.mrb[64].mxu0 }
 0x5f1   :  { %v2478_v27 = vadd.f32 %v21758_v14, %v2477_v24  ;;  %v19005_v28 = vpop.f32.mrb[61].mxu1  ;;  %v19061_v30 = vpop.f32.mrb[65].mxu0  ;;  %v2198_v6 = vadd.f32 %v21777_v10, %v2197_v23 }
 0x5f2   :  { %v2200_v32 = vpop.f32.mrb[62].mxu1  ;;  %v2480_v33 = vpop.f32.mrb[66].mxu0 }
 0x5f3   :  { %v2847_v35 = vpack.c.bf16 %v2478_v27, %v2478_v27  ;;  %v19006_v36 = vpop.f32.mrb[63].mxu1  ;;  %v19062_v37 = vpop.f32.mrb[67].mxu0  ;;  %v2604_v52 = vpack.c.bf16 %v2198_v6, %v2198_v6 }
 0x5f5   :  { %19102 = vmatmul.mubr.msk.bf16.vlgmr.msra.gmra.mrb[76].mxu0 %vm1491_vm2, %v2605_v34  ;;  %v2855_v38 = vsel %vm1735_vm3, %v2847_v35, 0 }
 0x5f6   :  { %19112 = vmatpush3.bf16.msra.mxu0 %v2855_v38  ;;  %19113 = vmatprep.mubr.msk.bf16.mxu0 %vm21433_vm0, %v25126_v55 }
 0x5f7   :  { %19123 = vmatprep.subr.bf16.mxu0 %v25126_v55 }
 0x5f8   :  { %v2277_v13 = vpop.f32.mrb[64].mxu1  ;;  %v22004_v14 = vpop.f32.mrb[68].mxu0 }
 0x5f9   :  { %v19021_v39 = vpop.f32.mrb[65].mxu1  ;;  %v19077_v40 = vpop.f32.mrb[69].mxu0  ;;  %v2278_v10 = vadd.f32 %v21787_v46, %v2277_v13 }
 0x5fa   :  { %v2280_v41 = vpop.f32.mrb[66].mxu1  ;;  %v2560_v42 = vpop.f32.mrb[70].mxu0 }
 0x5fb   :  { %v19022_v43 = vpop.f32.mrb[67].mxu1  ;;  %v19078_v44 = vpop.f32.mrb[71].mxu0  ;;  %v2606_v57 = vpack.c.bf16 %v2278_v10, %v2278_v10 }
 0x600   :  { %v2357_v59 = vpop.f32.mrb[68].mxu1 }
 0x601   :  { %v2358_v62 = vadd.f32 %v21773_v3, %v2357_v59  ;;  %v19037_v51 = vpop.f32.mrb[69].mxu1 }
 0x602   :  { %v2360_v60 = vpop.f32.mrb[70].mxu1 }
 0x603   :  { %v2608_v49 = vpack.c.bf16 %v2358_v62, %v2358_v62  ;;  %v19038_v5 = vpop.f32.mrb[71].mxu1 }
 0x605   :  { %v2661_v0 = vsel %vm1491_vm2, %v2608_v49, 0 }
 0x606   :  { %19094 = vmatpush3.bf16.xpose.msra.mxu1 %v2661_v0 }
 0x607   :  { %19105 = vmatprep.subr.bf16.mxu1 %v25126_v55 }
 0x608   :  { %v2437_v8 = vpop.f32.mrb[72].mxu1 }
 0x609   :  { %v2438_v11 = vadd.f32 %v21781_v12, %v2437_v8  ;;  %v19053_v15 = vpop.f32.mrb[73].mxu1  ;;  %v22036_v8 = vld [vmem:[%s22032_s3] ss:$0 sm:$0xff] }
 0x60a   :  { %v2440_v16 = vpop.f32.mrb[74].mxu1 }
 0x60b   :  { %v2610_v17 = vpack.c.bf16 %v2438_v11, %v2438_v11  ;;  %v19054_v22 = vpop.f32.mrb[75].mxu1  ;;  %v2118_v11 = vadd.f32 %v22036_v8, %v21990_v1 }
 0x60d   :  { %19096 = vmatmul.mubr.msk.bf16.vlgmr.msra.gmra.mrb[84].mxu1 %vm1491_vm2, %v2604_v52  ;;  %v2753_v3 = vsel %vm1491_vm2, %v2610_v17, 0  ;;  %v3219_v52 = vadd.f32 %v2118_v11, %v21577_v21 }
 0x60e   :  { %19106 = vmatpush3.bf16.xpose.msra.mxu1 %v2753_v3  ;;  %19107 = vmatprep.mubr.msk.bf16.mxu1 %vm21433_vm0, %v25126_v55 }
 0x60f   :  { %19117 = vmatprep.subr.bf16.mxu1 %v25126_v55  ;;  %v3223_v17 = vsel %vm819_vm1, %v3219_v52, 0.0 }
 0x610   :  { %v2517_v25 = vpop.f32.mrb[76].mxu1 }
 0x611   :  { %v2518_v12 = vadd.f32 %v21792_v48, %v2517_v25  ;;  %v19069_v45 = vpop.f32.mrb[77].mxu1 }
 0x612   :  { %v2520_v54 = vpop.f32.mrb[78].mxu1 }
 0x613   :  { %v2848_v29 = vpack.c.bf16 %v2518_v12, %v2518_v12  ;;  %v19070_v47 = vpop.f32.mrb[79].mxu1 }
 0x614   :  { %v2558_v47 = vadd.f32 %v21815_v4, %v22004_v14 }
 0x615   :  { %19108 = vmatmul.mubr.msk.bf16.vlgmr.msra.gmra.mrb[88].mxu1 %vm1491_vm2, %v2606_v57  ;;  %v2901_v9 = vsel %vm1735_vm3, %v2848_v29, 0 }
 0x616   :  { %19118 = vmatpush3.bf16.msra.mxu1 %v2901_v9  ;;  %19119 = vmatprep.mubr.msk.bf16.mxu1 %vm21433_vm0, %v25126_v55 }
 0x617   :  { %19129 = vmatprep.subr.bf16.mxu1 %v25126_v55 }
 0x618   :  { %v22023_v46 = vpop.f32.mrb[80].mxu1 }
 0x619   :  { %v19085_v56 = vpop.f32.mrb[81].mxu1 }
 0x61a   :  { %v2600_v58 = vpop.f32.mrb[82].mxu1 }
 0x61b   :  { %v19086_v48 = vpop.f32.mrb[83].mxu1  ;;  %v2849_v58 = vpack.c.bf16 %v2558_v47, %v2558_v47 }
 0x6c0   :  { %v2651_v50 = vpop.f32.mrb[72].mxu0 }
 0x6c1   :  { %v19091_v20 = vpop.f32.mrb[73].mxu0  ;;  %v2795_v53 = vmul.f32 0.35355338, %v2651_v50 }
 0x6c2   :  { %v2654_v61 = vpop.f32.mrb[74].mxu0 }
 0x6c3   :  { %v19092_v63 = vpop.f32.mrb[75].mxu0  ;;  %v2799_v23 = vsel %vm1491_vm2, %v2795_v53, -inf }
 0x6c4   :  { %2800 = vmax.xlane.f32.xlu0 %v2799_v23  ;;  %v2947_v63 = vsel %vm1735_vm3, %v2849_v58, 0 }
 0x6c8   :  { %v2743_v24 = vpop.f32.mrb[76].mxu0 }
 0x6c9   :  { %v19103_v27 = vpop.f32.mrb[77].mxu0  ;;  %v2797_v28 = vmul.f32 0.35355338, %v2743_v24 }
 0x6ca   :  { %v2746_v30 = vpop.f32.mrb[78].mxu0 }
 0x6cb   :  { %v19104_v32 = vpop.f32.mrb[79].mxu0  ;;  %v2805_v33 = vsel %vm1491_vm2, %v2797_v28, -inf  ;;  %v2598_v30 = vadd.f32 %v21828_v18, %v22023_v46 }
 0x6cc   :  { %2806 = vmax.xlane.f32.xlu0 %v2805_v33 }
 0x6e0   :  { %v2697_v34 = vpop.f32.mrb[84].mxu1 }
 0x6e1   :  { %v19097_v35 = vpop.f32.mrb[85].mxu1  ;;  %v2796_v36 = vmul.f32 0.35355338, %v2697_v34  ;;  %v2850_v34 = vpack.c.bf16 %v2598_v30, %v2598_v30 }
 0x6e2   :  { %v2700_v37 = vpop.f32.mrb[86].mxu1 }
 0x6e3   :  { %v19098_v38 = vpop.f32.mrb[87].mxu1  ;;  %v2802_v13 = vsel %vm1491_vm2, %v2796_v36, -inf }
 0x6e4   :  { %2803 = vmax.xlane.f32.xlu1 %v2802_v13 }
 0x6e8   :  { %v2789_v39 = vpop.f32.mrb[88].mxu1 }
 0x6e9   :  { %v19109_v40 = vpop.f32.mrb[89].mxu1  ;;  %v2798_v41 = vmul.f32 0.35355338, %v2789_v39 }
 0x6ea   :  { %v2792_v42 = vpop.f32.mrb[90].mxu1 }
 0x6eb   :  { %v19110_v43 = vpop.f32.mrb[91].mxu1  ;;  %v2808_v44 = vsel %vm1491_vm2, %v2798_v41, -inf }
 0x6ec   :  { %2809 = vmax.xlane.f32.xlu1 %v2808_v44 }
 0x751   :  { %v2801_v59 = vpop.xlane.xlu0 %2800 }
 0x752   :  { %v2811_v62 = vsub.f32 %v2795_v53, %v2801_v59 }
 0x754   :  { %v2815_v51 = vmul.f32 1.442695, %v2811_v62 }
 0x756   :  { %21211 = vpow2.f32 %v2815_v51 }
 0x759   :  { %v2807_v60 = vpop.xlane.xlu0 %2806 }
 0x75a   :  { %v2813_v49 = vsub.f32 %v2797_v28, %v2807_v60 }
 0x75c   :  { %v2819_v5 = vmul.f32 1.442695, %v2813_v49 }
 0x75e   :  { %21213 = vpow2.f32 %v2819_v5 }
 0x760   :  { %v21212_v0 = vpop.eup %21211 }
 0x761   :  { %v2823_v6 = vsel %vm1491_vm2, %v21212_v0, 0.0 }
 0x762   :  { %2824 = vadd.xlane.f32.xlu0 %v2823_v6 }
 0x768   :  { %v21214_v15 = vpop.eup %21213 }
 0x769   :  { %v2829_v16 = vsel %vm1491_vm2, %v21214_v15, 0.0 }
 0x76a   :  { %2830 = vadd.xlane.f32.xlu0 %v2829_v16 }
 0x76e   :  { %3224 = vadd.xlane.f32.xlu0 %v3223_v17 }
 0x771   :  { %v2804_v22 = vpop.xlane.xlu1 %2803 }
 0x772   :  { %v2812_v3 = vsub.f32 %v2796_v36, %v2804_v22 }
 0x774   :  { %v2817_v10 = vmul.f32 1.442695, %v2812_v3 }
 0x776   :  { %21215 = vpow2.f32 %v2817_v10 }
 0x779   :  { %v2810_v25 = vpop.xlane.xlu1 %2809 }
 0x77a   :  { %v2814_v12 = vsub.f32 %v2798_v41, %v2810_v25 }
 0x77c   :  { %v2821_v45 = vmul.f32 1.442695, %v2814_v12 }
 0x77e   :  { %21217 = vpow2.f32 %v2821_v45 }
 0x780   :  { %v21216_v54 = vpop.eup %21215 }
 0x781   :  { %v2826_v1 = vsel %vm1491_vm2, %v21216_v54, 0.0 }
 0x782   :  { %2827 = vadd.xlane.f32.xlu1 %v2826_v1 }
 0x788   :  { %v21218_v57 = vpop.eup %21217 }
 0x789   :  { %v2832_v29 = vsel %vm1491_vm2, %v21218_v57, 0.0 }
 0x78a   :  { %2833 = vadd.xlane.f32.xlu1 %v2832_v29 }
 0x7ef   :  { %v2825_v21 = vpop.xlane.xlu0 %2824 }
 0x7f0   :  { %21219 = vrcp.f32 %v2825_v21 }
 0x7f7   :  { %v2831_v9 = vpop.xlane.xlu0 %2830 }
 0x7f8   :  { %21221 = vrcp.f32 %v2831_v9 }
 0x7fa   :  { %v21220_v56 = vpop.eup %21219 }
 0x7fb   :  { %v3225_v48 = vpop.xlane.xlu0 %3224  ;;  %v2839_v50 = vmul.f32 %v21220_v56, %v21212_v0 }
 0x7fc   :  { %v3230_v20 = vmul.f32 0.03125, %v3225_v48 }
 0x7fd   :  { %v2843_v53 = vpack.c.bf16 %v2839_v50, %v2839_v50 }
 0x7fe   :  { %v22047_v61 = vsub.f32 %v3219_v52, %v3230_v20 }
 0x7ff   :  { %19114 = vmatmul.mubr.msk.bf16.vlgmr.msra.gmra.mrb[80].mxu0 %vm1491_vm2, %v2843_v53 }
 0x800   :  { %19124 = vmatpush3.bf16.msra.mxu0 %v2947_v63  ;;  %v3234_v23 = vmul.f32 %v22047_v61, %v22047_v61  ;;  %19125 = vmatprep.mubr.msk.bf16.mxu0 %vm21433_vm0, %v25126_v55 }
 0x801   :  { %19135 = vmatprep.subr.bf16.mxu0 %v25126_v55 }
 0x802   :  { %v21222_v4 = vpop.eup %21221  ;;  %v3236_v14 = vsel %vm819_vm1, %v3234_v23, 0.0 }
 0x803   :  { %3237 = vadd.xlane.f32.xlu0 %v3236_v14  ;;  %v2841_v24 = vmul.f32 %v21222_v4, %v21214_v15 }
 0x805   :  { %v2845_v27 = vpack.c.bf16 %v2841_v24, %v2841_v24 }
 0x807   :  { %19126 = vmatmul.mubr.msk.bf16.vlgmr.msra.gmra.mrb[84].mxu0 %vm1491_vm2, %v2845_v27 }
 0x808   :  { %19136 = vmatpush3.bf16.msra.mxu0 %v21847_v19  ;;  %19137 = vmatprep.mubr.msk.bf16.mxu0 %vm21433_vm0, %v25126_v55  ;;  %v2993_v19 = vsel %vm1735_vm3, %v2850_v34, 0 }
 0x809   :  { %19147 = vmatprep.subr.bf16.mxu0 %v25126_v55 }
 0x80f   :  { %v2828_v28 = vpop.xlane.xlu1 %2827 }
 0x810   :  { %21223 = vrcp.f32 %v2828_v28 }
 0x817   :  { %v2834_v32 = vpop.xlane.xlu1 %2833 }
 0x818   :  { %21225 = vrcp.f32 %v2834_v32  ;;  %v21051_v32 = vld [vmem:[%s22110_s11] sm:$0xff]  }
 0x81a   :  { %v21224_v33 = vpop.eup %21223 }
 0x81b   :  { %v2840_v35 = vmul.f32 %v21224_v33, %v21216_v54  ;;  %v21052_v33 = vld [vmem:[%s22110_s11 + $0x8] sm:$0xff]  }
 0x81d   :  { %v2844_v36 = vpack.c.bf16 %v2840_v35, %v2840_v35 }
 0x81f   :  { %19120 = vmatmul.mubr.msk.bf16.vlgmr.msra.gmra.mrb[92].mxu1 %vm1491_vm2, %v2844_v36 }
 0x820   :  { %19130 = vmatpush3.bf16.msra.mxu1 %v2993_v19  ;;  %19131 = vmatprep.mubr.msk.bf16.mxu1 %vm21433_vm0, %v25126_v55 }
 0x821   :  { %19141 = vmatprep.subr.bf16.mxu1 %v25126_v55 }
 0x822   :  { %v21226_v37 = vpop.eup %21225 }
 0x823   :  { %v2842_v38 = vmul.f32 %v21226_v37, %v21218_v57 }
 0x825   :  { %v2846_v13 = vpack.c.bf16 %v2842_v38, %v2842_v38 }
 0x827   :  { %19132 = vmatmul.mubr.msk.bf16.vlgmr.msra.gmra.mrb[96].mxu1 %vm1491_vm2, %v2846_v13 }
 0x828   :  { %19142 = vmatpush3.bf16.msra.mxu1 %v21853_v2  ;;  %19143 = vmatprep.mubr.msk.bf16.mxu1 %vm21433_vm0, %v25126_v55 }
 0x829   :  { %19153 = vmatprep.subr.bf16.mxu1 %v25126_v55 }
 0x890   :  { %v3238_v34 = vpop.xlane.xlu0 %3237 }
 0x891   :  { %v3242_v35 = vmul.f32 0.03125, %v3238_v34  ;;  %v22243_v34 = vld [vmem:[%s21543_s13 + $0xf8] sm:$0xff]  }
 0x893   :  { %v3244_v36 = vadd.f32 1e-05, %v3242_v35  ;;  %v22246_v35 = vld [vmem:[%s21543_s13 + $0x128] sm:$0xff]  }
 0x895   :  { %21227 = vrsqrt.f32 %v3244_v36  ;;  %v22257_v36 = vld [vmem:[%s21543_s13 + $0x110] sm:$0xff]  }
 0x89f   :  { %v21228_v13 = vpop.eup %21227 }
 0x8d2   :  { %v2891_v18 = vpop.f32.mrb[80].mxu0 }
 0x8d3   :  { %v3035_v46 = vpack.c.bf16 %v2891_v18, %v2891_v18  ;;  %v19115_v39 = vpop.f32.mrb[81].mxu0  ;;  %v3248_v18 = vmul.f32 %v21228_v13, %v22047_v61  ;;  %v21054_v61 = vld [vmem:[%s22110_s11 + $0x18] sm:$0xff]   ;;  %v22285_v13 = vld [vmem:[%s21543_s13 + $0x130] sm:$0xff]  }
 0x8d4   :  { %v2894_v40 = vpop.f32.mrb[82].mxu0 }
 0x8d5   :  { %v19116_v41 = vpop.f32.mrb[83].mxu0  ;;  %19138 = vmatmul.mubr.msk.bf16.vlgmr.msra.gmra.mrb[88].mxu0 %vm1491_vm2, %v3035_v46  ;;  %v17198_v46 = vld [vmem:[%s22119_s16] ss:$0 sm:$0xff] }
 0x8d6   :  { %19148 = vmatpush3.bf16.msra.mxu0 %v21859_v7  ;;  %19149 = vmatprep.mubr.msk.bf16.mxu0 %vm21433_vm0, %v25126_v55  ;;  %v3256_v40 = vmul.f32 %v17198_v46, %v3248_v18  ;;  %v22288_v18 = vld [vmem:[%s21543_s13 + $0x160] sm:$0xff]  }
 0x8d7   :  { %19159 = vmatprep.subr.bf16.mxu0 %v25126_v55 }
 0x8da   :  { %v2983_v2 = vpop.f32.mrb[84].mxu0 }
 0x8db   :  { %v3037_v42 = vpack.c.bf16 %v2983_v2, %v2983_v2  ;;  %v19127_v43 = vpop.f32.mrb[85].mxu0  ;;  %v17199_v2 = vld [vmem:[%s22124_s20] ss:$0 sm:$0xff] }
 0x8dc   :  { %v2986_v44 = vpop.f32.mrb[86].mxu0  ;;  %v3264_v43 = vadd.f32 %v17199_v2, %v3256_v40  ;;  %v22313_v40 = vld [vmem:[%s21543_s13 + $0x150] sm:$0xff]  }
 0x8dd   :  { %v19128_v59 = vpop.f32.mrb[87].mxu0  ;;  %19150 = vmatmul.mubr.msk.bf16.vlgmr.msra.gmra.mrb[92].mxu0 %vm1491_vm2, %v3037_v42 }
 0x8de   :  { %19163 = vmatprep.mubr.msk.bf16.mxu0 %vm21433_vm0, %v25126_v55 }
 0x8f2   :  { %v2937_v62 = vpop.f32.mrb[92].mxu1 }
 0x8f3   :  { %v3036_v51 = vpack.c.bf16 %v2937_v62, %v2937_v62  ;;  %v19121_v60 = vpop.f32.mrb[93].mxu1  ;;  %v21053_v62 = vld [vmem:[%s22110_s11 + $0x10] sm:$0xff]  }
 0x8f4   :  { %v2940_v49 = vpop.f32.mrb[94].mxu1 }
 0x8f5   :  { %v19122_v7 = vpop.f32.mrb[95].mxu1  ;;  %19144 = vmatmul.mubr.msk.bf16.vlgmr.msra.gmra.mrb[100].mxu1 %vm1491_vm2, %v3036_v51  ;;  %v17200_v51 = vld [vmem:[%s22142_s24] ss:$0 sm:$0xff] }
 0x8f6   :  { %19154 = vmatpush3.bf16.msra.mxu1 %v21895_v31  ;;  %19155 = vmatprep.mubr.msk.bf16.mxu1 %vm21433_vm0, %v25126_v55 }
 0x8f7   :  { %19167 = vmatprep.subr.bf16.mxu1 %v25126_v55 }
 0x8fa   :  { %v3029_v5 = vpop.f32.mrb[96].mxu1 }
 0x8fb   :  { %v3038_v0 = vpack.c.bf16 %v3029_v5, %v3029_v5  ;;  %v19133_v6 = vpop.f32.mrb[97].mxu1 }
 0x8fc   :  { %v3032_v11 = vpop.f32.mrb[98].mxu1 }
 0x8fd   :  { %v19134_v15 = vpop.f32.mrb[99].mxu1  ;;  %19156 = vmatmul.mubr.msk.bf16.vlgmr.msra.gmra.mrb[104].mxu1 %vm1491_vm2, %v3038_v0 }
 0x8fe   :  { %19175 = vmatprep.mubr.msk.bf16.mxu1 %vm21433_vm0, %v25126_v55  ;;  %19168 = vmatpush3.bf16.msra.mxu1 %v21051_v32  ;;  %v22229_v32 = vld [vmem:[%s21543_s13 + $0xf0] sm:$0xff]  }
 0x8ff   :  { %19169 = vmatprep.subr.bf16.mxu1 %v25126_v55 }
 0x902   :  { %19170 = vmatpush3.bf16.msra.mxu1 %v21052_v33  ;;  %v22232_v33 = vld [vmem:[%s21543_s13 + $0x120] sm:$0xff]  }
 0x903   :  { %19171 = vmatprep.subr.bf16.mxu1 %v25126_v55 }
 0x906   :  { %19172 = vmatpush3.bf16.msra.mxu1 %v21053_v62 }
 0x907   :  { %19173 = vmatprep.subr.bf16.mxu1 %v25126_v55 }
 0x90a   :  { %19174 = vmatpush3.bf16.msra.mxu1 %v21054_v61 }
 0x90b   :  { %19195 = vmatprep.subr.bf16.mxu1 %v25126_v55 }
 0x9a8   :  { %v3076_v16 = vpop.f32.mrb[88].mxu0 }
 0x9a9   :  { %v19139_v52 = vpop.f32.mrb[89].mxu0  ;;  %v3211_v45 = vsel %vm819_vm1, %v3076_v16, 0.0 }
 0x9aa   :  { %v3079_v17 = vpop.f32.mrb[90].mxu0  ;;  %v17204_v52 = vld [vmem:[%s22151_s30] ss:$0 sm:$0xff] }
 0x9ab   :  { %v19140_v22 = vpop.f32.mrb[91].mxu0 }
 0x9b0   :  { %v3162_v31 = vpop.f32.mrb[92].mxu0 }
 0x9b1   :  { %v19151_v3 = vpop.f32.mrb[93].mxu0  ;;  %v3214_v21 = vsel %vm819_vm1, %v3162_v31, 0.0 }
 0x9b2   :  { %v3165_v10 = vpop.f32.mrb[94].mxu0 }
 0x9b3   :  { %v19152_v25 = vpop.f32.mrb[95].mxu0 }
 0x9c8   :  { %v3119_v12 = vpop.f32.mrb[100].mxu1 }
 0x9c9   :  { %v3212_v54 = vsel %vm819_vm1, %v3119_v12, 0.0  ;;  %v19145_v1 = vpop.f32.mrb[101].mxu1 }
 0x9ca   :  { %v3213_v57 = vadd.f32 %v3212_v54, %v3211_v45  ;;  %v3122_v29 = vpop.f32.mrb[102].mxu1 }
 0x9cb   :  { %v19146_v47 = vpop.f32.mrb[103].mxu1 }
 0x9cc   :  { %v3215_v9 = vadd.f32 %v3214_v21, %v3213_v57  ;;  %v22159_v47 = vld [vmem:[%s21543_s13 + $0xc0] sm:$0xff]  }
 0x9d0   :  { %v3205_v56 = vpop.f32.mrb[104].mxu1 }
 0x9d1   :  { %v3216_v58 = vsel %vm819_vm1, %v3205_v56, 0.0  ;;  %v19157_v48 = vpop.f32.mrb[105].mxu1  ;;  %v22169_v56 = vld [vmem:[%s21543_s13 + $0xc8] sm:$0xff]  }
 0x9d2   :  { %v3217_v50 = vadd.f32 %v3216_v58, %v3215_v9  ;;  %v3208_v20 = vpop.f32.mrb[106].mxu1  ;;  %v22162_v9 = vld [vmem:[%s21543_s13 + $0xe0] sm:$0xff]   ;;  %v22172_v58 = vld [vmem:[%s21543_s13 + $0xe8] sm:$0xff]  }
 0x9d3   :  { %v19158_v53 = vpop.f32.mrb[107].mxu1 }
 0x9d4   :  { %v3218_v63 = vadd.f32 %v22036_v8, %v3217_v50  ;;  %v21049_v8 = vld [vmem:[%s22101_s7] sm:$0xff]  }
 0x9d5   :  { %19160 = vmatpush3.bf16.msra.mxu0 %v21049_v8  ;;  %v22215_v8 = vld [vmem:[%s21543_s13 + $0xd8] sm:$0xff]  }
 0x9d6   :  { %v3220_v23 = vadd.f32 %v3218_v63, %v21589_v26  ;;  %v21050_v26 = vld [vmem:[%s22101_s7 + $0x8] sm:$0xff]   ;;  %19161 = vmatprep.subr.bf16.mxu0 %v25126_v55  ;;  %v22189_v63 = vld [vmem:[%s22181_s5] ss:$0 sm:$0xff] }
 0x9d8   :  { %v3226_v4 = vsel %vm819_vm1, %v3220_v23, 0.0 }
 0x9d9   :  { %3227 = vadd.xlane.f32.xlu1 %v3226_v4  ;;  %19162 = vmatpush3.bf16.msra.mxu0 %v21050_v26  ;;  %v22192_v4 = vld [vmem:[%s22186_s10] ss:$0 sm:$0xff]  ;;  %v22218_v26 = vld [vmem:[%s21543_s13 + $0x108] sm:$0xff]  }
 0x9da   :  { %19179 = vmatprep.subr.bf16.mxu0 %v25126_v55 }
 0xa66   :  { %v3228_v14 = vpop.xlane.xlu1 %3227 }
 0xa67   :  { %v3231_v24 = vmul.f32 0.03125, %v3228_v14 }
 0xa69   :  { %v3233_v27 = vsub.f32 %v3220_v23, %v3231_v24 }
 0xa6b   :  { %v3235_v28 = vmul.f32 %v3233_v27, %v3233_v27 }
 0xa6d   :  { %v3239_v30 = vsel %vm819_vm1, %v3235_v28, 0.0  ;;  %v22202_v28 = vld [vmem:[%s21543_s13 + $0x100] sm:$0xff]  }
 0xa6e   :  { %3240 = vadd.xlane.f32.xlu1 %v3239_v30 }
 0xafb   :  { %v3241_v19 = vpop.xlane.xlu1 %3240 }
 0xafc   :  { %v3243_v37 = vmul.f32 0.03125, %v3241_v19  ;;  %v22260_v19 = vld [vmem:[%s21543_s13 + $0x140] sm:$0xff]  }
 0xafe   :  { %v3245_v38 = vadd.f32 1e-05, %v3243_v37  ;;  %v22271_v37 = vld [vmem:[%s21543_s13 + $0x118] sm:$0xff]  }
 0xb00   :  { %21229 = vrsqrt.f32 %v3245_v38  ;;  %v22274_v38 = vld [vmem:[%s21543_s13 + $0x148] sm:$0xff]  }
 0xb0a   :  { %v21230_v39 = vpop.eup %21229 }
 0xb0b   :  { %v3249_v41 = vmul.f32 %v21230_v39, %v3233_v27  ;;  %v22199_v27 = vld [vmem:[%s21543_s13 + $0xd0] sm:$0xff]   ;;  %v22302_v39 = vld [vmem:[%s21543_s13 + $0x168] sm:$0xff]  }
 0xb0d   :  { %v3257_v42 = vmul.f32 %v17198_v46, %v3249_v41  ;;  %v22299_v46 = vld [vmem:[%s21543_s13 + $0x138] sm:$0xff]  }
 0xb0e   :  { %v22323_v41 = vld [vmem:[%s21543_s13 + $0x158] sm:$0xff]  }
 0xb0f   :  { %v22129_v44 = vadd.f32 %v17199_v2, %v3257_v42  ;;  %v22332_v2 = vld [vmem:[%s21543_s13 + $0x170] sm:$0xff]   ;;  %v22339_v42 = vld [vmem:[%s21543_s13 + $0x178] sm:$0xff]   ;;  %s21447_s13 = smov 18  }
 0xb11   :  { %v3266_v59 = vpack.c.bf16 %v22129_v44, %v3264_v43 }
 0xb13   :  { %19164 = vmatmul.mubr.msk.bf16.vlgmr.msra.gmra.mrb[96].mxu0 %vm819_vm1, %v3266_v59 }
 0xb14   :  { %19183 = vmatprep.mubr.msk.bf16.mxu0 %vm21433_vm0, %v25126_v55  ;;  %19180 = vmatpush3.bf16.msra.mxu0 %v22159_v47 }
 0xb15   :  { %19181 = vmatprep.subr.bf16.mxu0 %v25126_v55 }
 0xb18   :  { %19182 = vmatpush3.bf16.msra.mxu0 %v22169_v56 }
 0xb19   :  { %19187 = vmatprep.subr.bf16.mxu0 %v25126_v55 }
 0xbe6   :  { %v3327_v60 = vpop.f32.mrb[96].mxu0 }
 0xbe7   :  { %v3328_v49 = vadd.f32 %v17200_v51, %v3327_v60  ;;  %v19165_v7 = vpop.f32.mrb[97].mxu0 }
 0xbe8   :  { %v3330_v5 = vpop.f32.mrb[98].mxu0 }
 0xbe9   :  { %v3331_v0 = vadd.f32 %v17200_v51, %v3330_v5  ;;  %v19166_v6 = vpop.f32.mrb[99].mxu0  ;;  %v3334_v11 = vmax.f32 %v3328_v49, 0.0  ;;  %v22351_v5 = vld [vmem:[%s21736_s25 + $0x10] ss:$0 sm:$0xff] }
 0xbeb   :  { %v3335_v15 = vmax.f32 %v3331_v0, 0.0 }
 0xbed   :  { %v3336_v16 = vpack.c.bf16 %v3335_v15, %v3334_v11 }
 0xbef   :  { %19176 = vmatmul.mubr.msk.bf16.vlgmr.msra.gmra.mrb[108].mxu1 %vm3376_vm4, %v3336_v16 }
 0xbf0   :  { %19199 = vmatprep.mubr.msk.bf16.mxu1 %vm21433_vm0, %v25126_v55  ;;  %19196 = vmatpush3.bf16.msra.mxu1 %v22162_v9 }
 0xbf1   :  { %19197 = vmatprep.subr.bf16.mxu1 %v25126_v55 }
 0xbf4   :  { %19198 = vmatpush3.bf16.msra.mxu1 %v22172_v58 }
 0xbf5   :  { %19211 = vmatprep.subr.bf16.mxu1 %v25126_v55 }
 0xcc2   :  { %v3414_v17 = vpop.f32.mrb[108].mxu1 }
 0xcc3   :  { %v3415_v22 = vadd.f32 %v17204_v52, %v3414_v17  ;;  %v19177_v31 = vpop.f32.mrb[109].mxu1 }
 0xcc4   :  { %v3417_v3 = vpop.f32.mrb[110].mxu1 }
 0xcc5   :  { %v22154_v10 = vadd.f32 %v17204_v52, %v3417_v3  ;;  %v19178_v25 = vpop.f32.mrb[111].mxu1  ;;  %v3421_v12 = vadd.f32 %v3415_v22, %v3264_v43 }
 0xcc6   :  { %v22355_v25 = vld [vmem:[%s21736_s25 + $0xc] ss:$0 sm:$0xff] }
 0xcc7   :  { %v3425_v45 = vsel %vm819_vm1, %v3421_v12, 0.0 }
 0xcc8   :  { %3426 = vadd.xlane.f32.xlu0 %v3425_v45  ;;  %v22359_v45 = vld [vmem:[%s21736_s25 + $0x12] ss:$0 sm:$0xff] }
 0xd55   :  { %v3427_v54 = vpop.xlane.xlu0 %3426 }
 0xd56   :  { %v3431_v1 = vmul.f32 0.03125, %v3427_v54 }
 0xd58   :  { %v3433_v57 = vsub.f32 %v3421_v12, %v3431_v1 }
 0xd5a   :  { %v3435_v29 = vmul.f32 %v3433_v57, %v3433_v57 }
 0xd5c   :  { %v3437_v21 = vsel %vm819_vm1, %v3435_v29, 0.0 }
 0xd5d   :  { %3438 = vadd.xlane.f32.xlu1 %v3437_v21 }
 0xdea   :  { %v3439_v48 = vpop.xlane.xlu1 %3438 }
 0xdeb   :  { %v3443_v50 = vmul.f32 0.03125, %v3439_v48 }
 0xded   :  { %v3445_v20 = vadd.f32 1e-05, %v3443_v50 }
 0xdef   :  { %21231 = vrsqrt.f32 %v3445_v20 }
 0xdf9   :  { %v21232_v53 = vpop.eup %21231 }
 0xdfa   :  { %v3449_v23 = vmul.f32 %v21232_v53, %v3433_v57 }
 0xdfc   :  { %v3457_v14 = vmul.f32 %v22189_v63, %v3449_v23 }
 0xdfe   :  { %v22196_v24 = vadd.f32 %v22192_v4, %v3457_v14 }
 0xe00   :  { %v22206_v30 = vpack.c.bf16 %v22196_v24, %v22196_v24 }
 0xe02   :  { %19184 = vmatmul.mubr.msk.bf16.vlgmr.msra.gmra.mrb[100].mxu0 %vm819_vm1, %v22206_v30  ;;  %19200 = vmatmul.mubr.msk.bf16.vlgmr.msra.gmra.mrb[112].mxu1 %vm819_vm1, %v22206_v30 }
 0xe03   :  { %19188 = vmatpush3.bf16.msra.mxu0 %v22199_v27  ;;  %19212 = vmatpush3.bf16.msra.mxu1 %v22202_v28 }
 0xe04   :  { %19189 = vmatprep.subr.bf16.mxu0 %v25126_v55  ;;  %19213 = vmatprep.subr.bf16.mxu1 %v25126_v55 }
 0xe05   :  { %19191 = vmatprep.mubr.msk.bf16.mxu0 %vm21433_vm0, %v25126_v55  ;;  %19215 = vmatprep.mubr.msk.bf16.mxu1 %vm21433_vm0, %v25126_v55 }
 0xe07   :  { %19190 = vmatpush3.bf16.msra.mxu0 %v22215_v8  ;;  %19214 = vmatpush3.bf16.msra.mxu1 %v22218_v26 }
 0xe08   :  { %19203 = vmatprep.subr.bf16.mxu0 %v25126_v55  ;;  %19227 = vmatprep.subr.bf16.mxu1 %v25126_v55 }
 0xe0a   :  { %19192 = vmatmul.mubr.msk.bf16.vlgmr.msra.gmra.mrb[104].mxu0 %vm819_vm1, %v22206_v30  ;;  %19216 = vmatmul.mubr.msk.bf16.vlgmr.msra.gmra.mrb[116].mxu1 %vm819_vm1, %v22206_v30 }
 0xe0b   :  { %19204 = vmatpush3.bf16.msra.mxu0 %v22229_v32  ;;  %19228 = vmatpush3.bf16.msra.mxu1 %v22232_v33 }
 0xe0c   :  { %19205 = vmatprep.subr.bf16.mxu0 %v25126_v55  ;;  %19229 = vmatprep.subr.bf16.mxu1 %v25126_v55 }
 0xe0d   :  { %19207 = vmatprep.mubr.msk.bf16.mxu0 %vm21433_vm0, %v25126_v55  ;;  %19231 = vmatprep.mubr.msk.bf16.mxu1 %vm21433_vm0, %v25126_v55 }
 0xe0f   :  { %19206 = vmatpush3.bf16.msra.mxu0 %v22243_v34  ;;  %19230 = vmatpush3.bf16.msra.mxu1 %v22246_v35 }
 0xe10   :  { %19219 = vmatprep.subr.bf16.mxu0 %v25126_v55  ;;  %19243 = vmatprep.subr.bf16.mxu1 %v25126_v55 }
 0xe12   :  { %19208 = vmatmul.mubr.msk.bf16.vlgmr.msra.gmra.mrb[108].mxu0 %vm819_vm1, %v22206_v30  ;;  %19232 = vmatmul.mubr.msk.bf16.vlgmr.msra.gmra.mrb[120].mxu1 %vm819_vm1, %v22206_v30 }
 0xe13   :  { %19220 = vmatpush3.bf16.msra.mxu0 %v22257_v36  ;;  %19244 = vmatpush3.bf16.msra.mxu1 %v22260_v19 }
 0xe14   :  { %19221 = vmatprep.subr.bf16.mxu0 %v25126_v55  ;;  %19245 = vmatprep.subr.bf16.mxu1 %v25126_v55 }
 0xe15   :  { %19223 = vmatprep.mubr.msk.bf16.mxu0 %vm21433_vm0, %v25126_v55  ;;  %19247 = vmatprep.mubr.msk.bf16.mxu1 %vm21433_vm0, %v25126_v55 }
 0xe17   :  { %19222 = vmatpush3.bf16.msra.mxu0 %v22271_v37  ;;  %19246 = vmatpush3.bf16.msra.mxu1 %v22274_v38 }
 0xe18   :  { %19235 = vmatprep.subr.bf16.mxu0 %v25126_v55  ;;  %19259 = vmatprep.subr.bf16.mxu1 %v25126_v55 }
 0xe1a   :  { %19224 = vmatmul.mubr.msk.bf16.vlgmr.msra.gmra.mrb[112].mxu0 %vm819_vm1, %v22206_v30  ;;  %19248 = vmatmul.mubr.msk.bf16.vlgmr.msra.gmra.mrb[124].mxu1 %vm819_vm1, %v22206_v30 }
 0xe1b   :  { %19236 = vmatpush3.bf16.msra.mxu0 %v22285_v13  ;;  %19260 = vmatpush3.bf16.msra.mxu1 %v22288_v18 }
 0xe1c   :  { %19237 = vmatprep.subr.bf16.mxu0 %v25126_v55  ;;  %19261 = vmatprep.subr.bf16.mxu1 %v25126_v55 }
 0xe1d   :  { %19239 = vmatprep.mubr.msk.bf16.mxu0 %vm21433_vm0, %v25126_v55  ;;  %19263 = vmatprep.mubr.msk.bf16.mxu1 %vm21433_vm0, %v25126_v55 }
 0xe1f   :  { %19238 = vmatpush3.bf16.msra.mxu0 %v22299_v46  ;;  %19262 = vmatpush3.bf16.msra.mxu1 %v22302_v39 }
 0xe20   :  { %19251 = vmatprep.subr.bf16.mxu0 %v25126_v55  ;;  %19275 = vmatprep.subr.bf16.mxu1 %v25126_v55 }
 0xe22   :  { %19240 = vmatmul.mubr.msk.bf16.vlgmr.msra.gmra.mrb[116].mxu0 %vm819_vm1, %v22206_v30  ;;  %19264 = vmatmul.mubr.msk.bf16.vlgmr.msra.gmra.mrb[128].mxu1 %vm819_vm1, %v22206_v30 }
 0xe23   :  { %19252 = vmatpush3.bf16.msra.mxu0 %v22313_v40  ;;  %19255 = vmatprep.mubr.msk.bf16.mxu0 %vm21433_vm0, %v25126_v55 }
 0xe24   :  { %19253 = vmatprep.subr.bf16.mxu0 %v25126_v55  ;;  %19277 = vmatprep.mubr.msk.bf16.mxu1 %vm21433_vm0, %v25126_v55 }
 0xe27   :  { %19254 = vmatpush3.bf16.msra.mxu0 %v22323_v41 }
 0xe28   :  { %19267 = vmatprep.subr.bf16.mxu0 %v25126_v55 }
 0xe2a   :  { %19256 = vmatmul.mubr.msk.bf16.vlgmr.msra.gmra.mrb[120].mxu0 %vm819_vm1, %v22206_v30 }
 0xe2b   :  { %19268 = vmatpush3.bf16.msra.mxu0 %v22332_v2  ;;  %19271 = vmatprep.mubr.msk.bf16.mxu0 %vm21433_vm0, %v25126_v55 }
 0xe2c   :  { %19269 = vmatprep.subr.bf16.mxu0 %v25126_v55 }
 0xe2f   :  { %19270 = vmatpush3.bf16.msra.mxu0 %v22339_v42 }
 0xe30   :  { %19281 = vmatprep.subr.bf16.mxu0 %v25126_v55 }
 0xe32   :  { %19272 = vmatmul.mubr.msk.bf16.vlgmr.msra.gmra.mrb[124].mxu0 %vm819_vm1, %v22206_v30 }
 0xe33   :  { %19283 = vmatprep.mubr.msk.bf16.mxu0 %vm21433_vm0, %v25126_v55 }
 0xed5   :  { %v3614_v43 = vpop.f32.mrb[100].mxu0  ;;  %v3718_v59 = vpop.f32.mrb[112].mxu1 }
 0xed6   :  { %v19185_v62 = vpop.f32.mrb[101].mxu0  ;;  %v19201_v61 = vpop.f32.mrb[113].mxu1  ;;  %v3615_v54 = vadd.f32 %v22355_v25, %v3614_v43 }
 0xed7   :  { %v3617_v51 = vpop.f32.mrb[102].mxu0  ;;  %v3721_v60 = vpop.f32.mrb[114].mxu1  ;;  %v22365_v62 = vld [vmem:[%s21736_s25 + $0xe] ss:$0 sm:$0xff]  ;;  %v22370_v61 = vld [vmem:[%s21736_s25 + $0x11] ss:$0 sm:$0xff] }
 0xed8   :  { %v19186_v49 = vpop.f32.mrb[103].mxu0  ;;  %v19202_v7 = vpop.f32.mrb[115].mxu1  ;;  %v4240_v53 = vpack.c.bf16 %v3615_v54, %v3615_v54  ;;  %v22373_v51 = vld [vmem:[%s21736_s25 + $0x14] ss:$0 sm:$0xff]  ;;  %v3719_v60 = vadd.f32 %v22365_v62, %v3718_v59 }
 0xedd   :  { %v3666_v0 = vpop.f32.mrb[104].mxu0  ;;  %v3846_v6 = vpop.f32.mrb[116].mxu1 }
 0xede   :  { %v3847_v11 = vadd.f32 %v22351_v5, %v3846_v6  ;;  %v19193_v15 = vpop.f32.mrb[105].mxu0  ;;  %v19217_v16 = vpop.f32.mrb[117].mxu1 }
 0xedf   :  { %v3669_v52 = vpop.f32.mrb[106].mxu0  ;;  %v3849_v17 = vpop.f32.mrb[118].mxu1 }
 0xee0   :  { %v4244_v22 = vpack.c.bf16 %v3847_v11, %v3847_v11  ;;  %v19194_v31 = vpop.f32.mrb[107].mxu0  ;;  %v19218_v3 = vpop.f32.mrb[119].mxu1 }
 0xee2   :  { %v4252_v12 = vsel %vm1491_vm2, %v4244_v22, 0  ;;  %v4242_v22 = vpack.c.bf16 %v3719_v60, %v3719_v60 }
 0xee3   :  { %19276 = vmatpush3.bf16.xpose.msra.mxu1 %v4252_v12 }
 0xee4   :  { %19287 = vmatprep.subr.bf16.mxu1 %v25126_v55 }
 0xee5   :  { %v3770_v1 = vpop.f32.mrb[108].mxu0  ;;  %v3950_v57 = vpop.f32.mrb[120].mxu1 }
 0xee6   :  { %v3951_v29 = vadd.f32 %v22359_v45, %v3950_v57  ;;  %v19209_v21 = vpop.f32.mrb[109].mxu0  ;;  %v19233_v48 = vpop.f32.mrb[121].mxu1  ;;  %v22382_v57 = vld [vmem:[%s21736_s25 + $0xd] ss:$0 sm:$0xff] }
 0xee7   :  { %v3773_v50 = vpop.f32.mrb[110].mxu0  ;;  %v3953_v20 = vpop.f32.mrb[122].mxu1  ;;  %v22388_v21 = vld [vmem:[%s21736_s25 + $0x13] ss:$0 sm:$0xff]  ;;  %v3667_v48 = vadd.f32 %v22382_v57, %v3666_v0 }
 0xee8   :  { %v4246_v23 = vpack.c.bf16 %v3951_v29, %v3951_v29  ;;  %v19210_v14 = vpop.f32.mrb[111].mxu0  ;;  %v19234_v30 = vpop.f32.mrb[123].mxu1 }
 0xee9   :  { %v4241_v60 = vpack.c.bf16 %v3667_v48, %v3667_v48 }
 0xeea   :  { %19278 = vmatmul.mubr.msk.bf16.vlgmr.msra.gmra.mrb[132].mxu1 %vm1491_vm2, %v4240_v53  ;;  %v4344_v43 = vsel %vm1491_vm2, %v4246_v23, 0 }
 0xeeb   :  { %19288 = vmatpush3.bf16.xpose.msra.mxu1 %v4344_v43  ;;  %19289 = vmatprep.mubr.msk.bf16.mxu1 %vm21433_vm0, %v25126_v55 }
 0xeec   :  { %19299 = vmatprep.subr.bf16.mxu1 %v25126_v55 }
 0xeed   :  { %v3898_v49 = vpop.f32.mrb[112].mxu0  ;;  %v4078_v7 = vpop.f32.mrb[124].mxu1 }
 0xeee   :  { %v3899_v6 = vadd.f32 %v22370_v61, %v3898_v49  ;;  %v4079_v11 = vadd.f32 %v22373_v51, %v4078_v7  ;;  %v19225_v15 = vpop.f32.mrb[113].mxu0  ;;  %v19249_v16 = vpop.f32.mrb[125].mxu1 }
 0xeef   :  { %v3901_v52 = vpop.f32.mrb[114].mxu0  ;;  %v4081_v17 = vpop.f32.mrb[126].mxu1  ;;  %v22404_v15 = vld [vmem:[%s21736_s25 + $0x15] ss:$0 sm:$0xff] }
 0xef0   :  { %v4245_v31 = vpack.c.bf16 %v3899_v6, %v3899_v6  ;;  %v4484_v3 = vpack.c.bf16 %v4079_v11, %v4079_v11  ;;  %v19226_v12 = vpop.f32.mrb[115].mxu0  ;;  %v19250_v54 = vpop.f32.mrb[127].mxu1  ;;  %v22399_v6 = vld [vmem:[%s21736_s25 + $0xf] ss:$0 sm:$0xff] }
 0xef1   :  { %v3771_v16 = vadd.f32 %v22399_v6, %v3770_v1 }
 0xef2   :  { %19290 = vmatmul.mubr.msk.bf16.vlgmr.msra.gmra.mrb[136].mxu1 %vm1491_vm2, %v4242_v22  ;;  %v4298_v59 = vsel %vm1491_vm2, %v4245_v31, 0  ;;  %v4492_v29 = vsel %vm1735_vm3, %v4484_v3, 0 }
 0xef3   :  { %19282 = vmatpush3.bf16.xpose.msra.mxu0 %v4298_v59  ;;  %19300 = vmatpush3.bf16.msra.mxu1 %v4492_v29  ;;  %v4243_v3 = vpack.c.bf16 %v3771_v16, %v3771_v16 }
 0xef4   :  { %19293 = vmatprep.subr.bf16.mxu0 %v25126_v55  ;;  %19301 = vmatprep.mubr.msk.bf16.mxu1 %vm21433_vm0, %v25126_v55 }
 0xef5   :  { %v4002_v50 = vpop.f32.mrb[116].mxu0  ;;  %v22394_v20 = vpop.f32.mrb[128].mxu1  ;;  %19311 = vmatprep.subr.bf16.mxu1 %v25126_v55 }
 0xef6   :  { %v4003_v53 = vadd.f32 %v22388_v21, %v4002_v50  ;;  %v19241_v23 = vpop.f32.mrb[117].mxu0  ;;  %v19265_v14 = vpop.f32.mrb[129].mxu1 }
 0xef7   :  { %v4005_v30 = vpop.f32.mrb[118].mxu0  ;;  %v4185_v43 = vpop.f32.mrb[130].mxu1 }
 0xef8   :  { %v4247_v49 = vpack.c.bf16 %v4003_v53, %v4003_v53  ;;  %v19242_v0 = vpop.f32.mrb[119].mxu0  ;;  %v19266_v7 = vpop.f32.mrb[131].mxu1 }
 0xefa   :  { %19284 = vmatmul.mubr.msk.bf16.vlgmr.msra.gmra.mrb[128].mxu0 %vm1491_vm2, %v4241_v60  ;;  %v4390_v11 = vsel %vm1491_vm2, %v4247_v49, 0 }
 0xefb   :  { %19294 = vmatpush3.bf16.xpose.msra.mxu0 %v4390_v11  ;;  %19295 = vmatprep.mubr.msk.bf16.mxu0 %vm21433_vm0, %v25126_v55 }
 0xefc   :  { %19305 = vmatprep.subr.bf16.mxu0 %v25126_v55 }
 0xefd   :  { %v4130_v52 = vpop.f32.mrb[120].mxu0 }
 0xefe   :  { %v4131_v17 = vadd.f32 %v22404_v15, %v4130_v52  ;;  %v19257_v22 = vpop.f32.mrb[121].mxu0 }
 0xeff   :  { %v4133_v31 = vpop.f32.mrb[122].mxu0 }
 0xf00   :  { %v4485_v12 = vpack.c.bf16 %v4131_v17, %v4131_v17  ;;  %v19258_v54 = vpop.f32.mrb[123].mxu0 }
 0xf02   :  { %19296 = vmatmul.mubr.msk.bf16.vlgmr.msra.gmra.mrb[132].mxu0 %vm1491_vm2, %v4243_v3  ;;  %v4538_v59 = vsel %vm1735_vm3, %v4485_v12, 0 }
 0xf03   :  { %19306 = vmatpush3.bf16.msra.mxu0 %v4538_v59  ;;  %19307 = vmatprep.mubr.msk.bf16.mxu0 %vm21433_vm0, %v25126_v55 }
 0xf04   :  { %19317 = vmatprep.subr.bf16.mxu0 %v25126_v55 }
 0xf05   :  { %v22416_v1 = vpop.f32.mrb[124].mxu0 }
 0xf06   :  { %v19273_v29 = vpop.f32.mrb[125].mxu0 }
 0xf07   :  { %v4237_v48 = vpop.f32.mrb[126].mxu0 }
 0xf08   :  { %v19274_v50 = vpop.f32.mrb[127].mxu0 }
 0xfbd   :  { %v4288_v53 = vpop.f32.mrb[132].mxu1 }
 0xfbe   :  { %v19279_v23 = vpop.f32.mrb[133].mxu1  ;;  %v4432_v14 = vmul.f32 0.35355338, %v4288_v53 }
 0xfbf   :  { %v4291_v30 = vpop.f32.mrb[134].mxu1 }
 0xfc0   :  { %v19280_v43 = vpop.f32.mrb[135].mxu1  ;;  %v4436_v60 = vsel %vm1491_vm2, %v4432_v14, -inf }
 0xfc1   :  { %4437 = vmax.xlane.f32.xlu0 %v4436_v60 }
 0xfc5   :  { %v4380_v49 = vpop.f32.mrb[136].mxu1 }
 0xfc6   :  { %v19291_v0 = vpop.f32.mrb[137].mxu1  ;;  %v4434_v7 = vmul.f32 0.35355338, %v4380_v49 }
 0xfc7   :  { %v4383_v11 = vpop.f32.mrb[138].mxu1 }
 0xfc8   :  { %v19292_v16 = vpop.f32.mrb[139].mxu1  ;;  %v4442_v52 = vsel %vm1491_vm2, %v4434_v7, -inf }
 0xfc9   :  { %4443 = vmax.xlane.f32.xlu0 %v4442_v52 }
 0xfcd   :  { %v4334_v17 = vpop.f32.mrb[128].mxu0 }
 0xfce   :  { %v19285_v22 = vpop.f32.mrb[129].mxu0  ;;  %v4433_v31 = vmul.f32 0.35355338, %v4334_v17 }
 0xfcf   :  { %v4337_v3 = vpop.f32.mrb[130].mxu0 }
 0xfd0   :  { %v19286_v12 = vpop.f32.mrb[131].mxu0  ;;  %v4439_v54 = vsel %vm1491_vm2, %v4433_v31, -inf }
 0xfd1   :  { %4440 = vmax.xlane.f32.xlu1 %v4439_v54 }
 0xfd5   :  { %v4426_v59 = vpop.f32.mrb[132].mxu0 }
 0xfd6   :  { %v19297_v29 = vpop.f32.mrb[133].mxu0  ;;  %v4435_v48 = vmul.f32 0.35355338, %v4426_v59 }
 0xfd7   :  { %v4429_v50 = vpop.f32.mrb[134].mxu0 }
 0xfd8   :  { %v19298_v53 = vpop.f32.mrb[135].mxu0  ;;  %v4445_v23 = vsel %vm1491_vm2, %v4435_v48, -inf }
 0xfd9   :  { %4446 = vmax.xlane.f32.xlu1 %v4445_v23 }
0x104e   :  { %v4438_v30 = vpop.xlane.xlu0 %4437 }
0x104f   :  { %v4448_v43 = vsub.f32 %v4432_v14, %v4438_v30  ;;  %v3422_v14 = vadd.f32 %v22154_v10, %v22129_v44 }
0x1051   :  { %v4452_v60 = vmul.f32 1.442695, %v4448_v43  ;;  %v3428_v50 = vsel %vm819_vm1, %v3422_v14, 0.0 }
0x1053   :  { %21233 = vpow2.f32 %v4452_v60  ;;  %v22430_v60 = vld [vmem:[%s21736_s25 + $0x16] ss:$0 sm:$0xff] }
0x1054   :  { %v4183_v44 = vadd.f32 %v22430_v60, %v22394_v20 }
0x1056   :  { %v4444_v49 = vpop.xlane.xlu0 %4443 }
0x1057   :  { %v4450_v0 = vsub.f32 %v4434_v7, %v4444_v49  ;;  %v4486_v49 = vpack.c.bf16 %v4183_v44, %v4183_v44 }
0x1059   :  { %v4456_v11 = vmul.f32 1.442695, %v4450_v0 }
0x105b   :  { %21235 = vpow2.f32 %v4456_v11 }
0x105d   :  { %v21234_v16 = vpop.eup %21233 }
0x105e   :  { %v4441_v52 = vpop.xlane.xlu1 %4440  ;;  %v4460_v17 = vsel %vm1491_vm2, %v21234_v16, 0.0 }
0x105f   :  { %v4449_v22 = vsub.f32 %v4433_v31, %v4441_v52  ;;  %4461 = vadd.xlane.f32.xlu0 %v4460_v17 }
0x1061   :  { %v4454_v3 = vmul.f32 1.442695, %v4449_v22 }
0x1063   :  { %21237 = vpow2.f32 %v4454_v3 }
0x1065   :  { %v21236_v12 = vpop.eup %21235 }
0x1066   :  { %v4447_v54 = vpop.xlane.xlu1 %4446  ;;  %v4466_v59 = vsel %vm1491_vm2, %v21236_v12, 0.0 }
0x1067   :  { %v4451_v29 = vsub.f32 %v4435_v48, %v4447_v54  ;;  %4467 = vadd.xlane.f32.xlu0 %v4466_v59  ;;  %v4584_v54 = vsel %vm1735_vm3, %v4486_v49, 0 }
0x1069   :  { %v4458_v7 = vmul.f32 1.442695, %v4451_v29 }
0x106b   :  { %21239 = vpow2.f32 %v4458_v7  ;;  %3429 = vadd.xlane.f32.xlu0 %v3428_v50  ;;  %v22441_v7 = vld [vmem:[%s21736_s25 + $0x17] ss:$0 sm:$0xff] }
0x106c   :  { %v4235_v50 = vadd.f32 %v22441_v7, %v22416_v1 }
0x106d   :  { %v21238_v53 = vpop.eup %21237 }
0x106e   :  { %v4463_v31 = vsel %vm1491_vm2, %v21238_v53, 0.0 }
0x106f   :  { %4464 = vadd.xlane.f32.xlu1 %v4463_v31 }
0x1075   :  { %v21240_v23 = vpop.eup %21239 }
0x1076   :  { %v4469_v30 = vsel %vm1491_vm2, %v21240_v23, 0.0 }
0x1077   :  { %4470 = vadd.xlane.f32.xlu1 %v4469_v30 }
0x10ec   :  { %v4462_v43 = vpop.xlane.xlu0 %4461 }
0x10ed   :  { %21241 = vrcp.f32 %v4462_v43  ;;  %v4487_v43 = vpack.c.bf16 %v4235_v50, %v4235_v50 }
0x10f4   :  { %v4468_v10 = vpop.xlane.xlu0 %4467 }
0x10f5   :  { %21243 = vrcp.f32 %v4468_v10 }
0x10f7   :  { %v21242_v48 = vpop.eup %21241 }
0x10f8   :  { %v3430_v0 = vpop.xlane.xlu0 %3429  ;;  %v4476_v11 = vmul.f32 %v21242_v48, %v21234_v16 }
0x10f9   :  { %v3432_v52 = vmul.f32 0.03125, %v3430_v0 }
0x10fa   :  { %v4480_v17 = vpack.c.bf16 %v4476_v11, %v4476_v11  ;;  %v17273_v11 = vld [vmem:[%s21843_s29 + $0x14] sm:$0xf] }
0x10fb   :  { %v3434_v22 = vsub.f32 %v3422_v14, %v3432_v52  ;;  %v22464_v52 = vsel %vm1735_vm3, %v17273_v11, 0 }
0x10fc   :  { %v4465_v3 = vpop.xlane.xlu1 %4464  ;;  %19302 = vmatmul.mubr.msk.bf16.vlgmr.msra.gmra.mrb[140].mxu1 %vm1491_vm2, %v4480_v17 }
0x10fd   :  { %21245 = vrcp.f32 %v4465_v3  ;;  %19312 = vmatpush3.bf16.msra.mxu1 %v4584_v54  ;;  %v3436_v59 = vmul.f32 %v3434_v22, %v3434_v22  ;;  %19313 = vmatprep.mubr.msk.bf16.mxu1 %vm21433_vm0, %v25126_v55  ;;  %v17274_v54 = vld [vmem:[%s21843_s29 + $0x18] sm:$0xf] }
0x10fe   :  { %19323 = vmatprep.subr.bf16.mxu1 %v25126_v55 }
0x10ff   :  { %v21244_v20 = vpop.eup %21243  ;;  %v3440_v16 = vsel %vm819_vm1, %v3436_v59, 0.0 }
0x1100   :  { %3441 = vadd.xlane.f32.xlu1 %v3440_v16  ;;  %v4478_v29 = vmul.f32 %v21244_v20, %v21236_v12  ;;  %v4630_v12 = vsel %vm1735_vm3, %v4487_v43, 0 }
0x1102   :  { %v4482_v14 = vpack.c.bf16 %v4478_v29, %v4478_v29  ;;  %v22470_v29 = vsel %vm1735_vm3, %v17274_v54, 0 }
0x1104   :  { %v4471_v31 = vpop.xlane.xlu1 %4470  ;;  %19314 = vmatmul.mubr.msk.bf16.vlgmr.msra.gmra.mrb[144].mxu1 %vm1491_vm2, %v4482_v14 }
0x1105   :  { %21247 = vrcp.f32 %v4471_v31  ;;  %19325 = vmatprep.mubr.msk.bf16.mxu1 %vm21433_vm0, %v25126_v55 }
0x1107   :  { %v21246_v30 = vpop.eup %21245 }
0x1108   :  { %v4477_v44 = vmul.f32 %v21246_v30, %v21238_v53  ;;  %v17272_v53 = vld [vmem:[%s21843_s29 + $0x10] sm:$0xf] }
0x1109   :  { %v22458_v0 = vsel %vm1735_vm3, %v17272_v53, 0 }
0x110a   :  { %v4481_v10 = vpack.c.bf16 %v4477_v44, %v4477_v44  ;;  %19324 = vmatpush3.bf16.msra.mxu1 %v22458_v0 }
0x110b   :  { %19335 = vmatprep.subr.bf16.mxu1 %v25126_v55 }
0x110c   :  { %19308 = vmatmul.mubr.msk.bf16.vlgmr.msra.gmra.mrb[136].mxu0 %vm1491_vm2, %v4481_v10 }
0x110d   :  { %19318 = vmatpush3.bf16.msra.mxu0 %v4630_v12  ;;  %19319 = vmatprep.mubr.msk.bf16.mxu0 %vm21433_vm0, %v25126_v55 }
0x110e   :  { %19329 = vmatprep.subr.bf16.mxu0 %v25126_v55 }
0x110f   :  { %v21248_v1 = vpop.eup %21247 }
0x1110   :  { %v4479_v48 = vmul.f32 %v21248_v1, %v21240_v23 }
0x1112   :  { %v4483_v49 = vpack.c.bf16 %v4479_v48, %v4479_v48 }
0x1114   :  { %19320 = vmatmul.mubr.msk.bf16.vlgmr.msra.gmra.mrb[140].mxu0 %vm1491_vm2, %v4483_v49 }
0x1115   :  { %19331 = vmatprep.mubr.msk.bf16.mxu0 %vm21433_vm0, %v25126_v55  ;;  %19330 = vmatpush3.bf16.msra.mxu0 %v22464_v52 }
0x1116   :  { %19341 = vmatprep.subr.bf16.mxu0 %v25126_v55 }
0x118d   :  { %v3442_v23 = vpop.xlane.xlu1 %3441 }
0x118e   :  { %v3444_v17 = vmul.f32 0.03125, %v3442_v23 }
0x1190   :  { %v3446_v3 = vadd.f32 1e-05, %v3444_v17 }
0x1192   :  { %21249 = vrsqrt.f32 %v3446_v3 }
0x119c   :  { %v21250_v14 = vpop.eup %21249 }
0x119d   :  { %v3450_v30 = vmul.f32 %v21250_v14, %v3434_v22  ;;  %v17275_v22 = vld [vmem:[%s21843_s29 + $0x1c] sm:$0xf]  ;;  %s23951_s29 = sld [smem:[%s25125_s0 + %s21461_s8]]  }
0x119f   :  { %v3458_v44 = vmul.f32 %v22189_v63, %v3450_v30 }
0x11a1   :  { %v22483_v49 = vadd.f32 %v22192_v4, %v3458_v44 }
0x11a3   :  { %v22490_v63 = vpack.c.bf16 %v22483_v49, %v22483_v49 }
0x11cf   :  { %v4528_v59 = vpop.f32.mrb[140].mxu1 }
0x11d0   :  { %v4672_v20 = vpack.c.bf16 %v4528_v59, %v4528_v59  ;;  %v19303_v16 = vpop.f32.mrb[141].mxu1 }
0x11d1   :  { %v4531_v50 = vpop.f32.mrb[142].mxu1 }
0x11d2   :  { %v19304_v31 = vpop.f32.mrb[143].mxu1  ;;  %19326 = vmatmul.mubr.msk.bf16.vlgmr.msra.gmra.mrb[148].mxu1 %vm1491_vm2, %v4672_v20 }
0x11d3   :  { %19336 = vmatpush3.bf16.msra.mxu1 %v22470_v29  ;;  %19337 = vmatprep.mubr.msk.bf16.mxu1 %vm21433_vm0, %v25126_v55 }
0x11d4   :  { %19347 = vmatprep.subr.bf16.mxu1 %v25126_v55 }
0x11d7   :  { %v4620_v43 = vpop.f32.mrb[144].mxu1 }
0x11d8   :  { %v4674_v10 = vpack.c.bf16 %v4620_v43, %v4620_v43  ;;  %v19315_v12 = vpop.f32.mrb[145].mxu1 }
0x11d9   :  { %v4623_v1 = vpop.f32.mrb[146].mxu1 }
0x11da   :  { %v19316_v48 = vpop.f32.mrb[147].mxu1  ;;  %19338 = vmatmul.mubr.msk.bf16.vlgmr.msra.gmra.mrb[152].mxu1 %vm1491_vm2, %v4674_v10 }
0x11db   :  { %19348 = vmatpush3.bf16.msra.mxu1 %v22159_v47  ;;  %19351 = vmatprep.mubr.msk.bf16.mxu1 %vm21433_vm0, %v25126_v55  ;;  %v22494_v47 = vsel %vm1735_vm3, %v17275_v22, 0 }
0x11dc   :  { %19349 = vmatprep.subr.bf16.mxu1 %v25126_v55 }
0x11df   :  { %v4574_v53 = vpop.f32.mrb[136].mxu0  ;;  %19350 = vmatpush3.bf16.msra.mxu1 %v22169_v56 }
0x11e0   :  { %v4673_v11 = vpack.c.bf16 %v4574_v53, %v4574_v53  ;;  %v19309_v23 = vpop.f32.mrb[137].mxu0  ;;  %19363 = vmatprep.subr.bf16.mxu1 %v25126_v55 }
0x11e1   :  { %v4577_v17 = vpop.f32.mrb[138].mxu0 }
0x11e2   :  { %v19310_v4 = vpop.f32.mrb[139].mxu0  ;;  %19332 = vmatmul.mubr.msk.bf16.vlgmr.msra.gmra.mrb[144].mxu0 %vm1491_vm2, %v4673_v11  ;;  %19352 = vmatmul.mubr.msk.bf16.vlgmr.msra.gmra.mrb[156].mxu1 %vm819_vm1, %v22490_v63 }
0x11e3   :  { %19342 = vmatpush3.bf16.msra.mxu0 %v22494_v47  ;;  %19364 = vmatpush3.bf16.msra.mxu1 %v22162_v9 }
0x11e4   :  { %19365 = vmatprep.subr.bf16.mxu1 %v25126_v55  ;;  %19343 = vmatprep.mubr.msk.bf16.mxu0 %vm21433_vm0, %v25126_v55 }
0x11e5   :  { %19367 = vmatprep.mubr.msk.bf16.mxu1 %vm21433_vm0, %v25126_v55  ;;  %19355 = vmatprep.subr.bf16.mxu0 %v25126_v55 }
0x11e7   :  { %v4666_v56 = vpop.f32.mrb[140].mxu0  ;;  %19366 = vmatpush3.bf16.msra.mxu1 %v22172_v58 }
0x11e8   :  { %v4675_v3 = vpack.c.bf16 %v4666_v56, %v4666_v56  ;;  %v19321_v54 = vpop.f32.mrb[141].mxu0  ;;  %19379 = vmatprep.subr.bf16.mxu1 %v25126_v55 }
0x11e9   :  { %v4669_v59 = vpop.f32.mrb[142].mxu0 }
0x11ea   :  { %v19322_v20 = vpop.f32.mrb[143].mxu0  ;;  %19344 = vmatmul.mubr.msk.bf16.vlgmr.msra.gmra.mrb[148].mxu0 %vm1491_vm2, %v4675_v3  ;;  %19368 = vmatmul.mubr.msk.bf16.vlgmr.msra.gmra.mrb[160].mxu1 %vm819_vm1, %v22490_v63 }
0x11eb   :  { %19356 = vmatpush3.bf16.msra.mxu0 %v22199_v27  ;;  %19380 = vmatpush3.bf16.msra.mxu1 %v22202_v28 }
0x11ec   :  { %19357 = vmatprep.subr.bf16.mxu0 %v25126_v55  ;;  %19381 = vmatprep.subr.bf16.mxu1 %v25126_v55 }
0x11ed   :  { %19359 = vmatprep.mubr.msk.bf16.mxu0 %vm21433_vm0, %v25126_v55  ;;  %19383 = vmatprep.mubr.msk.bf16.mxu1 %vm21433_vm0, %v25126_v55 }
0x11ef   :  { %19358 = vmatpush3.bf16.msra.mxu0 %v22215_v8  ;;  %19382 = vmatpush3.bf16.msra.mxu1 %v22218_v26 }
0x11f0   :  { %19371 = vmatprep.subr.bf16.mxu0 %v25126_v55  ;;  %19395 = vmatprep.subr.bf16.mxu1 %v25126_v55 }
0x11f2   :  { %19360 = vmatmul.mubr.msk.bf16.vlgmr.msra.gmra.mrb[152].mxu0 %vm819_vm1, %v22490_v63  ;;  %19384 = vmatmul.mubr.msk.bf16.vlgmr.msra.gmra.mrb[164].mxu1 %vm819_vm1, %v22490_v63 }
0x11f3   :  { %19372 = vmatpush3.bf16.msra.mxu0 %v22229_v32  ;;  %19396 = vmatpush3.bf16.msra.mxu1 %v22232_v33 }
0x11f4   :  { %19373 = vmatprep.subr.bf16.mxu0 %v25126_v55  ;;  %19397 = vmatprep.subr.bf16.mxu1 %v25126_v55 }
0x11f5   :  { %19375 = vmatprep.mubr.msk.bf16.mxu0 %vm21433_vm0, %v25126_v55  ;;  %19399 = vmatprep.mubr.msk.bf16.mxu1 %vm21433_vm0, %v25126_v55 }
0x11f7   :  { %19374 = vmatpush3.bf16.msra.mxu0 %v22243_v34  ;;  %19398 = vmatpush3.bf16.msra.mxu1 %v22246_v35 }
0x11f8   :  { %19387 = vmatprep.subr.bf16.mxu0 %v25126_v55  ;;  %19411 = vmatprep.subr.bf16.mxu1 %v25126_v55 }
0x11fa   :  { %19376 = vmatmul.mubr.msk.bf16.vlgmr.msra.gmra.mrb[156].mxu0 %vm819_vm1, %v22490_v63  ;;  %19400 = vmatmul.mubr.msk.bf16.vlgmr.msra.gmra.mrb[168].mxu1 %vm819_vm1, %v22490_v63 }
0x11fb   :  { %19388 = vmatpush3.bf16.msra.mxu0 %v22257_v36  ;;  %19412 = vmatpush3.bf16.msra.mxu1 %v22260_v19 }
0x11fc   :  { %19389 = vmatprep.subr.bf16.mxu0 %v25126_v55  ;;  %19413 = vmatprep.subr.bf16.mxu1 %v25126_v55 }
0x11fd   :  { %19391 = vmatprep.mubr.msk.bf16.mxu0 %vm21433_vm0, %v25126_v55  ;;  %19415 = vmatprep.mubr.msk.bf16.mxu1 %vm21433_vm0, %v25126_v55 }
0x11ff   :  { %19390 = vmatpush3.bf16.msra.mxu0 %v22271_v37  ;;  %19414 = vmatpush3.bf16.msra.mxu1 %v22274_v38 }
0x1200   :  { %19403 = vmatprep.subr.bf16.mxu0 %v25126_v55  ;;  %19427 = vmatprep.subr.bf16.mxu1 %v25126_v55 }
0x1202   :  { %19392 = vmatmul.mubr.msk.bf16.vlgmr.msra.gmra.mrb[160].mxu0 %vm819_vm1, %v22490_v63  ;;  %19416 = vmatmul.mubr.msk.bf16.vlgmr.msra.gmra.mrb[172].mxu1 %vm819_vm1, %v22490_v63 }
0x1203   :  { %19404 = vmatpush3.bf16.msra.mxu0 %v22285_v13  ;;  %19428 = vmatpush3.bf16.msra.mxu1 %v22288_v18 }
0x1204   :  { %19405 = vmatprep.subr.bf16.mxu0 %v25126_v55  ;;  %19429 = vmatprep.subr.bf16.mxu1 %v25126_v55 }
0x1205   :  { %19407 = vmatprep.mubr.msk.bf16.mxu0 %vm21433_vm0, %v25126_v55  ;;  %19431 = vmatprep.mubr.msk.bf16.mxu1 %vm21433_vm0, %v25126_v55 }
0x1207   :  { %19406 = vmatpush3.bf16.msra.mxu0 %v22299_v46  ;;  %19430 = vmatpush3.bf16.msra.mxu1 %v22302_v39 }
0x1208   :  { %19419 = vmatprep.subr.bf16.mxu0 %v25126_v55  ;;  %19443 = vmatprep.subr.bf16.mxu1 %v25126_v55 }
0x120a   :  { %19408 = vmatmul.mubr.msk.bf16.vlgmr.msra.gmra.mrb[164].mxu0 %vm819_vm1, %v22490_v63  ;;  %19432 = vmatmul.mubr.msk.bf16.vlgmr.msra.gmra.mrb[176].mxu1 %vm819_vm1, %v22490_v63 }
0x120b   :  { %19420 = vmatpush3.bf16.msra.mxu0 %v22313_v40  ;;  %19423 = vmatprep.mubr.msk.bf16.mxu0 %vm21433_vm0, %v25126_v55 }
0x120c   :  { %19421 = vmatprep.subr.bf16.mxu0 %v25126_v55  ;;  %19445 = vmatprep.mubr.msk.bf16.mxu1 %vm21433_vm0, %v25126_v55 }
0x120f   :  { %19422 = vmatpush3.bf16.msra.mxu0 %v22323_v41 }
0x1210   :  { %19435 = vmatprep.subr.bf16.mxu0 %v25126_v55 }
0x1212   :  { %19424 = vmatmul.mubr.msk.bf16.vlgmr.msra.gmra.mrb[168].mxu0 %vm819_vm1, %v22490_v63 }
0x1213   :  { %19436 = vmatpush3.bf16.msra.mxu0 %v22332_v2  ;;  %19439 = vmatprep.mubr.msk.bf16.mxu0 %vm21433_vm0, %v25126_v55 }
0x1214   :  { %19437 = vmatprep.subr.bf16.mxu0 %v25126_v55 }
0x1217   :  { %19438 = vmatpush3.bf16.msra.mxu0 %v22339_v42 }
0x1218   :  { %19449 = vmatprep.subr.bf16.mxu0 %v25126_v55 }
0x121a   :  { %19440 = vmatmul.mubr.msk.bf16.vlgmr.msra.gmra.mrb[172].mxu0 %vm819_vm1, %v22490_v63 }
0x121b   :  { %19451 = vmatprep.mubr.msk.bf16.mxu0 %vm21433_vm0, %v25126_v55 }
0x12a5   :  { %v4716_v9 = vpop.f32.mrb[148].mxu1 }
0x12a6   :  { %v19327_v58 = vpop.f32.mrb[149].mxu1  ;;  %v4860_v36 = vsel %vm819_vm1, %v4716_v9, 0.0 }
0x12a7   :  { %v4719_v27 = vpop.f32.mrb[150].mxu1 }
0x12a8   :  { %v19328_v28 = vpop.f32.mrb[151].mxu1 }
0x12ad   :  { %v4808_v8 = vpop.f32.mrb[152].mxu1 }
0x12ae   :  { %v19339_v26 = vpop.f32.mrb[153].mxu1  ;;  %v4863_v39 = vsel %vm819_vm1, %v4808_v8, 0.0 }
0x12af   :  { %v4811_v32 = vpop.f32.mrb[154].mxu1 }
0x12b0   :  { %v19340_v33 = vpop.f32.mrb[155].mxu1 }
0x12b5   :  { %v4762_v34 = vpop.f32.mrb[144].mxu0  ;;  %v4912_v35 = vpop.f32.mrb[156].mxu1 }
0x12b6   :  { %v4861_v19 = vsel %vm819_vm1, %v4762_v34, 0.0  ;;  %v19333_v37 = vpop.f32.mrb[145].mxu0  ;;  %v19353_v38 = vpop.f32.mrb[157].mxu1  ;;  %v4913_v54 = vadd.f32 %v22355_v25, %v4912_v35 }
0x12b7   :  { %v4862_v13 = vadd.f32 %v4861_v19, %v4860_v36  ;;  %v4765_v18 = vpop.f32.mrb[146].mxu0  ;;  %v4915_v46 = vpop.f32.mrb[158].mxu1 }
0x12b8   :  { %v19334_v40 = vpop.f32.mrb[147].mxu0  ;;  %v19354_v41 = vpop.f32.mrb[159].mxu1  ;;  %v5358_v8 = vpack.c.bf16 %v4913_v54, %v4913_v54 }
0x12b9   :  { %v4864_v2 = vadd.f32 %v4863_v39, %v4862_v13 }
0x12bd   :  { %v4854_v42 = vpop.f32.mrb[148].mxu0  ;;  %v4992_v16 = vpop.f32.mrb[160].mxu1 }
0x12be   :  { %v4865_v14 = vsel %vm819_vm1, %v4854_v42, 0.0  ;;  %v19345_v50 = vpop.f32.mrb[149].mxu0  ;;  %v19369_v31 = vpop.f32.mrb[161].mxu1  ;;  %v4993_v25 = vadd.f32 %v22365_v62, %v4992_v16 }
0x12bf   :  { %v22600_v30 = vadd.f32 %v4865_v14, %v4864_v2  ;;  %v4857_v43 = vpop.f32.mrb[150].mxu0  ;;  %v4995_v44 = vpop.f32.mrb[162].mxu1 }
0x12c0   :  { %v19346_v10 = vpop.f32.mrb[151].mxu0  ;;  %v19370_v12 = vpop.f32.mrb[163].mxu1  ;;  %v5360_v46 = vpack.c.bf16 %v4993_v25, %v4993_v25 }
0x12c5   :  { %v4952_v1 = vpop.f32.mrb[152].mxu0  ;;  %v5072_v48 = vpop.f32.mrb[164].mxu1 }
0x12c6   :  { %v5073_v22 = vadd.f32 %v22351_v5, %v5072_v48  ;;  %v19361_v53 = vpop.f32.mrb[153].mxu0  ;;  %v19385_v63 = vpop.f32.mrb[165].mxu1 }
0x12c7   :  { %v4955_v11 = vpop.f32.mrb[154].mxu0  ;;  %v5075_v23 = vpop.f32.mrb[166].mxu1 }
0x12c8   :  { %v5362_v17 = vpack.c.bf16 %v5073_v22, %v5073_v22  ;;  %v19362_v4 = vpop.f32.mrb[155].mxu0  ;;  %v19386_v56 = vpop.f32.mrb[167].mxu1 }
0x12ca   :  { %v5370_v3 = vsel %vm1491_vm2, %v5362_v17, 0 }
0x12cb   :  { %19444 = vmatpush3.bf16.xpose.msra.mxu1 %v5370_v3 }
0x12cc   :  { %19455 = vmatprep.subr.bf16.mxu1 %v25126_v55 }
0x12cd   :  { %v5032_v59 = vpop.f32.mrb[156].mxu0  ;;  %v5152_v20 = vpop.f32.mrb[168].mxu1 }
0x12ce   :  { %v5153_v9 = vadd.f32 %v22359_v45, %v5152_v20  ;;  %v19377_v58 = vpop.f32.mrb[157].mxu0  ;;  %v19401_v5 = vpop.f32.mrb[169].mxu1  ;;  %v5033_v22 = vadd.f32 %v22399_v6, %v5032_v59 }
0x12cf   :  { %v5035_v27 = vpop.f32.mrb[158].mxu0  ;;  %v5155_v28 = vpop.f32.mrb[170].mxu1 }
0x12d0   :  { %v5364_v26 = vpack.c.bf16 %v5153_v9, %v5153_v9  ;;  %v19378_v32 = vpop.f32.mrb[159].mxu0  ;;  %v19402_v33 = vpop.f32.mrb[171].mxu1  ;;  %v5361_v23 = vpack.c.bf16 %v5033_v22, %v5033_v22 }
0x12d2   :  { %19446 = vmatmul.mubr.msk.bf16.vlgmr.msra.gmra.mrb[180].mxu1 %vm1491_vm2, %v5358_v8  ;;  %v5462_v34 = vsel %vm1491_vm2, %v5364_v26, 0 }
0x12d3   :  { %19456 = vmatpush3.bf16.xpose.msra.mxu1 %v5462_v34  ;;  %19457 = vmatprep.mubr.msk.bf16.mxu1 %vm21433_vm0, %v25126_v55 }
0x12d4   :  { %19467 = vmatprep.subr.bf16.mxu1 %v25126_v55 }
0x12d5   :  { %v5112_v45 = vpop.f32.mrb[160].mxu0  ;;  %v5232_v35 = vpop.f32.mrb[172].mxu1 }
0x12d6   :  { %v5113_v36 = vadd.f32 %v22370_v61, %v5112_v45  ;;  %v5233_v19 = vadd.f32 %v22373_v51, %v5232_v35  ;;  %v19393_v37 = vpop.f32.mrb[161].mxu0  ;;  %v19417_v38 = vpop.f32.mrb[173].mxu1  ;;  %v4953_v61 = vadd.f32 %v22382_v57, %v4952_v1 }
0x12d7   :  { %v5115_v13 = vpop.f32.mrb[162].mxu0  ;;  %v5235_v18 = vpop.f32.mrb[174].mxu1 }
0x12d8   :  { %v5363_v39 = vpack.c.bf16 %v5113_v36, %v5113_v36  ;;  %v5602_v40 = vpack.c.bf16 %v5233_v19, %v5233_v19  ;;  %v19394_v41 = vpop.f32.mrb[163].mxu0  ;;  %v19418_v2 = vpop.f32.mrb[175].mxu1  ;;  %v5359_v10 = vpack.c.bf16 %v4953_v61, %v4953_v61 }
0x12da   :  { %19458 = vmatmul.mubr.msk.bf16.vlgmr.msra.gmra.mrb[184].mxu1 %vm1491_vm2, %v5360_v46  ;;  %v5416_v62 = vsel %vm1491_vm2, %v5363_v39, 0  ;;  %v5610_v42 = vsel %vm1735_vm3, %v5602_v40, 0 }
0x12db   :  { %19450 = vmatpush3.bf16.xpose.msra.mxu0 %v5416_v62  ;;  %19468 = vmatpush3.bf16.msra.mxu1 %v5610_v42 }
0x12dc   :  { %19461 = vmatprep.subr.bf16.mxu0 %v25126_v55  ;;  %19469 = vmatprep.mubr.msk.bf16.mxu1 %vm21433_vm0, %v25126_v55 }
0x12dd   :  { %v5192_v51 = vpop.f32.mrb[164].mxu0  ;;  %v22622_v16 = vpop.f32.mrb[176].mxu1  ;;  %19479 = vmatprep.subr.bf16.mxu1 %v25126_v55 }
0x12de   :  { %v5193_v14 = vadd.f32 %v22388_v21, %v5192_v51  ;;  %v19409_v50 = vpop.f32.mrb[165].mxu0  ;;  %v19433_v31 = vpop.f32.mrb[177].mxu1 }
0x12df   :  { %v5195_v43 = vpop.f32.mrb[166].mxu0  ;;  %v5315_v44 = vpop.f32.mrb[178].mxu1 }
0x12e0   :  { %v5365_v12 = vpack.c.bf16 %v5193_v14, %v5193_v14  ;;  %v19410_v48 = vpop.f32.mrb[167].mxu0  ;;  %v19434_v57 = vpop.f32.mrb[179].mxu1  ;;  %v22646_v44 = vld [vmem:[%s22032_s3 + $0x1] ss:$0 sm:$0xff]  ;;  %s22713_s3 = sld [smem:[%s25125_s0 + %s21447_s13]]   ;;  %s21455_s13 = smov 22  }
0x12e2   :  { %19452 = vmatmul.mubr.msk.bf16.vlgmr.msra.gmra.mrb[176].mxu0 %vm1491_vm2, %v5359_v10  ;;  %v5508_v1 = vsel %vm1491_vm2, %v5365_v12, 0  ;;  %v4873_v12 = vadd.f32 %v22646_v44, %v22600_v30 }
0x12e3   :  { %19462 = vmatpush3.bf16.xpose.msra.mxu0 %v5508_v1  ;;  %19463 = vmatprep.mubr.msk.bf16.mxu0 %vm21433_vm0, %v25126_v55 }
0x12e4   :  { %19473 = vmatprep.subr.bf16.mxu0 %v25126_v55  ;;  %v5974_v22 = vadd.f32 %v4873_v12, %v22196_v24  ;;  %v5313_v24 = vadd.f32 %v22430_v60, %v22622_v16 }
0x12e5   :  { %v5272_v21 = vpop.f32.mrb[168].mxu0 }
0x12e6   :  { %v5273_v53 = vadd.f32 %v22404_v15, %v5272_v21  ;;  %v19425_v63 = vpop.f32.mrb[169].mxu0 }
0x12e7   :  { %v5275_v11 = vpop.f32.mrb[170].mxu0  ;;  %v5980_v63 = vsel %vm819_vm1, %v5974_v22, 0.0 }
0x12e8   :  { %v5603_v17 = vpack.c.bf16 %v5273_v53, %v5273_v53  ;;  %v19426_v4 = vpop.f32.mrb[171].mxu0 }
0x12ea   :  { %19464 = vmatmul.mubr.msk.bf16.vlgmr.msra.gmra.mrb[180].mxu0 %vm1491_vm2, %v5361_v23  ;;  %v5656_v56 = vsel %vm1735_vm3, %v5603_v17, 0 }
0x12eb   :  { %19474 = vmatpush3.bf16.msra.mxu0 %v5656_v56  ;;  %19475 = vmatprep.mubr.msk.bf16.mxu0 %vm21433_vm0, %v25126_v55 }
0x12ec   :  { %19485 = vmatprep.subr.bf16.mxu0 %v25126_v55 }
0x12ed   :  { %v22638_v6 = vpop.f32.mrb[172].mxu0 }
0x12ee   :  { %v19441_v3 = vpop.f32.mrb[173].mxu0 }
0x12ef   :  { %v5355_v54 = vpop.f32.mrb[174].mxu0 }
0x12f0   :  { %v19442_v15 = vpop.f32.mrb[175].mxu0  ;;  %v5604_v54 = vpack.c.bf16 %v5313_v24, %v5313_v24 }
0x13a5   :  { %v5406_v59 = vpop.f32.mrb[180].mxu1 }
0x13a6   :  { %v19447_v20 = vpop.f32.mrb[181].mxu1  ;;  %v5550_v9 = vmul.f32 0.35355338, %v5406_v59 }
0x13a7   :  { %v5409_v58 = vpop.f32.mrb[182].mxu1 }
0x13a8   :  { %v19448_v5 = vpop.f32.mrb[183].mxu1  ;;  %v5554_v27 = vsel %vm1491_vm2, %v5550_v9, -inf }
0x13a9   :  { %5555 = vmax.xlane.f32.xlu0 %v5554_v27  ;;  %v5702_v27 = vsel %vm1735_vm3, %v5604_v54, 0 }
0x13ad   :  { %v5498_v28 = vpop.f32.mrb[184].mxu1 }
0x13ae   :  { %v19459_v8 = vpop.f32.mrb[185].mxu1  ;;  %v5552_v26 = vmul.f32 0.35355338, %v5498_v28 }
0x13af   :  { %v5501_v32 = vpop.f32.mrb[186].mxu1 }
0x13b0   :  { %v19460_v33 = vpop.f32.mrb[187].mxu1  ;;  %v5560_v34 = vsel %vm1491_vm2, %v5552_v26, -inf  ;;  %v5353_v32 = vadd.f32 %v22441_v7, %v22638_v6 }
0x13b1   :  { %5561 = vmax.xlane.f32.xlu0 %v5560_v34 }
0x13b5   :  { %v5452_v25 = vpop.f32.mrb[176].mxu0 }
0x13b6   :  { %v19453_v45 = vpop.f32.mrb[177].mxu0  ;;  %v5551_v35 = vmul.f32 0.35355338, %v5452_v25  ;;  %v5605_v25 = vpack.c.bf16 %v5353_v32, %v5353_v32 }
0x13b7   :  { %v5455_v36 = vpop.f32.mrb[178].mxu0 }
0x13b8   :  { %v19454_v19 = vpop.f32.mrb[179].mxu0  ;;  %v5557_v37 = vsel %vm1491_vm2, %v5551_v35, -inf  ;;  %v5748_v36 = vsel %vm1735_vm3, %v5605_v25, 0 }
0x13b9   :  { %5558 = vmax.xlane.f32.xlu1 %v5557_v37 }
0x13bd   :  { %v5544_v38 = vpop.f32.mrb[180].mxu0 }
0x13be   :  { %v19465_v13 = vpop.f32.mrb[181].mxu0  ;;  %v5553_v18 = vmul.f32 0.35355338, %v5544_v38 }
0x13bf   :  { %v5547_v46 = vpop.f32.mrb[182].mxu0 }
0x13c0   :  { %v19466_v39 = vpop.f32.mrb[183].mxu0  ;;  %v5563_v40 = vsel %vm1491_vm2, %v5553_v18, -inf }
0x13c1   :  { %5564 = vmax.xlane.f32.xlu1 %v5563_v40 }
0x1436   :  { %v5556_v41 = vpop.xlane.xlu0 %5555 }
0x1437   :  { %v5566_v2 = vsub.f32 %v5550_v9, %v5556_v41 }
0x1439   :  { %v5570_v62 = vmul.f32 1.442695, %v5566_v2 }
0x143b   :  { %21251 = vpow2.f32 %v5570_v62 }
0x143e   :  { %v5562_v42 = vpop.xlane.xlu0 %5561 }
0x143f   :  { %v5568_v61 = vsub.f32 %v5552_v26, %v5562_v42 }
0x1441   :  { %v5574_v51 = vmul.f32 1.442695, %v5568_v61 }
0x1443   :  { %21253 = vpow2.f32 %v5574_v51 }
0x1445   :  { %v21252_v14 = vpop.eup %21251 }
0x1446   :  { %v5559_v50 = vpop.xlane.xlu1 %5558  ;;  %v5578_v31 = vsel %vm1491_vm2, %v21252_v14, 0.0 }
0x1447   :  { %v5567_v43 = vsub.f32 %v5551_v35, %v5559_v50  ;;  %5579 = vadd.xlane.f32.xlu0 %v5578_v31 }
0x1449   :  { %v5572_v10 = vmul.f32 1.442695, %v5567_v43 }
0x144b   :  { %21255 = vpow2.f32 %v5572_v10 }
0x144d   :  { %v21254_v48 = vpop.eup %21253 }
0x144e   :  { %v5565_v57 = vpop.xlane.xlu1 %5564  ;;  %v5584_v1 = vsel %vm1491_vm2, %v21254_v48, 0.0 }
0x144f   :  { %v5569_v21 = vsub.f32 %v5553_v18, %v5565_v57  ;;  %5585 = vadd.xlane.f32.xlu0 %v5584_v1 }
0x1451   :  { %v5576_v53 = vmul.f32 1.442695, %v5569_v21 }
0x1453   :  { %21257 = vpow2.f32 %v5576_v53  ;;  %5981 = vadd.xlane.f32.xlu0 %v5980_v63 }
0x1455   :  { %v21256_v11 = vpop.eup %21255 }
0x1456   :  { %v5581_v23 = vsel %vm1491_vm2, %v21256_v11, 0.0 }
0x1457   :  { %5582 = vadd.xlane.f32.xlu1 %v5581_v23 }
0x145d   :  { %v21258_v17 = vpop.eup %21257 }
0x145e   :  { %v5587_v30 = vsel %vm1491_vm2, %v21258_v17, 0.0 }
0x145f   :  { %5588 = vadd.xlane.f32.xlu1 %v5587_v30 }
0x14d4   :  { %v5580_v4 = vpop.xlane.xlu0 %5579 }
0x14d5   :  { %21259 = vrcp.f32 %v5580_v4 }
0x14dc   :  { %v5586_v56 = vpop.xlane.xlu0 %5585 }
0x14dd   :  { %21261 = vrcp.f32 %v5586_v56 }
0x14df   :  { %v21260_v3 = vpop.eup %21259 }
0x14e0   :  { %v5982_v15 = vpop.xlane.xlu0 %5981  ;;  %v5594_v59 = vmul.f32 %v21260_v3, %v21252_v14 }
0x14e1   :  { %v5986_v20 = vmul.f32 0.03125, %v5982_v15 }
0x14e2   :  { %v5598_v9 = vpack.c.bf16 %v5594_v59, %v5594_v59 }
0x14e3   :  { %v22657_v58 = vsub.f32 %v5974_v22, %v5986_v20 }
0x14e4   :  { %v5583_v5 = vpop.xlane.xlu1 %5582  ;;  %19470 = vmatmul.mubr.msk.bf16.vlgmr.msra.gmra.mrb[188].mxu1 %vm1491_vm2, %v5598_v9 }
0x14e5   :  { %21263 = vrcp.f32 %v5583_v5  ;;  %19480 = vmatpush3.bf16.msra.mxu1 %v5702_v27  ;;  %v5990_v60 = vmul.f32 %v22657_v58, %v22657_v58  ;;  %19481 = vmatprep.mubr.msk.bf16.mxu1 %vm21433_vm0, %v25126_v55 }
0x14e6   :  { %19491 = vmatprep.subr.bf16.mxu1 %v25126_v55 }
0x14e7   :  { %v21262_v16 = vpop.eup %21261  ;;  %v5992_v28 = vsel %vm819_vm1, %v5990_v60, 0.0 }
0x14e8   :  { %v5596_v8 = vmul.f32 %v21262_v16, %v21254_v48  ;;  %5993 = vadd.xlane.f32.xlu0 %v5992_v28 }
0x14ea   :  { %v5600_v26 = vpack.c.bf16 %v5596_v8, %v5596_v8 }
0x14ec   :  { %v5589_v33 = vpop.xlane.xlu1 %5588  ;;  %19482 = vmatmul.mubr.msk.bf16.vlgmr.msra.gmra.mrb[192].mxu1 %vm1491_vm2, %v5600_v26 }
0x14ed   :  { %21265 = vrcp.f32 %v5589_v33  ;;  %19492 = vmatpush3.bf16.msra.mxu1 %v22458_v0  ;;  %19493 = vmatprep.mubr.msk.bf16.mxu1 %vm21433_vm0, %v25126_v55  ;;  %v21079_v33 = vld [vmem:[%s22101_s7 + $0x10] sm:$0xff]  }
0x14ee   :  { %19503 = vmatprep.subr.bf16.mxu1 %v25126_v55 }
0x14ef   :  { %v21264_v34 = vpop.eup %21263 }
0x14f0   :  { %v5595_v45 = vmul.f32 %v21264_v34, %v21256_v11  ;;  %v21080_v34 = vld [vmem:[%s22101_s7 + $0x18] sm:$0xff]   ;;  %s21448_s7 = smov 1  }
0x14f1   :  { %s22727_s15 = sld [smem:[%s25125_s0 + %s21448_s7]]  }
0x14f2   :  { %v5599_v35 = vpack.c.bf16 %v5595_v45, %v5595_v45  ;;  %s23331_s7 = sld [smem:[%s25125_s0 + %s21455_s13]]   ;;  %s21466_s13 = smov 34  }
0x14f3   :  { %s24022_s14 = sld [smem:[%s25125_s0 + %s21466_s13]]  }
0x14f4   :  { %19476 = vmatmul.mubr.msk.bf16.vlgmr.msra.gmra.mrb[184].mxu0 %vm1491_vm2, %v5599_v35 }
0x14f5   :  { %19486 = vmatpush3.bf16.msra.mxu0 %v5748_v36  ;;  %19487 = vmatprep.mubr.msk.bf16.mxu0 %vm21433_vm0, %v25126_v55 }
0x14f6   :  { %19497 = vmatprep.subr.bf16.mxu0 %v25126_v55 }
0x14f7   :  { %v21266_v7 = vpop.eup %21265 }
0x14f8   :  { %v5597_v0 = vmul.f32 %v21266_v7, %v21258_v17 }
0x14fa   :  { %v5601_v6 = vpack.c.bf16 %v5597_v0, %v5597_v0 }
0x14fc   :  { %19488 = vmatmul.mubr.msk.bf16.vlgmr.msra.gmra.mrb[188].mxu0 %vm1491_vm2, %v5601_v6 }
0x14fd   :  { %19498 = vmatpush3.bf16.msra.mxu0 %v22464_v52  ;;  %19499 = vmatprep.mubr.msk.bf16.mxu0 %vm21433_vm0, %v25126_v55 }
0x14fe   :  { %19509 = vmatprep.subr.bf16.mxu0 %v25126_v55 }
0x1575   :  { %v5994_v25 = vpop.xlane.xlu0 %5993 }
0x1576   :  { %v5998_v45 = vmul.f32 0.03125, %v5994_v25 }
0x1578   :  { %v6000_v35 = vadd.f32 1e-05, %v5998_v45  ;;  %v22895_v45 = vld [vmem:[%s22713_s3 + $0x80] sm:$0xff]  }
0x157a   :  { %21267 = vrsqrt.f32 %v6000_v35 }
0x1584   :  { %v21268_v6 = vpop.eup %21267 }
0x15b7   :  { %v5646_v19 = vpop.f32.mrb[188].mxu1 }
0x15b8   :  { %v5790_v37 = vpack.c.bf16 %v5646_v19, %v5646_v19  ;;  %v19471_v38 = vpop.f32.mrb[189].mxu1  ;;  %v6004_v19 = vmul.f32 %v21268_v6, %v22657_v58  ;;  %v22734_v58 = vld [vmem:[%s22713_s3] sm:$0xff]  }
0x15b9   :  { %v5649_v13 = vpop.f32.mrb[190].mxu1 }
0x15ba   :  { %v19472_v18 = vpop.f32.mrb[191].mxu1  ;;  %19494 = vmatmul.mubr.msk.bf16.vlgmr.msra.gmra.mrb[196].mxu1 %vm1491_vm2, %v5790_v37  ;;  %v17364_v37 = vld [vmem:[%s22119_s16 + $0x1] ss:$0 sm:$0xff]  ;;  %s23336_s16 = sld [smem:[%s25125_s0 + %s21456_s12]]   ;;  %s21462_s12 = smov 28  }
0x15bb   :  { %19504 = vmatpush3.bf16.msra.mxu1 %v22470_v29  ;;  %19505 = vmatprep.mubr.msk.bf16.mxu1 %vm21433_vm0, %v25126_v55  ;;  %v6012_v13 = vmul.f32 %v17364_v37, %v6004_v19 }
0x15bc   :  { %19515 = vmatprep.subr.bf16.mxu1 %v25126_v55 }
0x15bf   :  { %v5738_v52 = vpop.f32.mrb[192].mxu1 }
0x15c0   :  { %v5792_v46 = vpack.c.bf16 %v5738_v52, %v5738_v52  ;;  %v19483_v39 = vpop.f32.mrb[193].mxu1  ;;  %v17365_v52 = vld [vmem:[%s22124_s20 + $0x1] ss:$0 sm:$0xff] }
0x15c1   :  { %v5741_v40 = vpop.f32.mrb[194].mxu1  ;;  %v22729_v39 = vadd.f32 %v17365_v52, %v6012_v13 }
0x15c2   :  { %v19484_v41 = vpop.f32.mrb[195].mxu1  ;;  %19506 = vmatmul.mubr.msk.bf16.vlgmr.msra.gmra.mrb[200].mxu1 %vm1491_vm2, %v5792_v46 }
0x15c3   :  { %19519 = vmatprep.mubr.msk.bf16.mxu1 %vm21433_vm0, %v25126_v55  ;;  %19516 = vmatpush3.bf16.msra.mxu1 %v21079_v33 }
0x15c4   :  { %19517 = vmatprep.subr.bf16.mxu1 %v25126_v55 }
0x15c7   :  { %v5692_v2 = vpop.f32.mrb[184].mxu0  ;;  %19518 = vmatpush3.bf16.msra.mxu1 %v21080_v34 }
0x15c8   :  { %v5791_v62 = vpack.c.bf16 %v5692_v2, %v5692_v2  ;;  %v19477_v42 = vpop.f32.mrb[185].mxu0  ;;  %19535 = vmatprep.subr.bf16.mxu1 %v25126_v55  ;;  %v22741_v2 = vld [vmem:[%s22713_s3 + $0x8] sm:$0xff]  }
0x15c9   :  { %v5695_v61 = vpop.f32.mrb[186].mxu0 }
0x15ca   :  { %v19478_v29 = vpop.f32.mrb[187].mxu0  ;;  %19500 = vmatmul.mubr.msk.bf16.vlgmr.msra.gmra.mrb[192].mxu0 %vm1491_vm2, %v5791_v62  ;;  %v6236_v62 = vld [vmem:[%s22727_s15] sm:$0xff]  ;;  %v22751_v61 = vld [vmem:[%s22713_s3 + $0x10] sm:$0xff]  }
0x15cb   :  { %19510 = vmatpush3.bf16.msra.mxu0 %v22494_v47  ;;  %19511 = vmatprep.mubr.msk.bf16.mxu0 %vm21433_vm0, %v25126_v55  ;;  %v22747_v42 = vpack.c.bf16 %v6236_v62, %v6236_v62  ;;  %v22758_v29 = vld [vmem:[%s22713_s3 + $0x18] sm:$0xff]  }
0x15cc   :  { %19523 = vmatprep.subr.bf16.mxu0 %v25126_v55 }
0x15cf   :  { %v5784_v51 = vpop.f32.mrb[188].mxu0 }
0x15d0   :  { %v5793_v14 = vpack.c.bf16 %v5784_v51, %v5784_v51  ;;  %v19489_v50 = vpop.f32.mrb[189].mxu0  ;;  %v22765_v51 = vld [vmem:[%s22713_s3 + $0x30] sm:$0xff]  }
0x15d1   :  { %v5787_v31 = vpop.f32.mrb[190].mxu0  ;;  %v22779_v50 = vld [vmem:[%s22713_s3 + $0x50] sm:$0xff]  }
0x15d2   :  { %v19490_v43 = vpop.f32.mrb[191].mxu0  ;;  %19512 = vmatmul.mubr.msk.bf16.vlgmr.msra.gmra.mrb[196].mxu0 %vm1491_vm2, %v5793_v14  ;;  %v22772_v14 = vld [vmem:[%s22713_s3 + $0x38] sm:$0xff]  }
0x15d3   :  { %19531 = vmatprep.mubr.msk.bf16.mxu0 %vm21433_vm0, %v25126_v55  ;;  %v22786_v31 = vld [vmem:[%s22713_s3 + $0x58] sm:$0xff]   ;;  %v22793_v43 = vld [vmem:[%s22713_s3 + $0x70] sm:$0xff]  }
0x168d   :  { %v5831_v10 = vpop.f32.mrb[196].mxu1 }
0x168e   :  { %v19495_v12 = vpop.f32.mrb[197].mxu1  ;;  %v5966_v63 = vsel %vm819_vm1, %v5831_v10, 0.0  ;;  %v22800_v10 = vld [vmem:[%s22713_s3 + $0x78] sm:$0xff]  }
0x168f   :  { %v5834_v48 = vpop.f32.mrb[198].mxu1  ;;  %v21093_v12 = vld [vmem:[%s22110_s11 + $0x30] sm:$0xff]  }
0x1690   :  { %v19496_v57 = vpop.f32.mrb[199].mxu1  ;;  %v21094_v48 = vld [vmem:[%s22110_s11 + $0x38] sm:$0xff]  }
0x1691   :  { %v22816_v57 = vld [vmem:[%s22713_s3 + $0x90] sm:$0xff]  }
0x1695   :  { %v5917_v47 = vpop.f32.mrb[200].mxu1 }
0x1696   :  { %v19507_v1 = vpop.f32.mrb[201].mxu1  ;;  %v5969_v4 = vsel %vm819_vm1, %v5917_v47, 0.0  ;;  %v22821_v47 = vld [vmem:[%s22713_s3 + $0x98] sm:$0xff]  }
0x1697   :  { %v5920_v22 = vpop.f32.mrb[202].mxu1  ;;  %v22826_v1 = vld [vmem:[%s22713_s3 + $0xb0] sm:$0xff]  }
0x1698   :  { %v19508_v21 = vpop.f32.mrb[203].mxu1  ;;  %v22835_v22 = vld [vmem:[%s22713_s3 + $0xb8] sm:$0xff]  }
0x1699   :  { %v17371_v21 = vld [vmem:[%s22142_s24 + $0x1] ss:$0 sm:$0xff] }
0x169d   :  { %v5874_v53 = vpop.f32.mrb[192].mxu0 }
0x169e   :  { %v5967_v11 = vsel %vm819_vm1, %v5874_v53, 0.0  ;;  %v19501_v23 = vpop.f32.mrb[193].mxu0 }
0x169f   :  { %v5968_v17 = vadd.f32 %v5967_v11, %v5966_v63  ;;  %v5877_v30 = vpop.f32.mrb[194].mxu0 }
0x16a0   :  { %v19502_v24 = vpop.f32.mrb[195].mxu0 }
0x16a1   :  { %v5970_v56 = vadd.f32 %v5969_v4, %v5968_v17 }
0x16a5   :  { %v5960_v3 = vpop.f32.mrb[196].mxu0 }
0x16a6   :  { %v5971_v54 = vsel %vm819_vm1, %v5960_v3, 0.0  ;;  %v19513_v15 = vpop.f32.mrb[197].mxu0 }
0x16a7   :  { %v5972_v59 = vadd.f32 %v5971_v54, %v5970_v56  ;;  %v5963_v20 = vpop.f32.mrb[198].mxu0  ;;  %v22845_v56 = vld [vmem:[%s22713_s3 + $0x20] sm:$0xff]  }
0x16a8   :  { %v19514_v9 = vpop.f32.mrb[199].mxu0 }
0x16a9   :  { %v5973_v5 = vadd.f32 %v22646_v44, %v5972_v59  ;;  %v21092_v44 = vld [vmem:[%s22110_s11 + $0x28] sm:$0xff]  }
0x16aa   :  { %v22852_v59 = vld [vmem:[%s22713_s3 + $0x28] sm:$0xff]  }
0x16ab   :  { %v5975_v27 = vadd.f32 %v5973_v5, %v22483_v49  ;;  %v21091_v49 = vld [vmem:[%s22110_s11 + $0x20] sm:$0xff]   ;;  %s21449_s11 = smov 19  }
0x16ac   :  { %19524 = vmatpush3.bf16.msra.mxu0 %v21091_v49  ;;  %v22859_v5 = vld [vmem:[%s22713_s3 + $0x40] sm:$0xff]   ;;  %s22874_s18 = sld [smem:[%s25125_s0 + %s21449_s11]]   ;;  %v22885_v49 = vld [vmem:[%s22713_s3 + $0x68] sm:$0xff]   ;;  %s21467_s11 = smov 35  }
0x16ad   :  { %v5983_v60 = vsel %vm819_vm1, %v5975_v27, 0.0  ;;  %19525 = vmatprep.subr.bf16.mxu0 %v25126_v55 }
0x16ae   :  { %5984 = vadd.xlane.f32.xlu1 %v5983_v60 }
0x16b0   :  { %19526 = vmatpush3.bf16.msra.mxu0 %v21092_v44 }
0x16b1   :  { %19527 = vmatprep.subr.bf16.mxu0 %v25126_v55 }
0x16b2   :  { %v22892_v25 = vld [vmem:[%s22874_s18 + $0x5] ss:$0 sm:$0xff] }
0x16b4   :  { %19528 = vmatpush3.bf16.msra.mxu0 %v21093_v12  ;;  %v22916_v12 = vld [vmem:[%s22874_s18 + $0x3] ss:$0 sm:$0xff] }
0x16b5   :  { %19529 = vmatprep.subr.bf16.mxu0 %v25126_v55 }
0x16b8   :  { %19530 = vmatpush3.bf16.msra.mxu0 %v21094_v48 }
0x16b9   :  { %19551 = vmatprep.subr.bf16.mxu0 %v25126_v55 }
0x173b   :  { %v5985_v16 = vpop.xlane.xlu1 %5984 }
0x173c   :  { %v5987_v28 = vmul.f32 0.03125, %v5985_v16  ;;  %v22866_v16 = vld [vmem:[%s22713_s3 + $0x48] sm:$0xff]  }
0x173e   :  { %v5989_v8 = vsub.f32 %v5975_v27, %v5987_v28 }
0x1740   :  { %v5991_v26 = vmul.f32 %v5989_v8, %v5989_v8 }
0x1742   :  { %v5995_v32 = vsel %vm819_vm1, %v5991_v26, 0.0  ;;  %v22878_v26 = vld [vmem:[%s22713_s3 + $0x60] sm:$0xff]  }
0x1743   :  { %5996 = vadd.xlane.f32.xlu1 %v5995_v32 }
0x17d0   :  { %v5997_v36 = vpop.xlane.xlu1 %5996 }
0x17d1   :  { %v5999_v7 = vmul.f32 0.03125, %v5997_v36 }
0x17d3   :  { %v6001_v0 = vadd.f32 1e-05, %v5999_v7 }
0x17d5   :  { %21269 = vrsqrt.f32 %v6001_v0  ;;  %v22902_v0 = vld [vmem:[%s22874_s18 + $0x1] ss:$0 sm:$0xff] }
0x17df   :  { %v21270_v38 = vpop.eup %21269 }
0x17e0   :  { %v6005_v18 = vmul.f32 %v21270_v38, %v5989_v8 }
0x17e2   :  { %v6013_v46 = vmul.f32 %v17364_v37, %v6005_v18  ;;  %v22911_v18 = vld [vmem:[%s22874_s18 + $0x7] ss:$0 sm:$0xff] }
0x17e4   :  { %v22731_v40 = vadd.f32 %v17365_v52, %v6013_v46 }
0x17e6   :  { %v6022_v41 = vpack.c.bf16 %v22731_v40, %v22729_v39 }
0x17e8   :  { %19520 = vmatmul.mubr.msk.bf16.vlgmr.msra.gmra.mrb[204].mxu1 %vm819_vm1, %v6022_v41 }
0x17e9   :  { %19536 = vmatpush3.bf16.msra.mxu1 %v22734_v58  ;;  %19539 = vmatprep.mubr.msk.bf16.mxu1 %vm21433_vm0, %v25126_v55 }
0x17ea   :  { %19537 = vmatprep.subr.bf16.mxu1 %v25126_v55 }
0x17ed   :  { %19538 = vmatpush3.bf16.msra.mxu1 %v22741_v2 }
0x17ee   :  { %19543 = vmatprep.subr.bf16.mxu1 %v25126_v55 }
0x17f0   :  { %19540 = vmatmul.mubr.msk.bf16.vlgmr.msra.gmra.mrb[208].mxu1 %vm819_vm1, %v22747_v42 }
0x17f1   :  { %19544 = vmatpush3.bf16.msra.mxu1 %v22751_v61  ;;  %19547 = vmatprep.mubr.msk.bf16.mxu1 %vm21433_vm0, %v25126_v55 }
0x17f2   :  { %19545 = vmatprep.subr.bf16.mxu1 %v25126_v55 }
0x17f5   :  { %19546 = vmatpush3.bf16.msra.mxu1 %v22758_v29 }
0x17f6   :  { %19559 = vmatprep.subr.bf16.mxu1 %v25126_v55 }
0x17f8   :  { %19548 = vmatmul.mubr.msk.bf16.vlgmr.msra.gmra.mrb[212].mxu1 %vm819_vm1, %v22747_v42 }
0x17f9   :  { %19560 = vmatpush3.bf16.msra.mxu1 %v22765_v51  ;;  %19563 = vmatprep.mubr.msk.bf16.mxu1 %vm21433_vm0, %v25126_v55 }
0x17fa   :  { %19561 = vmatprep.subr.bf16.mxu1 %v25126_v55 }
0x17fd   :  { %19562 = vmatpush3.bf16.msra.mxu1 %v22772_v14 }
0x17fe   :  { %19575 = vmatprep.subr.bf16.mxu1 %v25126_v55 }
0x1800   :  { %19564 = vmatmul.mubr.msk.bf16.vlgmr.msra.gmra.mrb[216].mxu1 %vm819_vm1, %v22747_v42 }
0x1801   :  { %19576 = vmatpush3.bf16.msra.mxu1 %v22779_v50  ;;  %19579 = vmatprep.mubr.msk.bf16.mxu1 %vm21433_vm0, %v25126_v55 }
0x1802   :  { %19577 = vmatprep.subr.bf16.mxu1 %v25126_v55 }
0x1805   :  { %19578 = vmatpush3.bf16.msra.mxu1 %v22786_v31 }
0x1806   :  { %19591 = vmatprep.subr.bf16.mxu1 %v25126_v55 }
0x1808   :  { %19580 = vmatmul.mubr.msk.bf16.vlgmr.msra.gmra.mrb[220].mxu1 %vm819_vm1, %v22747_v42 }
0x1809   :  { %19592 = vmatpush3.bf16.msra.mxu1 %v22793_v43  ;;  %19595 = vmatprep.mubr.msk.bf16.mxu1 %vm21433_vm0, %v25126_v55 }
0x180a   :  { %19593 = vmatprep.subr.bf16.mxu1 %v25126_v55 }
0x180d   :  { %19594 = vmatpush3.bf16.msra.mxu1 %v22800_v10 }
0x180e   :  { %19607 = vmatprep.subr.bf16.mxu1 %v25126_v55 }
0x1810   :  { %19596 = vmatmul.mubr.msk.bf16.vlgmr.msra.gmra.mrb[224].mxu1 %vm819_vm1, %v22747_v42 }
0x1811   :  { %19611 = vmatprep.mubr.msk.bf16.mxu1 %vm21433_vm0, %v25126_v55  ;;  %19608 = vmatpush3.bf16.msra.mxu1 %v22816_v57 }
0x1812   :  { %19609 = vmatprep.subr.bf16.mxu1 %v25126_v55 }
0x1815   :  { %19610 = vmatpush3.bf16.msra.mxu1 %v22821_v47 }
0x1816   :  { %19623 = vmatprep.subr.bf16.mxu1 %v25126_v55 }
0x1818   :  { %19612 = vmatmul.mubr.msk.bf16.vlgmr.msra.gmra.mrb[228].mxu1 %vm819_vm1, %v22747_v42 }
0x1819   :  { %19624 = vmatpush3.bf16.msra.mxu1 %v22826_v1  ;;  %19627 = vmatprep.mubr.msk.bf16.mxu1 %vm21433_vm0, %v25126_v55 }
0x181a   :  { %19625 = vmatprep.subr.bf16.mxu1 %v25126_v55 }
0x181d   :  { %19626 = vmatpush3.bf16.msra.mxu1 %v22835_v22 }
0x181e   :  { %19637 = vmatprep.subr.bf16.mxu1 %v25126_v55 }
0x1820   :  { %19628 = vmatmul.mubr.msk.bf16.vlgmr.msra.gmra.mrb[232].mxu1 %vm819_vm1, %v22747_v42 }
0x1821   :  { %19639 = vmatprep.mubr.msk.bf16.mxu1 %vm21433_vm0, %v25126_v55 }
0x18bb   :  { %v6085_v53 = vpop.f32.mrb[204].mxu1 }
0x18bc   :  { %v6086_v63 = vadd.f32 %v17371_v21, %v6085_v53  ;;  %v19521_v11 = vpop.f32.mrb[205].mxu1 }
0x18bd   :  { %v6088_v23 = vpop.f32.mrb[206].mxu1 }
0x18be   :  { %v6089_v17 = vadd.f32 %v17371_v21, %v6088_v23  ;;  %v19522_v30 = vpop.f32.mrb[207].mxu1  ;;  %v6092_v4 = vmax.f32 %v6086_v63, 0.0 }
0x18bf   :  { %v22935_v30 = vld [vmem:[%s22713_s3 + $0xa0] sm:$0xff]  }
0x18c0   :  { %v6093_v24 = vmax.f32 %v6089_v17, 0.0  ;;  %v22928_v17 = vld [vmem:[%s22713_s3 + $0x88] sm:$0xff]  }
0x18c2   :  { %v6094_v3 = vpack.c.bf16 %v6093_v24, %v6092_v4  ;;  %v22942_v4 = vld [vmem:[%s22713_s3 + $0xa8] sm:$0xff]  }
0x18c3   :  { %v22847_v54 = vpop.f32.mrb[208].mxu1 }
0x18c4   :  { %19532 = vmatmul.mubr.msk.bf16.vlgmr.msra.gmra.mrb[200].mxu0 %vm3376_vm4, %v6094_v3  ;;  %v19541_v15 = vpop.f32.mrb[209].mxu1 }
0x18c5   :  { %19552 = vmatpush3.bf16.msra.mxu0 %v22845_v56  ;;  %19555 = vmatprep.mubr.msk.bf16.mxu0 %vm21433_vm0, %v25126_v55  ;;  %v6391_v20 = vpop.f32.mrb[210].mxu1 }
0x18c6   :  { %19553 = vmatprep.subr.bf16.mxu0 %v25126_v55  ;;  %v19542_v9 = vpop.f32.mrb[211].mxu1 }
0x18c9   :  { %19554 = vmatpush3.bf16.msra.mxu0 %v22852_v59 }
0x18ca   :  { %19567 = vmatprep.subr.bf16.mxu0 %v25126_v55 }
0x18cb   :  { %v6440_v27 = vpop.f32.mrb[212].mxu1 }
0x18cc   :  { %19556 = vmatmul.mubr.msk.bf16.vlgmr.msra.gmra.mrb[204].mxu0 %vm819_vm1, %v22747_v42  ;;  %v19549_v60 = vpop.f32.mrb[213].mxu1  ;;  %v6441_v38 = vadd.f32 %v22902_v0, %v6440_v27 }
0x18cd   :  { %19568 = vmatpush3.bf16.msra.mxu0 %v22859_v5  ;;  %19571 = vmatprep.mubr.msk.bf16.mxu0 %vm21433_vm0, %v25126_v55  ;;  %v6443_v28 = vpop.f32.mrb[214].mxu1 }
0x18ce   :  { %19569 = vmatprep.subr.bf16.mxu0 %v25126_v55  ;;  %v19550_v8 = vpop.f32.mrb[215].mxu1  ;;  %v7015_v46 = vpack.c.bf16 %v6441_v38, %v6441_v38 }
0x18d1   :  { %19570 = vmatpush3.bf16.msra.mxu0 %v22866_v16 }
0x18d2   :  { %19583 = vmatprep.subr.bf16.mxu0 %v25126_v55 }
0x18d3   :  { %v6544_v32 = vpop.f32.mrb[216].mxu1 }
0x18d4   :  { %19572 = vmatmul.mubr.msk.bf16.vlgmr.msra.gmra.mrb[208].mxu0 %vm819_vm1, %v22747_v42  ;;  %v19565_v33 = vpop.f32.mrb[217].mxu1  ;;  %v6545_v63 = vadd.f32 %v22916_v12, %v6544_v32 }
0x18d5   :  { %19584 = vmatpush3.bf16.msra.mxu0 %v22878_v26  ;;  %v6547_v34 = vpop.f32.mrb[218].mxu1  ;;  %19587 = vmatprep.mubr.msk.bf16.mxu0 %vm21433_vm0, %v25126_v55  ;;  %v22957_v33 = vld [vmem:[%s22151_s30 + $0x1] ss:$0 sm:$0xff]  ;;  %s21460_s30 = smov 30  }
0x18d6   :  { %19585 = vmatprep.subr.bf16.mxu0 %v25126_v55  ;;  %v19566_v44 = vpop.f32.mrb[219].mxu1  ;;  %v7017_v23 = vpack.c.bf16 %v6545_v63, %v6545_v63  ;;  %s23942_s6 = sld [smem:[%s25125_s0 + %s21460_s30]]   ;;  %s21465_s30 = smov 33  }
0x18d7   :  { %s23992_s8 = sld [smem:[%s25125_s0 + %s21465_s30]]  }
0x18d9   :  { %19586 = vmatpush3.bf16.msra.mxu0 %v22885_v49 }
0x18da   :  { %19599 = vmatprep.subr.bf16.mxu0 %v25126_v55 }
0x18db   :  { %v6672_v35 = vpop.f32.mrb[220].mxu1 }
0x18dc   :  { %v6673_v36 = vadd.f32 %v22892_v25, %v6672_v35  ;;  %19588 = vmatmul.mubr.msk.bf16.vlgmr.msra.gmra.mrb[212].mxu0 %vm819_vm1, %v22747_v42  ;;  %v19581_v7 = vpop.f32.mrb[221].mxu1 }
0x18dd   :  { %v6675_v6 = vpop.f32.mrb[222].mxu1  ;;  %19600 = vmatpush3.bf16.msra.mxu0 %v22895_v45  ;;  %19603 = vmatprep.mubr.msk.bf16.mxu0 %vm21433_vm0, %v25126_v55 }
0x18de   :  { %v7019_v19 = vpack.c.bf16 %v6673_v36, %v6673_v36  ;;  %v19582_v37 = vpop.f32.mrb[223].mxu1  ;;  %19601 = vmatprep.subr.bf16.mxu0 %v25126_v55 }
0x18e0   :  { %v7072_v13 = vsel %vm1491_vm2, %v7019_v19, 0  ;;  %v22963_v19 = vld [vmem:[%s22874_s18 + $0x4] ss:$0 sm:$0xff] }
0x18e1   :  { %19638 = vmatpush3.bf16.xpose.msra.mxu1 %v7072_v13  ;;  %19602 = vmatpush3.bf16.msra.mxu0 %v22928_v17 }
0x18e2   :  { %19649 = vmatprep.subr.bf16.mxu1 %v25126_v55  ;;  %19615 = vmatprep.subr.bf16.mxu0 %v25126_v55 }
0x18e3   :  { %v6776_v52 = vpop.f32.mrb[224].mxu1 }
0x18e4   :  { %v6777_v41 = vadd.f32 %v22911_v18, %v6776_v52  ;;  %v19597_v62 = vpop.f32.mrb[225].mxu1  ;;  %19604 = vmatmul.mubr.msk.bf16.vlgmr.msra.gmra.mrb[216].mxu0 %vm819_vm1, %v22747_v42 }
0x18e5   :  { %v6779_v48 = vpop.f32.mrb[226].mxu1  ;;  %19619 = vmatprep.mubr.msk.bf16.mxu0 %vm21433_vm0, %v25126_v55  ;;  %19616 = vmatpush3.bf16.msra.mxu0 %v22935_v30  ;;  %v22967_v62 = vld [vmem:[%s22874_s18] ss:$0 sm:$0xff] }
0x18e6   :  { %v7021_v21 = vpack.c.bf16 %v6777_v41, %v6777_v41  ;;  %v19598_v53 = vpop.f32.mrb[227].mxu1  ;;  %19617 = vmatprep.subr.bf16.mxu0 %v25126_v55  ;;  %v6389_v63 = vadd.f32 %v22967_v62, %v22847_v54  ;;  %v22983_v54 = vld [vmem:[%s22874_s18 + $0x2] ss:$0 sm:$0xff] }
0x18e7   :  { %v22971_v53 = vld [vmem:[%s22874_s18 + $0x6] ss:$0 sm:$0xff] }
0x18e8   :  { %19640 = vmatmul.mubr.msk.bf16.vlgmr.msra.gmra.mrb[236].mxu1 %vm1491_vm2, %v7015_v46  ;;  %v7164_v11 = vsel %vm1491_vm2, %v7021_v21, 0  ;;  %v6228_v21 = vlaneseq }
0x18e9   :  { %19650 = vmatpush3.bf16.xpose.msra.mxu1 %v7164_v11  ;;  %19651 = vmatprep.mubr.msk.bf16.mxu1 %vm21433_vm0, %v25126_v55 }
0x18ea   :  { %19661 = vmatprep.subr.bf16.mxu1 %v25126_v55  ;;  %19618 = vmatpush3.bf16.msra.mxu0 %v22942_v4 }
0x18eb   :  { %19631 = vmatprep.subr.bf16.mxu0 %v25126_v55  ;;  %v22950_v24 = vpop.f32.mrb[228].mxu1 }
0x18ec   :  { %v19613_v3 = vpop.f32.mrb[229].mxu1 }
0x18ed   :  { %19620 = vmatmul.mubr.msk.bf16.vlgmr.msra.gmra.mrb[220].mxu0 %vm819_vm1, %v22747_v42  ;;  %v6907_v15 = vpop.f32.mrb[230].mxu1 }
0x18ee   :  { %19633 = vmatprep.mubr.msk.bf16.mxu0 %vm21433_vm0, %v25126_v55  ;;  %v19614_v20 = vpop.f32.mrb[231].mxu1  ;;  %v6229_v15 = vshrl.u32 %v6228_v21, 7 }
0x18ef   :  { %v6231_v20 = vand.u32 127, %v6228_v21 }
0x18f0   :  { %19652 = vmatmul.mubr.msk.bf16.vlgmr.msra.gmra.mrb[240].mxu1 %vm1491_vm2, %v7017_v23 }
0x18f1   :  { %19663 = vmatprep.mubr.msk.bf16.mxu1 %vm21433_vm0, %v25126_v55  ;;  %vm6232_vm5 = vcmp.ge.s32.totalorder %v6229_v15, %v6231_v20 }
0x18f3   :  { %v22952_v9 = vpop.f32.mrb[232].mxu1 }
0x18f4   :  { %v19629_v27 = vpop.f32.mrb[233].mxu1 }
0x18f5   :  { %v7011_v60 = vpop.f32.mrb[234].mxu1 }
0x18f6   :  { %v19630_v28 = vpop.f32.mrb[235].mxu1  ;;  %v7014_v60 = vpack.c.bf16 %v6389_v63, %v6389_v63 }
0x1997   :  { %v22954_v8 = vpop.f32.mrb[200].mxu0 }
0x1998   :  { %v19533_v32 = vpop.f32.mrb[201].mxu0 }
0x1999   :  { %v6176_v42 = vpop.f32.mrb[202].mxu0 }
0x199a   :  { %v22960_v34 = vadd.f32 %v22957_v33, %v6176_v42  ;;  %v19534_v44 = vpop.f32.mrb[203].mxu0 }
0x199f   :  { %v6492_v35 = vpop.f32.mrb[204].mxu0 }
0x19a0   :  { %v19557_v36 = vpop.f32.mrb[205].mxu0  ;;  %v6493_v44 = vadd.f32 %v22983_v54, %v6492_v35 }
0x19a1   :  { %v6495_v7 = vpop.f32.mrb[206].mxu0  ;;  %v21451_v36 = vmov -1e+30  }
0x19a2   :  { %v19558_v6 = vpop.f32.mrb[207].mxu0  ;;  %v22991_v7 = vsel %vm6232_vm5, 0.0, %v21451_v36 }
0x19a3   :  { %v17434_v6 = vld [vmem:[%s22979_s22] ss:$0 sm:$0xff] }
0x19a7   :  { %v6620_v37 = vpop.f32.mrb[208].mxu0 }
0x19a8   :  { %v6621_v38 = vadd.f32 %v22963_v19, %v6620_v37  ;;  %v19573_v13 = vpop.f32.mrb[209].mxu0  ;;  %v7016_v37 = vpack.c.bf16 %v6493_v44, %v6493_v44  ;;  %v23012_v44 = vld [vmem:[%s22874_s18 + $0x8] ss:$0 sm:$0xff] }
0x19a9   :  { %v6623_v52 = vpop.f32.mrb[210].mxu0 }
0x19aa   :  { %v7018_v46 = vpack.c.bf16 %v6621_v38, %v6621_v38  ;;  %v19574_v41 = vpop.f32.mrb[211].mxu0  ;;  %v22995_v38 = vadd.f32 %v17434_v6, %v22991_v7 }
0x19ac   :  { %v7026_v48 = vsel %vm1491_vm2, %v7018_v46, 0 }
0x19ad   :  { %19632 = vmatpush3.bf16.xpose.msra.mxu0 %v7026_v48 }
0x19ae   :  { %19643 = vmatprep.subr.bf16.mxu0 %v25126_v55 }
0x19af   :  { %v6724_v11 = vpop.f32.mrb[212].mxu0 }
0x19b0   :  { %v6725_v23 = vadd.f32 %v22971_v53, %v6724_v11  ;;  %v19589_v3 = vpop.f32.mrb[213].mxu0 }
0x19b1   :  { %v6727_v27 = vpop.f32.mrb[214].mxu0 }
0x19b2   :  { %v7020_v28 = vpack.c.bf16 %v6725_v23, %v6725_v23  ;;  %v19590_v32 = vpop.f32.mrb[215].mxu0 }
0x19b4   :  { %19634 = vmatmul.mubr.msk.bf16.vlgmr.msra.gmra.mrb[224].mxu0 %vm1491_vm2, %v7014_v60  ;;  %v7118_v42 = vsel %vm1491_vm2, %v7020_v28, 0  ;;  %v23005_v60 = vld [vmem:[%s22874_s18 + $0x9] ss:$0 sm:$0xff] }
0x19b5   :  { %19644 = vmatpush3.bf16.xpose.msra.mxu0 %v7118_v42  ;;  %19645 = vmatprep.mubr.msk.bf16.mxu0 %vm21433_vm0, %v25126_v55  ;;  %v6905_v28 = vadd.f32 %v23005_v60, %v22950_v24 }
0x19b6   :  { %19655 = vmatprep.subr.bf16.mxu0 %v25126_v55 }
0x19b7   :  { %v7263_v32 = vpack.c.bf16 %v6905_v28, %v6905_v28  ;;  %v6852_v36 = vpop.f32.mrb[216].mxu0 }
0x19b8   :  { %v6853_v6 = vadd.f32 %v23012_v44, %v6852_v36 }
0x19b9   :  { %v7316_v42 = vsel %vm1735_vm3, %v7263_v32, 0 }
0x19ba   :  { %19662 = vmatpush3.bf16.msra.mxu1 %v7316_v42 }
0x19bb   :  { %v7108_v13 = vpop.f32.mrb[236].mxu1  ;;  %19673 = vmatprep.subr.bf16.mxu1 %v25126_v55 }
0x19bc   :  { %v7207_v52 = vmul.f32 0.35355338, %v7108_v13  ;;  %19646 = vmatmul.mubr.msk.bf16.vlgmr.msra.gmra.mrb[228].mxu0 %vm1491_vm2, %v7016_v37  ;;  %v19641_v46 = vpop.f32.mrb[237].mxu1  ;;  %v19605_v37 = vpop.f32.mrb[217].mxu0 }
0x19bd   :  { %v7111_v41 = vpop.f32.mrb[238].mxu1  ;;  %19657 = vmatprep.mubr.msk.bf16.mxu0 %vm21433_vm0, %v25126_v55  ;;  %v6855_v13 = vpop.f32.mrb[218].mxu0 }
0x19be   :  { %v7211_v35 = vadd.f32 %v7207_v52, %v22995_v38  ;;  %v19642_v48 = vpop.f32.mrb[239].mxu1  ;;  %v7262_v52 = vpack.c.bf16 %v6853_v6, %v6853_v6  ;;  %v19606_v46 = vpop.f32.mrb[219].mxu0 }
0x19c0   :  { %v7217_v21 = vsel %vm1491_vm2, %v7211_v35, -inf  ;;  %v7270_v41 = vsel %vm1735_vm3, %v7262_v52, 0  ;;  %v23017_v24 = vpop.f32.mrb[220].mxu0 }
0x19c1   :  { %7218 = vmax.xlane.f32.xlu1 %v7217_v21  ;;  %19656 = vmatpush3.bf16.msra.mxu0 %v7270_v41  ;;  %v19621_v48 = vpop.f32.mrb[221].mxu0 }
0x19c2   :  { %19667 = vmatprep.subr.bf16.mxu0 %v25126_v55  ;;  %v6959_v21 = vpop.f32.mrb[222].mxu0 }
0x19c3   :  { %v7200_v63 = vpop.f32.mrb[240].mxu1 }
0x19c4   :  { %v7209_v11 = vmul.f32 0.35355338, %v7200_v63  ;;  %v19653_v23 = vpop.f32.mrb[241].mxu1  ;;  %v19622_v63 = vpop.f32.mrb[223].mxu0 }
0x19c5   :  { %v7203_v3 = vpop.f32.mrb[242].mxu1 }
0x19c6   :  { %v7213_v15 = vadd.f32 %v7209_v11, %v22995_v38  ;;  %v19654_v20 = vpop.f32.mrb[243].mxu1 }
0x19c8   :  { %v7223_v27 = vsel %vm1491_vm2, %v7213_v15, -inf }
0x19c9   :  { %7224 = vmax.xlane.f32.xlu1 %v7223_v27 }
0x1a4e   :  { %v7219_v11 = vpop.xlane.xlu1 %7218 }
0x1a4f   :  { %v7227_v23 = vsub.f32 %v7211_v35, %v7219_v11 }
0x1a51   :  { %v7232_v3 = vmul.f32 1.442695, %v7227_v23 }
0x1a53   :  { %21271 = vpow2.f32 %v7232_v3 }
0x1a56   :  { %v7225_v20 = vpop.xlane.xlu1 %7224 }
0x1a57   :  { %v7229_v27 = vsub.f32 %v7213_v15, %v7225_v20 }
0x1a59   :  { %v7236_v28 = vmul.f32 1.442695, %v7229_v27 }
0x1a5b   :  { %21273 = vpow2.f32 %v7236_v28  ;;  %v23026_v28 = vld [vmem:[%s22874_s18 + $0xb] ss:$0 sm:$0xff] }
0x1a5d   :  { %v21272_v32 = vpop.eup %21271 }
0x1a5e   :  { %v7241_v42 = vsel %vm1491_vm2, %v21272_v32, 0.0 }
0x1a5f   :  { %7242 = vadd.xlane.f32.xlu1 %v7241_v42  ;;  %v7009_v42 = vadd.f32 %v23026_v28, %v22952_v9 }
0x1a65   :  { %v21274_v36 = vpop.eup %21273 }
0x1a66   :  { %v7247_v6 = vsel %vm1491_vm2, %v21274_v36, 0.0 }
0x1a67   :  { %7248 = vadd.xlane.f32.xlu1 %v7247_v6 }
0x1a87   :  { %v7062_v37 = vpop.f32.mrb[224].mxu0 }
0x1a88   :  { %v7206_v13 = vmul.f32 0.35355338, %v7062_v37  ;;  %v19635_v52 = vpop.f32.mrb[225].mxu0 }
0x1a89   :  { %v7065_v46 = vpop.f32.mrb[226].mxu0 }
0x1a8a   :  { %v19636_v35 = vpop.f32.mrb[227].mxu0  ;;  %v7210_v41 = vadd.f32 %v7206_v13, %v22995_v38  ;;  %v7265_v13 = vpack.c.bf16 %v7009_v42, %v7009_v42 }
0x1a8c   :  { %v7214_v15 = vsel %vm1491_vm2, %v7210_v41, -inf  ;;  %v7408_v35 = vsel %vm1735_vm3, %v7265_v13, 0  ;;  %v23052_v13 = vld [vmem:[%s22874_s18 + $0xa] ss:$0 sm:$0xff] }
0x1a8d   :  { %7215 = vmax.xlane.f32.xlu0 %v7214_v15 }
0x1a8f   :  { %v7154_v48 = vpop.f32.mrb[228].mxu0 }
0x1a90   :  { %v7208_v21 = vmul.f32 0.35355338, %v7154_v48  ;;  %v19647_v63 = vpop.f32.mrb[229].mxu0 }
0x1a91   :  { %v7157_v11 = vpop.f32.mrb[230].mxu0 }
0x1a92   :  { %v19648_v23 = vpop.f32.mrb[231].mxu0  ;;  %v7212_v3 = vadd.f32 %v7208_v21, %v22995_v38 }
0x1a94   :  { %v7220_v20 = vsel %vm1491_vm2, %v7212_v3, -inf }
0x1a95   :  { %7221 = vmax.xlane.f32.xlu0 %v7220_v20 }
0x1aec   :  { %v7243_v27 = vpop.xlane.xlu1 %7242 }
0x1aed   :  { %21275 = vrcp.f32 %v7243_v27 }
0x1af4   :  { %v7249_v6 = vpop.xlane.xlu1 %7248 }
0x1af5   :  { %21277 = vrcp.f32 %v7249_v6 }
0x1af7   :  { %v21276_v37 = vpop.eup %21275 }
0x1af8   :  { %v7255_v52 = vmul.f32 %v21276_v37, %v21272_v32 }
0x1afa   :  { %v7259_v46 = vpack.c.bf16 %v7255_v52, %v7255_v52  ;;  %v6957_v52 = vadd.f32 %v23052_v13, %v23017_v24  ;;  %v6305_v24 = vld [vmem:[%s23043_s27 + $0xc] sm:$0xf] }
0x1afc   :  { %19664 = vmatmul.mubr.msk.bf16.vlgmr.msra.gmra.mrb[244].mxu1 %vm1491_vm2, %v7259_v46 }
0x1afd   :  { %19674 = vmatpush3.bf16.msra.mxu1 %v7408_v35  ;;  %19675 = vmatprep.mubr.msk.bf16.mxu1 %vm21433_vm0, %v25126_v55 }
0x1afe   :  { %19685 = vmatprep.subr.bf16.mxu1 %v25126_v55 }
0x1aff   :  { %v21278_v15 = vpop.eup %21277 }
0x1b00   :  { %v7257_v48 = vmul.f32 %v21278_v15, %v21274_v36  ;;  %v7264_v15 = vpack.c.bf16 %v6957_v52, %v6957_v52 }
0x1b02   :  { %v7261_v21 = vpack.c.bf16 %v7257_v48, %v7257_v48 }
0x1b04   :  { %19676 = vmatmul.mubr.msk.bf16.vlgmr.msra.gmra.mrb[248].mxu1 %vm1491_vm2, %v7261_v21 }
0x1b05   :  { %19687 = vmatprep.mubr.msk.bf16.mxu1 %vm21433_vm0, %v25126_v55 }
0x1b1a   :  { %v7216_v9 = vpop.xlane.xlu0 %7215 }
0x1b1b   :  { %v7226_v32 = vsub.f32 %v7210_v41, %v7216_v9  ;;  %v6303_v41 = vld [vmem:[%s23043_s27 + $0x4] sm:$0xf]  ;;  %v7362_v9 = vsel %vm1735_vm3, %v7264_v15, 0 }
0x1b1d   :  { %v7230_v63 = vmul.f32 1.442695, %v7226_v32 }
0x1b1f   :  { %21279 = vpow2.f32 %v7230_v63  ;;  %v6302_v63 = vld [vmem:[%s23043_s27] sm:$0xf] }
0x1b22   :  { %v7222_v11 = vpop.xlane.xlu0 %7221 }
0x1b23   :  { %v7228_v23 = vsub.f32 %v7212_v3, %v7222_v11  ;;  %v23047_v3 = vsel %vm1735_vm3, %v6303_v41, 0  ;;  %v23068_v41 = vsel %vm1735_vm3, %v6305_v24, 0 }
0x1b24   :  { %19686 = vmatpush3.bf16.msra.mxu1 %v23047_v3 }
0x1b25   :  { %v7234_v20 = vmul.f32 1.442695, %v7228_v23  ;;  %19697 = vmatprep.subr.bf16.mxu1 %v25126_v55 }
0x1b27   :  { %21281 = vpow2.f32 %v7234_v20  ;;  %v23064_v20 = vsel %vm1735_vm3, %v6302_v63, 0 }
0x1b29   :  { %v21280_v27 = vpop.eup %21279 }
0x1b2a   :  { %v7238_v42 = vsel %vm1491_vm2, %v21280_v27, 0.0 }
0x1b2b   :  { %7239 = vadd.xlane.f32.xlu0 %v7238_v42 }
0x1b31   :  { %v21282_v36 = vpop.eup %21281 }
0x1b32   :  { %v7244_v6 = vsel %vm1491_vm2, %v21282_v36, 0.0 }
0x1b33   :  { %7245 = vadd.xlane.f32.xlu0 %v7244_v6 }
0x1bb8   :  { %v7240_v37 = vpop.xlane.xlu0 %7239 }
0x1bb9   :  { %21283 = vrcp.f32 %v7240_v37 }
0x1bc0   :  { %v7246_v46 = vpop.xlane.xlu0 %7245 }
0x1bc1   :  { %21285 = vrcp.f32 %v7246_v46 }
0x1bc3   :  { %v21284_v35 = vpop.eup %21283 }
0x1bc4   :  { %v7254_v48 = vmul.f32 %v21284_v35, %v21280_v27 }
0x1bc6   :  { %v7258_v21 = vpack.c.bf16 %v7254_v48, %v7254_v48 }
0x1bc8   :  { %19658 = vmatmul.mubr.msk.bf16.vlgmr.msra.gmra.mrb[232].mxu0 %vm1491_vm2, %v7258_v21  ;;  %v6237_v21 = vld [vmem:[%s22727_s15 + $0x8] sm:$0xff] }
0x1bc9   :  { %19668 = vmatpush3.bf16.msra.mxu0 %v7362_v9  ;;  %19669 = vmatprep.mubr.msk.bf16.mxu0 %vm21433_vm0, %v25126_v55  ;;  %v23085_v9 = vpack.c.bf16 %v6237_v21, %v6237_v21 }
0x1bca   :  { %19679 = vmatprep.subr.bf16.mxu0 %v25126_v55 }
0x1bcb   :  { %v21286_v32 = vpop.eup %21285 }
0x1bcc   :  { %v7256_v11 = vmul.f32 %v21286_v32, %v21282_v36 }
0x1bce   :  { %v7260_v23 = vpack.c.bf16 %v7256_v11, %v7256_v11 }
0x1bcf   :  { %v7352_v27 = vpop.f32.mrb[244].mxu1 }
0x1bd0   :  { %v7451_v42 = vpack.c.bf16 %v7352_v27, %v7352_v27  ;;  %v19665_v6 = vpop.f32.mrb[245].mxu1  ;;  %19670 = vmatmul.mubr.msk.bf16.vlgmr.msra.gmra.mrb[236].mxu0 %vm1491_vm2, %v7260_v23 }
0x1bd1   :  { %v7355_v37 = vpop.f32.mrb[246].mxu1  ;;  %19680 = vmatpush3.bf16.msra.mxu0 %v23064_v20  ;;  %19681 = vmatprep.mubr.msk.bf16.mxu0 %vm21433_vm0, %v25126_v55 }
0x1bd2   :  { %v19666_v36 = vpop.f32.mrb[247].mxu1  ;;  %19688 = vmatmul.mubr.msk.bf16.vlgmr.msra.gmra.mrb[252].mxu1 %vm1491_vm2, %v7451_v42  ;;  %19691 = vmatprep.subr.bf16.mxu0 %v25126_v55 }
0x1bd3   :  { %19698 = vmatpush3.bf16.msra.mxu1 %v23068_v41  ;;  %19699 = vmatprep.mubr.msk.bf16.mxu1 %vm21433_vm0, %v25126_v55 }
0x1bd4   :  { %19711 = vmatprep.subr.bf16.mxu1 %v25126_v55 }
0x1bd7   :  { %v7444_v52 = vpop.f32.mrb[248].mxu1 }
0x1bd8   :  { %v7453_v46 = vpack.c.bf16 %v7444_v52, %v7444_v52  ;;  %v19677_v35 = vpop.f32.mrb[249].mxu1 }
0x1bd9   :  { %v7447_v15 = vpop.f32.mrb[250].mxu1 }
0x1bda   :  { %v19678_v48 = vpop.f32.mrb[251].mxu1  ;;  %19700 = vmatmul.mubr.msk.bf16.vlgmr.msra.gmra.mrb[0].mxu1 %vm1491_vm2, %v7453_v46 }
0x1bdb   :  { %19712 = vmatpush3.bf16.msra.mxu1 %v22751_v61  ;;  %19715 = vmatprep.mubr.msk.bf16.mxu1 %vm21433_vm0, %v25126_v55  ;;  %v6304_v61 = vld [vmem:[%s23043_s27 + $0x8] sm:$0xf] }
0x1bdc   :  { %19713 = vmatprep.subr.bf16.mxu1 %v25126_v55 }
0x1bdf   :  { %19714 = vmatpush3.bf16.msra.mxu1 %v22758_v29 }
0x1be0   :  { %19727 = vmatprep.subr.bf16.mxu1 %v25126_v55 }
0x1be2   :  { %19716 = vmatmul.mubr.msk.bf16.vlgmr.msra.gmra.mrb[4].mxu1 %vm819_vm1, %v23085_v9 }
0x1be3   :  { %19728 = vmatpush3.bf16.msra.mxu1 %v22765_v51  ;;  %19731 = vmatprep.mubr.msk.bf16.mxu1 %vm21433_vm0, %v25126_v55 }
0x1be4   :  { %19729 = vmatprep.subr.bf16.mxu1 %v25126_v55 }
0x1be7   :  { %19730 = vmatpush3.bf16.msra.mxu1 %v22772_v14 }
0x1be8   :  { %19743 = vmatprep.subr.bf16.mxu1 %v25126_v55 }
0x1bea   :  { %19732 = vmatmul.mubr.msk.bf16.vlgmr.msra.gmra.mrb[8].mxu1 %vm819_vm1, %v23085_v9 }
0x1beb   :  { %19744 = vmatpush3.bf16.msra.mxu1 %v22779_v50  ;;  %19747 = vmatprep.mubr.msk.bf16.mxu1 %vm21433_vm0, %v25126_v55  ;;  %v23135_v50 = vsel %vm1735_vm3, %v6304_v61, 0 }
0x1bec   :  { %19745 = vmatprep.subr.bf16.mxu1 %v25126_v55 }
0x1bef   :  { %19746 = vmatpush3.bf16.msra.mxu1 %v22786_v31 }
0x1bf0   :  { %19759 = vmatprep.subr.bf16.mxu1 %v25126_v55 }
0x1bf2   :  { %19748 = vmatmul.mubr.msk.bf16.vlgmr.msra.gmra.mrb[12].mxu1 %vm819_vm1, %v23085_v9 }
0x1bf3   :  { %19760 = vmatpush3.bf16.msra.mxu1 %v22793_v43  ;;  %19763 = vmatprep.mubr.msk.bf16.mxu1 %vm21433_vm0, %v25126_v55 }
0x1bf4   :  { %19761 = vmatprep.subr.bf16.mxu1 %v25126_v55 }
0x1bf7   :  { %19762 = vmatpush3.bf16.msra.mxu1 %v22800_v10 }
0x1bf8   :  { %19775 = vmatprep.subr.bf16.mxu1 %v25126_v55 }
0x1bfa   :  { %19764 = vmatmul.mubr.msk.bf16.vlgmr.msra.gmra.mrb[16].mxu1 %vm819_vm1, %v23085_v9 }
0x1bfb   :  { %19776 = vmatpush3.bf16.msra.mxu1 %v22816_v57  ;;  %19779 = vmatprep.mubr.msk.bf16.mxu1 %vm21433_vm0, %v25126_v55 }
0x1bfc   :  { %19777 = vmatprep.subr.bf16.mxu1 %v25126_v55 }
0x1bff   :  { %19778 = vmatpush3.bf16.msra.mxu1 %v22821_v47 }
0x1c00   :  { %19791 = vmatprep.subr.bf16.mxu1 %v25126_v55 }
0x1c02   :  { %19780 = vmatmul.mubr.msk.bf16.vlgmr.msra.gmra.mrb[20].mxu1 %vm819_vm1, %v23085_v9 }
0x1c03   :  { %19792 = vmatpush3.bf16.msra.mxu1 %v22826_v1  ;;  %19795 = vmatprep.mubr.msk.bf16.mxu1 %vm21433_vm0, %v25126_v55 }
0x1c04   :  { %19793 = vmatprep.subr.bf16.mxu1 %v25126_v55 }
0x1c07   :  { %19794 = vmatpush3.bf16.msra.mxu1 %v22835_v22 }
0x1c08   :  { %19805 = vmatprep.subr.bf16.mxu1 %v25126_v55 }
0x1c0a   :  { %19796 = vmatmul.mubr.msk.bf16.vlgmr.msra.gmra.mrb[24].mxu1 %vm819_vm1, %v23085_v9 }
0x1c0b   :  { %19807 = vmatprep.mubr.msk.bf16.mxu1 %vm21433_vm0, %v25126_v55 }
0x1c9b   :  { %v7306_v29 = vpop.f32.mrb[232].mxu0 }
0x1c9c   :  { %v7450_v51 = vpack.c.bf16 %v7306_v29, %v7306_v29  ;;  %v19659_v14 = vpop.f32.mrb[233].mxu0 }
0x1c9d   :  { %v7309_v31 = vpop.f32.mrb[234].mxu0 }
0x1c9e   :  { %v19660_v43 = vpop.f32.mrb[235].mxu0  ;;  %19682 = vmatmul.mubr.msk.bf16.vlgmr.msra.gmra.mrb[240].mxu0 %vm1491_vm2, %v7450_v51 }
0x1c9f   :  { %19692 = vmatpush3.bf16.msra.mxu0 %v23135_v50  ;;  %19693 = vmatprep.mubr.msk.bf16.mxu0 %vm21433_vm0, %v25126_v55 }
0x1ca0   :  { %19703 = vmatprep.subr.bf16.mxu0 %v25126_v55 }
0x1ca3   :  { %v7398_v10 = vpop.f32.mrb[236].mxu0 }
0x1ca4   :  { %v7452_v57 = vpack.c.bf16 %v7398_v10, %v7398_v10  ;;  %v19671_v47 = vpop.f32.mrb[237].mxu0 }
0x1ca5   :  { %v7401_v1 = vpop.f32.mrb[238].mxu0  ;;  %v23142_v22 = vpop.f32.mrb[252].mxu1 }
0x1ca6   :  { %v19672_v32 = vpop.f32.mrb[239].mxu0  ;;  %v19689_v63 = vpop.f32.mrb[253].mxu1  ;;  %19694 = vmatmul.mubr.msk.bf16.vlgmr.msra.gmra.mrb[244].mxu0 %vm1491_vm2, %v7452_v57 }
0x1ca7   :  { %v7543_v11 = vpop.f32.mrb[254].mxu1  ;;  %19704 = vmatpush3.bf16.msra.mxu0 %v22734_v58  ;;  %19707 = vmatprep.mubr.msk.bf16.mxu0 %vm21433_vm0, %v25126_v55 }
0x1ca8   :  { %v19690_v24 = vpop.f32.mrb[255].mxu1  ;;  %19705 = vmatprep.subr.bf16.mxu0 %v25126_v55 }
0x1cab   :  { %19706 = vmatpush3.bf16.msra.mxu0 %v22741_v2 }
0x1cac   :  { %19719 = vmatprep.subr.bf16.mxu0 %v25126_v55 }
0x1cad   :  { %v23151_v23 = vpop.f32.mrb[0].mxu1 }
0x1cae   :  { %v19701_v27 = vpop.f32.mrb[1].mxu1  ;;  %19708 = vmatmul.mubr.msk.bf16.vlgmr.msra.gmra.mrb[248].mxu0 %vm819_vm1, %v23085_v9 }
0x1caf   :  { %v7635_v42 = vpop.f32.mrb[2].mxu1  ;;  %19720 = vmatpush3.bf16.msra.mxu0 %v22845_v56  ;;  %19723 = vmatprep.mubr.msk.bf16.mxu0 %vm21433_vm0, %v25126_v55 }
0x1cb0   :  { %v19702_v58 = vpop.f32.mrb[3].mxu1  ;;  %19721 = vmatprep.subr.bf16.mxu0 %v25126_v55 }
0x1cb3   :  { %19722 = vmatpush3.bf16.msra.mxu0 %v22852_v59 }
0x1cb4   :  { %19735 = vmatprep.subr.bf16.mxu0 %v25126_v55 }
0x1cb5   :  { %v7737_v2 = vpop.f32.mrb[4].mxu1 }
0x1cb6   :  { %19724 = vmatmul.mubr.msk.bf16.vlgmr.msra.gmra.mrb[252].mxu0 %vm819_vm1, %v23085_v9  ;;  %v19717_v6 = vpop.f32.mrb[5].mxu1 }
0x1cb7   :  { %19736 = vmatpush3.bf16.msra.mxu0 %v22859_v5  ;;  %19739 = vmatprep.mubr.msk.bf16.mxu0 %vm21433_vm0, %v25126_v55  ;;  %v7740_v56 = vpop.f32.mrb[6].mxu1 }
0x1cb8   :  { %19737 = vmatprep.subr.bf16.mxu0 %v25126_v55  ;;  %v19718_v37 = vpop.f32.mrb[7].mxu1 }
0x1cbb   :  { %19738 = vmatpush3.bf16.msra.mxu0 %v22866_v16 }
0x1cbc   :  { %19751 = vmatprep.subr.bf16.mxu0 %v25126_v55 }
0x1cbd   :  { %v7817_v59 = vpop.f32.mrb[8].mxu1 }
0x1cbe   :  { %19740 = vmatmul.mubr.msk.bf16.vlgmr.msra.gmra.mrb[0].mxu0 %vm819_vm1, %v23085_v9  ;;  %v19733_v36 = vpop.f32.mrb[9].mxu1  ;;  %v7818_v14 = vadd.f32 %v22916_v12, %v7817_v59  ;;  %v7643_v59 = vsel %vm819_vm1, %v23151_v23, 0.0 }
0x1cbf   :  { %19752 = vmatpush3.bf16.msra.mxu0 %v22878_v26  ;;  %v7820_v52 = vpop.f32.mrb[10].mxu1  ;;  %19755 = vmatprep.mubr.msk.bf16.mxu0 %vm21433_vm0, %v25126_v55 }
0x1cc0   :  { %19753 = vmatprep.subr.bf16.mxu0 %v25126_v55  ;;  %v19734_v5 = vpop.f32.mrb[11].mxu1 }
0x1cc3   :  { %19754 = vmatpush3.bf16.msra.mxu0 %v22885_v49  ;;  %v7738_v49 = vadd.f32 %v22902_v0, %v7737_v2 }
0x1cc4   :  { %19767 = vmatprep.subr.bf16.mxu0 %v25126_v55 }
0x1cc5   :  { %v7897_v16 = vpop.f32.mrb[12].mxu1 }
0x1cc6   :  { %v7898_v46 = vadd.f32 %v22892_v25, %v7897_v16  ;;  %19756 = vmatmul.mubr.msk.bf16.vlgmr.msra.gmra.mrb[4].mxu0 %vm819_vm1, %v23085_v9  ;;  %v19749_v35 = vpop.f32.mrb[13].mxu1 }
0x1cc7   :  { %v7900_v15 = vpop.f32.mrb[14].mxu1  ;;  %19768 = vmatpush3.bf16.msra.mxu0 %v22895_v45  ;;  %19771 = vmatprep.mubr.msk.bf16.mxu0 %vm21433_vm0, %v25126_v55  ;;  %v8144_v45 = vpack.c.bf16 %v7738_v49, %v7738_v49 }
0x1cc8   :  { %v8148_v26 = vpack.c.bf16 %v7898_v46, %v7898_v46  ;;  %v19750_v48 = vpop.f32.mrb[15].mxu1  ;;  %19769 = vmatprep.subr.bf16.mxu0 %v25126_v55 }
0x1cca   :  { %v8201_v21 = vsel %vm1491_vm2, %v8148_v26, 0 }
0x1ccb   :  { %19806 = vmatpush3.bf16.xpose.msra.mxu1 %v8201_v21  ;;  %19770 = vmatpush3.bf16.msra.mxu0 %v22928_v17 }
0x1ccc   :  { %19817 = vmatprep.subr.bf16.mxu1 %v25126_v55  ;;  %19783 = vmatprep.subr.bf16.mxu0 %v25126_v55 }
0x1ccd   :  { %v7977_v25 = vpop.f32.mrb[16].mxu1 }
0x1cce   :  { %v7978_v61 = vadd.f32 %v22911_v18, %v7977_v25  ;;  %19772 = vmatmul.mubr.msk.bf16.vlgmr.msra.gmra.mrb[8].mxu0 %vm819_vm1, %v23085_v9  ;;  %v19765_v29 = vpop.f32.mrb[17].mxu1 }
0x1ccf   :  { %19784 = vmatpush3.bf16.msra.mxu0 %v22935_v30  ;;  %19787 = vmatprep.mubr.msk.bf16.mxu0 %vm21433_vm0, %v25126_v55  ;;  %v7980_v0 = vpop.f32.mrb[18].mxu1  ;;  %v8146_v30 = vpack.c.bf16 %v7818_v14, %v7818_v14 }
0x1cd0   :  { %v8150_v51 = vpack.c.bf16 %v7978_v61, %v7978_v61  ;;  %19785 = vmatprep.subr.bf16.mxu0 %v25126_v55  ;;  %v19766_v17 = vpop.f32.mrb[19].mxu1 }
0x1cd2   :  { %19808 = vmatmul.mubr.msk.bf16.vlgmr.msra.gmra.mrb[28].mxu1 %vm1491_vm2, %v8144_v45  ;;  %v8293_v18 = vsel %vm1491_vm2, %v8150_v51, 0 }
0x1cd3   :  { %19818 = vmatpush3.bf16.xpose.msra.mxu1 %v8293_v18  ;;  %19819 = vmatprep.mubr.msk.bf16.mxu1 %vm21433_vm0, %v25126_v55 }
0x1cd4   :  { %19786 = vmatpush3.bf16.msra.mxu0 %v22942_v4  ;;  %19829 = vmatprep.subr.bf16.mxu1 %v25126_v55 }
0x1cd5   :  { %19799 = vmatprep.subr.bf16.mxu0 %v25126_v55  ;;  %v23211_v12 = vpop.f32.mrb[20].mxu1 }
0x1cd6   :  { %v19781_v31 = vpop.f32.mrb[21].mxu1 }
0x1cd7   :  { %19788 = vmatmul.mubr.msk.bf16.vlgmr.msra.gmra.mrb[12].mxu0 %vm819_vm1, %v23085_v9  ;;  %v8060_v4 = vpop.f32.mrb[22].mxu1  ;;  %v7639_v9 = vsel %vm819_vm1, %v23142_v22, 0.0 }
0x1cd8   :  { %19801 = vmatprep.mubr.msk.bf16.mxu0 %vm21433_vm0, %v25126_v55  ;;  %v19782_v43 = vpop.f32.mrb[23].mxu1 }
0x1cd9   :  { %v17496_v43 = vld [vmem:[%s22979_s22 + $0x1] ss:$0 sm:$0xff] }
0x1cda   :  { %19820 = vmatmul.mubr.msk.bf16.vlgmr.msra.gmra.mrb[32].mxu1 %vm1491_vm2, %v8146_v30 }
0x1cdb   :  { %19831 = vmatprep.mubr.msk.bf16.mxu1 %vm21433_vm0, %v25126_v55 }
0x1cdd   :  { %v23213_v10 = vpop.f32.mrb[24].mxu1 }
0x1cde   :  { %v19797_v57 = vpop.f32.mrb[25].mxu1 }
0x1cdf   :  { %v8140_v47 = vpop.f32.mrb[26].mxu1 }
0x1ce0   :  { %v19798_v1 = vpop.f32.mrb[27].mxu1 }
0x1d71   :  { %v7494_v32 = vpop.f32.mrb[240].mxu0 }
0x1d72   :  { %v7638_v63 = vsel %vm819_vm1, %v7494_v32, 0.0  ;;  %v19683_v11 = vpop.f32.mrb[241].mxu0 }
0x1d73   :  { %v7640_v24 = vadd.f32 %v7639_v9, %v7638_v63  ;;  %v7497_v27 = vpop.f32.mrb[242].mxu0 }
0x1d74   :  { %v19684_v42 = vpop.f32.mrb[243].mxu0 }
0x1d79   :  { %v7586_v58 = vpop.f32.mrb[244].mxu0 }
0x1d7a   :  { %v7641_v2 = vsel %vm819_vm1, %v7586_v58, 0.0  ;;  %v19695_v6 = vpop.f32.mrb[245].mxu0 }
0x1d7b   :  { %v7642_v56 = vadd.f32 %v7641_v2, %v7640_v24  ;;  %v7589_v37 = vpop.f32.mrb[246].mxu0 }
0x1d7c   :  { %v19696_v36 = vpop.f32.mrb[247].mxu0  ;;  %v8058_v37 = vadd.f32 %v23005_v60, %v23211_v12 }
0x1d7d   :  { %v23221_v52 = vadd.f32 %v7643_v59, %v7642_v56 }
0x1d7e   :  { %v8392_v59 = vpack.c.bf16 %v8058_v37, %v8058_v37 }
0x1d81   :  { %v7697_v5 = vpop.f32.mrb[248].mxu0 }
0x1d82   :  { %v19709_v22 = vpop.f32.mrb[249].mxu0  ;;  %v7698_v0 = vadd.f32 %v22967_v62, %v7697_v5  ;;  %v8445_v5 = vsel %vm1735_vm3, %v8392_v59, 0 }
0x1d83   :  { %v7700_v16 = vpop.f32.mrb[250].mxu0  ;;  %19830 = vmatpush3.bf16.msra.mxu1 %v8445_v5 }
0x1d84   :  { %v19710_v46 = vpop.f32.mrb[251].mxu0  ;;  %v8143_v30 = vpack.c.bf16 %v7698_v0, %v7698_v0  ;;  %19841 = vmatprep.subr.bf16.mxu1 %v25126_v55 }
0x1d89   :  { %v7777_v35 = vpop.f32.mrb[252].mxu0 }
0x1d8a   :  { %v19725_v15 = vpop.f32.mrb[253].mxu0  ;;  %v7778_v62 = vadd.f32 %v22983_v54, %v7777_v35 }
0x1d8b   :  { %v7780_v26 = vpop.f32.mrb[254].mxu0 }
0x1d8c   :  { %v19726_v48 = vpop.f32.mrb[255].mxu0  ;;  %v8145_v57 = vpack.c.bf16 %v7778_v62, %v7778_v62 }
0x1d91   :  { %v7857_v49 = vpop.f32.mrb[0].mxu0 }
0x1d92   :  { %v7858_v21 = vadd.f32 %v22963_v19, %v7857_v49  ;;  %v19741_v25 = vpop.f32.mrb[1].mxu0 }
0x1d93   :  { %v7860_v45 = vpop.f32.mrb[2].mxu0 }
0x1d94   :  { %v8147_v61 = vpack.c.bf16 %v7858_v21, %v7858_v21  ;;  %v19742_v29 = vpop.f32.mrb[3].mxu0 }
0x1d96   :  { %v8155_v23 = vsel %vm1491_vm2, %v8147_v61, 0 }
0x1d97   :  { %19800 = vmatpush3.bf16.xpose.msra.mxu0 %v8155_v23 }
0x1d98   :  { %19811 = vmatprep.subr.bf16.mxu0 %v25126_v55 }
0x1d99   :  { %v7937_v51 = vpop.f32.mrb[4].mxu0 }
0x1d9a   :  { %v7938_v17 = vadd.f32 %v22971_v53, %v7937_v51  ;;  %v19757_v14 = vpop.f32.mrb[5].mxu0  ;;  %v23236_v53 = vadd.f32 %v17496_v43, %v22991_v7  ;;  %v6174_v51 = vadd.f32 %v22957_v33, %v22954_v8 }
0x1d9b   :  { %v7940_v18 = vpop.f32.mrb[6].mxu0 }
0x1d9c   :  { %v8149_v31 = vpack.c.bf16 %v7938_v17, %v7938_v17  ;;  %v19758_v19 = vpop.f32.mrb[7].mxu0  ;;  %25132 = vst [vmem:[#allocation2_spill] sm:$0xff] %v23236_v53  ;;  %v6180_v18 = vadd.f32 %v6174_v51, %v22729_v39 }
0x1d9e   :  { %19802 = vmatmul.mubr.msk.bf16.vlgmr.msra.gmra.mrb[16].mxu0 %vm1491_vm2, %v8143_v30  ;;  %v8247_v4 = vsel %vm1491_vm2, %v8149_v31, 0  ;;  %v6186_v30 = vsel %vm819_vm1, %v6180_v18, 0.0 }
0x1d9f   :  { %19812 = vmatpush3.bf16.xpose.msra.mxu0 %v8247_v4  ;;  %19813 = vmatprep.mubr.msk.bf16.mxu0 %vm21433_vm0, %v25126_v55 }
0x1da0   :  { %19823 = vmatprep.subr.bf16.mxu0 %v25126_v55 }
0x1da1   :  { %v8017_v36 = vpop.f32.mrb[8].mxu0 }
0x1da2   :  { %v8018_v22 = vadd.f32 %v23012_v44, %v8017_v36  ;;  %v19773_v16 = vpop.f32.mrb[9].mxu0 }
0x1da3   :  { %v8020_v46 = vpop.f32.mrb[10].mxu0 }
0x1da4   :  { %v8391_v35 = vpack.c.bf16 %v8018_v22, %v8018_v22  ;;  %v19774_v15 = vpop.f32.mrb[11].mxu0 }
0x1da5   :  { %v8237_v47 = vpop.f32.mrb[28].mxu1 }
0x1da6   :  { %v8336_v1 = vmul.f32 0.35355338, %v8237_v47  ;;  %19814 = vmatmul.mubr.msk.bf16.vlgmr.msra.gmra.mrb[20].mxu0 %vm1491_vm2, %v8145_v57  ;;  %v19809_v32 = vpop.f32.mrb[29].mxu1  ;;  %v8399_v48 = vsel %vm1735_vm3, %v8391_v35, 0 }
0x1da7   :  { %v8240_v9 = vpop.f32.mrb[30].mxu1  ;;  %19825 = vmatprep.mubr.msk.bf16.mxu0 %vm21433_vm0, %v25126_v55  ;;  %19824 = vmatpush3.bf16.msra.mxu0 %v8399_v48 }
0x1da8   :  { %v8340_v63 = vadd.f32 %v8336_v1, %v23236_v53  ;;  %v19810_v11 = vpop.f32.mrb[31].mxu1  ;;  %19835 = vmatprep.subr.bf16.mxu0 %v25126_v55 }
0x1daa   :  { %v8346_v54 = vsel %vm1491_vm2, %v8340_v63, -inf  ;;  %v23250_v26 = vpop.f32.mrb[12].mxu0 }
0x1dab   :  { %8347 = vmax.xlane.f32.xlu1 %v8346_v54  ;;  %v19789_v49 = vpop.f32.mrb[13].mxu0  ;;  %v8138_v54 = vadd.f32 %v23026_v28, %v23213_v10 }
0x1dac   :  { %v8100_v60 = vpop.f32.mrb[14].mxu0 }
0x1dad   :  { %v8329_v24 = vpop.f32.mrb[32].mxu1  ;;  %v19790_v12 = vpop.f32.mrb[15].mxu0 }
0x1dae   :  { %v8338_v27 = vmul.f32 0.35355338, %v8329_v24  ;;  %v19821_v42 = vpop.f32.mrb[33].mxu1  ;;  %v23288_v12 = vld [vmem:[%s23284_s2] ss:$0 sm:$0xff] }
0x1daf   :  { %v8332_v58 = vpop.f32.mrb[34].mxu1  ;;  %v8394_v42 = vpack.c.bf16 %v8138_v54, %v8138_v54  ;;  %v23324_v54 = vld [vmem:[%s23319_s9 + $0x18] sm:$0xff]  }
0x1db0   :  { %v8342_v2 = vadd.f32 %v8338_v27, %v23236_v53  ;;  %v19822_v6 = vpop.f32.mrb[35].mxu1 }
0x1db1   :  { %v8537_v59 = vsel %vm1735_vm3, %v8394_v42, 0 }
0x1db2   :  { %v8352_v56 = vsel %vm1491_vm2, %v8342_v2, -inf }
0x1db3   :  { %8353 = vmax.xlane.f32.xlu1 %v8352_v56 }
0x1e38   :  { %v8348_v21 = vpop.xlane.xlu1 %8347 }
0x1e39   :  { %v8356_v25 = vsub.f32 %v8340_v63, %v8348_v21  ;;  %v7651_v21 = vadd.f32 %v23288_v12, %v23221_v52 }
0x1e3b   :  { %v8361_v44 = vmul.f32 1.442695, %v8356_v25 }
0x1e3d   :  { %21287 = vpow2.f32 %v8361_v44 }
0x1e40   :  { %v8354_v45 = vpop.xlane.xlu1 %8353 }
0x1e41   :  { %v8358_v61 = vsub.f32 %v8342_v2, %v8354_v45  ;;  %v21427_v45 = vld [vmem:[%s22727_s15] sm:$0xff] }
0x1e43   :  { %v8365_v29 = vmul.f32 1.442695, %v8358_v61  ;;  %v8763_v61 = vadd.f32 %v21427_v45, %v7651_v21  ;;  %v23398_v45 = vld [vmem:[%s23319_s9 + $0x78] sm:$0xff]  }
0x1e45   :  { %21289 = vpow2.f32 %v8365_v29  ;;  %v8767_v29 = vsel %vm819_vm1, %v8763_v61, 0.0 }
0x1e47   :  { %v21288_v23 = vpop.eup %21287 }
0x1e48   :  { %v8370_v0 = vsel %vm1491_vm2, %v21288_v23, 0.0 }
0x1e49   :  { %8371 = vadd.xlane.f32.xlu1 %v8370_v0  ;;  %v8098_v0 = vadd.f32 %v23052_v13, %v23250_v26 }
0x1e4f   :  { %v21290_v17 = vpop.eup %21289 }
0x1e50   :  { %v8376_v14 = vsel %vm1491_vm2, %v21290_v17, 0.0 }
0x1e51   :  { %8377 = vadd.xlane.f32.xlu1 %v8376_v14  ;;  %v8393_v14 = vpack.c.bf16 %v8098_v0, %v8098_v0  ;;  %v23426_v0 = vld [vmem:[%s23319_s9 + $0xb8] sm:$0xff]  }
0x1e55   :  { %6187 = vadd.xlane.f32.xlu1 %v6186_v30 }
0x1e71   :  { %v8191_v31 = vpop.f32.mrb[16].mxu0 }
0x1e72   :  { %v8335_v19 = vmul.f32 0.35355338, %v8191_v31  ;;  %v19803_v4 = vpop.f32.mrb[17].mxu0 }
0x1e73   :  { %v8194_v62 = vpop.f32.mrb[18].mxu0  ;;  %v8491_v4 = vsel %vm1735_vm3, %v8393_v14, 0 }
0x1e74   :  { %v19804_v43 = vpop.f32.mrb[19].mxu0  ;;  %v8339_v57 = vadd.f32 %v8335_v19, %v23236_v53 }
0x1e76   :  { %v8343_v47 = vsel %vm1491_vm2, %v8339_v57, -inf }
0x1e77   :  { %8344 = vmax.xlane.f32.xlu0 %v8343_v47 }
0x1e79   :  { %v8283_v8 = vpop.f32.mrb[20].mxu0 }
0x1e7a   :  { %v8337_v33 = vmul.f32 0.35355338, %v8283_v8  ;;  %v19815_v1 = vpop.f32.mrb[21].mxu0 }
0x1e7b   :  { %v8286_v32 = vpop.f32.mrb[22].mxu0 }
0x1e7c   :  { %v19816_v9 = vpop.f32.mrb[23].mxu0  ;;  %v8341_v39 = vadd.f32 %v8337_v33, %v23236_v53 }
0x1e7e   :  { %v8349_v63 = vsel %vm1491_vm2, %v8341_v39, -inf }
0x1e7f   :  { %8350 = vmax.xlane.f32.xlu0 %v8349_v63 }
0x1ed6   :  { %v8372_v11 = vpop.xlane.xlu1 %8371 }
0x1ed7   :  { %21291 = vrcp.f32 %v8372_v11 }
0x1ede   :  { %v8378_v24 = vpop.xlane.xlu1 %8377 }
0x1edf   :  { %21293 = vrcp.f32 %v8378_v24 }
0x1ee1   :  { %v21292_v27 = vpop.eup %21291 }
0x1ee2   :  { %v8384_v58 = vmul.f32 %v21292_v27, %v21288_v23  ;;  %v6188_v2 = vpop.xlane.xlu1 %6187 }
0x1ee3   :  { %v6192_v6 = vmul.f32 0.03125, %v6188_v2 }
0x1ee4   :  { %v8388_v56 = vpack.c.bf16 %v8384_v58, %v8384_v58 }
0x1ee5   :  { %v23266_v37 = vsub.f32 %v6180_v18, %v6192_v6 }
0x1ee6   :  { %19832 = vmatmul.mubr.msk.bf16.vlgmr.msra.gmra.mrb[36].mxu1 %vm1491_vm2, %v8388_v56 }
0x1ee7   :  { %19842 = vmatpush3.bf16.msra.mxu1 %v8537_v59  ;;  %v6196_v36 = vmul.f32 %v23266_v37, %v23266_v37  ;;  %19843 = vmatprep.mubr.msk.bf16.mxu1 %vm21433_vm0, %v25126_v55  ;;  %v23339_v59 = vld [vmem:[%s23331_s7] ss:$0 sm:$0xff] }
0x1ee8   :  { %19853 = vmatprep.subr.bf16.mxu1 %v25126_v55 }
0x1ee9   :  { %v21294_v28 = vpop.eup %21293  ;;  %v6198_v10 = vsel %vm819_vm1, %v6196_v36, 0.0 }
0x1eea   :  { %v8386_v5 = vmul.f32 %v21294_v28, %v21290_v17  ;;  %6199 = vadd.xlane.f32.xlu1 %v6198_v10  ;;  %v23342_v28 = vld [vmem:[%s23336_s16] ss:$0 sm:$0xff] }
0x1eec   :  { %v8390_v22 = vpack.c.bf16 %v8386_v5, %v8386_v5 }
0x1eee   :  { %19844 = vmatmul.mubr.msk.bf16.vlgmr.msra.gmra.mrb[40].mxu1 %vm1491_vm2, %v8390_v22  ;;  %v23349_v22 = vld [vmem:[%s23319_s9 + $0x30] sm:$0xff]  }
0x1eef   :  { %19854 = vmatpush3.bf16.msra.mxu1 %v23047_v3  ;;  %19855 = vmatprep.mubr.msk.bf16.mxu1 %vm21433_vm0, %v25126_v55 }
0x1ef0   :  { %19865 = vmatprep.subr.bf16.mxu1 %v25126_v55 }
0x1f04   :  { %v8345_v16 = vpop.xlane.xlu0 %8344 }
0x1f05   :  { %v8355_v46 = vsub.f32 %v8339_v57, %v8345_v16 }
0x1f07   :  { %v8359_v35 = vmul.f32 1.442695, %v8355_v46 }
0x1f09   :  { %21295 = vpow2.f32 %v8359_v35  ;;  %v23359_v35 = vld [vmem:[%s23319_s9 + $0x38] sm:$0xff]  }
0x1f0c   :  { %v8351_v15 = vpop.xlane.xlu0 %8350 }
0x1f0d   :  { %v8357_v48 = vsub.f32 %v8341_v39, %v8351_v15 }
0x1f0f   :  { %v8363_v3 = vmul.f32 1.442695, %v8357_v48  ;;  %v23366_v48 = vld [vmem:[%s22181_s5 + $0x1] ss:$0 sm:$0xff]  ;;  %s21457_s5 = smov 25  }
0x1f10   :  { %s23536_s19 = sld [smem:[%s25125_s0 + %s21457_s5]]  }
0x1f11   :  { %21297 = vpow2.f32 %v8363_v3  ;;  %v23370_v3 = vld [vmem:[%s23319_s9 + $0x50] sm:$0xff]   ;;  %s23960_s5 = sld [smem:[%s25125_s0 + %s21462_s12]]  }
0x1f13   :  { %v21296_v49 = vpop.eup %21295 }
0x1f14   :  { %v8367_v60 = vsel %vm1491_vm2, %v21296_v49, 0.0 }
0x1f15   :  { %8368 = vadd.xlane.f32.xlu0 %v8367_v60  ;;  %v23375_v60 = vld [vmem:[%s22186_s10 + $0x1] ss:$0 sm:$0xff]  ;;  %s21463_s10 = smov 29  }
0x1f16   :  { %s23965_s20 = sld [smem:[%s25125_s0 + %s21463_s10]]  }
0x1f1b   :  { %v21298_v25 = vpop.eup %21297 }
0x1f1c   :  { %v8373_v44 = vsel %vm1491_vm2, %v21298_v25, 0.0 }
0x1f1d   :  { %8374 = vadd.xlane.f32.xlu0 %v8373_v44 }
0x1f21   :  { %8768 = vadd.xlane.f32.xlu0 %v8767_v29  ;;  %v23412_v29 = vld [vmem:[%s23319_s9 + $0x98] sm:$0xff]  }
0x1f77   :  { %v6200_v42 = vpop.xlane.xlu1 %6199 }
0x1f78   :  { %v6204_v2 = vmul.f32 0.03125, %v6200_v42  ;;  %v23515_v42 = vld [vmem:[%s23319_s9 + $0xa0] sm:$0xff]  }
0x1f7a   :  { %v6206_v6 = vadd.f32 1e-05, %v6204_v2 }
0x1fa2   :  { %v8369_v23 = vpop.xlane.xlu0 %8368 }
0x1fa3   :  { %21299 = vrcp.f32 %v8369_v23  ;;  %v23419_v23 = vld [vmem:[%s23319_s9 + $0xb0] sm:$0xff]  }
0x1faa   :  { %v8375_v51 = vpop.xlane.xlu0 %8374 }
0x1fab   :  { %21301 = vrcp.f32 %v8375_v51 }
0x1fad   :  { %v21300_v17 = vpop.eup %21299 }
0x1fae   :  { %v8383_v18 = vmul.f32 %v21300_v17, %v21296_v49  ;;  %v8769_v52 = vpop.xlane.xlu0 %8768 }
0x1faf   :  { %v8773_v30 = vmul.f32 0.03125, %v8769_v52 }
0x1fb0   :  { %v8387_v31 = vpack.c.bf16 %v8383_v18, %v8383_v18 }
0x1fb1   :  { %v8775_v19 = vsub.f32 %v8763_v61, %v8773_v30  ;;  %v23405_v61 = vld [vmem:[%s23319_s9 + $0x90] sm:$0xff]  }
0x1fb2   :  { %19826 = vmatmul.mubr.msk.bf16.vlgmr.msra.gmra.mrb[24].mxu0 %vm1491_vm2, %v8387_v31  ;;  %v23443_v31 = vld [vmem:[%s23319_s9] sm:$0xff]  }
0x1fb3   :  { %19836 = vmatpush3.bf16.msra.mxu0 %v8491_v4  ;;  %v8777_v62 = vmul.f32 %v8775_v19, %v8775_v19  ;;  %19837 = vmatprep.mubr.msk.bf16.mxu0 %vm21433_vm0, %v25126_v55 }
0x1fb4   :  { %19847 = vmatprep.subr.bf16.mxu0 %v25126_v55 }
0x1fb5   :  { %v21302_v13 = vpop.eup %21301  ;;  %v8779_v26 = vsel %vm819_vm1, %v8777_v62, 0.0 }
0x1fb6   :  { %v8385_v43 = vmul.f32 %v21302_v13, %v21298_v25  ;;  %8780 = vadd.xlane.f32.xlu0 %v8779_v26  ;;  %v23389_v25 = vld [vmem:[%s23319_s9 + $0x70] sm:$0xff]  }
0x1fb8   :  { %v8389_v57 = vpack.c.bf16 %v8385_v43, %v8385_v43 }
0x1fb9   :  { %v8481_v47 = vpop.f32.mrb[36].mxu1 }
0x1fba   :  { %v8580_v8 = vpack.c.bf16 %v8481_v47, %v8481_v47  ;;  %v19833_v33 = vpop.f32.mrb[37].mxu1  ;;  %19838 = vmatmul.mubr.msk.bf16.vlgmr.msra.gmra.mrb[28].mxu0 %vm1491_vm2, %v8389_v57  ;;  %v23450_v57 = vld [vmem:[%s23319_s9 + $0x8] sm:$0xff]  }
0x1fbb   :  { %v8484_v1 = vpop.f32.mrb[38].mxu1  ;;  %19848 = vmatpush3.bf16.msra.mxu0 %v23064_v20  ;;  %19849 = vmatprep.mubr.msk.bf16.mxu0 %vm21433_vm0, %v25126_v55 }
0x1fbc   :  { %v19834_v32 = vpop.f32.mrb[39].mxu1  ;;  %19856 = vmatmul.mubr.msk.bf16.vlgmr.msra.gmra.mrb[44].mxu1 %vm1491_vm2, %v8580_v8  ;;  %19859 = vmatprep.subr.bf16.mxu0 %v25126_v55  ;;  %v23457_v8 = vld [vmem:[%s23319_s9 + $0x20] sm:$0xff]  }
0x1fbd   :  { %19866 = vmatpush3.bf16.msra.mxu1 %v23068_v41  ;;  %19867 = vmatprep.mubr.msk.bf16.mxu1 %vm21433_vm0, %v25126_v55  ;;  %v21109_v41 = vld [vmem:[%s23319_s9 + $0x10] sm:$0xff]  }
0x1fbe   :  { %19879 = vmatprep.subr.bf16.mxu1 %v25126_v55 }
0x1fc1   :  { %v8573_v9 = vpop.f32.mrb[40].mxu1 }
0x1fc2   :  { %v8582_v39 = vpack.c.bf16 %v8573_v9, %v8573_v9  ;;  %v19845_v63 = vpop.f32.mrb[41].mxu1  ;;  %v23466_v9 = vld [vmem:[%s23319_s9 + $0x28] sm:$0xff]  }
0x1fc3   :  { %v8576_v11 = vpop.f32.mrb[42].mxu1  ;;  %v23473_v63 = vld [vmem:[%s23319_s9 + $0x40] sm:$0xff]  }
0x1fc4   :  { %v19846_v20 = vpop.f32.mrb[43].mxu1  ;;  %19868 = vmatmul.mubr.msk.bf16.vlgmr.msra.gmra.mrb[48].mxu1 %vm1491_vm2, %v8582_v39  ;;  %v23480_v11 = vld [vmem:[%s23319_s9 + $0x48] sm:$0xff]  }
0x1fc5   :  { %19883 = vmatprep.mubr.msk.bf16.mxu1 %vm21433_vm0, %v25126_v55  ;;  %19880 = vmatpush3.bf16.msra.mxu1 %v21109_v41  ;;  %v23487_v20 = vld [vmem:[%s23319_s9 + $0x60] sm:$0xff]   ;;  %v23494_v41 = vld [vmem:[%s23319_s9 + $0x68] sm:$0xff]  }
0x1fc6   :  { %19881 = vmatprep.subr.bf16.mxu1 %v25126_v55 }
0x1fc9   :  { %19882 = vmatpush3.bf16.msra.mxu1 %v23324_v54 }
0x1fca   :  { %19895 = vmatprep.subr.bf16.mxu1 %v25126_v55 }
0x2043   :  { %v8781_v24 = vpop.xlane.xlu0 %8780 }
0x2044   :  { %v8785_v27 = vmul.f32 0.03125, %v8781_v24  ;;  %v23501_v24 = vld [vmem:[%s23319_s9 + $0x80] sm:$0xff]  }
0x2046   :  { %v8787_v58 = vadd.f32 1e-05, %v8785_v27  ;;  %v23508_v27 = vld [vmem:[%s23319_s9 + $0x88] sm:$0xff]  }
0x2048   :  { %21303 = vrsqrt.f32 %v8787_v58  ;;  %v23522_v58 = vld [vmem:[%s23319_s9 + $0xa8] sm:$0xff]  }
0x2049   :  { %21305 = vrsqrt.f32 %v6206_v6 }
0x2052   :  { %v21304_v56 = vpop.eup %21303 }
0x2053   :  { %v8791_v36 = vmul.f32 %v21304_v56, %v8775_v19  ;;  %v21306_v46 = vpop.eup %21305 }
0x2054   :  { %v6210_v15 = vmul.f32 %v21306_v46, %v23266_v37  ;;  %v23381_v37 = vld [vmem:[%s23319_s9 + $0x58] sm:$0xff]  }
0x2055   :  { %v8799_v10 = vmul.f32 %v23339_v59, %v8791_v36 }
0x2056   :  { %v6218_v49 = vmul.f32 %v23366_v48, %v6210_v15 }
0x2057   :  { %v23346_v5 = vadd.f32 %v23342_v28, %v8799_v10 }
0x2058   :  { %v6226_v21 = vadd.f32 %v23375_v60, %v6218_v49  ;;  %v23539_v49 = vld [vmem:[%s23536_s19 + $0x5] ss:$0 sm:$0xff] }
0x2059   :  { %v23353_v16 = vpack.c.bf16 %v23346_v5, %v23346_v5 }
0x205a   :  { %v23391_v44 = vpack.c.bf16 %v6226_v21, %v6226_v21 }
0x205b   :  { %19884 = vmatmul.mubr.msk.bf16.vlgmr.msra.gmra.mrb[52].mxu1 %vm819_vm1, %v23353_v16 }
0x205c   :  { %19896 = vmatpush3.bf16.msra.mxu1 %v23349_v22  ;;  %19899 = vmatprep.mubr.msk.bf16.mxu1 %vm21433_vm0, %v25126_v55  ;;  %25133 = vst [vmem:[#allocation3_spill] sm:$0xff] %v23391_v44 }
0x205d   :  { %19897 = vmatprep.subr.bf16.mxu1 %v25126_v55 }
0x2060   :  { %19898 = vmatpush3.bf16.msra.mxu1 %v23359_v35 }
0x2061   :  { %19911 = vmatprep.subr.bf16.mxu1 %v25126_v55 }
0x2063   :  { %19900 = vmatmul.mubr.msk.bf16.vlgmr.msra.gmra.mrb[56].mxu1 %vm819_vm1, %v23353_v16 }
0x2064   :  { %19912 = vmatpush3.bf16.msra.mxu1 %v23370_v3  ;;  %19915 = vmatprep.mubr.msk.bf16.mxu1 %vm21433_vm0, %v25126_v55 }
0x2065   :  { %19913 = vmatprep.subr.bf16.mxu1 %v25126_v55 }
0x2068   :  { %19914 = vmatpush3.bf16.msra.mxu1 %v23381_v37 }
0x2069   :  { %19927 = vmatprep.subr.bf16.mxu1 %v25126_v55 }
0x206b   :  { %19916 = vmatmul.mubr.msk.bf16.vlgmr.msra.gmra.mrb[60].mxu1 %vm819_vm1, %v23391_v44 }
0x206c   :  { %19928 = vmatpush3.bf16.msra.mxu1 %v23389_v25  ;;  %19931 = vmatprep.mubr.msk.bf16.mxu1 %vm21433_vm0, %v25126_v55 }
0x206d   :  { %19929 = vmatprep.subr.bf16.mxu1 %v25126_v55 }
0x2070   :  { %19930 = vmatpush3.bf16.msra.mxu1 %v23398_v45 }
0x2071   :  { %19943 = vmatprep.subr.bf16.mxu1 %v25126_v55 }
0x2073   :  { %19932 = vmatmul.mubr.msk.bf16.vlgmr.msra.gmra.mrb[64].mxu1 %vm819_vm1, %v23391_v44 }
0x2074   :  { %19944 = vmatpush3.bf16.msra.mxu1 %v23405_v61  ;;  %19947 = vmatprep.mubr.msk.bf16.mxu1 %vm21433_vm0, %v25126_v55 }
0x2075   :  { %19945 = vmatprep.subr.bf16.mxu1 %v25126_v55 }
0x2078   :  { %19946 = vmatpush3.bf16.msra.mxu1 %v23412_v29 }
0x2079   :  { %19959 = vmatprep.subr.bf16.mxu1 %v25126_v55 }
0x207b   :  { %19948 = vmatmul.mubr.msk.bf16.vlgmr.msra.gmra.mrb[68].mxu1 %vm819_vm1, %v23391_v44 }
0x207c   :  { %19960 = vmatpush3.bf16.msra.mxu1 %v23419_v23  ;;  %19963 = vmatprep.mubr.msk.bf16.mxu1 %vm21433_vm0, %v25126_v55 }
0x207d   :  { %19961 = vmatprep.subr.bf16.mxu1 %v25126_v55 }
0x2080   :  { %19962 = vmatpush3.bf16.msra.mxu1 %v23426_v0 }
0x2081   :  { %19973 = vmatprep.subr.bf16.mxu1 %v25126_v55 }
0x2083   :  { %19964 = vmatmul.mubr.msk.bf16.vlgmr.msra.gmra.mrb[72].mxu1 %vm819_vm1, %v23391_v44 }
0x2084   :  { %19975 = vmatprep.mubr.msk.bf16.mxu1 %vm21433_vm0, %v25126_v55 }
0x2085   :  { %v8435_v51 = vpop.f32.mrb[24].mxu0 }
0x2086   :  { %v8579_v17 = vpack.c.bf16 %v8435_v51, %v8435_v51  ;;  %v19827_v14 = vpop.f32.mrb[25].mxu0 }
0x2087   :  { %v8438_v18 = vpop.f32.mrb[26].mxu0 }
0x2088   :  { %v19828_v52 = vpop.f32.mrb[27].mxu0  ;;  %19850 = vmatmul.mubr.msk.bf16.vlgmr.msra.gmra.mrb[32].mxu0 %vm1491_vm2, %v8579_v17 }
0x2089   :  { %19860 = vmatpush3.bf16.msra.mxu0 %v23135_v50  ;;  %19861 = vmatprep.mubr.msk.bf16.mxu0 %vm21433_vm0, %v25126_v55 }
0x208a   :  { %19871 = vmatprep.subr.bf16.mxu0 %v25126_v55 }
0x208d   :  { %v8527_v30 = vpop.f32.mrb[28].mxu0 }
0x208e   :  { %v8581_v19 = vpack.c.bf16 %v8527_v30, %v8527_v30  ;;  %v19839_v4 = vpop.f32.mrb[29].mxu0  ;;  %v23543_v30 = vld [vmem:[%s23536_s19 + $0x1] ss:$0 sm:$0xff] }
0x208f   :  { %v8530_v62 = vpop.f32.mrb[30].mxu0  ;;  %v23445_v13 = vpop.f32.mrb[44].mxu1  ;;  %v23547_v4 = vld [vmem:[%s23536_s19 + $0x7] ss:$0 sm:$0xff] }
0x2090   :  { %v19840_v26 = vpop.f32.mrb[31].mxu0  ;;  %v19857_v43 = vpop.f32.mrb[45].mxu1  ;;  %19862 = vmatmul.mubr.msk.bf16.vlgmr.msra.gmra.mrb[36].mxu0 %vm1491_vm2, %v8581_v19 }
0x2091   :  { %v8666_v50 = vpop.f32.mrb[46].mxu1  ;;  %19872 = vmatpush3.bf16.msra.mxu0 %v23443_v31  ;;  %19875 = vmatprep.mubr.msk.bf16.mxu0 %vm21433_vm0, %v25126_v55 }
0x2092   :  { %v19858_v47 = vpop.f32.mrb[47].mxu1  ;;  %19873 = vmatprep.subr.bf16.mxu0 %v25126_v55 }
0x2095   :  { %19874 = vmatpush3.bf16.msra.mxu0 %v23450_v57 }
0x2096   :  { %19887 = vmatprep.subr.bf16.mxu0 %v25126_v55 }
0x2097   :  { %v23460_v33 = vpop.f32.mrb[48].mxu1 }
0x2098   :  { %v19869_v1 = vpop.f32.mrb[49].mxu1  ;;  %19876 = vmatmul.mubr.msk.bf16.vlgmr.msra.gmra.mrb[40].mxu0 %vm819_vm1, %v23353_v16 }
0x2099   :  { %v8752_v32 = vpop.f32.mrb[50].mxu1  ;;  %19888 = vmatpush3.bf16.msra.mxu0 %v23457_v8  ;;  %19891 = vmatprep.mubr.msk.bf16.mxu0 %vm21433_vm0, %v25126_v55 }
0x209a   :  { %v19870_v39 = vpop.f32.mrb[51].mxu1  ;;  %19889 = vmatprep.subr.bf16.mxu0 %v25126_v55 }
0x209d   :  { %19890 = vmatpush3.bf16.msra.mxu0 %v23466_v9 }
0x209e   :  { %19903 = vmatprep.subr.bf16.mxu0 %v25126_v55 }
0x20a0   :  { %19892 = vmatmul.mubr.msk.bf16.vlgmr.msra.gmra.mrb[44].mxu0 %vm819_vm1, %v23353_v16 }
0x20a1   :  { %19904 = vmatpush3.bf16.msra.mxu0 %v23473_v63  ;;  %19907 = vmatprep.mubr.msk.bf16.mxu0 %vm21433_vm0, %v25126_v55 }
0x20a2   :  { %19905 = vmatprep.subr.bf16.mxu0 %v25126_v55 }
0x20a5   :  { %19906 = vmatpush3.bf16.msra.mxu0 %v23480_v11 }
0x20a6   :  { %19919 = vmatprep.subr.bf16.mxu0 %v25126_v55 }
0x20a8   :  { %19908 = vmatmul.mubr.msk.bf16.vlgmr.msra.gmra.mrb[48].mxu0 %vm819_vm1, %v23391_v44 }
0x20a9   :  { %19920 = vmatpush3.bf16.msra.mxu0 %v23487_v20  ;;  %19923 = vmatprep.mubr.msk.bf16.mxu0 %vm21433_vm0, %v25126_v55 }
0x20aa   :  { %19921 = vmatprep.subr.bf16.mxu0 %v25126_v55 }
0x20ad   :  { %19922 = vmatpush3.bf16.msra.mxu0 %v23494_v41 }
0x20ae   :  { %19935 = vmatprep.subr.bf16.mxu0 %v25126_v55 }
0x20b0   :  { %19924 = vmatmul.mubr.msk.bf16.vlgmr.msra.gmra.mrb[52].mxu0 %vm819_vm1, %v23391_v44 }
0x20b1   :  { %19936 = vmatpush3.bf16.msra.mxu0 %v23501_v24  ;;  %19939 = vmatprep.mubr.msk.bf16.mxu0 %vm21433_vm0, %v25126_v55 }
0x20b2   :  { %19937 = vmatprep.subr.bf16.mxu0 %v25126_v55 }
0x20b5   :  { %19938 = vmatpush3.bf16.msra.mxu0 %v23508_v27 }
0x20b6   :  { %19951 = vmatprep.subr.bf16.mxu0 %v25126_v55 }
0x20b8   :  { %19940 = vmatmul.mubr.msk.bf16.vlgmr.msra.gmra.mrb[56].mxu0 %vm819_vm1, %v23391_v44 }
0x20b9   :  { %19952 = vmatpush3.bf16.msra.mxu0 %v23515_v42  ;;  %19955 = vmatprep.mubr.msk.bf16.mxu0 %vm21433_vm0, %v25126_v55 }
0x20ba   :  { %19953 = vmatprep.subr.bf16.mxu0 %v25126_v55 }
0x20bd   :  { %19954 = vmatpush3.bf16.msra.mxu0 %v23522_v58 }
0x20be   :  { %19967 = vmatprep.subr.bf16.mxu0 %v25126_v55 }
0x20c0   :  { %19956 = vmatmul.mubr.msk.bf16.vlgmr.msra.gmra.mrb[60].mxu0 %vm819_vm1, %v23391_v44 }
0x20c1   :  { %19969 = vmatprep.mubr.msk.bf16.mxu0 %vm21433_vm0, %v25126_v55 }
0x212e   :  { %v9005_v2 = vpop.f32.mrb[52].mxu1 }
0x212f   :  { %v19885_v6 = vpop.f32.mrb[53].mxu1  ;;  %v9006_v62 = vadd.f32 %v23543_v30, %v9005_v2 }
0x2130   :  { %v9008_v56 = vpop.f32.mrb[54].mxu1  ;;  %v23553_v6 = vld [vmem:[%s23536_s19 + $0x3] ss:$0 sm:$0xff] }
0x2131   :  { %v19886_v36 = vpop.f32.mrb[55].mxu1  ;;  %v9583_v1 = vpack.c.bf16 %v9006_v62, %v9006_v62 }
0x2132   :  { %v23558_v36 = vld [vmem:[%s23536_s19 + $0x9] ss:$0 sm:$0xff] }
0x2136   :  { %v9109_v10 = vpop.f32.mrb[56].mxu1 }
0x2137   :  { %v19901_v16 = vpop.f32.mrb[57].mxu1  ;;  %v9110_v2 = vadd.f32 %v23553_v6, %v9109_v10 }
0x2138   :  { %v9112_v46 = vpop.f32.mrb[58].mxu1 }
0x2139   :  { %v19902_v15 = vpop.f32.mrb[59].mxu1 }
0x213e   :  { %v9240_v21 = vpop.f32.mrb[60].mxu1 }
0x213f   :  { %v9241_v51 = vadd.f32 %v23539_v49, %v9240_v21  ;;  %v19917_v17 = vpop.f32.mrb[61].mxu1 }
0x2140   :  { %v9243_v14 = vpop.f32.mrb[62].mxu1 }
0x2141   :  { %v9587_v18 = vpack.c.bf16 %v9241_v51, %v9241_v51  ;;  %v19918_v52 = vpop.f32.mrb[63].mxu1  ;;  %v9585_v51 = vpack.c.bf16 %v9110_v2, %v9110_v2 }
0x2143   :  { %v9640_v19 = vsel %vm1491_vm2, %v9587_v18, 0 }
0x2144   :  { %19974 = vmatpush3.bf16.xpose.msra.mxu1 %v9640_v19 }
0x2145   :  { %19985 = vmatprep.subr.bf16.mxu1 %v25126_v55 }
0x2146   :  { %v9344_v26 = vpop.f32.mrb[64].mxu1 }
0x2147   :  { %v9345_v43 = vadd.f32 %v23547_v4, %v9344_v26  ;;  %v19933_v50 = vpop.f32.mrb[65].mxu1 }
0x2148   :  { %v9347_v47 = vpop.f32.mrb[66].mxu1 }
0x2149   :  { %v9589_v32 = vpack.c.bf16 %v9345_v43, %v9345_v43  ;;  %v19934_v39 = vpop.f32.mrb[67].mxu1  ;;  %v8756_v43 = vsel %vm819_vm1, %v23445_v13, 0.0 }
0x214b   :  { %19976 = vmatmul.mubr.msk.bf16.vlgmr.msra.gmra.mrb[76].mxu1 %vm1491_vm2, %v9583_v1  ;;  %v9732_v56 = vsel %vm1491_vm2, %v9589_v32, 0 }
0x214c   :  { %19986 = vmatpush3.bf16.xpose.msra.mxu1 %v9732_v56  ;;  %19987 = vmatprep.mubr.msk.bf16.mxu1 %vm21433_vm0, %v25126_v55 }
0x214d   :  { %19997 = vmatprep.subr.bf16.mxu1 %v25126_v55 }
0x214e   :  { %v9472_v16 = vpop.f32.mrb[68].mxu1 }
0x214f   :  { %v9473_v46 = vadd.f32 %v23558_v36, %v9472_v16  ;;  %v19949_v15 = vpop.f32.mrb[69].mxu1 }
0x2150   :  { %v9475_v21 = vpop.f32.mrb[70].mxu1 }
0x2151   :  { %v9831_v17 = vpack.c.bf16 %v9473_v46, %v9473_v46  ;;  %v19950_v14 = vpop.f32.mrb[71].mxu1  ;;  %v8760_v21 = vsel %vm819_vm1, %v23460_v33, 0.0 }
0x2153   :  { %19988 = vmatmul.mubr.msk.bf16.vlgmr.msra.gmra.mrb[80].mxu1 %vm1491_vm2, %v9585_v51  ;;  %v9884_v18 = vsel %vm1735_vm3, %v9831_v17, 0 }
0x2154   :  { %19998 = vmatpush3.bf16.msra.mxu1 %v9884_v18  ;;  %19999 = vmatprep.mubr.msk.bf16.mxu1 %vm21433_vm0, %v25126_v55 }
0x2155   :  { %20009 = vmatprep.subr.bf16.mxu1 %v25126_v55 }
0x2156   :  { %v23570_v10 = vpop.f32.mrb[72].mxu1 }
0x2157   :  { %v19965_v52 = vpop.f32.mrb[73].mxu1 }
0x2158   :  { %v9579_v19 = vpop.f32.mrb[74].mxu1 }
0x2159   :  { %v19966_v62 = vpop.f32.mrb[75].mxu1 }
0x215b   :  { %v8620_v26 = vpop.f32.mrb[32].mxu0 }
0x215c   :  { %v8755_v50 = vsel %vm819_vm1, %v8620_v26, 0.0  ;;  %v19851_v47 = vpop.f32.mrb[33].mxu0 }
0x215d   :  { %v8757_v1 = vadd.f32 %v8756_v43, %v8755_v50  ;;  %v8623_v32 = vpop.f32.mrb[34].mxu0  ;;  %v23581_v50 = vld [vmem:[%s23536_s19 + $0x4] ss:$0 sm:$0xff] }
0x215e   :  { %v19852_v39 = vpop.f32.mrb[35].mxu0 }
0x2163   :  { %v8706_v56 = vpop.f32.mrb[36].mxu0 }
0x2164   :  { %v8758_v2 = vsel %vm819_vm1, %v8706_v56, 0.0  ;;  %v19863_v16 = vpop.f32.mrb[37].mxu0 }
0x2165   :  { %v8759_v46 = vadd.f32 %v8758_v2, %v8757_v1  ;;  %v8709_v15 = vpop.f32.mrb[38].mxu0  ;;  %v23585_v2 = vld [vmem:[%s23536_s19] ss:$0 sm:$0xff] }
0x2166   :  { %v19864_v51 = vpop.f32.mrb[39].mxu0 }
0x2167   :  { %v23578_v17 = vadd.f32 %v8760_v21, %v8759_v46  ;;  %v23589_v46 = vld [vmem:[%s23536_s19 + $0x6] ss:$0 sm:$0xff] }
0x216b   :  { %v8953_v13 = vpop.f32.mrb[40].mxu0 }
0x216c   :  { %v19877_v14 = vpop.f32.mrb[41].mxu0  ;;  %v8954_v15 = vadd.f32 %v23585_v2, %v8953_v13 }
0x216d   :  { %v8956_v18 = vpop.f32.mrb[42].mxu0 }
0x216e   :  { %v19878_v52 = vpop.f32.mrb[43].mxu0 }
0x216f   :  { %v9582_v52 = vpack.c.bf16 %v8954_v15, %v8954_v15 }
0x2173   :  { %v9057_v19 = vpop.f32.mrb[44].mxu0 }
0x2174   :  { %v19893_v62 = vpop.f32.mrb[45].mxu0 }
0x2175   :  { %v9060_v26 = vpop.f32.mrb[46].mxu0 }
0x2176   :  { %v19894_v43 = vpop.f32.mrb[47].mxu0 }
0x2177   :  { %v23595_v43 = vld [vmem:[%s23536_s19 + $0x2] ss:$0 sm:$0xff] }
0x2178   :  { %v9058_v13 = vadd.f32 %v23595_v43, %v9057_v19 }
0x217b   :  { %v9188_v47 = vpop.f32.mrb[48].mxu0 }
0x217c   :  { %v9189_v1 = vadd.f32 %v23581_v50, %v9188_v47  ;;  %v19909_v32 = vpop.f32.mrb[49].mxu0 }
0x217d   :  { %v9191_v33 = vpop.f32.mrb[50].mxu0 }
0x217e   :  { %v9586_v39 = vpack.c.bf16 %v9189_v1, %v9189_v1  ;;  %v19910_v56 = vpop.f32.mrb[51].mxu0  ;;  %v23600_v1 = vld [vmem:[%s23536_s19 + $0x8] ss:$0 sm:$0xff] }
0x2180   :  { %v9594_v16 = vsel %vm1491_vm2, %v9586_v39, 0 }
0x2181   :  { %19968 = vmatpush3.bf16.xpose.msra.mxu0 %v9594_v16  ;;  %v9584_v16 = vpack.c.bf16 %v9058_v13, %v9058_v13 }
0x2182   :  { %19979 = vmatprep.subr.bf16.mxu0 %v25126_v55 }
0x2183   :  { %v9292_v21 = vpop.f32.mrb[52].mxu0 }
0x2184   :  { %v9293_v51 = vadd.f32 %v23589_v46, %v9292_v21  ;;  %v19925_v14 = vpop.f32.mrb[53].mxu0 }
0x2185   :  { %v9295_v18 = vpop.f32.mrb[54].mxu0 }
0x2186   :  { %v9588_v62 = vpack.c.bf16 %v9293_v51, %v9293_v51  ;;  %v19926_v26 = vpop.f32.mrb[55].mxu0 }
0x2188   :  { %19970 = vmatmul.mubr.msk.bf16.vlgmr.msra.gmra.mrb[64].mxu0 %vm1491_vm2, %v9582_v52  ;;  %v9686_v47 = vsel %vm1491_vm2, %v9588_v62, 0 }
0x2189   :  { %19980 = vmatpush3.bf16.xpose.msra.mxu0 %v9686_v47  ;;  %19981 = vmatprep.mubr.msk.bf16.mxu0 %vm21433_vm0, %v25126_v55 }
0x218a   :  { %19991 = vmatprep.subr.bf16.mxu0 %v25126_v55 }
0x218b   :  { %v9420_v32 = vpop.f32.mrb[56].mxu0 }
0x218c   :  { %v9421_v33 = vadd.f32 %v23600_v1, %v9420_v32  ;;  %v19941_v39 = vpop.f32.mrb[57].mxu0 }
0x218d   :  { %v9423_v56 = vpop.f32.mrb[58].mxu0 }
0x218e   :  { %v9830_v15 = vpack.c.bf16 %v9421_v33, %v9421_v33  ;;  %v19942_v21 = vpop.f32.mrb[59].mxu0 }
0x2190   :  { %19982 = vmatmul.mubr.msk.bf16.vlgmr.msra.gmra.mrb[68].mxu0 %vm1491_vm2, %v9584_v16  ;;  %v9838_v51 = vsel %vm1735_vm3, %v9830_v15, 0 }
0x2191   :  { %19992 = vmatpush3.bf16.msra.mxu0 %v9838_v51  ;;  %19993 = vmatprep.mubr.msk.bf16.mxu0 %vm21433_vm0, %v25126_v55 }
0x2192   :  { %20003 = vmatprep.subr.bf16.mxu0 %v25126_v55 }
0x2193   :  { %v23612_v19 = vpop.f32.mrb[60].mxu0 }
0x2194   :  { %v19957_v14 = vpop.f32.mrb[61].mxu0 }
0x2195   :  { %v9527_v18 = vpop.f32.mrb[62].mxu0 }
0x2196   :  { %v19958_v52 = vpop.f32.mrb[63].mxu0 }
0x221e   :  { %v9676_v62 = vpop.f32.mrb[76].mxu1 }
0x221f   :  { %v9775_v26 = vmul.f32 0.35355338, %v9676_v62  ;;  %v19977_v47 = vpop.f32.mrb[77].mxu1 }
0x2220   :  { %v9679_v13 = vpop.f32.mrb[78].mxu1 }
0x2221   :  { %v19978_v32 = vpop.f32.mrb[79].mxu1  ;;  %v9779_v33 = vadd.f32 %v9775_v26, %v22991_v7 }
0x2223   :  { %v9785_v39 = vsel %vm1491_vm2, %v9779_v33, -inf }
0x2224   :  { %9786 = vmax.xlane.f32.xlu1 %v9785_v39 }
0x2226   :  { %v9768_v56 = vpop.f32.mrb[80].mxu1 }
0x2227   :  { %v9777_v16 = vmul.f32 0.35355338, %v9768_v56  ;;  %v19989_v15 = vpop.f32.mrb[81].mxu1 }
0x2228   :  { %v9771_v21 = vpop.f32.mrb[82].mxu1 }
0x2229   :  { %v19990_v51 = vpop.f32.mrb[83].mxu1  ;;  %v9781_v55 = vadd.f32 %v9777_v16, %v22991_v7 }
0x222b   :  { %v9791_v14 = vsel %vm1491_vm2, %v9781_v55, -inf }
0x222c   :  { %9792 = vmax.xlane.f32.xlu1 %v9791_v14 }
0x225b   :  { %v9630_v18 = vpop.f32.mrb[64].mxu0 }
0x225c   :  { %v9774_v52 = vmul.f32 0.35355338, %v9630_v18  ;;  %v19971_v62 = vpop.f32.mrb[65].mxu0 }
0x225d   :  { %v9633_v47 = vpop.f32.mrb[66].mxu0 }
0x225e   :  { %v19972_v13 = vpop.f32.mrb[67].mxu0  ;;  %v9778_v26 = vadd.f32 %v9774_v52, %v22991_v7 }
0x2260   :  { %v9782_v32 = vsel %vm1491_vm2, %v9778_v26, -inf }
0x2261   :  { %9783 = vmax.xlane.f32.xlu0 %v9782_v32 }
0x2263   :  { %v9722_v39 = vpop.f32.mrb[68].mxu0 }
0x2264   :  { %v9776_v56 = vmul.f32 0.35355338, %v9722_v39  ;;  %v19983_v15 = vpop.f32.mrb[69].mxu0 }
0x2265   :  { %v9725_v21 = vpop.f32.mrb[70].mxu0 }
0x2266   :  { %v19984_v51 = vpop.f32.mrb[71].mxu0  ;;  %v9780_v16 = vadd.f32 %v9776_v56, %v22991_v7  ;;  %v6181_v56 = vadd.f32 %v22960_v34, %v22731_v40  ;;  %v8762_v40 = vadd.f32 %v23288_v12, %v23578_v17 }
0x2268   :  { %v9788_v44 = vsel %vm1491_vm2, %v9780_v16, -inf }
0x2269   :  { %9789 = vmax.xlane.f32.xlu0 %v9788_v44  ;;  %v6189_v44 = vsel %vm819_vm1, %v6181_v56, 0.0 }
0x22b1   :  { %v9787_v14 = vpop.xlane.xlu1 %9786 }
0x22b2   :  { %v9795_v18 = vsub.f32 %v9779_v33, %v9787_v14 }
0x22b4   :  { %v9800_v62 = vmul.f32 1.442695, %v9795_v18 }
0x22b6   :  { %21307 = vpow2.f32 %v9800_v62 }
0x22b9   :  { %v9793_v47 = vpop.xlane.xlu1 %9792 }
0x22ba   :  { %v9797_v13 = vsub.f32 %v9781_v55, %v9793_v47 }
0x22bc   :  { %v9804_v52 = vmul.f32 1.442695, %v9797_v13 }
0x22be   :  { %21309 = vpow2.f32 %v9804_v52  ;;  %v21428_v52 = vld [vmem:[%s22727_s15 + $0x8] sm:$0xff]  ;;  %s21458_s15 = smov 26  }
0x22bf   :  { %s23668_s22 = sld [smem:[%s25125_s0 + %s21458_s15]]  }
0x22c0   :  { %v21308_v53 = vpop.eup %21307  ;;  %s24027_s15 = sld [smem:[%s25125_s0 + %s21467_s11]]  }
0x22c1   :  { %v9809_v32 = vsel %vm1491_vm2, %v21308_v53, 0.0 }
0x22c2   :  { %9810 = vadd.xlane.f32.xlu1 %v9809_v32  ;;  %v8764_v32 = vadd.f32 %v21428_v52, %v8762_v40 }
0x22c8   :  { %v21310_v39 = vpop.eup %21309 }
0x22c9   :  { %v9815_v15 = vsel %vm1491_vm2, %v21310_v39, 0.0 }
0x22ca   :  { %9816 = vadd.xlane.f32.xlu1 %v9815_v15  ;;  %v23634_v15 = vld [vmem:[%s23536_s19 + $0xb] ss:$0 sm:$0xff] }
0x22ce   :  { %6190 = vadd.xlane.f32.xlu1 %v6189_v44  ;;  %v9577_v44 = vadd.f32 %v23634_v15, %v23570_v10  ;;  %v25134_v10 = vmov 0.0  }
0x22d0   :  { %v9833_v12 = vpack.c.bf16 %v9577_v44, %v9577_v44 }
0x22ee   :  { %v9784_v33 = vpop.xlane.xlu0 %9783 }
0x22ef   :  { %v9794_v21 = vsub.f32 %v9778_v26, %v9784_v33  ;;  %v8770_v26 = vsel %vm819_vm1, %v8764_v32, 0.0 }
0x22f1   :  { %v9798_v55 = vmul.f32 1.442695, %v9794_v21 }
0x22f3   :  { %21311 = vpow2.f32 %v9798_v55 }
0x22f6   :  { %v9790_v51 = vpop.xlane.xlu0 %9789 }
0x22f7   :  { %v9796_v14 = vsub.f32 %v9780_v16, %v9790_v51 }
0x22f9   :  { %v9802_v18 = vmul.f32 1.442695, %v9796_v14 }
0x22fb   :  { %21313 = vpow2.f32 %v9802_v18 }
0x22fd   :  { %v21312_v62 = vpop.eup %21311 }
0x22fe   :  { %v9806_v47 = vsel %vm1491_vm2, %v21312_v62, 0.0 }
0x22ff   :  { %9807 = vadd.xlane.f32.xlu0 %v9806_v47  ;;  %v9976_v47 = vsel %vm1735_vm3, %v9833_v12, 0 }
0x2305   :  { %v21314_v34 = vpop.eup %21313 }
0x2306   :  { %v9812_v13 = vsel %vm1491_vm2, %v21314_v34, 0.0 }
0x2307   :  { %9813 = vadd.xlane.f32.xlu0 %v9812_v13 }
0x230b   :  { %8771 = vadd.xlane.f32.xlu0 %v8770_v26 }
0x234f   :  { %v9811_v16 = vpop.xlane.xlu1 %9810 }
0x2350   :  { %21315 = vrcp.f32 %v9811_v16  ;;  %v23652_v16 = vld [vmem:[%s23536_s19 + $0xa] ss:$0 sm:$0xff] }
0x2351   :  { %v9525_v44 = vadd.f32 %v23652_v16, %v23612_v19 }
0x2353   :  { %v9832_v12 = vpack.c.bf16 %v9525_v44, %v9525_v44 }
0x2357   :  { %v9817_v33 = vpop.xlane.xlu1 %9816 }
0x2358   :  { %21317 = vrcp.f32 %v9817_v33 }
0x235a   :  { %v21316_v21 = vpop.eup %21315 }
0x235b   :  { %v9823_v17 = vmul.f32 %v21316_v21, %v21308_v53  ;;  %v6191_v55 = vpop.xlane.xlu1 %6190 }
0x235c   :  { %v6193_v51 = vmul.f32 0.03125, %v6191_v55 }
0x235d   :  { %v9827_v14 = vpack.c.bf16 %v9823_v17, %v9823_v17 }
0x235e   :  { %v23638_v18 = vsub.f32 %v6181_v56, %v6193_v51 }
0x235f   :  { %20000 = vmatmul.mubr.msk.bf16.vlgmr.msra.gmra.mrb[84].mxu1 %vm1491_vm2, %v9827_v14 }
0x2360   :  { %20010 = vmatpush3.bf16.msra.mxu1 %v9976_v47  ;;  %v6197_v40 = vmul.f32 %v23638_v18, %v23638_v18  ;;  %20011 = vmatprep.mubr.msk.bf16.mxu1 %vm21433_vm0, %v25134_v10  ;;  %v9930_v47 = vsel %vm1735_vm3, %v9832_v12, 0  ;;  %v8876_v12 = vld [vmem:[%s23668_s22 + $0xc] sm:$0xf] }
0x2361   :  { %20021 = vmatprep.subr.bf16.mxu1 %v25134_v10 }
0x2362   :  { %v21318_v53 = vpop.eup %21317  ;;  %v6201_v13 = vsel %vm819_vm1, %v6197_v40, 0.0 }
0x2363   :  { %v9825_v52 = vmul.f32 %v21318_v53, %v21310_v39  ;;  %6202 = vadd.xlane.f32.xlu1 %v6201_v13 }
0x2365   :  { %v9829_v56 = vpack.c.bf16 %v9825_v52, %v9825_v52 }
0x2367   :  { %20012 = vmatmul.mubr.msk.bf16.vlgmr.msra.gmra.mrb[88].mxu1 %vm1491_vm2, %v9829_v56 }
0x2368   :  { %20023 = vmatprep.mubr.msk.bf16.mxu1 %vm21433_vm0, %v25134_v10 }
0x238c   :  { %v9808_v26 = vpop.xlane.xlu0 %9807 }
0x238d   :  { %21319 = vrcp.f32 %v9808_v26 }
0x2394   :  { %v9814_v33 = vpop.xlane.xlu0 %9813 }
0x2395   :  { %21321 = vrcp.f32 %v9814_v33 }
0x2397   :  { %v21320_v21 = vpop.eup %21319 }
0x2398   :  { %v9822_v17 = vmul.f32 %v21320_v21, %v21312_v62  ;;  %v8772_v39 = vpop.xlane.xlu0 %8771 }
0x2399   :  { %v8774_v55 = vmul.f32 0.03125, %v8772_v39 }
0x239a   :  { %v9826_v51 = vpack.c.bf16 %v9822_v17, %v9822_v17 }
0x239b   :  { %v8776_v14 = vsub.f32 %v8764_v32, %v8774_v55  ;;  %v8874_v32 = vld [vmem:[%s23668_s22 + $0x4] sm:$0xf] }
0x239c   :  { %19994 = vmatmul.mubr.msk.bf16.vlgmr.msra.gmra.mrb[72].mxu0 %vm1491_vm2, %v9826_v51  ;;  %v23672_v52 = vsel %vm1735_vm3, %v8874_v32, 0 }
0x239d   :  { %20004 = vmatpush3.bf16.msra.mxu0 %v9930_v47  ;;  %v8778_v40 = vmul.f32 %v8776_v14, %v8776_v14  ;;  %20005 = vmatprep.mubr.msk.bf16.mxu0 %vm21433_vm0, %v25134_v10  ;;  %v23684_v47 = vsel %vm1735_vm3, %v8876_v12, 0 }
0x239e   :  { %20015 = vmatprep.subr.bf16.mxu0 %v25134_v10  ;;  %20022 = vmatpush3.bf16.msra.mxu1 %v23672_v52 }
0x239f   :  { %v21322_v19 = vpop.eup %21321  ;;  %v8782_v53 = vsel %vm819_vm1, %v8778_v40, 0.0  ;;  %20033 = vmatprep.subr.bf16.mxu1 %v25134_v10 }
0x23a0   :  { %v9824_v13 = vmul.f32 %v21322_v19, %v21314_v34  ;;  %8783 = vadd.xlane.f32.xlu0 %v8782_v53  ;;  %v8873_v34 = vld [vmem:[%s23668_s22] sm:$0xf] }
0x23a1   :  { %v23678_v56 = vsel %vm1735_vm3, %v8873_v34, 0 }
0x23a2   :  { %v9828_v62 = vpack.c.bf16 %v9824_v13, %v9824_v13 }
0x23a4   :  { %20006 = vmatmul.mubr.msk.bf16.vlgmr.msra.gmra.mrb[76].mxu0 %vm1491_vm2, %v9828_v62 }
0x23a5   :  { %20017 = vmatprep.mubr.msk.bf16.mxu0 %vm21433_vm0, %v25134_v10  ;;  %20016 = vmatpush3.bf16.msra.mxu0 %v23678_v56 }
0x23a6   :  { %20027 = vmatprep.subr.bf16.mxu0 %v25134_v10 }
0x23f0   :  { %v6203_v33 = vpop.xlane.xlu1 %6202 }
0x23f1   :  { %v6205_v17 = vmul.f32 0.03125, %v6203_v33 }
0x23f3   :  { %v6207_v53 = vadd.f32 1e-05, %v6205_v17 }
0x242d   :  { %v8784_v26 = vpop.xlane.xlu0 %8783 }
0x242e   :  { %v8786_v44 = vmul.f32 0.03125, %v8784_v26 }
0x2430   :  { %v8788_v21 = vadd.f32 1e-05, %v8786_v44 }
0x2432   :  { %21323 = vrsqrt.f32 %v8788_v21  ;;  %v9920_v39 = vpop.f32.mrb[84].mxu1  ;;  %v21429_v21 = vld [vmem:[%s23319_s9 + $0x10] sm:$0xff]  }
0x2433   :  { %v10019_v55 = vpack.c.bf16 %v9920_v39, %v9920_v39  ;;  %v20001_v51 = vpop.f32.mrb[85].mxu1  ;;  %21325 = vrsqrt.f32 %v6207_v53 }
0x2434   :  { %v9923_v40 = vpop.f32.mrb[86].mxu1 }
0x2435   :  { %v20002_v19 = vpop.f32.mrb[87].mxu1  ;;  %20024 = vmatmul.mubr.msk.bf16.vlgmr.msra.gmra.mrb[92].mxu1 %vm1491_vm2, %v10019_v55 }
0x2436   :  { %20034 = vmatpush3.bf16.msra.mxu1 %v23684_v47  ;;  %20035 = vmatprep.mubr.msk.bf16.mxu1 %vm21433_vm0, %v25134_v10 }
0x2437   :  { %20047 = vmatprep.subr.bf16.mxu1 %v25134_v10 }
0x243a   :  { %v10012_v13 = vpop.f32.mrb[88].mxu1 }
0x243b   :  { %v10021_v62 = vpack.c.bf16 %v10012_v13, %v10012_v13  ;;  %v20013_v32 = vpop.f32.mrb[89].mxu1 }
0x243c   :  { %v21324_v34 = vpop.eup %21323  ;;  %v10015_v26 = vpop.f32.mrb[90].mxu1 }
0x243d   :  { %v8792_v44 = vmul.f32 %v21324_v34, %v8776_v14  ;;  %v20014_v33 = vpop.f32.mrb[91].mxu1  ;;  %20036 = vmatmul.mubr.msk.bf16.vlgmr.msra.gmra.mrb[96].mxu1 %vm1491_vm2, %v10021_v62  ;;  %v21326_v39 = vpop.eup %21325 }
0x243e   :  { %20048 = vmatpush3.bf16.msra.mxu1 %v21429_v21  ;;  %20051 = vmatprep.mubr.msk.bf16.mxu1 %vm21433_vm0, %v25134_v10 }
0x243f   :  { %v8800_v12 = vmul.f32 %v23339_v59, %v8792_v44  ;;  %20049 = vmatprep.subr.bf16.mxu1 %v25134_v10  ;;  %v6211_v59 = vmul.f32 %v21326_v39, %v23638_v18 }
0x2441   :  { %v23698_v17 = vadd.f32 %v23342_v28, %v8800_v12 }
0x2442   :  { %20050 = vmatpush3.bf16.msra.mxu1 %v23324_v54  ;;  %v6219_v54 = vmul.f32 %v23366_v48, %v6211_v59 }
0x2443   :  { %v23703_v14 = vpack.c.bf16 %v23698_v17, %v23698_v17  ;;  %20063 = vmatprep.subr.bf16.mxu1 %v25134_v10 }
0x2444   :  { %v6227_v28 = vadd.f32 %v23375_v60, %v6219_v54 }
0x2445   :  { %20052 = vmatmul.mubr.msk.bf16.vlgmr.msra.gmra.mrb[100].mxu1 %vm819_vm1, %v23703_v14 }
0x2446   :  { %20064 = vmatpush3.bf16.msra.mxu1 %v23349_v22  ;;  %20067 = vmatprep.mubr.msk.bf16.mxu1 %vm21433_vm0, %v25134_v10  ;;  %v23724_v22 = vpack.c.bf16 %v6227_v28, %v6227_v28 }
0x2447   :  { %20065 = vmatprep.subr.bf16.mxu1 %v25134_v10 }
0x244a   :  { %20066 = vmatpush3.bf16.msra.mxu1 %v23359_v35  ;;  %v8875_v35 = vld [vmem:[%s23668_s22 + $0x8] sm:$0xf] }
0x244b   :  { %20079 = vmatprep.subr.bf16.mxu1 %v25134_v10 }
0x244d   :  { %20068 = vmatmul.mubr.msk.bf16.vlgmr.msra.gmra.mrb[104].mxu1 %vm819_vm1, %v23703_v14 }
0x244e   :  { %20080 = vmatpush3.bf16.msra.mxu1 %v23370_v3  ;;  %20083 = vmatprep.mubr.msk.bf16.mxu1 %vm21433_vm0, %v25134_v10 }
0x244f   :  { %20081 = vmatprep.subr.bf16.mxu1 %v25134_v10 }
0x2452   :  { %20082 = vmatpush3.bf16.msra.mxu1 %v23381_v37  ;;  %v23757_v37 = vsel %vm1735_vm3, %v8875_v35, 0 }
0x2453   :  { %20095 = vmatprep.subr.bf16.mxu1 %v25134_v10 }
0x2455   :  { %20084 = vmatmul.mubr.msk.bf16.vlgmr.msra.gmra.mrb[108].mxu1 %vm819_vm1, %v23724_v22 }
0x2456   :  { %20096 = vmatpush3.bf16.msra.mxu1 %v23389_v25  ;;  %20099 = vmatprep.mubr.msk.bf16.mxu1 %vm21433_vm0, %v25134_v10 }
0x2457   :  { %20097 = vmatprep.subr.bf16.mxu1 %v25134_v10 }
0x245a   :  { %20098 = vmatpush3.bf16.msra.mxu1 %v23398_v45 }
0x245b   :  { %20111 = vmatprep.subr.bf16.mxu1 %v25134_v10 }
0x245d   :  { %20100 = vmatmul.mubr.msk.bf16.vlgmr.msra.gmra.mrb[112].mxu1 %vm819_vm1, %v23724_v22 }
0x245e   :  { %20112 = vmatpush3.bf16.msra.mxu1 %v23405_v61  ;;  %20115 = vmatprep.mubr.msk.bf16.mxu1 %vm21433_vm0, %v25134_v10 }
0x245f   :  { %20113 = vmatprep.subr.bf16.mxu1 %v25134_v10 }
0x2462   :  { %20114 = vmatpush3.bf16.msra.mxu1 %v23412_v29 }
0x2463   :  { %20127 = vmatprep.subr.bf16.mxu1 %v25134_v10 }
0x2465   :  { %20116 = vmatmul.mubr.msk.bf16.vlgmr.msra.gmra.mrb[116].mxu1 %vm819_vm1, %v23724_v22 }
0x2466   :  { %20128 = vmatpush3.bf16.msra.mxu1 %v23419_v23  ;;  %20131 = vmatprep.mubr.msk.bf16.mxu1 %vm21433_vm0, %v25134_v10 }
0x2467   :  { %20129 = vmatprep.subr.bf16.mxu1 %v25134_v10 }
0x246a   :  { %20130 = vmatpush3.bf16.msra.mxu1 %v23426_v0 }
0x246b   :  { %20141 = vmatprep.subr.bf16.mxu1 %v25134_v10 }
0x246d   :  { %20132 = vmatmul.mubr.msk.bf16.vlgmr.msra.gmra.mrb[120].mxu1 %vm819_vm1, %v23724_v22 }
0x246e   :  { %20143 = vmatprep.mubr.msk.bf16.mxu1 %vm21433_vm0, %v25134_v10 }
0x246f   :  { %v9874_v48 = vpop.f32.mrb[72].mxu0 }
0x2470   :  { %v10018_v3 = vpack.c.bf16 %v9874_v48, %v9874_v48  ;;  %v19995_v60 = vpop.f32.mrb[73].mxu0 }
0x2471   :  { %v9877_v25 = vpop.f32.mrb[74].mxu0 }
0x2472   :  { %v19996_v45 = vpop.f32.mrb[75].mxu0  ;;  %20018 = vmatmul.mubr.msk.bf16.vlgmr.msra.gmra.mrb[80].mxu0 %vm1491_vm2, %v10018_v3 }
0x2473   :  { %20028 = vmatpush3.bf16.msra.mxu0 %v23757_v37  ;;  %20029 = vmatprep.mubr.msk.bf16.mxu0 %vm21433_vm0, %v25134_v10 }
0x2474   :  { %20039 = vmatprep.subr.bf16.mxu0 %v25134_v10 }
0x2477   :  { %v9966_v61 = vpop.f32.mrb[76].mxu0 }
0x2478   :  { %v10020_v29 = vpack.c.bf16 %v9966_v61, %v9966_v61  ;;  %v20007_v23 = vpop.f32.mrb[77].mxu0 }
0x2479   :  { %v9969_v0 = vpop.f32.mrb[78].mxu0 }
0x247a   :  { %v20008_v18 = vpop.f32.mrb[79].mxu0  ;;  %20030 = vmatmul.mubr.msk.bf16.vlgmr.msra.gmra.mrb[84].mxu0 %vm1491_vm2, %v10020_v29 }
0x247b   :  { %20040 = vmatpush3.bf16.msra.mxu0 %v23443_v31  ;;  %20043 = vmatprep.mubr.msk.bf16.mxu0 %vm21433_vm0, %v25134_v10 }
0x247c   :  { %20041 = vmatprep.subr.bf16.mxu0 %v25134_v10 }
0x247f   :  { %20042 = vmatpush3.bf16.msra.mxu0 %v23450_v57 }
0x2480   :  { %20055 = vmatprep.subr.bf16.mxu0 %v25134_v10 }
0x2482   :  { %20044 = vmatmul.mubr.msk.bf16.vlgmr.msra.gmra.mrb[88].mxu0 %vm819_vm1, %v23703_v14 }
0x2483   :  { %20056 = vmatpush3.bf16.msra.mxu0 %v23457_v8  ;;  %20059 = vmatprep.mubr.msk.bf16.mxu0 %vm21433_vm0, %v25134_v10 }
0x2484   :  { %20057 = vmatprep.subr.bf16.mxu0 %v25134_v10 }
0x2487   :  { %20058 = vmatpush3.bf16.msra.mxu0 %v23466_v9 }
0x2488   :  { %20071 = vmatprep.subr.bf16.mxu0 %v25134_v10 }
0x248a   :  { %20060 = vmatmul.mubr.msk.bf16.vlgmr.msra.gmra.mrb[92].mxu0 %vm819_vm1, %v23703_v14 }
0x248b   :  { %20072 = vmatpush3.bf16.msra.mxu0 %v23473_v63  ;;  %20075 = vmatprep.mubr.msk.bf16.mxu0 %vm21433_vm0, %v25134_v10 }
0x248c   :  { %20073 = vmatprep.subr.bf16.mxu0 %v25134_v10 }
0x248f   :  { %20074 = vmatpush3.bf16.msra.mxu0 %v23480_v11 }
0x2490   :  { %20087 = vmatprep.subr.bf16.mxu0 %v25134_v10 }
0x2492   :  { %20076 = vmatmul.mubr.msk.bf16.vlgmr.msra.gmra.mrb[96].mxu0 %vm819_vm1, %v23724_v22 }
0x2493   :  { %20088 = vmatpush3.bf16.msra.mxu0 %v23487_v20  ;;  %20091 = vmatprep.mubr.msk.bf16.mxu0 %vm21433_vm0, %v25134_v10 }
0x2494   :  { %20089 = vmatprep.subr.bf16.mxu0 %v25134_v10 }
0x2497   :  { %20090 = vmatpush3.bf16.msra.mxu0 %v23494_v41 }
0x2498   :  { %20103 = vmatprep.subr.bf16.mxu0 %v25134_v10 }
0x249a   :  { %20092 = vmatmul.mubr.msk.bf16.vlgmr.msra.gmra.mrb[100].mxu0 %vm819_vm1, %v23724_v22 }
0x249b   :  { %20104 = vmatpush3.bf16.msra.mxu0 %v23501_v24  ;;  %20107 = vmatprep.mubr.msk.bf16.mxu0 %vm21433_vm0, %v25134_v10 }
0x249c   :  { %20105 = vmatprep.subr.bf16.mxu0 %v25134_v10 }
0x249f   :  { %20106 = vmatpush3.bf16.msra.mxu0 %v23508_v27 }
0x24a0   :  { %20119 = vmatprep.subr.bf16.mxu0 %v25134_v10 }
0x24a2   :  { %20108 = vmatmul.mubr.msk.bf16.vlgmr.msra.gmra.mrb[104].mxu0 %vm819_vm1, %v23724_v22 }
0x24a3   :  { %20120 = vmatpush3.bf16.msra.mxu0 %v23515_v42  ;;  %20123 = vmatprep.mubr.msk.bf16.mxu0 %vm21433_vm0, %v25134_v10 }
0x24a4   :  { %20121 = vmatprep.subr.bf16.mxu0 %v25134_v10 }
0x24a7   :  { %20122 = vmatpush3.bf16.msra.mxu0 %v23522_v58 }
0x24a8   :  { %20135 = vmatprep.subr.bf16.mxu0 %v25134_v10 }
0x24aa   :  { %20124 = vmatmul.mubr.msk.bf16.vlgmr.msra.gmra.mrb[108].mxu0 %vm819_vm1, %v23724_v22 }
0x24ab   :  { %20137 = vmatprep.mubr.msk.bf16.mxu0 %vm21433_vm0, %v25134_v10 }
0x2508   :  { %v10108_v31 = vpop.f32.mrb[92].mxu1 }
0x2509   :  { %v20025_v57 = vpop.f32.mrb[93].mxu1  ;;  %v10207_v18 = vsel %vm819_vm1, %v10108_v31, 0.0 }
0x250a   :  { %v10111_v8 = vpop.f32.mrb[94].mxu1 }
0x250b   :  { %v20026_v9 = vpop.f32.mrb[95].mxu1 }
0x2510   :  { %v23815_v63 = vpop.f32.mrb[96].mxu1 }
0x2511   :  { %v20037_v11 = vpop.f32.mrb[97].mxu1 }
0x2512   :  { %v10203_v20 = vpop.f32.mrb[98].mxu1 }
0x2513   :  { %v20038_v41 = vpop.f32.mrb[99].mxu1 }
0x2518   :  { %v10299_v24 = vpop.f32.mrb[100].mxu1 }
0x2519   :  { %v20053_v27 = vpop.f32.mrb[101].mxu1  ;;  %v10300_v33 = vadd.f32 %v23543_v30, %v10299_v24 }
0x251a   :  { %v10302_v42 = vpop.f32.mrb[102].mxu1 }
0x251b   :  { %v20054_v58 = vpop.f32.mrb[103].mxu1  ;;  %v10709_v59 = vpack.c.bf16 %v10300_v33, %v10300_v33 }
0x2520   :  { %v10379_v55 = vpop.f32.mrb[104].mxu1 }
0x2521   :  { %v20069_v51 = vpop.f32.mrb[105].mxu1  ;;  %v10380_v30 = vadd.f32 %v23553_v6, %v10379_v55  ;;  %v10211_v55 = vsel %vm819_vm1, %v23815_v63, 0.0 }
0x2522   :  { %v10382_v40 = vpop.f32.mrb[106].mxu1 }
0x2523   :  { %v20070_v19 = vpop.f32.mrb[107].mxu1  ;;  %v10711_v60 = vpack.c.bf16 %v10380_v30, %v10380_v30 }
0x2528   :  { %v10462_v53 = vpop.f32.mrb[108].mxu1 }
0x2529   :  { %v10463_v13 = vadd.f32 %v23539_v49, %v10462_v53  ;;  %v20085_v62 = vpop.f32.mrb[109].mxu1 }
0x252a   :  { %v10465_v32 = vpop.f32.mrb[110].mxu1 }
0x252b   :  { %v10713_v34 = vpack.c.bf16 %v10463_v13, %v10463_v13  ;;  %v20086_v26 = vpop.f32.mrb[111].mxu1 }
0x252d   :  { %v10766_v44 = vsel %vm1491_vm2, %v10713_v34, 0 }
0x252e   :  { %20142 = vmatpush3.bf16.xpose.msra.mxu1 %v10766_v44 }
0x252f   :  { %20153 = vmatprep.subr.bf16.mxu1 %v25134_v10 }
0x2530   :  { %v10542_v21 = vpop.f32.mrb[112].mxu1 }
0x2531   :  { %v10543_v12 = vadd.f32 %v23547_v4, %v10542_v21  ;;  %v20101_v14 = vpop.f32.mrb[113].mxu1 }
0x2532   :  { %v10545_v39 = vpop.f32.mrb[114].mxu1 }
0x2533   :  { %v10715_v54 = vpack.c.bf16 %v10543_v12, %v10543_v12  ;;  %v20102_v28 = vpop.f32.mrb[115].mxu1 }
0x2535   :  { %v10858_v49 = vsel %vm1491_vm2, %v10715_v54, 0  ;;  %20144 = vmatmul.mubr.msk.bf16.vlgmr.msra.gmra.mrb[124].mxu1 %vm1491_vm2, %v10709_v59 }
0x2536   :  { %20154 = vmatpush3.bf16.xpose.msra.mxu1 %v10858_v49  ;;  %20155 = vmatprep.mubr.msk.bf16.mxu1 %vm21433_vm0, %v25134_v10 }
0x2537   :  { %20165 = vmatprep.subr.bf16.mxu1 %v25134_v10 }
0x2538   :  { %v10622_v35 = vpop.f32.mrb[116].mxu1 }
0x2539   :  { %v10623_v4 = vadd.f32 %v23558_v36, %v10622_v35  ;;  %v20117_v48 = vpop.f32.mrb[117].mxu1 }
0x253a   :  { %v10625_v3 = vpop.f32.mrb[118].mxu1 }
0x253b   :  { %v10957_v25 = vpack.c.bf16 %v10623_v4, %v10623_v4  ;;  %v20118_v45 = vpop.f32.mrb[119].mxu1 }
0x253d   :  { %v11010_v61 = vsel %vm1735_vm3, %v10957_v25, 0  ;;  %20156 = vmatmul.mubr.msk.bf16.vlgmr.msra.gmra.mrb[128].mxu1 %vm1491_vm2, %v10711_v60 }
0x253e   :  { %20166 = vmatpush3.bf16.msra.mxu1 %v11010_v61  ;;  %20167 = vmatprep.mubr.msk.bf16.mxu1 %vm21433_vm0, %v25134_v10 }
0x253f   :  { %20177 = vmatprep.subr.bf16.mxu1 %v25134_v10 }
0x2540   :  { %v23834_v6 = vpop.f32.mrb[120].mxu1 }
0x2541   :  { %v20133_v29 = vpop.f32.mrb[121].mxu1 }
0x2542   :  { %v10705_v23 = vpop.f32.mrb[122].mxu1 }
0x2543   :  { %v20134_v36 = vpop.f32.mrb[123].mxu1 }
0x2545   :  { %v10062_v0 = vpop.f32.mrb[80].mxu0 }
0x2546   :  { %v10206_v57 = vsel %vm819_vm1, %v10062_v0, 0.0  ;;  %v20019_v8 = vpop.f32.mrb[81].mxu0 }
0x2547   :  { %v10065_v9 = vpop.f32.mrb[82].mxu0  ;;  %v10208_v11 = vadd.f32 %v10207_v18, %v10206_v57 }
0x2548   :  { %v20020_v20 = vpop.f32.mrb[83].mxu0 }
0x254d   :  { %v10154_v41 = vpop.f32.mrb[84].mxu0 }
0x254e   :  { %v10209_v24 = vsel %vm819_vm1, %v10154_v41, 0.0  ;;  %v20031_v27 = vpop.f32.mrb[85].mxu0 }
0x254f   :  { %v10210_v42 = vadd.f32 %v10209_v24, %v10208_v11  ;;  %v10157_v58 = vpop.f32.mrb[86].mxu0 }
0x2550   :  { %v20032_v51 = vpop.f32.mrb[87].mxu0 }
0x2551   :  { %v23841_v40 = vadd.f32 %v10211_v55, %v10210_v42 }
0x2555   :  { %v10259_v19 = vpop.f32.mrb[88].mxu0 }
0x2556   :  { %v20045_v31 = vpop.f32.mrb[89].mxu0  ;;  %v10260_v59 = vadd.f32 %v23585_v2, %v10259_v19 }
0x2557   :  { %v10262_v53 = vpop.f32.mrb[90].mxu0 }
0x2558   :  { %v20046_v13 = vpop.f32.mrb[91].mxu0  ;;  %v10708_v35 = vpack.c.bf16 %v10260_v59, %v10260_v59 }
0x255d   :  { %v10339_v62 = vpop.f32.mrb[92].mxu0 }
0x255e   :  { %v20061_v32 = vpop.f32.mrb[93].mxu0  ;;  %v10340_v2 = vadd.f32 %v23595_v43, %v10339_v62 }
0x255f   :  { %v10342_v34 = vpop.f32.mrb[94].mxu0 }
0x2560   :  { %v20062_v26 = vpop.f32.mrb[95].mxu0  ;;  %v10710_v45 = vpack.c.bf16 %v10340_v2, %v10340_v2 }
0x2565   :  { %v10422_v44 = vpop.f32.mrb[96].mxu0 }
0x2566   :  { %v10423_v33 = vadd.f32 %v23581_v50, %v10422_v44  ;;  %v20077_v21 = vpop.f32.mrb[97].mxu0 }
0x2567   :  { %v10425_v12 = vpop.f32.mrb[98].mxu0 }
0x2568   :  { %v10712_v14 = vpack.c.bf16 %v10423_v33, %v10423_v33  ;;  %v20078_v39 = vpop.f32.mrb[99].mxu0 }
0x256a   :  { %v10720_v63 = vsel %vm1491_vm2, %v10712_v14, 0 }
0x256b   :  { %20136 = vmatpush3.bf16.xpose.msra.mxu0 %v10720_v63 }
0x256c   :  { %20147 = vmatprep.subr.bf16.mxu0 %v25134_v10 }
0x256d   :  { %v10502_v54 = vpop.f32.mrb[100].mxu0 }
0x256e   :  { %v10503_v28 = vadd.f32 %v23589_v46, %v10502_v54  ;;  %v20093_v49 = vpop.f32.mrb[101].mxu0 }
0x256f   :  { %v10505_v30 = vpop.f32.mrb[102].mxu0 }
0x2570   :  { %v10714_v4 = vpack.c.bf16 %v10503_v28, %v10503_v28  ;;  %v20094_v48 = vpop.f32.mrb[103].mxu0 }
0x2572   :  { %v10812_v50 = vsel %vm1491_vm2, %v10714_v4, 0  ;;  %20138 = vmatmul.mubr.msk.bf16.vlgmr.msra.gmra.mrb[112].mxu0 %vm1491_vm2, %v10708_v35 }
0x2573   :  { %20148 = vmatpush3.bf16.xpose.msra.mxu0 %v10812_v50  ;;  %20149 = vmatprep.mubr.msk.bf16.mxu0 %vm21433_vm0, %v25134_v10 }
0x2574   :  { %20159 = vmatprep.subr.bf16.mxu0 %v25134_v10 }
0x2575   :  { %v10582_v3 = vpop.f32.mrb[104].mxu0 }
0x2576   :  { %v10583_v46 = vadd.f32 %v23600_v1, %v10582_v3  ;;  %v20109_v60 = vpop.f32.mrb[105].mxu0 }
0x2577   :  { %v10585_v25 = vpop.f32.mrb[106].mxu0 }
0x2578   :  { %v10956_v61 = vpack.c.bf16 %v10583_v46, %v10583_v46  ;;  %v20110_v29 = vpop.f32.mrb[107].mxu0 }
0x257a   :  { %v10964_v23 = vsel %vm1735_vm3, %v10956_v61, 0  ;;  %20150 = vmatmul.mubr.msk.bf16.vlgmr.msra.gmra.mrb[116].mxu0 %vm1491_vm2, %v10710_v45 }
0x257b   :  { %20160 = vmatpush3.bf16.msra.mxu0 %v10964_v23  ;;  %20161 = vmatprep.mubr.msk.bf16.mxu0 %vm21433_vm0, %v25134_v10 }
0x257c   :  { %20171 = vmatprep.subr.bf16.mxu0 %v25134_v10 }
0x257d   :  { %v23860_v43 = vpop.f32.mrb[108].mxu0 }
0x257e   :  { %v20125_v36 = vpop.f32.mrb[109].mxu0 }
0x257f   :  { %v10665_v0 = vpop.f32.mrb[110].mxu0  ;;  %v23879_v36 = vld [vmem:[%s23875_s28] ss:$0 sm:$0xff] }
0x2580   :  { %v20126_v1 = vpop.f32.mrb[111].mxu0  ;;  %v10219_v0 = vadd.f32 %v23879_v36, %v23841_v40 }
0x2608   :  { %v10802_v18 = vpop.f32.mrb[124].mxu1 }
0x2609   :  { %v10901_v57 = vmul.f32 0.35355338, %v10802_v18  ;;  %v20145_v8 = vpop.f32.mrb[125].mxu1 }
0x260a   :  { %v10805_v9 = vpop.f32.mrb[126].mxu1 }
0x260b   :  { %v20146_v11 = vpop.f32.mrb[127].mxu1  ;;  %v10905_v20 = vadd.f32 %v10901_v57, %v22991_v7  ;;  %v11328_v57 = vadd.f32 %v10219_v0, %v23346_v5 }
0x260c   :  { %v10703_v11 = vadd.f32 %v23634_v15, %v23834_v6  ;;  %v10663_v6 = vadd.f32 %v23652_v16, %v23860_v43 }
0x260d   :  { %v10911_v41 = vsel %vm1491_vm2, %v10905_v20, -inf  ;;  %v11332_v8 = vsel %vm819_vm1, %v11328_v57, 0.0 }
0x260e   :  { %10912 = vmax.xlane.f32.xlu1 %v10911_v41 }
0x2610   :  { %v10894_v24 = vpop.f32.mrb[128].mxu1 }
0x2611   :  { %v10903_v27 = vmul.f32 0.35355338, %v10894_v24  ;;  %v20157_v42 = vpop.f32.mrb[129].mxu1  ;;  %v10959_v24 = vpack.c.bf16 %v10703_v11, %v10703_v11 }
0x2612   :  { %v10897_v58 = vpop.f32.mrb[130].mxu1 }
0x2613   :  { %v20158_v55 = vpop.f32.mrb[131].mxu1  ;;  %v10907_v51 = vadd.f32 %v10903_v27, %v22991_v7  ;;  %v11102_v42 = vsel %vm1735_vm3, %v10959_v24, 0 }
0x2615   :  { %v10917_v19 = vsel %vm1491_vm2, %v10907_v51, -inf }
0x2616   :  { %10918 = vmax.xlane.f32.xlu1 %v10917_v19 }
0x2645   :  { %v10756_v31 = vpop.f32.mrb[112].mxu0 }
0x2646   :  { %v10900_v53 = vmul.f32 0.35355338, %v10756_v31  ;;  %v20139_v13 = vpop.f32.mrb[113].mxu0  ;;  %v10958_v31 = vpack.c.bf16 %v10663_v6, %v10663_v6 }
0x2647   :  { %v10759_v62 = vpop.f32.mrb[114].mxu0 }
0x2648   :  { %v20140_v32 = vpop.f32.mrb[115].mxu0  ;;  %v10904_v34 = vadd.f32 %v10900_v53, %v22991_v7 }
0x264a   :  { %v10908_v26 = vsel %vm1491_vm2, %v10904_v34, -inf }
0x264b   :  { %10909 = vmax.xlane.f32.xlu0 %v10908_v26 }
0x264d   :  { %v10848_v44 = vpop.f32.mrb[116].mxu0 }
0x264e   :  { %v10902_v33 = vmul.f32 0.35355338, %v10848_v44  ;;  %v20151_v21 = vpop.f32.mrb[117].mxu0 }
0x264f   :  { %v10851_v12 = vpop.f32.mrb[118].mxu0 }
0x2650   :  { %v20152_v14 = vpop.f32.mrb[119].mxu0  ;;  %v10906_v39 = vadd.f32 %v10902_v33, %v22991_v7 }
0x2652   :  { %v10914_v63 = vsel %vm1491_vm2, %v10906_v39, -inf }
0x2653   :  { %10915 = vmax.xlane.f32.xlu0 %v10914_v63 }
0x269b   :  { %v10913_v59 = vpop.xlane.xlu1 %10912 }
0x269c   :  { %v10921_v54 = vsub.f32 %v10905_v20, %v10913_v59 }
0x269e   :  { %v10926_v28 = vmul.f32 1.442695, %v10921_v54 }
0x26a0   :  { %21327 = vpow2.f32 %v10926_v28 }
0x26a3   :  { %v10919_v49 = vpop.xlane.xlu1 %10918 }
0x26a4   :  { %v10923_v30 = vsub.f32 %v10907_v51, %v10919_v49 }
0x26a6   :  { %v10930_v35 = vmul.f32 1.442695, %v10923_v30 }
0x26a8   :  { %21329 = vpow2.f32 %v10930_v35 }
0x26aa   :  { %v21328_v4 = vpop.eup %21327 }
0x26ab   :  { %v10935_v48 = vsel %vm1491_vm2, %v21328_v4, 0.0 }
0x26ac   :  { %10936 = vadd.xlane.f32.xlu1 %v10935_v48 }
0x26b2   :  { %v21330_v50 = vpop.eup %21329 }
0x26b3   :  { %v10941_v2 = vsel %vm1491_vm2, %v21330_v50, 0.0 }
0x26b4   :  { %10942 = vadd.xlane.f32.xlu1 %v10941_v2 }
0x26d8   :  { %v10910_v3 = vpop.xlane.xlu0 %10909 }
0x26d9   :  { %v10920_v46 = vsub.f32 %v10904_v34, %v10910_v3 }
0x26db   :  { %v10924_v60 = vmul.f32 1.442695, %v10920_v46 }
0x26dd   :  { %21331 = vpow2.f32 %v10924_v60 }
0x26e0   :  { %v10916_v25 = vpop.xlane.xlu0 %10915 }
0x26e1   :  { %v10922_v45 = vsub.f32 %v10906_v39, %v10916_v25 }
0x26e3   :  { %v10928_v61 = vmul.f32 1.442695, %v10922_v45 }
0x26e5   :  { %21333 = vpow2.f32 %v10928_v61 }
0x26e7   :  { %v21332_v29 = vpop.eup %21331 }
0x26e8   :  { %v10932_v23 = vsel %vm1491_vm2, %v21332_v29, 0.0 }
0x26e9   :  { %10933 = vadd.xlane.f32.xlu0 %v10932_v23 }
0x26ef   :  { %v21334_v1 = vpop.eup %21333 }
0x26f0   :  { %v10938_v18 = vsel %vm1491_vm2, %v21334_v1, 0.0 }
0x26f1   :  { %10939 = vadd.xlane.f32.xlu0 %v10938_v18 }
0x26f5   :  { %11333 = vadd.xlane.f32.xlu0 %v11332_v8 }
0x2739   :  { %v10937_v9 = vpop.xlane.xlu1 %10936 }
0x273a   :  { %21335 = vrcp.f32 %v10937_v9 }
0x2741   :  { %v10943_v20 = vpop.xlane.xlu1 %10942 }
0x2742   :  { %21337 = vrcp.f32 %v10943_v20 }
0x2744   :  { %v21336_v41 = vpop.eup %21335 }
0x2745   :  { %v10949_v27 = vmul.f32 %v21336_v41, %v21328_v4 }
0x2747   :  { %v10953_v40 = vpack.c.bf16 %v10949_v27, %v10949_v27 }
0x2749   :  { %20168 = vmatmul.mubr.msk.bf16.vlgmr.msra.gmra.mrb[132].mxu1 %vm1491_vm2, %v10953_v40 }
0x274a   :  { %20178 = vmatpush3.bf16.msra.mxu1 %v11102_v42  ;;  %20179 = vmatprep.mubr.msk.bf16.mxu1 %vm21433_vm0, %v25134_v10 }
0x274b   :  { %20189 = vmatprep.subr.bf16.mxu1 %v25134_v10 }
0x274c   :  { %v21338_v5 = vpop.eup %21337 }
0x274d   :  { %v10951_v58 = vmul.f32 %v21338_v5, %v21330_v50 }
0x274f   :  { %v10955_v55 = vpack.c.bf16 %v10951_v58, %v10951_v58 }
0x2751   :  { %20180 = vmatmul.mubr.msk.bf16.vlgmr.msra.gmra.mrb[136].mxu1 %vm1491_vm2, %v10955_v55 }
0x2752   :  { %20190 = vmatpush3.bf16.msra.mxu1 %v23672_v52  ;;  %20191 = vmatprep.mubr.msk.bf16.mxu1 %vm21433_vm0, %v25134_v10  ;;  %v11056_v52 = vsel %vm1735_vm3, %v10958_v31, 0 }
0x2753   :  { %20201 = vmatprep.subr.bf16.mxu1 %v25134_v10 }
0x2776   :  { %v10934_v15 = vpop.xlane.xlu0 %10933 }
0x2777   :  { %21339 = vrcp.f32 %v10934_v15 }
0x277e   :  { %v10940_v51 = vpop.xlane.xlu0 %10939 }
0x277f   :  { %21341 = vrcp.f32 %v10940_v51 }
0x2781   :  { %v21340_v19 = vpop.eup %21339 }
0x2782   :  { %v10948_v53 = vmul.f32 %v21340_v19, %v21332_v29  ;;  %v11334_v13 = vpop.xlane.xlu0 %11333 }
0x2783   :  { %v11338_v62 = vmul.f32 0.03125, %v11334_v13 }
0x2784   :  { %v10952_v32 = vpack.c.bf16 %v10948_v53, %v10948_v53 }
0x2785   :  { %v23900_v34 = vsub.f32 %v11328_v57, %v11338_v62 }
0x2786   :  { %20162 = vmatmul.mubr.msk.bf16.vlgmr.msra.gmra.mrb[120].mxu0 %vm1491_vm2, %v10952_v32 }
0x2787   :  { %20172 = vmatpush3.bf16.msra.mxu0 %v11056_v52  ;;  %v11342_v26 = vmul.f32 %v23900_v34, %v23900_v34  ;;  %20173 = vmatprep.mubr.msk.bf16.mxu0 %vm21433_vm0, %v25134_v10  ;;  %v21135_v52 = vld [vmem:[%s23951_s29] sm:$0xff]  }
0x2788   :  { %20183 = vmatprep.subr.bf16.mxu0 %v25134_v10 }
0x2789   :  { %v21342_v16 = vpop.eup %21341  ;;  %v11344_v43 = vsel %vm819_vm1, %v11342_v26, 0.0  ;;  %v21136_v26 = vld [vmem:[%s23951_s29 + $0x8] sm:$0xff]  }
0x278a   :  { %v10950_v44 = vmul.f32 %v21342_v16, %v21334_v1  ;;  %11345 = vadd.xlane.f32.xlu0 %v11344_v43 }
0x278c   :  { %v10954_v33 = vpack.c.bf16 %v10950_v44, %v10950_v44 }
0x278e   :  { %20174 = vmatmul.mubr.msk.bf16.vlgmr.msra.gmra.mrb[124].mxu0 %vm1491_vm2, %v10954_v33 }
0x278f   :  { %20184 = vmatpush3.bf16.msra.mxu0 %v23678_v56  ;;  %20185 = vmatprep.mubr.msk.bf16.mxu0 %vm21433_vm0, %v25134_v10 }
0x2790   :  { %20195 = vmatprep.subr.bf16.mxu0 %v25134_v10 }
0x2817   :  { %v11346_v16 = vpop.xlane.xlu0 %11345 }
0x2818   :  { %v11350_v43 = vmul.f32 0.03125, %v11346_v16  ;;  %v24059_v16 = vld [vmem:[%s22713_s3 + $0x108] sm:$0xff]  }
0x281a   :  { %v11352_v44 = vadd.f32 1e-05, %v11350_v43  ;;  %v24070_v43 = vld [vmem:[%s22713_s3 + $0xf0] sm:$0xff]  }
0x281c   :  { %v11046_v21 = vpop.f32.mrb[132].mxu1  ;;  %21343 = vrsqrt.f32 %v11352_v44  ;;  %v24073_v44 = vld [vmem:[%s22713_s3 + $0x120] sm:$0xff]  }
0x281d   :  { %v11145_v12 = vpack.c.bf16 %v11046_v21, %v11046_v21  ;;  %v20169_v14 = vpop.f32.mrb[133].mxu1 }
0x281e   :  { %v11049_v39 = vpop.f32.mrb[134].mxu1 }
0x281f   :  { %v20170_v63 = vpop.f32.mrb[135].mxu1  ;;  %20192 = vmatmul.mubr.msk.bf16.vlgmr.msra.gmra.mrb[140].mxu1 %vm1491_vm2, %v11145_v12 }
0x2820   :  { %20202 = vmatpush3.bf16.msra.mxu1 %v23684_v47  ;;  %20203 = vmatprep.mubr.msk.bf16.mxu1 %vm21433_vm0, %v25134_v10  ;;  %v17648_v63 = vld [vmem:[%s23960_s5] ss:$0 sm:$0xff] }
0x2821   :  { %20215 = vmatprep.subr.bf16.mxu1 %v25134_v10 }
0x2824   :  { %v11138_v56 = vpop.f32.mrb[136].mxu1 }
0x2825   :  { %v11147_v59 = vpack.c.bf16 %v11138_v56, %v11138_v56  ;;  %v20181_v54 = vpop.f32.mrb[137].mxu1 }
0x2826   :  { %v11141_v28 = vpop.f32.mrb[138].mxu1  ;;  %v21344_v14 = vpop.eup %21343 }
0x2827   :  { %v20182_v49 = vpop.f32.mrb[139].mxu1  ;;  %20204 = vmatmul.mubr.msk.bf16.vlgmr.msra.gmra.mrb[144].mxu1 %vm1491_vm2, %v11147_v59  ;;  %v11356_v39 = vmul.f32 %v21344_v14, %v23900_v34  ;;  %v17649_v28 = vld [vmem:[%s23965_s20] ss:$0 sm:$0xff]  ;;  %v21138_v34 = vld [vmem:[%s23951_s29 + $0x18] sm:$0xff]  }
0x2828   :  { %20223 = vmatprep.mubr.msk.bf16.mxu1 %vm21433_vm0, %v25134_v10  ;;  %20216 = vmatpush3.bf16.msra.mxu1 %v21135_v52  ;;  %v24101_v14 = vld [vmem:[%s22713_s3 + $0x140] sm:$0xff]  }
0x2829   :  { %20217 = vmatprep.subr.bf16.mxu1 %v25134_v10  ;;  %v11364_v59 = vmul.f32 %v17648_v63, %v11356_v39  ;;  %v24112_v39 = vld [vmem:[%s22713_s3 + $0x118] sm:$0xff]  }
0x282c   :  { %20218 = vmatpush3.bf16.msra.mxu1 %v21136_v26  ;;  %v24056_v26 = vld [vmem:[%s22713_s3 + $0xd8] sm:$0xff]  }
0x282d   :  { %20219 = vmatprep.subr.bf16.mxu1 %v25134_v10 }
0x2859   :  { %v11000_v30 = vpop.f32.mrb[120].mxu0 }
0x285a   :  { %v11144_v35 = vpack.c.bf16 %v11000_v30, %v11000_v30  ;;  %v20163_v4 = vpop.f32.mrb[121].mxu0  ;;  %v11372_v30 = vadd.f32 %v17649_v28, %v11364_v59  ;;  %v24129_v59 = vld [vmem:[%s22713_s3 + $0x160] sm:$0xff]  }
0x285b   :  { %v11003_v48 = vpop.f32.mrb[122].mxu0 }
0x285c   :  { %v20164_v47 = vpop.f32.mrb[123].mxu0  ;;  %20186 = vmatmul.mubr.msk.bf16.vlgmr.msra.gmra.mrb[128].mxu0 %vm1491_vm2, %v11144_v35  ;;  %v21137_v48 = vld [vmem:[%s23951_s29 + $0x10] sm:$0xff]  }
0x285d   :  { %20196 = vmatpush3.bf16.msra.mxu0 %v23757_v37  ;;  %20197 = vmatprep.mubr.msk.bf16.mxu0 %vm21433_vm0, %v25134_v10  ;;  %v17650_v47 = vld [vmem:[%s23983_s26] ss:$0 sm:$0xff] }
0x285e   :  { %20207 = vmatprep.subr.bf16.mxu0 %v25134_v10  ;;  %20220 = vmatpush3.bf16.msra.mxu1 %v21137_v48  ;;  %v24180_v48 = vld [vmem:[%s22713_s3 + $0x178] sm:$0xff]  }
0x285f   :  { %20221 = vmatprep.subr.bf16.mxu1 %v25134_v10 }
0x2861   :  { %v11092_v50 = vpop.f32.mrb[124].mxu0 }
0x2862   :  { %v11146_v2 = vpack.c.bf16 %v11092_v50, %v11092_v50  ;;  %v20175_v3 = vpop.f32.mrb[125].mxu0  ;;  %20222 = vmatpush3.bf16.msra.mxu1 %v21138_v34 }
0x2863   :  { %v11095_v46 = vpop.f32.mrb[126].mxu0  ;;  %20243 = vmatprep.subr.bf16.mxu1 %v25134_v10 }
0x2864   :  { %v20176_v60 = vpop.f32.mrb[127].mxu0  ;;  %20198 = vmatmul.mubr.msk.bf16.vlgmr.msra.gmra.mrb[132].mxu0 %vm1491_vm2, %v11146_v2 }
0x2865   :  { %20211 = vmatprep.mubr.msk.bf16.mxu0 %vm21433_vm0, %v25134_v10 }
0x28f2   :  { %v11228_v25 = vpop.f32.mrb[140].mxu1 }
0x28f3   :  { %v20193_v45 = vpop.f32.mrb[141].mxu1  ;;  %v11321_v57 = vsel %vm819_vm1, %v11228_v25, 0.0 }
0x28f4   :  { %v11231_v61 = vpop.f32.mrb[142].mxu1 }
0x28f5   :  { %v20194_v29 = vpop.f32.mrb[143].mxu1 }
0x28fa   :  { %v11314_v37 = vpop.f32.mrb[144].mxu1 }
0x28fb   :  { %v20205_v23 = vpop.f32.mrb[145].mxu1  ;;  %v11325_v58 = vsel %vm819_vm1, %v11314_v37, 0.0  ;;  %v17654_v37 = vld [vmem:[%s23992_s8] ss:$0 sm:$0xff] }
0x28fc   :  { %v11317_v0 = vpop.f32.mrb[146].mxu1 }
0x28fd   :  { %v20206_v1 = vpop.f32.mrb[147].mxu1 }
0x292f   :  { %v11185_v18 = vpop.f32.mrb[128].mxu0 }
0x2930   :  { %v11320_v8 = vsel %vm819_vm1, %v11185_v18, 0.0  ;;  %v20187_v9 = vpop.f32.mrb[129].mxu0 }
0x2931   :  { %v11322_v11 = vadd.f32 %v11321_v57, %v11320_v8  ;;  %v11188_v20 = vpop.f32.mrb[130].mxu0 }
0x2932   :  { %v20188_v41 = vpop.f32.mrb[131].mxu0 }
0x2937   :  { %v11271_v24 = vpop.f32.mrb[132].mxu0 }
0x2938   :  { %v11323_v27 = vsel %vm819_vm1, %v11271_v24, 0.0  ;;  %v20199_v40 = vpop.f32.mrb[133].mxu0 }
0x2939   :  { %v11324_v42 = vadd.f32 %v11323_v27, %v11322_v11  ;;  %v11274_v5 = vpop.f32.mrb[134].mxu0 }
0x293a   :  { %v20200_v55 = vpop.f32.mrb[135].mxu0  ;;  %v24003_v5 = vld [vmem:[%s22713_s3 + $0xe0] sm:$0xff]  }
0x293b   :  { %v11326_v15 = vadd.f32 %v11325_v58, %v11324_v42  ;;  %v24000_v42 = vld [vmem:[%s22713_s3 + $0xc0] sm:$0xff]   ;;  %v24010_v58 = vld [vmem:[%s22713_s3 + $0xc8] sm:$0xff]  }
0x293c   :  { %v24013_v55 = vld [vmem:[%s22713_s3 + $0xe8] sm:$0xff]  }
0x293d   :  { %v11327_v6 = vadd.f32 %v23879_v36, %v11326_v15  ;;  %v21133_v36 = vld [vmem:[%s23942_s6] sm:$0xff]  }
0x293e   :  { %20208 = vmatpush3.bf16.msra.mxu0 %v21133_v36  ;;  %v24040_v36 = vld [vmem:[%s22713_s3 + $0xd0] sm:$0xff]  }
0x293f   :  { %v11329_v51 = vadd.f32 %v11327_v6, %v23698_v17  ;;  %20209 = vmatprep.subr.bf16.mxu0 %v25134_v10  ;;  %v21134_v17 = vld [vmem:[%s23942_s6 + $0x8] sm:$0xff]  }
0x2941   :  { %v11335_v19 = vsel %vm819_vm1, %v11329_v51, 0.0 }
0x2942   :  { %11336 = vadd.xlane.f32.xlu1 %v11335_v19  ;;  %20210 = vmatpush3.bf16.msra.mxu0 %v21134_v17  ;;  %v24043_v17 = vld [vmem:[%s22713_s3 + $0x100] sm:$0xff]  }
0x2943   :  { %20227 = vmatprep.subr.bf16.mxu0 %v25134_v10 }
0x29cf   :  { %v11337_v31 = vpop.xlane.xlu1 %11336 }
0x29d0   :  { %v11339_v53 = vmul.f32 0.03125, %v11337_v31  ;;  %v24030_v31 = vld [vmem:[%s24022_s14] ss:$0 sm:$0xff] }
0x29d2   :  { %v11341_v13 = vsub.f32 %v11329_v51, %v11339_v53 }
0x29d4   :  { %v11343_v62 = vmul.f32 %v11341_v13, %v11341_v13 }
0x29d6   :  { %v11347_v32 = vsel %vm819_vm1, %v11343_v62, 0.0 }
0x29d7   :  { %11348 = vadd.xlane.f32.xlu1 %v11347_v32 }
0x2a64   :  { %v11349_v33 = vpop.xlane.xlu1 %11348 }
0x2a65   :  { %v11351_v21 = vmul.f32 0.03125, %v11349_v33  ;;  %v24084_v33 = vld [vmem:[%s22713_s3 + $0xf8] sm:$0xff]  }
0x2a67   :  { %v11353_v12 = vadd.f32 1e-05, %v11351_v21  ;;  %v24087_v21 = vld [vmem:[%s22713_s3 + $0x128] sm:$0xff]  }
0x2a69   :  { %21345 = vrsqrt.f32 %v11353_v12  ;;  %v24098_v12 = vld [vmem:[%s22713_s3 + $0x110] sm:$0xff]  }
0x2a73   :  { %v21346_v56 = vpop.eup %21345 }
0x2a74   :  { %v11357_v54 = vmul.f32 %v21346_v56, %v11341_v13  ;;  %v24033_v13 = vld [vmem:[%s24027_s15] ss:$0 sm:$0xff]  ;;  %v24126_v56 = vld [vmem:[%s22713_s3 + $0x130] sm:$0xff]  }
0x2a76   :  { %v11365_v49 = vmul.f32 %v17648_v63, %v11357_v54  ;;  %v24115_v63 = vld [vmem:[%s22713_s3 + $0x148] sm:$0xff]   ;;  %v24140_v54 = vld [vmem:[%s22713_s3 + $0x138] sm:$0xff]  }
0x2a78   :  { %v23970_v35 = vadd.f32 %v17649_v28, %v11365_v49  ;;  %v24143_v28 = vld [vmem:[%s22713_s3 + $0x168] sm:$0xff]   ;;  %v24154_v49 = vld [vmem:[%s22713_s3 + $0x150] sm:$0xff]  }
0x2a7a   :  { %v11374_v4 = vpack.c.bf16 %v23970_v35, %v11372_v30 }
0x2a7c   :  { %20212 = vmatmul.mubr.msk.bf16.vlgmr.msra.gmra.mrb[136].mxu0 %vm819_vm1, %v11374_v4  ;;  %v24173_v4 = vld [vmem:[%s22713_s3 + $0x170] sm:$0xff]  }
0x2a7d   :  { %20231 = vmatprep.mubr.msk.bf16.mxu0 %vm21433_vm0, %v25134_v10  ;;  %20228 = vmatpush3.bf16.msra.mxu0 %v24000_v42 }
0x2a7e   :  { %20229 = vmatprep.subr.bf16.mxu0 %v25134_v10 }
0x2a81   :  { %20230 = vmatpush3.bf16.msra.mxu0 %v24010_v58 }
0x2a82   :  { %20235 = vmatprep.subr.bf16.mxu0 %v25134_v10 }
0x2b4f   :  { %v11435_v50 = vpop.f32.mrb[136].mxu0 }
0x2b50   :  { %v11436_v2 = vadd.f32 %v17650_v47, %v11435_v50  ;;  %v20213_v3 = vpop.f32.mrb[137].mxu0 }
0x2b51   :  { %v11438_v46 = vpop.f32.mrb[138].mxu0 }
0x2b52   :  { %v11439_v60 = vadd.f32 %v17650_v47, %v11438_v46  ;;  %v20214_v25 = vpop.f32.mrb[139].mxu0  ;;  %v11442_v45 = vmax.f32 %v11436_v2, 0.0 }
0x2b54   :  { %v11443_v61 = vmax.f32 %v11439_v60, 0.0 }
0x2b56   :  { %v11444_v29 = vpack.c.bf16 %v11443_v61, %v11442_v45  ;;  %v24192_v45 = vld [vmem:[%s22874_s18 + $0x10] ss:$0 sm:$0xff] }
0x2b58   :  { %20224 = vmatmul.mubr.msk.bf16.vlgmr.msra.gmra.mrb[148].mxu1 %vm3376_vm4, %v11444_v29 }
0x2b59   :  { %20247 = vmatprep.mubr.msk.bf16.mxu1 %vm21433_vm0, %v25134_v10  ;;  %20244 = vmatpush3.bf16.msra.mxu1 %v24003_v5 }
0x2b5a   :  { %20245 = vmatprep.subr.bf16.mxu1 %v25134_v10 }
0x2b5d   :  { %20246 = vmatpush3.bf16.msra.mxu1 %v24013_v55 }
0x2b5e   :  { %20259 = vmatprep.subr.bf16.mxu1 %v25134_v10 }
0x2c2b   :  { %v11521_v23 = vpop.f32.mrb[148].mxu1 }
0x2c2c   :  { %v11522_v0 = vadd.f32 %v17654_v37, %v11521_v23  ;;  %v20225_v1 = vpop.f32.mrb[149].mxu1 }
0x2c2d   :  { %v11524_v18 = vpop.f32.mrb[150].mxu1 }
0x2c2e   :  { %v23995_v57 = vadd.f32 %v17654_v37, %v11524_v18  ;;  %v20226_v8 = vpop.f32.mrb[151].mxu1  ;;  %v11528_v9 = vadd.f32 %v11522_v0, %v11372_v30  ;;  %v24164_v30 = vld [vmem:[%s22713_s3 + $0x158] sm:$0xff]   ;;  %s21468_s3 = smov 36  }
0x2c30   :  { %v11532_v11 = vsel %vm819_vm1, %v11528_v9, 0.0 }
0x2c31   :  { %11533 = vadd.xlane.f32.xlu0 %v11532_v11 }
0x2cbe   :  { %v11534_v20 = vpop.xlane.xlu0 %11533 }
0x2cbf   :  { %v11538_v41 = vmul.f32 0.03125, %v11534_v20  ;;  %v24196_v20 = vld [vmem:[%s22874_s18 + $0xc] ss:$0 sm:$0xff] }
0x2cc1   :  { %v11540_v24 = vsub.f32 %v11528_v9, %v11538_v41 }
0x2cc3   :  { %v11542_v27 = vmul.f32 %v11540_v24, %v11540_v24 }
0x2cc5   :  { %v11544_v40 = vsel %vm819_vm1, %v11542_v27, 0.0 }
0x2cc6   :  { %11545 = vadd.xlane.f32.xlu1 %v11544_v40 }
0x2d53   :  { %v11546_v15 = vpop.xlane.xlu1 %11545 }
0x2d54   :  { %v11550_v6 = vmul.f32 0.03125, %v11546_v15 }
0x2d56   :  { %v11552_v51 = vadd.f32 1e-05, %v11550_v6 }
0x2d58   :  { %21347 = vrsqrt.f32 %v11552_v51 }
0x2d62   :  { %v21348_v19 = vpop.eup %21347 }
0x2d63   :  { %v11556_v53 = vmul.f32 %v21348_v19, %v11540_v24  ;;  %v24200_v24 = vld [vmem:[%s22874_s18 + $0x12] ss:$0 sm:$0xff] }
0x2d65   :  { %v11564_v62 = vmul.f32 %v24030_v31, %v11556_v53 }
0x2d67   :  { %v24037_v32 = vadd.f32 %v24033_v13, %v11564_v62 }
0x2d69   :  { %v24047_v52 = vpack.c.bf16 %v24037_v32, %v24037_v32 }
0x2d6b   :  { %20232 = vmatmul.mubr.msk.bf16.vlgmr.msra.gmra.mrb[140].mxu0 %vm819_vm1, %v24047_v52  ;;  %20248 = vmatmul.mubr.msk.bf16.vlgmr.msra.gmra.mrb[152].mxu1 %vm819_vm1, %v24047_v52 }
0x2d6c   :  { %20236 = vmatpush3.bf16.msra.mxu0 %v24040_v36  ;;  %20260 = vmatpush3.bf16.msra.mxu1 %v24043_v17 }
0x2d6d   :  { %20237 = vmatprep.subr.bf16.mxu0 %v25134_v10  ;;  %20261 = vmatprep.subr.bf16.mxu1 %v25134_v10 }
0x2d6e   :  { %20239 = vmatprep.mubr.msk.bf16.mxu0 %vm21433_vm0, %v25134_v10  ;;  %20263 = vmatprep.mubr.msk.bf16.mxu1 %vm21433_vm0, %v25134_v10 }
0x2d70   :  { %20238 = vmatpush3.bf16.msra.mxu0 %v24056_v26  ;;  %20262 = vmatpush3.bf16.msra.mxu1 %v24059_v16 }
0x2d71   :  { %20251 = vmatprep.subr.bf16.mxu0 %v25134_v10  ;;  %20275 = vmatprep.subr.bf16.mxu1 %v25134_v10 }
0x2d73   :  { %20240 = vmatmul.mubr.msk.bf16.vlgmr.msra.gmra.mrb[144].mxu0 %vm819_vm1, %v24047_v52  ;;  %20264 = vmatmul.mubr.msk.bf16.vlgmr.msra.gmra.mrb[156].mxu1 %vm819_vm1, %v24047_v52 }
0x2d74   :  { %20252 = vmatpush3.bf16.msra.mxu0 %v24070_v43  ;;  %20276 = vmatpush3.bf16.msra.mxu1 %v24073_v44 }
0x2d75   :  { %20253 = vmatprep.subr.bf16.mxu0 %v25134_v10  ;;  %20277 = vmatprep.subr.bf16.mxu1 %v25134_v10 }
0x2d76   :  { %20255 = vmatprep.mubr.msk.bf16.mxu0 %vm21433_vm0, %v25134_v10  ;;  %20279 = vmatprep.mubr.msk.bf16.mxu1 %vm21433_vm0, %v25134_v10 }
0x2d78   :  { %20254 = vmatpush3.bf16.msra.mxu0 %v24084_v33  ;;  %20278 = vmatpush3.bf16.msra.mxu1 %v24087_v21 }
0x2d79   :  { %20267 = vmatprep.subr.bf16.mxu0 %v25134_v10  ;;  %20291 = vmatprep.subr.bf16.mxu1 %v25134_v10 }
0x2d7b   :  { %20256 = vmatmul.mubr.msk.bf16.vlgmr.msra.gmra.mrb[148].mxu0 %vm819_vm1, %v24047_v52  ;;  %20280 = vmatmul.mubr.msk.bf16.vlgmr.msra.gmra.mrb[160].mxu1 %vm819_vm1, %v24047_v52 }
0x2d7c   :  { %20268 = vmatpush3.bf16.msra.mxu0 %v24098_v12  ;;  %20292 = vmatpush3.bf16.msra.mxu1 %v24101_v14 }
0x2d7d   :  { %20269 = vmatprep.subr.bf16.mxu0 %v25134_v10  ;;  %20293 = vmatprep.subr.bf16.mxu1 %v25134_v10 }
0x2d7e   :  { %20271 = vmatprep.mubr.msk.bf16.mxu0 %vm21433_vm0, %v25134_v10  ;;  %20295 = vmatprep.mubr.msk.bf16.mxu1 %vm21433_vm0, %v25134_v10 }
0x2d80   :  { %20270 = vmatpush3.bf16.msra.mxu0 %v24112_v39  ;;  %20294 = vmatpush3.bf16.msra.mxu1 %v24115_v63 }
0x2d81   :  { %20283 = vmatprep.subr.bf16.mxu0 %v25134_v10  ;;  %20307 = vmatprep.subr.bf16.mxu1 %v25134_v10 }
0x2d83   :  { %20272 = vmatmul.mubr.msk.bf16.vlgmr.msra.gmra.mrb[152].mxu0 %vm819_vm1, %v24047_v52  ;;  %20296 = vmatmul.mubr.msk.bf16.vlgmr.msra.gmra.mrb[164].mxu1 %vm819_vm1, %v24047_v52 }
0x2d84   :  { %20284 = vmatpush3.bf16.msra.mxu0 %v24126_v56  ;;  %20308 = vmatpush3.bf16.msra.mxu1 %v24129_v59 }
0x2d85   :  { %20285 = vmatprep.subr.bf16.mxu0 %v25134_v10  ;;  %20309 = vmatprep.subr.bf16.mxu1 %v25134_v10 }
0x2d86   :  { %20287 = vmatprep.mubr.msk.bf16.mxu0 %vm21433_vm0, %v25134_v10  ;;  %20311 = vmatprep.mubr.msk.bf16.mxu1 %vm21433_vm0, %v25134_v10 }
0x2d88   :  { %20286 = vmatpush3.bf16.msra.mxu0 %v24140_v54  ;;  %20310 = vmatpush3.bf16.msra.mxu1 %v24143_v28 }
0x2d89   :  { %20299 = vmatprep.subr.bf16.mxu0 %v25134_v10  ;;  %20323 = vmatprep.subr.bf16.mxu1 %v25134_v10 }
0x2d8b   :  { %20288 = vmatmul.mubr.msk.bf16.vlgmr.msra.gmra.mrb[156].mxu0 %vm819_vm1, %v24047_v52  ;;  %20312 = vmatmul.mubr.msk.bf16.vlgmr.msra.gmra.mrb[168].mxu1 %vm819_vm1, %v24047_v52 }
0x2d8c   :  { %20300 = vmatpush3.bf16.msra.mxu0 %v24154_v49  ;;  %20303 = vmatprep.mubr.msk.bf16.mxu0 %vm21433_vm0, %v25134_v10 }
0x2d8d   :  { %20301 = vmatprep.subr.bf16.mxu0 %v25134_v10  ;;  %20325 = vmatprep.mubr.msk.bf16.mxu1 %vm21433_vm0, %v25134_v10 }
0x2d90   :  { %20302 = vmatpush3.bf16.msra.mxu0 %v24164_v30 }
0x2d91   :  { %20315 = vmatprep.subr.bf16.mxu0 %v25134_v10 }
0x2d93   :  { %20304 = vmatmul.mubr.msk.bf16.vlgmr.msra.gmra.mrb[160].mxu0 %vm819_vm1, %v24047_v52 }
0x2d94   :  { %20316 = vmatpush3.bf16.msra.mxu0 %v24173_v4  ;;  %20319 = vmatprep.mubr.msk.bf16.mxu0 %vm21433_vm0, %v25134_v10 }
0x2d95   :  { %20317 = vmatprep.subr.bf16.mxu0 %v25134_v10 }
0x2d98   :  { %20318 = vmatpush3.bf16.msra.mxu0 %v24180_v48 }
0x2d99   :  { %20329 = vmatprep.subr.bf16.mxu0 %v25134_v10 }
0x2d9b   :  { %20320 = vmatmul.mubr.msk.bf16.vlgmr.msra.gmra.mrb[164].mxu0 %vm819_vm1, %v24047_v52 }
0x2d9c   :  { %20331 = vmatprep.mubr.msk.bf16.mxu0 %vm21433_vm0, %v25134_v10 }
0x2e3e   :  { %v11721_v34 = vpop.f32.mrb[140].mxu0  ;;  %v11825_v47 = vpop.f32.mrb[152].mxu1 }
0x2e3f   :  { %v20233_v50 = vpop.f32.mrb[141].mxu0  ;;  %v20249_v2 = vpop.f32.mrb[153].mxu1  ;;  %v11722_v27 = vadd.f32 %v24196_v20, %v11721_v34 }
0x2e40   :  { %v11724_v3 = vpop.f32.mrb[142].mxu0  ;;  %v11828_v46 = vpop.f32.mrb[154].mxu1 }
0x2e41   :  { %v20234_v60 = vpop.f32.mrb[143].mxu0  ;;  %v20250_v25 = vpop.f32.mrb[155].mxu1  ;;  %v12347_v52 = vpack.c.bf16 %v11722_v27, %v11722_v27  ;;  %v24206_v46 = vld [vmem:[%s22874_s18 + $0xe] ss:$0 sm:$0xff] }
0x2e42   :  { %v24211_v60 = vld [vmem:[%s22874_s18 + $0x11] ss:$0 sm:$0xff]  ;;  %v24214_v25 = vld [vmem:[%s22874_s18 + $0x14] ss:$0 sm:$0xff] }
0x2e46   :  { %v11773_v61 = vpop.f32.mrb[144].mxu0  ;;  %v11953_v29 = vpop.f32.mrb[156].mxu1 }
0x2e47   :  { %v11954_v37 = vadd.f32 %v24192_v45, %v11953_v29  ;;  %v20241_v23 = vpop.f32.mrb[145].mxu0  ;;  %v20265_v0 = vpop.f32.mrb[157].mxu1  ;;  %v11826_v29 = vadd.f32 %v24206_v46, %v11825_v47 }
0x2e48   :  { %v11776_v1 = vpop.f32.mrb[146].mxu0  ;;  %v11956_v18 = vpop.f32.mrb[158].mxu1 }
0x2e49   :  { %v12351_v8 = vpack.c.bf16 %v11954_v37, %v11954_v37  ;;  %v20242_v9 = vpop.f32.mrb[147].mxu0  ;;  %v20266_v11 = vpop.f32.mrb[159].mxu1 }
0x2e4b   :  { %v12359_v41 = vsel %vm1491_vm2, %v12351_v8, 0 }
0x2e4c   :  { %20324 = vmatpush3.bf16.xpose.msra.mxu1 %v12359_v41  ;;  %v12349_v41 = vpack.c.bf16 %v11826_v29, %v11826_v29 }
0x2e4d   :  { %20335 = vmatprep.subr.bf16.mxu1 %v25134_v10 }
0x2e4e   :  { %v11877_v40 = vpop.f32.mrb[148].mxu0  ;;  %v12057_v15 = vpop.f32.mrb[160].mxu1 }
0x2e4f   :  { %v12058_v6 = vadd.f32 %v24200_v24, %v12057_v15  ;;  %v20257_v51 = vpop.f32.mrb[149].mxu0  ;;  %v20281_v19 = vpop.f32.mrb[161].mxu1 }
0x2e50   :  { %v11880_v53 = vpop.f32.mrb[150].mxu0  ;;  %v12060_v62 = vpop.f32.mrb[162].mxu1  ;;  %v24223_v19 = vld [vmem:[%s22874_s18 + $0xd] ss:$0 sm:$0xff] }
0x2e51   :  { %v12353_v50 = vpack.c.bf16 %v12058_v6, %v12058_v6  ;;  %v20258_v2 = vpop.f32.mrb[151].mxu0  ;;  %v20282_v3 = vpop.f32.mrb[163].mxu1  ;;  %v24229_v62 = vld [vmem:[%s22874_s18 + $0x13] ss:$0 sm:$0xff] }
0x2e53   :  { %v12451_v34 = vsel %vm1491_vm2, %v12353_v50, 0  ;;  %20326 = vmatmul.mubr.msk.bf16.vlgmr.msra.gmra.mrb[172].mxu1 %vm1491_vm2, %v12347_v52  ;;  %v11774_v52 = vadd.f32 %v24223_v19, %v11773_v61 }
0x2e54   :  { %20336 = vmatpush3.bf16.xpose.msra.mxu1 %v12451_v34  ;;  %20337 = vmatprep.mubr.msk.bf16.mxu1 %vm21433_vm0, %v25134_v10 }
0x2e55   :  { %20347 = vmatprep.subr.bf16.mxu1 %v25134_v10 }
0x2e56   :  { %v12005_v37 = vpop.f32.mrb[152].mxu0  ;;  %v12185_v23 = vpop.f32.mrb[164].mxu1 }
0x2e57   :  { %v12006_v0 = vadd.f32 %v24211_v60, %v12005_v37  ;;  %v12186_v1 = vadd.f32 %v24214_v25, %v12185_v23  ;;  %v20273_v18 = vpop.f32.mrb[153].mxu0  ;;  %v20297_v8 = vpop.f32.mrb[165].mxu1 }
0x2e58   :  { %v12008_v9 = vpop.f32.mrb[154].mxu0  ;;  %v12188_v11 = vpop.f32.mrb[166].mxu1  ;;  %v24240_v8 = vld [vmem:[%s22874_s18 + $0xf] ss:$0 sm:$0xff] }
0x2e59   :  { %v12352_v27 = vpack.c.bf16 %v12006_v0, %v12006_v0  ;;  %v12595_v15 = vpack.c.bf16 %v12186_v1, %v12186_v1  ;;  %v20274_v6 = vpop.f32.mrb[155].mxu0  ;;  %v20298_v51 = vpop.f32.mrb[167].mxu1  ;;  %v12348_v0 = vpack.c.bf16 %v11774_v52, %v11774_v52  ;;  %v24245_v11 = vld [vmem:[%s22874_s18 + $0x15] ss:$0 sm:$0xff] }
0x2e5b   :  { %v12405_v47 = vsel %vm1491_vm2, %v12352_v27, 0  ;;  %v12603_v53 = vsel %vm1735_vm3, %v12595_v15, 0  ;;  %20338 = vmatmul.mubr.msk.bf16.vlgmr.msra.gmra.mrb[176].mxu1 %vm1491_vm2, %v12349_v41  ;;  %v11878_v41 = vadd.f32 %v24240_v8, %v11877_v40 }
0x2e5c   :  { %20330 = vmatpush3.bf16.xpose.msra.mxu0 %v12405_v47  ;;  %20348 = vmatpush3.bf16.msra.mxu1 %v12603_v53 }
0x2e5d   :  { %20341 = vmatprep.subr.bf16.mxu0 %v25134_v10  ;;  %20349 = vmatprep.mubr.msk.bf16.mxu1 %vm21433_vm0, %v25134_v10  ;;  %v12350_v47 = vpack.c.bf16 %v11878_v41, %v11878_v41 }
0x2e5e   :  { %v12109_v50 = vpop.f32.mrb[156].mxu0  ;;  %v24235_v2 = vpop.f32.mrb[168].mxu1  ;;  %20359 = vmatprep.subr.bf16.mxu1 %v25134_v10 }
0x2e5f   :  { %v12110_v3 = vadd.f32 %v24229_v62, %v12109_v50  ;;  %v20289_v34 = vpop.f32.mrb[157].mxu0  ;;  %v20313_v29 = vpop.f32.mrb[169].mxu1 }
0x2e60   :  { %v12112_v37 = vpop.f32.mrb[158].mxu0  ;;  %v12292_v23 = vpop.f32.mrb[170].mxu1 }
0x2e61   :  { %v12354_v1 = vpack.c.bf16 %v12110_v3, %v12110_v3  ;;  %v20290_v61 = vpop.f32.mrb[159].mxu0  ;;  %v20314_v18 = vpop.f32.mrb[171].mxu1 }
0x2e63   :  { %v12497_v9 = vsel %vm1491_vm2, %v12354_v1, 0  ;;  %20332 = vmatmul.mubr.msk.bf16.vlgmr.msra.gmra.mrb[168].mxu0 %vm1491_vm2, %v12348_v0 }
0x2e64   :  { %20342 = vmatpush3.bf16.xpose.msra.mxu0 %v12497_v9  ;;  %20343 = vmatprep.mubr.msk.bf16.mxu0 %vm21433_vm0, %v25134_v10 }
0x2e65   :  { %20353 = vmatprep.subr.bf16.mxu0 %v25134_v10 }
0x2e66   :  { %v12237_v27 = vpop.f32.mrb[160].mxu0 }
0x2e67   :  { %v12238_v15 = vadd.f32 %v24245_v11, %v12237_v27  ;;  %v20305_v6 = vpop.f32.mrb[161].mxu0 }
0x2e68   :  { %v12240_v51 = vpop.f32.mrb[162].mxu0 }
0x2e69   :  { %v12596_v53 = vpack.c.bf16 %v12238_v15, %v12238_v15  ;;  %v20306_v52 = vpop.f32.mrb[163].mxu0 }
0x2e6b   :  { %v12649_v50 = vsel %vm1735_vm3, %v12596_v53, 0  ;;  %20344 = vmatmul.mubr.msk.bf16.vlgmr.msra.gmra.mrb[172].mxu0 %vm1491_vm2, %v12350_v47 }
0x2e6c   :  { %20354 = vmatpush3.bf16.msra.mxu0 %v12649_v50  ;;  %20355 = vmatprep.mubr.msk.bf16.mxu0 %vm21433_vm0, %v25134_v10 }
0x2e6d   :  { %20365 = vmatprep.subr.bf16.mxu0 %v25134_v10 }
0x2e6e   :  { %v24257_v40 = vpop.f32.mrb[164].mxu0 }
0x2e6f   :  { %v20321_v3 = vpop.f32.mrb[165].mxu0 }
0x2e70   :  { %v12344_v34 = vpop.f32.mrb[166].mxu0 }
0x2e71   :  { %v20322_v29 = vpop.f32.mrb[167].mxu0 }
0x2f26   :  { %v12395_v37 = vpop.f32.mrb[172].mxu1 }
0x2f27   :  { %v12539_v23 = vmul.f32 0.35355338, %v12395_v37  ;;  %v20327_v0 = vpop.f32.mrb[173].mxu1 }
0x2f28   :  { %v12398_v1 = vpop.f32.mrb[174].mxu1 }
0x2f29   :  { %v20328_v61 = vpop.f32.mrb[175].mxu1  ;;  %v12543_v18 = vadd.f32 %v12539_v23, %v22995_v38 }
0x2f2b   :  { %v12547_v9 = vsel %vm1491_vm2, %v12543_v18, -inf }
0x2f2c   :  { %12548 = vmax.xlane.f32.xlu0 %v12547_v9 }
0x2f2e   :  { %v12487_v41 = vpop.f32.mrb[176].mxu1 }
0x2f2f   :  { %v12541_v27 = vmul.f32 0.35355338, %v12487_v41  ;;  %v20339_v15 = vpop.f32.mrb[177].mxu1 }
0x2f30   :  { %v12490_v6 = vpop.f32.mrb[178].mxu1 }
0x2f31   :  { %v20340_v51 = vpop.f32.mrb[179].mxu1  ;;  %v12545_v47 = vadd.f32 %v12541_v27, %v22995_v38 }
0x2f33   :  { %v12553_v53 = vsel %vm1491_vm2, %v12545_v47, -inf }
0x2f34   :  { %12554 = vmax.xlane.f32.xlu0 %v12553_v53 }
0x2f36   :  { %v12441_v52 = vpop.f32.mrb[168].mxu0 }
0x2f37   :  { %v12540_v50 = vmul.f32 0.35355338, %v12441_v52  ;;  %v20333_v3 = vpop.f32.mrb[169].mxu0 }
0x2f38   :  { %v12444_v34 = vpop.f32.mrb[170].mxu0 }
0x2f39   :  { %v20334_v29 = vpop.f32.mrb[171].mxu0  ;;  %v12544_v37 = vadd.f32 %v12540_v50, %v22995_v38 }
0x2f3b   :  { %v12550_v23 = vsel %vm1491_vm2, %v12544_v37, -inf }
0x2f3c   :  { %12551 = vmax.xlane.f32.xlu1 %v12550_v23 }
0x2f3e   :  { %v12533_v0 = vpop.f32.mrb[172].mxu0 }
0x2f3f   :  { %v12542_v1 = vmul.f32 0.35355338, %v12533_v0  ;;  %v20345_v61 = vpop.f32.mrb[173].mxu0 }
0x2f40   :  { %v12536_v9 = vpop.f32.mrb[174].mxu0 }
0x2f41   :  { %v20346_v41 = vpop.f32.mrb[175].mxu0  ;;  %v12546_v27 = vadd.f32 %v12542_v1, %v22995_v38  ;;  %v11529_v1 = vadd.f32 %v23995_v57, %v23970_v35  ;;  %v24275_v57 = vld [vmem:[%s22874_s18 + $0x16] ss:$0 sm:$0xff] }
0x2f43   :  { %v12556_v15 = vsel %vm1491_vm2, %v12546_v27, -inf }
0x2f44   :  { %12557 = vmax.xlane.f32.xlu1 %v12556_v15  ;;  %v11535_v15 = vsel %vm819_vm1, %v11529_v1, 0.0 }
0x2fb9   :  { %v12549_v6 = vpop.xlane.xlu0 %12548 }
0x2fba   :  { %v12559_v51 = vsub.f32 %v12543_v18, %v12549_v6 }
0x2fbc   :  { %v12563_v53 = vmul.f32 1.442695, %v12559_v51 }
0x2fbe   :  { %21349 = vpow2.f32 %v12563_v53 }
0x2fc1   :  { %v12555_v52 = vpop.xlane.xlu0 %12554 }
0x2fc2   :  { %v12561_v3 = vsub.f32 %v12545_v47, %v12555_v52 }
0x2fc4   :  { %v12567_v50 = vmul.f32 1.442695, %v12561_v3 }
0x2fc6   :  { %21351 = vpow2.f32 %v12567_v50 }
0x2fc8   :  { %v21350_v34 = vpop.eup %21349 }
0x2fc9   :  { %v12552_v29 = vpop.xlane.xlu1 %12551  ;;  %v12571_v23 = vsel %vm1491_vm2, %v21350_v34, 0.0 }
0x2fca   :  { %v12560_v0 = vsub.f32 %v12544_v37, %v12552_v29  ;;  %12572 = vadd.xlane.f32.xlu0 %v12571_v23 }
0x2fcc   :  { %v12565_v61 = vmul.f32 1.442695, %v12560_v0 }
0x2fce   :  { %21353 = vpow2.f32 %v12565_v61 }
0x2fd0   :  { %v21352_v38 = vpop.eup %21351 }
0x2fd1   :  { %v12558_v9 = vpop.xlane.xlu1 %12557  ;;  %v12577_v18 = vsel %vm1491_vm2, %v21352_v38, 0.0 }
0x2fd2   :  { %v12562_v41 = vsub.f32 %v12546_v27, %v12558_v9  ;;  %12578 = vadd.xlane.f32.xlu0 %v12577_v18  ;;  %v12290_v27 = vadd.f32 %v24275_v57, %v24235_v2 }
0x2fd4   :  { %v12569_v47 = vmul.f32 1.442695, %v12562_v41  ;;  %v12597_v50 = vpack.c.bf16 %v12290_v27, %v12290_v27 }
0x2fd6   :  { %21355 = vpow2.f32 %v12569_v47  ;;  %11536 = vadd.xlane.f32.xlu0 %v11535_v15  ;;  %v12695_v18 = vsel %vm1735_vm3, %v12597_v50, 0 }
0x2fd8   :  { %v21354_v6 = vpop.eup %21353 }
0x2fd9   :  { %v12574_v37 = vsel %vm1491_vm2, %v21354_v6, 0.0 }
0x2fda   :  { %12575 = vadd.xlane.f32.xlu1 %v12574_v37  ;;  %v24286_v37 = vld [vmem:[%s22874_s18 + $0x17] ss:$0 sm:$0xff] }
0x2fe0   :  { %v21356_v51 = vpop.eup %21355 }
0x2fe1   :  { %v12580_v53 = vsel %vm1491_vm2, %v21356_v51, 0.0 }
0x2fe2   :  { %12581 = vadd.xlane.f32.xlu1 %v12580_v53  ;;  %v12342_v53 = vadd.f32 %v24286_v37, %v24257_v40 }
0x3057   :  { %v12573_v35 = vpop.xlane.xlu0 %12572 }
0x3058   :  { %21357 = vrcp.f32 %v12573_v35 }
0x305f   :  { %v12579_v52 = vpop.xlane.xlu0 %12578 }
0x3060   :  { %21359 = vrcp.f32 %v12579_v52  ;;  %v12598_v52 = vpack.c.bf16 %v12342_v53, %v12342_v53 }
0x3062   :  { %v21358_v3 = vpop.eup %21357  ;;  %v12741_v50 = vsel %vm1735_vm3, %v12598_v52, 0 }
0x3063   :  { %v12587_v29 = vmul.f32 %v21358_v3, %v21350_v34  ;;  %v11537_v23 = vpop.xlane.xlu0 %11536 }
0x3064   :  { %v11539_v0 = vmul.f32 0.03125, %v11537_v23 }
0x3065   :  { %v12591_v61 = vpack.c.bf16 %v12587_v29, %v12587_v29 }
0x3066   :  { %v11541_v9 = vsub.f32 %v11529_v1, %v11539_v0 }
0x3067   :  { %v12576_v41 = vpop.xlane.xlu1 %12575  ;;  %20350 = vmatmul.mubr.msk.bf16.vlgmr.msra.gmra.mrb[180].mxu1 %vm1491_vm2, %v12591_v61  ;;  %v17723_v61 = vld [vmem:[%s23043_s27 + $0x14] sm:$0xf] }
0x3068   :  { %21361 = vrcp.f32 %v12576_v41  ;;  %20360 = vmatpush3.bf16.msra.mxu1 %v12695_v18  ;;  %v11543_v47 = vmul.f32 %v11541_v9, %v11541_v9  ;;  %20361 = vmatprep.mubr.msk.bf16.mxu1 %vm21433_vm0, %v25134_v10  ;;  %v24309_v18 = vsel %vm1735_vm3, %v17723_v61, 0 }
0x3069   :  { %20371 = vmatprep.subr.bf16.mxu1 %v25134_v10 }
0x306a   :  { %v21360_v2 = vpop.eup %21359  ;;  %v11547_v34 = vsel %vm819_vm1, %v11543_v47, 0.0 }
0x306b   :  { %v12589_v15 = vmul.f32 %v21360_v2, %v21352_v38  ;;  %11548 = vadd.xlane.f32.xlu1 %v11547_v34  ;;  %v17724_v2 = vld [vmem:[%s23043_s27 + $0x18] sm:$0xf] }
0x306c   :  { %v24315_v53 = vsel %vm1735_vm3, %v17724_v2, 0 }
0x306d   :  { %v12593_v1 = vpack.c.bf16 %v12589_v15, %v12589_v15 }
0x306f   :  { %v12582_v35 = vpop.xlane.xlu1 %12581  ;;  %20362 = vmatmul.mubr.msk.bf16.vlgmr.msra.gmra.mrb[184].mxu1 %vm1491_vm2, %v12593_v1 }
0x3070   :  { %21363 = vrcp.f32 %v12582_v35  ;;  %20373 = vmatprep.mubr.msk.bf16.mxu1 %vm21433_vm0, %v25134_v10 }
0x3072   :  { %v21362_v27 = vpop.eup %21361 }
0x3073   :  { %v12588_v3 = vmul.f32 %v21362_v27, %v21354_v6  ;;  %v17722_v6 = vld [vmem:[%s23043_s27 + $0x10] sm:$0xf] }
0x3074   :  { %v24303_v0 = vsel %vm1735_vm3, %v17722_v6, 0 }
0x3075   :  { %v12592_v38 = vpack.c.bf16 %v12588_v3, %v12588_v3  ;;  %20372 = vmatpush3.bf16.msra.mxu1 %v24303_v0 }
0x3076   :  { %20383 = vmatprep.subr.bf16.mxu1 %v25134_v10 }
0x3077   :  { %20356 = vmatmul.mubr.msk.bf16.vlgmr.msra.gmra.mrb[176].mxu0 %vm1491_vm2, %v12592_v38 }
0x3078   :  { %20366 = vmatpush3.bf16.msra.mxu0 %v12741_v50  ;;  %20367 = vmatprep.mubr.msk.bf16.mxu0 %vm21433_vm0, %v25134_v10 }
0x3079   :  { %20377 = vmatprep.subr.bf16.mxu0 %v25134_v10 }
0x307a   :  { %v21364_v40 = vpop.eup %21363 }
0x307b   :  { %v12590_v29 = vmul.f32 %v21364_v40, %v21356_v51 }
0x307d   :  { %v12594_v23 = vpack.c.bf16 %v12590_v29, %v12590_v29 }
0x307f   :  { %20368 = vmatmul.mubr.msk.bf16.vlgmr.msra.gmra.mrb[180].mxu0 %vm1491_vm2, %v12594_v23 }
0x3080   :  { %20379 = vmatprep.mubr.msk.bf16.mxu0 %vm21433_vm0, %v25134_v10  ;;  %20378 = vmatpush3.bf16.msra.mxu0 %v24309_v18 }
0x3081   :  { %20389 = vmatprep.subr.bf16.mxu0 %v25134_v10 }
0x30f8   :  { %v11549_v51 = vpop.xlane.xlu1 %11548 }
0x30f9   :  { %v11551_v41 = vmul.f32 0.03125, %v11549_v51 }
0x30fb   :  { %v11553_v47 = vadd.f32 1e-05, %v11551_v41 }
0x30fd   :  { %21365 = vrsqrt.f32 %v11553_v47 }
0x3107   :  { %v21366_v35 = vpop.eup %21365 }
0x3108   :  { %v11557_v3 = vmul.f32 %v21366_v35, %v11541_v9  ;;  %v17725_v9 = vld [vmem:[%s23043_s27 + $0x1c] sm:$0xf] }
0x310a   :  { %v11565_v50 = vmul.f32 %v24030_v31, %v11557_v3 }
0x310c   :  { %v24328_v61 = vadd.f32 %v24033_v13, %v11565_v50 }
0x310e   :  { %v24335_v31 = vpack.c.bf16 %v24328_v61, %v24328_v61 }
0x313a   :  { %v12639_v34 = vpop.f32.mrb[180].mxu1 }
0x313b   :  { %v12783_v15 = vpack.c.bf16 %v12639_v34, %v12639_v34  ;;  %v20351_v1 = vpop.f32.mrb[181].mxu1 }
0x313c   :  { %v12642_v27 = vpop.f32.mrb[182].mxu1 }
0x313d   :  { %v20352_v52 = vpop.f32.mrb[183].mxu1  ;;  %20374 = vmatmul.mubr.msk.bf16.vlgmr.msra.gmra.mrb[188].mxu1 %vm1491_vm2, %v12783_v15 }
0x313e   :  { %20384 = vmatpush3.bf16.msra.mxu1 %v24315_v53  ;;  %20385 = vmatprep.mubr.msk.bf16.mxu1 %vm21433_vm0, %v25134_v10 }
0x313f   :  { %20395 = vmatprep.subr.bf16.mxu1 %v25134_v10 }
0x3142   :  { %v12731_v38 = vpop.f32.mrb[184].mxu1 }
0x3143   :  { %v12785_v40 = vpack.c.bf16 %v12731_v38, %v12731_v38  ;;  %v20363_v29 = vpop.f32.mrb[185].mxu1 }
0x3144   :  { %v12734_v23 = vpop.f32.mrb[186].mxu1 }
0x3145   :  { %v20364_v6 = vpop.f32.mrb[187].mxu1  ;;  %20386 = vmatmul.mubr.msk.bf16.vlgmr.msra.gmra.mrb[192].mxu1 %vm1491_vm2, %v12785_v40 }
0x3146   :  { %20396 = vmatpush3.bf16.msra.mxu1 %v24000_v42  ;;  %20399 = vmatprep.mubr.msk.bf16.mxu1 %vm21433_vm0, %v25134_v10  ;;  %v24339_v42 = vsel %vm1735_vm3, %v17725_v9, 0 }
0x3147   :  { %20397 = vmatprep.subr.bf16.mxu1 %v25134_v10 }
0x314a   :  { %v12685_v51 = vpop.f32.mrb[176].mxu0  ;;  %20398 = vmatpush3.bf16.msra.mxu1 %v24010_v58 }
0x314b   :  { %v12784_v41 = vpack.c.bf16 %v12685_v51, %v12685_v51  ;;  %v20357_v47 = vpop.f32.mrb[177].mxu0  ;;  %20411 = vmatprep.subr.bf16.mxu1 %v25134_v10 }
0x314c   :  { %v12688_v2 = vpop.f32.mrb[178].mxu0 }
0x314d   :  { %v20358_v13 = vpop.f32.mrb[179].mxu0  ;;  %20380 = vmatmul.mubr.msk.bf16.vlgmr.msra.gmra.mrb[184].mxu0 %vm1491_vm2, %v12784_v41  ;;  %20400 = vmatmul.mubr.msk.bf16.vlgmr.msra.gmra.mrb[196].mxu1 %vm819_vm1, %v24335_v31 }
0x314e   :  { %20390 = vmatpush3.bf16.msra.mxu0 %v24339_v42  ;;  %20412 = vmatpush3.bf16.msra.mxu1 %v24003_v5 }
0x314f   :  { %20413 = vmatprep.subr.bf16.mxu1 %v25134_v10  ;;  %20391 = vmatprep.mubr.msk.bf16.mxu0 %vm21433_vm0, %v25134_v10 }
0x3150   :  { %20415 = vmatprep.mubr.msk.bf16.mxu1 %vm21433_vm0, %v25134_v10  ;;  %20403 = vmatprep.subr.bf16.mxu0 %v25134_v10 }
0x3152   :  { %v12777_v58 = vpop.f32.mrb[180].mxu0  ;;  %20414 = vmatpush3.bf16.msra.mxu1 %v24013_v55 }
0x3153   :  { %v12786_v34 = vpack.c.bf16 %v12777_v58, %v12777_v58  ;;  %v20369_v15 = vpop.f32.mrb[181].mxu0  ;;  %20427 = vmatprep.subr.bf16.mxu1 %v25134_v10 }
0x3154   :  { %v12780_v1 = vpop.f32.mrb[182].mxu0 }
0x3155   :  { %v20370_v35 = vpop.f32.mrb[183].mxu0  ;;  %20392 = vmatmul.mubr.msk.bf16.vlgmr.msra.gmra.mrb[188].mxu0 %vm1491_vm2, %v12786_v34  ;;  %20416 = vmatmul.mubr.msk.bf16.vlgmr.msra.gmra.mrb[200].mxu1 %vm819_vm1, %v24335_v31 }
0x3156   :  { %20404 = vmatpush3.bf16.msra.mxu0 %v24040_v36  ;;  %20428 = vmatpush3.bf16.msra.mxu1 %v24043_v17 }
0x3157   :  { %20405 = vmatprep.subr.bf16.mxu0 %v25134_v10  ;;  %20429 = vmatprep.subr.bf16.mxu1 %v25134_v10 }
0x3158   :  { %20407 = vmatprep.mubr.msk.bf16.mxu0 %vm21433_vm0, %v25134_v10  ;;  %20431 = vmatprep.mubr.msk.bf16.mxu1 %vm21433_vm0, %v25134_v10 }
0x315a   :  { %20406 = vmatpush3.bf16.msra.mxu0 %v24056_v26  ;;  %20430 = vmatpush3.bf16.msra.mxu1 %v24059_v16 }
0x315b   :  { %20419 = vmatprep.subr.bf16.mxu0 %v25134_v10  ;;  %20443 = vmatprep.subr.bf16.mxu1 %v25134_v10 }
0x315d   :  { %20408 = vmatmul.mubr.msk.bf16.vlgmr.msra.gmra.mrb[192].mxu0 %vm819_vm1, %v24335_v31  ;;  %20432 = vmatmul.mubr.msk.bf16.vlgmr.msra.gmra.mrb[204].mxu1 %vm819_vm1, %v24335_v31 }
0x315e   :  { %20420 = vmatpush3.bf16.msra.mxu0 %v24070_v43  ;;  %20444 = vmatpush3.bf16.msra.mxu1 %v24073_v44 }
0x315f   :  { %20421 = vmatprep.subr.bf16.mxu0 %v25134_v10  ;;  %20445 = vmatprep.subr.bf16.mxu1 %v25134_v10 }
0x3160   :  { %20423 = vmatprep.mubr.msk.bf16.mxu0 %vm21433_vm0, %v25134_v10  ;;  %20447 = vmatprep.mubr.msk.bf16.mxu1 %vm21433_vm0, %v25134_v10 }
0x3162   :  { %20422 = vmatpush3.bf16.msra.mxu0 %v24084_v33  ;;  %20446 = vmatpush3.bf16.msra.mxu1 %v24087_v21 }
0x3163   :  { %20435 = vmatprep.subr.bf16.mxu0 %v25134_v10  ;;  %20459 = vmatprep.subr.bf16.mxu1 %v25134_v10 }
0x3165   :  { %20424 = vmatmul.mubr.msk.bf16.vlgmr.msra.gmra.mrb[196].mxu0 %vm819_vm1, %v24335_v31  ;;  %20448 = vmatmul.mubr.msk.bf16.vlgmr.msra.gmra.mrb[208].mxu1 %vm819_vm1, %v24335_v31 }
0x3166   :  { %20436 = vmatpush3.bf16.msra.mxu0 %v24098_v12  ;;  %20460 = vmatpush3.bf16.msra.mxu1 %v24101_v14 }
0x3167   :  { %20437 = vmatprep.subr.bf16.mxu0 %v25134_v10  ;;  %20461 = vmatprep.subr.bf16.mxu1 %v25134_v10 }
0x3168   :  { %20439 = vmatprep.mubr.msk.bf16.mxu0 %vm21433_vm0, %v25134_v10  ;;  %20463 = vmatprep.mubr.msk.bf16.mxu1 %vm21433_vm0, %v25134_v10 }
0x316a   :  { %20438 = vmatpush3.bf16.msra.mxu0 %v24112_v39  ;;  %20462 = vmatpush3.bf16.msra.mxu1 %v24115_v63 }
0x316b   :  { %20451 = vmatprep.subr.bf16.mxu0 %v25134_v10  ;;  %20475 = vmatprep.subr.bf16.mxu1 %v25134_v10 }
0x316d   :  { %20440 = vmatmul.mubr.msk.bf16.vlgmr.msra.gmra.mrb[200].mxu0 %vm819_vm1, %v24335_v31  ;;  %20464 = vmatmul.mubr.msk.bf16.vlgmr.msra.gmra.mrb[212].mxu1 %vm819_vm1, %v24335_v31 }
0x316e   :  { %20452 = vmatpush3.bf16.msra.mxu0 %v24126_v56  ;;  %20476 = vmatpush3.bf16.msra.mxu1 %v24129_v59 }
0x316f   :  { %20453 = vmatprep.subr.bf16.mxu0 %v25134_v10  ;;  %20477 = vmatprep.subr.bf16.mxu1 %v25134_v10 }
0x3170   :  { %20455 = vmatprep.mubr.msk.bf16.mxu0 %vm21433_vm0, %v25134_v10  ;;  %20479 = vmatprep.mubr.msk.bf16.mxu1 %vm21433_vm0, %v25134_v10 }
0x3172   :  { %20454 = vmatpush3.bf16.msra.mxu0 %v24140_v54  ;;  %20478 = vmatpush3.bf16.msra.mxu1 %v24143_v28 }
0x3173   :  { %20467 = vmatprep.subr.bf16.mxu0 %v25134_v10  ;;  %20491 = vmatprep.subr.bf16.mxu1 %v25134_v10 }
0x3175   :  { %20456 = vmatmul.mubr.msk.bf16.vlgmr.msra.gmra.mrb[204].mxu0 %vm819_vm1, %v24335_v31  ;;  %20480 = vmatmul.mubr.msk.bf16.vlgmr.msra.gmra.mrb[216].mxu1 %vm819_vm1, %v24335_v31 }
0x3176   :  { %20468 = vmatpush3.bf16.msra.mxu0 %v24154_v49  ;;  %20471 = vmatprep.mubr.msk.bf16.mxu0 %vm21433_vm0, %v25134_v10 }
0x3177   :  { %20469 = vmatprep.subr.bf16.mxu0 %v25134_v10  ;;  %20493 = vmatprep.mubr.msk.bf16.mxu1 %vm21433_vm0, %v25134_v10 }
0x317a   :  { %20470 = vmatpush3.bf16.msra.mxu0 %v24164_v30 }
0x317b   :  { %20483 = vmatprep.subr.bf16.mxu0 %v25134_v10 }
0x317d   :  { %20472 = vmatmul.mubr.msk.bf16.vlgmr.msra.gmra.mrb[208].mxu0 %vm819_vm1, %v24335_v31 }
0x317e   :  { %20484 = vmatpush3.bf16.msra.mxu0 %v24173_v4  ;;  %20487 = vmatprep.mubr.msk.bf16.mxu0 %vm21433_vm0, %v25134_v10 }
0x317f   :  { %20485 = vmatprep.subr.bf16.mxu0 %v25134_v10 }
0x3182   :  { %20486 = vmatpush3.bf16.msra.mxu0 %v24180_v48 }
0x3183   :  { %20497 = vmatprep.subr.bf16.mxu0 %v25134_v10 }
0x3185   :  { %20488 = vmatmul.mubr.msk.bf16.vlgmr.msra.gmra.mrb[212].mxu0 %vm819_vm1, %v24335_v31 }
0x3186   :  { %20499 = vmatprep.mubr.msk.bf16.mxu0 %vm21433_vm0, %v25134_v10 }
0x3210   :  { %v12827_v5 = vpop.f32.mrb[188].mxu1 }
0x3211   :  { %v20375_v55 = vpop.f32.mrb[189].mxu1  ;;  %v12971_v12 = vsel %vm819_vm1, %v12827_v5, 0.0 }
0x3212   :  { %v12830_v36 = vpop.f32.mrb[190].mxu1 }
0x3213   :  { %v20376_v17 = vpop.f32.mrb[191].mxu1 }
0x3218   :  { %v12919_v26 = vpop.f32.mrb[192].mxu1 }
0x3219   :  { %v20387_v16 = vpop.f32.mrb[193].mxu1  ;;  %v12974_v28 = vsel %vm819_vm1, %v12919_v26, 0.0 }
0x321a   :  { %v12922_v43 = vpop.f32.mrb[194].mxu1 }
0x321b   :  { %v20388_v44 = vpop.f32.mrb[195].mxu1 }
0x3220   :  { %v12873_v33 = vpop.f32.mrb[184].mxu0  ;;  %v13023_v21 = vpop.f32.mrb[196].mxu1 }
0x3221   :  { %v12972_v14 = vsel %vm819_vm1, %v12873_v33, 0.0  ;;  %v20381_v39 = vpop.f32.mrb[185].mxu0  ;;  %v20401_v63 = vpop.f32.mrb[197].mxu1  ;;  %v13024_v35 = vadd.f32 %v24196_v20, %v13023_v21 }
0x3222   :  { %v12973_v56 = vadd.f32 %v12972_v14, %v12971_v12  ;;  %v12876_v59 = vpop.f32.mrb[186].mxu0  ;;  %v13026_v54 = vpop.f32.mrb[198].mxu1 }
0x3223   :  { %v20382_v49 = vpop.f32.mrb[187].mxu0  ;;  %v20402_v30 = vpop.f32.mrb[199].mxu1  ;;  %v13469_v43 = vpack.c.bf16 %v13024_v35, %v13024_v35 }
0x3224   :  { %v12975_v4 = vadd.f32 %v12974_v28, %v12973_v56 }
0x3228   :  { %v12965_v48 = vpop.f32.mrb[188].mxu0  ;;  %v13103_v27 = vpop.f32.mrb[200].mxu1 }
0x3229   :  { %v12976_v52 = vsel %vm819_vm1, %v12965_v48, 0.0  ;;  %v20393_v3 = vpop.f32.mrb[189].mxu0  ;;  %v20417_v38 = vpop.f32.mrb[201].mxu1  ;;  %v13104_v20 = vadd.f32 %v24206_v46, %v13103_v27 }
0x322a   :  { %v24445_v50 = vadd.f32 %v12976_v52, %v12975_v4  ;;  %v12968_v40 = vpop.f32.mrb[190].mxu0  ;;  %v13106_v29 = vpop.f32.mrb[202].mxu1 }
0x322b   :  { %v20394_v23 = vpop.f32.mrb[191].mxu0  ;;  %v20418_v6 = vpop.f32.mrb[203].mxu1  ;;  %v13471_v49 = vpack.c.bf16 %v13104_v20, %v13104_v20 }
0x3230   :  { %v13063_v9 = vpop.f32.mrb[192].mxu0  ;;  %v13183_v51 = vpop.f32.mrb[204].mxu1 }
0x3231   :  { %v13184_v31 = vadd.f32 %v24192_v45, %v13183_v51  ;;  %v20409_v41 = vpop.f32.mrb[193].mxu0  ;;  %v20433_v47 = vpop.f32.mrb[205].mxu1 }
0x3232   :  { %v13066_v2 = vpop.f32.mrb[194].mxu0  ;;  %v13186_v13 = vpop.f32.mrb[206].mxu1 }
0x3233   :  { %v13473_v58 = vpack.c.bf16 %v13184_v31, %v13184_v31  ;;  %v20410_v34 = vpop.f32.mrb[195].mxu0  ;;  %v20434_v15 = vpop.f32.mrb[207].mxu1 }
0x3235   :  { %v13481_v1 = vsel %vm1491_vm2, %v13473_v58, 0 }
0x3236   :  { %20492 = vmatpush3.bf16.xpose.msra.mxu1 %v13481_v1 }
0x3237   :  { %20503 = vmatprep.subr.bf16.mxu1 %v25134_v10 }
0x3238   :  { %v13143_v5 = vpop.f32.mrb[196].mxu0  ;;  %v13263_v55 = vpop.f32.mrb[208].mxu1 }
0x3239   :  { %v13264_v36 = vadd.f32 %v24200_v24, %v13263_v55  ;;  %v20425_v17 = vpop.f32.mrb[197].mxu0  ;;  %v20449_v45 = vpop.f32.mrb[209].mxu1  ;;  %v13144_v47 = vadd.f32 %v24240_v8, %v13143_v5 }
0x323a   :  { %v13146_v26 = vpop.f32.mrb[198].mxu0  ;;  %v13266_v16 = vpop.f32.mrb[210].mxu1 }
0x323b   :  { %v13475_v44 = vpack.c.bf16 %v13264_v36, %v13264_v36  ;;  %v20426_v33 = vpop.f32.mrb[199].mxu0  ;;  %v20450_v12 = vpop.f32.mrb[211].mxu1  ;;  %v13472_v34 = vpack.c.bf16 %v13144_v47, %v13144_v47  ;;  %v25135_v16 = vld [vmem:[#allocation2_spill] sm:$0xff] }
0x323c   :  { %v24495_v47 = vld [vmem:[%s23284_s2 + $0x1] ss:$0 sm:$0xff]  ;;  %s17015_s2 = sld [smem:[%s25125_s0 + %s21468_s3]]  }
0x323d   :  { %v13573_v14 = vsel %vm1491_vm2, %v13475_v44, 0  ;;  %20494 = vmatmul.mubr.msk.bf16.vlgmr.msra.gmra.mrb[220].mxu1 %vm1491_vm2, %v13469_v43 }
0x323e   :  { %20504 = vmatpush3.bf16.xpose.msra.mxu1 %v13573_v14  ;;  %20505 = vmatprep.mubr.msk.bf16.mxu1 %vm21433_vm0, %v25134_v10 }
0x323f   :  { %20515 = vmatprep.subr.bf16.mxu1 %v25134_v10 }
0x3240   :  { %v13223_v24 = vpop.f32.mrb[200].mxu0  ;;  %v13343_v21 = vpop.f32.mrb[212].mxu1 }
0x3241   :  { %v13224_v39 = vadd.f32 %v24211_v60, %v13223_v24  ;;  %v13344_v63 = vadd.f32 %v24214_v25, %v13343_v21  ;;  %v20441_v56 = vpop.f32.mrb[201].mxu0  ;;  %v20465_v59 = vpop.f32.mrb[213].mxu1  ;;  %v13064_v60 = vadd.f32 %v24223_v19, %v13063_v9 }
0x3242   :  { %v13226_v54 = vpop.f32.mrb[202].mxu0  ;;  %v13346_v28 = vpop.f32.mrb[214].mxu1 }
0x3243   :  { %v13474_v30 = vpack.c.bf16 %v13224_v39, %v13224_v39  ;;  %v13717_v4 = vpack.c.bf16 %v13344_v63, %v13344_v63  ;;  %v20442_v48 = vpop.f32.mrb[203].mxu0  ;;  %v20466_v52 = vpop.f32.mrb[215].mxu1  ;;  %v13470_v51 = vpack.c.bf16 %v13064_v60, %v13064_v60 }
0x3245   :  { %v13527_v3 = vsel %vm1491_vm2, %v13474_v30, 0  ;;  %v13725_v46 = vsel %vm1735_vm3, %v13717_v4, 0  ;;  %20506 = vmatmul.mubr.msk.bf16.vlgmr.msra.gmra.mrb[224].mxu1 %vm1491_vm2, %v13471_v49 }
0x3246   :  { %20498 = vmatpush3.bf16.xpose.msra.mxu0 %v13527_v3  ;;  %20516 = vmatpush3.bf16.msra.mxu1 %v13725_v46 }
0x3247   :  { %20509 = vmatprep.subr.bf16.mxu0 %v25134_v10  ;;  %20517 = vmatprep.mubr.msk.bf16.mxu1 %vm21433_vm0, %v25134_v10 }
0x3248   :  { %v13303_v25 = vpop.f32.mrb[204].mxu0  ;;  %v24467_v27 = vpop.f32.mrb[216].mxu1  ;;  %20527 = vmatprep.subr.bf16.mxu1 %v25134_v10 }
0x3249   :  { %v13304_v38 = vadd.f32 %v24229_v62, %v13303_v25  ;;  %v20457_v40 = vpop.f32.mrb[205].mxu0  ;;  %v20481_v29 = vpop.f32.mrb[217].mxu1 }
0x324a   :  { %v13306_v23 = vpop.f32.mrb[206].mxu0  ;;  %v13426_v6 = vpop.f32.mrb[218].mxu1 }
0x324b   :  { %v13476_v31 = vpack.c.bf16 %v13304_v38, %v13304_v38  ;;  %v20458_v41 = vpop.f32.mrb[207].mxu0  ;;  %v20482_v19 = vpop.f32.mrb[219].mxu1 }
0x324d   :  { %v13619_v9 = vsel %vm1491_vm2, %v13476_v31, 0  ;;  %20500 = vmatmul.mubr.msk.bf16.vlgmr.msra.gmra.mrb[216].mxu0 %vm1491_vm2, %v13470_v51 }
0x324e   :  { %20510 = vmatpush3.bf16.xpose.msra.mxu0 %v13619_v9  ;;  %20511 = vmatprep.mubr.msk.bf16.mxu0 %vm21433_vm0, %v25134_v10 }
0x324f   :  { %20521 = vmatprep.subr.bf16.mxu0 %v25134_v10 }
0x3250   :  { %v13383_v62 = vpop.f32.mrb[208].mxu0 }
0x3251   :  { %v13384_v2 = vadd.f32 %v24245_v11, %v13383_v62  ;;  %v20473_v13 = vpop.f32.mrb[209].mxu0 }
0x3252   :  { %v13386_v58 = vpop.f32.mrb[210].mxu0  ;;  %v12984_v13 = vadd.f32 %v24495_v47, %v24445_v50 }
0x3253   :  { %v13718_v15 = vpack.c.bf16 %v13384_v2, %v13384_v2  ;;  %v20474_v1 = vpop.f32.mrb[211].mxu0 }
0x3254   :  { %v14089_v1 = vadd.f32 %v12984_v13, %v24037_v32  ;;  %v13424_v32 = vadd.f32 %v24275_v57, %v24467_v27  ;;  %v24547_v13 = vld [vmem:[%s23319_s9 + $0xc8] sm:$0xff]  }
0x3255   :  { %v13771_v35 = vsel %vm1735_vm3, %v13718_v15, 0  ;;  %20512 = vmatmul.mubr.msk.bf16.vlgmr.msra.gmra.mrb[220].mxu0 %vm1491_vm2, %v13472_v34 }
0x3256   :  { %20522 = vmatpush3.bf16.msra.mxu0 %v13771_v35  ;;  %20523 = vmatprep.mubr.msk.bf16.mxu0 %vm21433_vm0, %v25134_v10 }
0x3257   :  { %20533 = vmatprep.subr.bf16.mxu0 %v25134_v10 }
0x3258   :  { %v24483_v8 = vpop.f32.mrb[212].mxu0 }
0x3259   :  { %v20489_v5 = vpop.f32.mrb[213].mxu0 }
0x325a   :  { %v13466_v55 = vpop.f32.mrb[214].mxu0 }
0x325b   :  { %v20490_v11 = vpop.f32.mrb[215].mxu0  ;;  %v14095_v55 = vsel %vm819_vm1, %v14089_v1, 0.0 }
0x3310   :  { %v13517_v36 = vpop.f32.mrb[220].mxu1 }
0x3311   :  { %v13661_v17 = vmul.f32 0.35355338, %v13517_v36  ;;  %v20495_v45 = vpop.f32.mrb[221].mxu1 }
0x3312   :  { %v13520_v26 = vpop.f32.mrb[222].mxu1 }
0x3313   :  { %v13665_v43 = vadd.f32 %v13661_v17, %v25135_v16  ;;  %v20496_v44 = vpop.f32.mrb[223].mxu1 }
0x3315   :  { %v13669_v33 = vsel %vm1491_vm2, %v13665_v43, -inf }
0x3316   :  { %13670 = vmax.xlane.f32.xlu0 %v13669_v33 }
0x3318   :  { %v13609_v12 = vpop.f32.mrb[224].mxu1 }
0x3319   :  { %v13663_v14 = vmul.f32 0.35355338, %v13609_v12  ;;  %v20507_v20 = vpop.f32.mrb[225].mxu1 }
0x331a   :  { %v13612_v24 = vpop.f32.mrb[226].mxu1 }
0x331b   :  { %v13667_v21 = vadd.f32 %v13663_v14, %v25135_v16  ;;  %v20508_v39 = vpop.f32.mrb[227].mxu1 }
0x331d   :  { %v13675_v63 = vsel %vm1491_vm2, %v13667_v21, -inf }
0x331e   :  { %13676 = vmax.xlane.f32.xlu0 %v13675_v63 }
0x3320   :  { %v13563_v56 = vpop.f32.mrb[216].mxu0 }
0x3321   :  { %v13662_v59 = vmul.f32 0.35355338, %v13563_v56  ;;  %v20501_v54 = vpop.f32.mrb[217].mxu0 }
0x3322   :  { %v13566_v28 = vpop.f32.mrb[218].mxu0 }
0x3323   :  { %v13666_v49 = vadd.f32 %v13662_v59, %v25135_v16  ;;  %v20502_v30 = vpop.f32.mrb[219].mxu0  ;;  %v13464_v59 = vadd.f32 %v24286_v37, %v24483_v8 }
0x3325   :  { %v13672_v4 = vsel %vm1491_vm2, %v13666_v49, -inf }
0x3326   :  { %13673 = vmax.xlane.f32.xlu1 %v13672_v4 }
0x3328   :  { %v13655_v48 = vpop.f32.mrb[220].mxu0 }
0x3329   :  { %v13664_v52 = vmul.f32 0.35355338, %v13655_v48  ;;  %v20513_v3 = vpop.f32.mrb[221].mxu0 }
0x332a   :  { %v13658_v46 = vpop.f32.mrb[222].mxu0 }
0x332b   :  { %v13668_v60 = vadd.f32 %v13664_v52, %v25135_v16  ;;  %v20514_v25 = vpop.f32.mrb[223].mxu0 }
0x332d   :  { %v13678_v38 = vsel %vm1491_vm2, %v13668_v60, -inf }
0x332e   :  { %13679 = vmax.xlane.f32.xlu1 %v13678_v38 }
0x33a3   :  { %v13671_v40 = vpop.xlane.xlu0 %13670 }
0x33a4   :  { %v13681_v29 = vsub.f32 %v13665_v43, %v13671_v40  ;;  %v13719_v43 = vpack.c.bf16 %v13424_v32, %v13424_v32 }
0x33a6   :  { %v13685_v23 = vmul.f32 1.442695, %v13681_v29  ;;  %v13817_v24 = vsel %vm1735_vm3, %v13719_v43, 0  ;;  %v24588_v43 = vld [vmem:[%s23319_s9 + $0xd8] sm:$0xff]  }
0x33a8   :  { %21367 = vpow2.f32 %v13685_v23 }
0x33ab   :  { %v13677_v6 = vpop.xlane.xlu0 %13676 }
0x33ac   :  { %v13683_v51 = vsub.f32 %v13667_v21, %v13677_v6  ;;  %v24535_v6 = vld [vmem:[%s23331_s7 + $0x1] ss:$0 sm:$0xff] }
0x33ae   :  { %v13689_v31 = vmul.f32 1.442695, %v13683_v51 }
0x33b0   :  { %21369 = vpow2.f32 %v13689_v31  ;;  %v24538_v31 = vld [vmem:[%s23319_s9 + $0xc0] sm:$0xff]  }
0x33b2   :  { %v21368_v41 = vpop.eup %21367 }
0x33b3   :  { %v13674_v19 = vpop.xlane.xlu1 %13673  ;;  %v13693_v9 = vsel %vm1491_vm2, %v21368_v41, 0.0 }
0x33b4   :  { %v13682_v62 = vsub.f32 %v13666_v49, %v13674_v19  ;;  %13694 = vadd.xlane.f32.xlu0 %v13693_v9  ;;  %v13720_v49 = vpack.c.bf16 %v13464_v59, %v13464_v59  ;;  %v24670_v59 = vld [vmem:[%s23319_s9 + $0x138] sm:$0xff]  }
0x33b6   :  { %v13687_v2 = vmul.f32 1.442695, %v13682_v62  ;;  %v13863_v48 = vsel %vm1735_vm3, %v13720_v49, 0  ;;  %v24542_v62 = vld [vmem:[%s23336_s16 + $0x1] ss:$0 sm:$0xff]  ;;  %v24694_v49 = vld [vmem:[%s23319_s9 + $0x158] sm:$0xff]  }
0x33b8   :  { %21371 = vpow2.f32 %v13687_v2 }
0x33ba   :  { %v21370_v58 = vpop.eup %21369 }
0x33bb   :  { %v13680_v34 = vpop.xlane.xlu1 %13679  ;;  %v13699_v15 = vsel %vm1491_vm2, %v21370_v58, 0.0 }
0x33bc   :  { %v13684_v35 = vsub.f32 %v13668_v60, %v13680_v34  ;;  %13700 = vadd.xlane.f32.xlu0 %v13699_v15  ;;  %v24557_v15 = vld [vmem:[%s23319_s9 + $0xe0] sm:$0xff]  }
0x33be   :  { %v13691_v5 = vmul.f32 1.442695, %v13684_v35 }
0x33c0   :  { %21373 = vpow2.f32 %v13691_v5  ;;  %14096 = vadd.xlane.f32.xlu0 %v14095_v55 }
0x33c2   :  { %v21372_v11 = vpop.eup %21371 }
0x33c3   :  { %v13696_v36 = vsel %vm1491_vm2, %v21372_v11, 0.0 }
0x33c4   :  { %13697 = vadd.xlane.f32.xlu1 %v13696_v36  ;;  %v24567_v36 = vld [vmem:[%s23319_s9 + $0xe8] sm:$0xff]  }
0x33ca   :  { %v21374_v17 = vpop.eup %21373 }
0x33cb   :  { %v13702_v50 = vsel %vm1491_vm2, %v21374_v17, 0.0 }
0x33cc   :  { %13703 = vadd.xlane.f32.xlu1 %v13702_v50  ;;  %v24580_v50 = vld [vmem:[%s23319_s9 + $0x100] sm:$0xff]  }
0x3441   :  { %v13695_v45 = vpop.xlane.xlu0 %13694 }
0x3442   :  { %21375 = vrcp.f32 %v13695_v45 }
0x3449   :  { %v13701_v26 = vpop.xlane.xlu0 %13700 }
0x344a   :  { %21377 = vrcp.f32 %v13701_v26 }
0x344c   :  { %v21376_v16 = vpop.eup %21375 }
0x344d   :  { %v13709_v44 = vmul.f32 %v21376_v16, %v21368_v41  ;;  %v14097_v33 = vpop.xlane.xlu0 %14096 }
0x344e   :  { %v14101_v12 = vmul.f32 0.03125, %v14097_v33  ;;  %v24602_v33 = vld [vmem:[%s23319_s9 + $0xf0] sm:$0xff]  }
0x344f   :  { %v13713_v14 = vpack.c.bf16 %v13709_v44, %v13709_v44  ;;  %v24591_v44 = vld [vmem:[%s23319_s9 + $0x108] sm:$0xff]  }
0x3450   :  { %v14103_v20 = vsub.f32 %v14089_v1, %v14101_v12  ;;  %v24605_v12 = vld [vmem:[%s23319_s9 + $0x120] sm:$0xff]  }
0x3451   :  { %v13698_v21 = vpop.xlane.xlu1 %13697  ;;  %20518 = vmatmul.mubr.msk.bf16.vlgmr.msra.gmra.mrb[228].mxu1 %vm1491_vm2, %v13713_v14  ;;  %v25136_v14 = vld [vmem:[#allocation3_spill] sm:$0xff] }
0x3452   :  { %21379 = vrcp.f32 %v13698_v21  ;;  %20528 = vmatpush3.bf16.msra.mxu1 %v13817_v24  ;;  %v14105_v39 = vmul.f32 %v14103_v20, %v14103_v20  ;;  %20529 = vmatprep.mubr.msk.bf16.mxu1 %vm21433_vm0, %v25134_v10  ;;  %v24618_v24 = vld [vmem:[%s23319_s9 + $0x128] sm:$0xff]   ;;  %v24629_v21 = vld [vmem:[%s23319_s9 + $0x110] sm:$0xff]  }
0x3453   :  { %20539 = vmatprep.subr.bf16.mxu1 %v25134_v10 }
0x3454   :  { %v21378_v57 = vpop.eup %21377  ;;  %v14107_v27 = vsel %vm819_vm1, %v14105_v39, 0.0  ;;  %v24632_v39 = vld [vmem:[%s23319_s9 + $0x140] sm:$0xff]  }
0x3455   :  { %v13711_v63 = vmul.f32 %v21378_v57, %v21370_v58  ;;  %14108 = vadd.xlane.f32.xlu1 %v14107_v27  ;;  %v24642_v57 = vld [vmem:[%s23319_s9 + $0x118] sm:$0xff]   ;;  %v24645_v27 = vld [vmem:[%s23319_s9 + $0x148] sm:$0xff]  }
0x3457   :  { %v13715_v56 = vpack.c.bf16 %v13711_v63, %v13711_v63  ;;  %v24656_v63 = vld [vmem:[%s23319_s9 + $0x130] sm:$0xff]  }
0x3459   :  { %v13704_v54 = vpop.xlane.xlu1 %13703  ;;  %20530 = vmatmul.mubr.msk.bf16.vlgmr.msra.gmra.mrb[232].mxu1 %vm1491_vm2, %v13715_v56  ;;  %v24659_v56 = vld [vmem:[%s23319_s9 + $0x160] sm:$0xff]  }
0x345a   :  { %21381 = vrcp.f32 %v13704_v54  ;;  %20540 = vmatpush3.bf16.msra.mxu1 %v24303_v0  ;;  %20541 = vmatprep.mubr.msk.bf16.mxu1 %vm21433_vm0, %v25134_v10  ;;  %v24673_v54 = vld [vmem:[%s23319_s9 + $0x168] sm:$0xff]  }
0x345b   :  { %20551 = vmatprep.subr.bf16.mxu1 %v25134_v10 }
0x345c   :  { %v21380_v28 = vpop.eup %21379 }
0x345d   :  { %v13710_v30 = vmul.f32 %v21380_v28, %v21372_v11  ;;  %v24684_v28 = vld [vmem:[%s23319_s9 + $0x150] sm:$0xff]  }
0x345f   :  { %v13714_v4 = vpack.c.bf16 %v13710_v30, %v13710_v30  ;;  %v24703_v30 = vld [vmem:[%s23319_s9 + $0x170] sm:$0xff]  }
0x3461   :  { %20524 = vmatmul.mubr.msk.bf16.vlgmr.msra.gmra.mrb[224].mxu0 %vm1491_vm2, %v13714_v4  ;;  %v24710_v4 = vld [vmem:[%s23319_s9 + $0x178] sm:$0xff]  }
0x3462   :  { %20534 = vmatpush3.bf16.msra.mxu0 %v13863_v48  ;;  %20535 = vmatprep.mubr.msk.bf16.mxu0 %vm21433_vm0, %v25134_v10 }
0x3463   :  { %20545 = vmatprep.subr.bf16.mxu0 %v25134_v10 }
0x3464   :  { %v21382_v37 = vpop.eup %21381 }
0x3465   :  { %v13712_v0 = vmul.f32 %v21382_v37, %v21374_v17 }
0x3467   :  { %v13716_v8 = vpack.c.bf16 %v13712_v0, %v13712_v0 }
0x3469   :  { %20536 = vmatmul.mubr.msk.bf16.vlgmr.msra.gmra.mrb[228].mxu0 %vm1491_vm2, %v13716_v8 }
0x346a   :  { %20546 = vmatpush3.bf16.msra.mxu0 %v24309_v18  ;;  %20547 = vmatprep.mubr.msk.bf16.mxu0 %vm21433_vm0, %v25134_v10 }
0x346b   :  { %20557 = vmatprep.subr.bf16.mxu0 %v25134_v10 }
0x34e2   :  { %v14109_v52 = vpop.xlane.xlu1 %14108 }
0x34e3   :  { %v14113_v3 = vmul.f32 0.03125, %v14109_v52 }
0x34e5   :  { %v14115_v46 = vadd.f32 1e-05, %v14113_v3 }
0x34e7   :  { %21383 = vrsqrt.f32 %v14115_v46 }
0x34f1   :  { %v21384_v40 = vpop.eup %21383 }
0x34f2   :  { %v14119_v18 = vmul.f32 %v21384_v40, %v14103_v20  ;;  %v24615_v20 = vld [vmem:[%s23319_s9 + $0xf8] sm:$0xff]  }
0x34f4   :  { %v14127_v41 = vmul.f32 %v24535_v6, %v14119_v18 }
0x34f6   :  { %v24552_v58 = vadd.f32 %v24542_v62, %v14127_v41 }
0x34f8   :  { %v14210_v1 = vpack.c.bf16 %v24552_v58, %v24552_v58 }
0x3524   :  { %v13761_v60 = vpop.f32.mrb[228].mxu1 }
0x3525   :  { %v13905_v25 = vpack.c.bf16 %v13761_v60, %v13761_v60  ;;  %v20519_v38 = vpop.f32.mrb[229].mxu1 }
0x3526   :  { %v13764_v29 = vpop.f32.mrb[230].mxu1 }
0x3527   :  { %v20520_v23 = vpop.f32.mrb[231].mxu1  ;;  %20542 = vmatmul.mubr.msk.bf16.vlgmr.msra.gmra.mrb[236].mxu1 %vm1491_vm2, %v13905_v25 }
0x3528   :  { %20552 = vmatpush3.bf16.msra.mxu1 %v24315_v53  ;;  %20553 = vmatprep.mubr.msk.bf16.mxu1 %vm21433_vm0, %v25134_v10 }
0x3529   :  { %20563 = vmatprep.subr.bf16.mxu1 %v25134_v10 }
0x352c   :  { %v13853_v51 = vpop.f32.mrb[232].mxu1 }
0x352d   :  { %v13907_v19 = vpack.c.bf16 %v13853_v51, %v13853_v51  ;;  %v20531_v9 = vpop.f32.mrb[233].mxu1 }
0x352e   :  { %v13856_v2 = vpop.f32.mrb[234].mxu1 }
0x352f   :  { %v20532_v53 = vpop.f32.mrb[235].mxu1  ;;  %20554 = vmatmul.mubr.msk.bf16.vlgmr.msra.gmra.mrb[240].mxu1 %vm1491_vm2, %v13907_v19 }
0x3530   :  { %20564 = vmatpush3.bf16.msra.mxu1 %v24538_v31  ;;  %20567 = vmatprep.mubr.msk.bf16.mxu1 %vm21433_vm0, %v25134_v10 }
0x3531   :  { %20565 = vmatprep.subr.bf16.mxu1 %v25134_v10 }
0x3534   :  { %v13807_v34 = vpop.f32.mrb[224].mxu0  ;;  %20566 = vmatpush3.bf16.msra.mxu1 %v24547_v13 }
0x3535   :  { %v13906_v35 = vpack.c.bf16 %v13807_v34, %v13807_v34  ;;  %v20525_v5 = vpop.f32.mrb[225].mxu0  ;;  %20579 = vmatprep.subr.bf16.mxu1 %v25134_v10 }
0x3536   :  { %v13810_v55 = vpop.f32.mrb[226].mxu0 }
0x3537   :  { %v20526_v11 = vpop.f32.mrb[227].mxu0  ;;  %20548 = vmatmul.mubr.msk.bf16.vlgmr.msra.gmra.mrb[232].mxu0 %vm1491_vm2, %v13906_v35  ;;  %20568 = vmatmul.mubr.msk.bf16.vlgmr.msra.gmra.mrb[244].mxu1 %vm819_vm1, %v14210_v1 }
0x3538   :  { %20558 = vmatpush3.bf16.msra.mxu0 %v24339_v42  ;;  %20580 = vmatpush3.bf16.msra.mxu1 %v24557_v15  ;;  %v24577_v42 = vld [vmem:[%s23319_s9 + $0xd0] sm:$0xff]   ;;  %s21469_s9 = smov 37  }
0x3539   :  { %20581 = vmatprep.subr.bf16.mxu1 %v25134_v10  ;;  %20559 = vmatprep.mubr.msk.bf16.mxu0 %vm21433_vm0, %v25134_v10 }
0x353a   :  { %20583 = vmatprep.mubr.msk.bf16.mxu1 %vm21433_vm0, %v25134_v10  ;;  %20571 = vmatprep.subr.bf16.mxu0 %v25134_v10 }
0x353c   :  { %v13899_v17 = vpop.f32.mrb[228].mxu0  ;;  %20582 = vmatpush3.bf16.msra.mxu1 %v24567_v36 }
0x353d   :  { %v13908_v45 = vpack.c.bf16 %v13899_v17, %v13899_v17  ;;  %v20537_v32 = vpop.f32.mrb[229].mxu0  ;;  %20595 = vmatprep.subr.bf16.mxu1 %v25134_v10 }
0x353e   :  { %v13902_v26 = vpop.f32.mrb[230].mxu0 }
0x353f   :  { %v20538_v16 = vpop.f32.mrb[231].mxu0  ;;  %20560 = vmatmul.mubr.msk.bf16.vlgmr.msra.gmra.mrb[236].mxu0 %vm1491_vm2, %v13908_v45  ;;  %20584 = vmatmul.mubr.msk.bf16.vlgmr.msra.gmra.mrb[248].mxu1 %vm819_vm1, %v14210_v1 }
0x3540   :  { %20572 = vmatpush3.bf16.msra.mxu0 %v24577_v42  ;;  %20596 = vmatpush3.bf16.msra.mxu1 %v24580_v50 }
0x3541   :  { %20573 = vmatprep.subr.bf16.mxu0 %v25134_v10  ;;  %20597 = vmatprep.subr.bf16.mxu1 %v25134_v10 }
0x3542   :  { %20575 = vmatprep.mubr.msk.bf16.mxu0 %vm21433_vm0, %v25134_v10  ;;  %20599 = vmatprep.mubr.msk.bf16.mxu1 %vm21433_vm0, %v25134_v10 }
0x3544   :  { %20574 = vmatpush3.bf16.msra.mxu0 %v24588_v43  ;;  %20598 = vmatpush3.bf16.msra.mxu1 %v24591_v44 }
0x3545   :  { %20587 = vmatprep.subr.bf16.mxu0 %v25134_v10  ;;  %20611 = vmatprep.subr.bf16.mxu1 %v25134_v10 }
0x3547   :  { %20576 = vmatmul.mubr.msk.bf16.vlgmr.msra.gmra.mrb[240].mxu0 %vm819_vm1, %v14210_v1  ;;  %20600 = vmatmul.mubr.msk.bf16.vlgmr.msra.gmra.mrb[252].mxu1 %vm819_vm1, %v25136_v14 }
0x3548   :  { %20588 = vmatpush3.bf16.msra.mxu0 %v24602_v33  ;;  %20612 = vmatpush3.bf16.msra.mxu1 %v24605_v12 }
0x3549   :  { %20589 = vmatprep.subr.bf16.mxu0 %v25134_v10  ;;  %20613 = vmatprep.subr.bf16.mxu1 %v25134_v10 }
0x354a   :  { %20591 = vmatprep.mubr.msk.bf16.mxu0 %vm21433_vm0, %v25134_v10  ;;  %20615 = vmatprep.mubr.msk.bf16.mxu1 %vm21433_vm0, %v25134_v10 }
0x354c   :  { %20590 = vmatpush3.bf16.msra.mxu0 %v24615_v20  ;;  %20614 = vmatpush3.bf16.msra.mxu1 %v24618_v24 }
0x354d   :  { %20603 = vmatprep.subr.bf16.mxu0 %v25134_v10  ;;  %20627 = vmatprep.subr.bf16.mxu1 %v25134_v10 }
0x354f   :  { %20592 = vmatmul.mubr.msk.bf16.vlgmr.msra.gmra.mrb[244].mxu0 %vm819_vm1, %v14210_v1  ;;  %20616 = vmatmul.mubr.msk.bf16.vlgmr.msra.gmra.mrb[0].mxu1 %vm819_vm1, %v25136_v14 }
0x3550   :  { %20604 = vmatpush3.bf16.msra.mxu0 %v24629_v21  ;;  %20628 = vmatpush3.bf16.msra.mxu1 %v24632_v39 }
0x3551   :  { %20605 = vmatprep.subr.bf16.mxu0 %v25134_v10  ;;  %20629 = vmatprep.subr.bf16.mxu1 %v25134_v10 }
0x3552   :  { %20607 = vmatprep.mubr.msk.bf16.mxu0 %vm21433_vm0, %v25134_v10  ;;  %20631 = vmatprep.mubr.msk.bf16.mxu1 %vm21433_vm0, %v25134_v10 }
0x3554   :  { %20606 = vmatpush3.bf16.msra.mxu0 %v24642_v57  ;;  %20630 = vmatpush3.bf16.msra.mxu1 %v24645_v27 }
0x3555   :  { %20619 = vmatprep.subr.bf16.mxu0 %v25134_v10  ;;  %20643 = vmatprep.subr.bf16.mxu1 %v25134_v10 }
0x3557   :  { %20608 = vmatmul.mubr.msk.bf16.vlgmr.msra.gmra.mrb[248].mxu0 %vm819_vm1, %v25136_v14  ;;  %20632 = vmatmul.mubr.msk.bf16.vlgmr.msra.gmra.mrb[4].mxu1 %vm819_vm1, %v25136_v14 }
0x3558   :  { %20620 = vmatpush3.bf16.msra.mxu0 %v24656_v63  ;;  %20644 = vmatpush3.bf16.msra.mxu1 %v24659_v56 }
0x3559   :  { %20621 = vmatprep.subr.bf16.mxu0 %v25134_v10  ;;  %20645 = vmatprep.subr.bf16.mxu1 %v25134_v10 }
0x355a   :  { %20623 = vmatprep.mubr.msk.bf16.mxu0 %vm21433_vm0, %v25134_v10  ;;  %20647 = vmatprep.mubr.msk.bf16.mxu1 %vm21433_vm0, %v25134_v10 }
0x355c   :  { %20622 = vmatpush3.bf16.msra.mxu0 %v24670_v59  ;;  %20646 = vmatpush3.bf16.msra.mxu1 %v24673_v54 }
0x355d   :  { %20635 = vmatprep.subr.bf16.mxu0 %v25134_v10  ;;  %20659 = vmatprep.subr.bf16.mxu1 %v25134_v10 }
0x355f   :  { %20624 = vmatmul.mubr.msk.bf16.vlgmr.msra.gmra.mrb[252].mxu0 %vm819_vm1, %v25136_v14  ;;  %20648 = vmatmul.mubr.msk.bf16.vlgmr.msra.gmra.mrb[8].mxu1 %vm819_vm1, %v25136_v14 }
0x3560   :  { %20636 = vmatpush3.bf16.msra.mxu0 %v24684_v28  ;;  %20639 = vmatprep.mubr.msk.bf16.mxu0 %vm21433_vm0, %v25134_v10 }
0x3561   :  { %20637 = vmatprep.subr.bf16.mxu0 %v25134_v10  ;;  %20661 = vmatprep.mubr.msk.bf16.mxu1 %vm21433_vm0, %v25134_v10 }
0x3564   :  { %20638 = vmatpush3.bf16.msra.mxu0 %v24694_v49 }
0x3565   :  { %20651 = vmatprep.subr.bf16.mxu0 %v25134_v10 }
0x3567   :  { %20640 = vmatmul.mubr.msk.bf16.vlgmr.msra.gmra.mrb[0].mxu0 %vm819_vm1, %v25136_v14 }
0x3568   :  { %20652 = vmatpush3.bf16.msra.mxu0 %v24703_v30  ;;  %20655 = vmatprep.mubr.msk.bf16.mxu0 %vm21433_vm0, %v25134_v10 }
0x3569   :  { %20653 = vmatprep.subr.bf16.mxu0 %v25134_v10 }
0x356c   :  { %20654 = vmatpush3.bf16.msra.mxu0 %v24710_v4 }
0x356d   :  { %20665 = vmatprep.subr.bf16.mxu0 %v25134_v10 }
0x356f   :  { %20656 = vmatmul.mubr.msk.bf16.vlgmr.msra.gmra.mrb[4].mxu0 %vm819_vm1, %v25136_v14  ;;  %v24728_v14 = vld [vmem:[%s23536_s19 + $0x10] ss:$0 sm:$0xff] }
0x3570   :  { %20667 = vmatprep.mubr.msk.bf16.mxu0 %vm21433_vm0, %v25134_v10 }
0x35fa   :  { %v13946_v48 = vpop.f32.mrb[236].mxu1 }
0x35fb   :  { %v20543_v37 = vpop.f32.mrb[237].mxu1  ;;  %v14081_v40 = vsel %vm819_vm1, %v13946_v48, 0.0 }
0x35fc   :  { %v13949_v0 = vpop.f32.mrb[238].mxu1 }
0x35fd   :  { %v20544_v8 = vpop.f32.mrb[239].mxu1 }
0x3602   :  { %v14032_v52 = vpop.f32.mrb[240].mxu1 }
0x3603   :  { %v20555_v3 = vpop.f32.mrb[241].mxu1  ;;  %v14084_v9 = vsel %vm819_vm1, %v14032_v52, 0.0 }
0x3604   :  { %v14035_v46 = vpop.f32.mrb[242].mxu1 }
0x3605   :  { %v20556_v60 = vpop.f32.mrb[243].mxu1 }
0x360a   :  { %v13989_v25 = vpop.f32.mrb[232].mxu0  ;;  %v14284_v38 = vpop.f32.mrb[244].mxu1 }
0x360b   :  { %v14082_v29 = vsel %vm819_vm1, %v13989_v25, 0.0  ;;  %v20549_v23 = vpop.f32.mrb[233].mxu0  ;;  %v20569_v18 = vpop.f32.mrb[245].mxu1 }
0x360c   :  { %v14083_v51 = vadd.f32 %v14082_v29, %v14081_v40  ;;  %v13992_v41 = vpop.f32.mrb[234].mxu0  ;;  %v14287_v19 = vpop.f32.mrb[246].mxu1  ;;  %v24732_v29 = vld [vmem:[%s23536_s19 + $0xc] ss:$0 sm:$0xff]  ;;  %v24736_v18 = vld [vmem:[%s23536_s19 + $0x12] ss:$0 sm:$0xff] }
0x360d   :  { %v20550_v2 = vpop.f32.mrb[235].mxu0  ;;  %v20570_v53 = vpop.f32.mrb[247].mxu1 }
0x360e   :  { %v14085_v34 = vadd.f32 %v14084_v9, %v14083_v51  ;;  %v14285_v51 = vadd.f32 %v24732_v29, %v14284_v38 }
0x3612   :  { %v14075_v1 = vpop.f32.mrb[236].mxu0  ;;  %v14388_v35 = vpop.f32.mrb[248].mxu1 }
0x3613   :  { %v14086_v5 = vsel %vm819_vm1, %v14075_v1, 0.0  ;;  %v20561_v55 = vpop.f32.mrb[237].mxu0  ;;  %v20585_v11 = vpop.f32.mrb[249].mxu1 }
0x3614   :  { %v24725_v17 = vadd.f32 %v14086_v5, %v14085_v34  ;;  %v14078_v45 = vpop.f32.mrb[238].mxu0  ;;  %v14391_v32 = vpop.f32.mrb[250].mxu1  ;;  %v14910_v5 = vpack.c.bf16 %v14285_v51, %v14285_v51 }
0x3615   :  { %v20562_v26 = vpop.f32.mrb[239].mxu0  ;;  %v20586_v16 = vpop.f32.mrb[251].mxu1  ;;  %v24742_v32 = vld [vmem:[%s23536_s19 + $0xe] ss:$0 sm:$0xff] }
0x3616   :  { %v24747_v26 = vld [vmem:[%s23536_s19 + $0x11] ss:$0 sm:$0xff]  ;;  %v24750_v16 = vld [vmem:[%s23536_s19 + $0x14] ss:$0 sm:$0xff] }
0x361a   :  { %v14336_v48 = vpop.f32.mrb[240].mxu0  ;;  %v14516_v37 = vpop.f32.mrb[252].mxu1 }
0x361b   :  { %v14517_v0 = vadd.f32 %v24728_v14, %v14516_v37  ;;  %v20577_v8 = vpop.f32.mrb[241].mxu0  ;;  %v20601_v52 = vpop.f32.mrb[253].mxu1  ;;  %v14389_v37 = vadd.f32 %v24742_v32, %v14388_v35 }
0x361c   :  { %v14339_v3 = vpop.f32.mrb[242].mxu0  ;;  %v14519_v46 = vpop.f32.mrb[254].mxu1 }
0x361d   :  { %v14914_v60 = vpack.c.bf16 %v14517_v0, %v14517_v0  ;;  %v20578_v25 = vpop.f32.mrb[243].mxu0  ;;  %v20602_v40 = vpop.f32.mrb[255].mxu1 }
0x361f   :  { %v14922_v23 = vsel %vm1491_vm2, %v14914_v60, 0 }
0x3620   :  { %20660 = vmatpush3.bf16.xpose.msra.mxu1 %v14922_v23  ;;  %v14912_v23 = vpack.c.bf16 %v14389_v37, %v14389_v37 }
0x3621   :  { %20671 = vmatprep.subr.bf16.mxu1 %v25134_v10 }
0x3622   :  { %v14440_v41 = vpop.f32.mrb[244].mxu0  ;;  %v14620_v19 = vpop.f32.mrb[0].mxu1 }
0x3623   :  { %v14621_v9 = vadd.f32 %v24736_v18, %v14620_v19  ;;  %v20593_v2 = vpop.f32.mrb[245].mxu0  ;;  %v20617_v53 = vpop.f32.mrb[1].mxu1 }
0x3624   :  { %v14443_v34 = vpop.f32.mrb[246].mxu0  ;;  %v14623_v1 = vpop.f32.mrb[2].mxu1  ;;  %v24759_v53 = vld [vmem:[%s23536_s19 + $0xd] ss:$0 sm:$0xff] }
0x3625   :  { %v14916_v55 = vpack.c.bf16 %v14621_v9, %v14621_v9  ;;  %v20594_v11 = vpop.f32.mrb[247].mxu0  ;;  %v20618_v45 = vpop.f32.mrb[3].mxu1  ;;  %v24765_v1 = vld [vmem:[%s23536_s19 + $0x13] ss:$0 sm:$0xff] }
0x3627   :  { %v15014_v38 = vsel %vm1491_vm2, %v14916_v55, 0  ;;  %20662 = vmatmul.mubr.msk.bf16.vlgmr.msra.gmra.mrb[12].mxu1 %vm1491_vm2, %v14910_v5  ;;  %v14337_v5 = vadd.f32 %v24759_v53, %v14336_v48 }
0x3628   :  { %20672 = vmatpush3.bf16.xpose.msra.mxu1 %v15014_v38  ;;  %20673 = vmatprep.mubr.msk.bf16.mxu1 %vm21433_vm0, %v25134_v10 }
0x3629   :  { %20683 = vmatprep.subr.bf16.mxu1 %v25134_v10 }
0x362a   :  { %v14568_v0 = vpop.f32.mrb[248].mxu0  ;;  %v14748_v8 = vpop.f32.mrb[4].mxu1 }
0x362b   :  { %v14569_v52 = vadd.f32 %v24747_v26, %v14568_v0  ;;  %v14749_v3 = vadd.f32 %v24750_v16, %v14748_v8  ;;  %v20609_v46 = vpop.f32.mrb[249].mxu0  ;;  %v20633_v60 = vpop.f32.mrb[5].mxu1 }
0x362c   :  { %v14571_v25 = vpop.f32.mrb[250].mxu0  ;;  %v14751_v40 = vpop.f32.mrb[6].mxu1  ;;  %v24776_v60 = vld [vmem:[%s23536_s19 + $0xf] ss:$0 sm:$0xff] }
0x362d   :  { %v14915_v51 = vpack.c.bf16 %v14569_v52, %v14569_v52  ;;  %v15158_v19 = vpack.c.bf16 %v14749_v3, %v14749_v3  ;;  %v20610_v9 = vpop.f32.mrb[251].mxu0  ;;  %v20634_v2 = vpop.f32.mrb[7].mxu1  ;;  %v14911_v52 = vpack.c.bf16 %v14337_v5, %v14337_v5  ;;  %v24781_v40 = vld [vmem:[%s23536_s19 + $0x15] ss:$0 sm:$0xff] }
0x362f   :  { %v14968_v35 = vsel %vm1491_vm2, %v14915_v51, 0  ;;  %v15166_v34 = vsel %vm1735_vm3, %v15158_v19, 0  ;;  %20674 = vmatmul.mubr.msk.bf16.vlgmr.msra.gmra.mrb[16].mxu1 %vm1491_vm2, %v14912_v23  ;;  %v14441_v23 = vadd.f32 %v24776_v60, %v14440_v41 }
0x3630   :  { %20666 = vmatpush3.bf16.xpose.msra.mxu0 %v14968_v35  ;;  %20684 = vmatpush3.bf16.msra.mxu1 %v15166_v34 }
0x3631   :  { %20677 = vmatprep.subr.bf16.mxu0 %v25134_v10  ;;  %20685 = vmatprep.mubr.msk.bf16.mxu1 %vm21433_vm0, %v25134_v10  ;;  %v14913_v35 = vpack.c.bf16 %v14441_v23, %v14441_v23 }
0x3632   :  { %v14672_v55 = vpop.f32.mrb[252].mxu0  ;;  %v24771_v11 = vpop.f32.mrb[8].mxu1  ;;  %20695 = vmatprep.subr.bf16.mxu1 %v25134_v10 }
0x3633   :  { %v14673_v45 = vadd.f32 %v24765_v1, %v14672_v55  ;;  %v20625_v38 = vpop.f32.mrb[253].mxu0  ;;  %v20649_v37 = vpop.f32.mrb[9].mxu1 }
0x3634   :  { %v14675_v0 = vpop.f32.mrb[254].mxu0  ;;  %v14855_v8 = vpop.f32.mrb[10].mxu1 }
0x3635   :  { %v14917_v3 = vpack.c.bf16 %v14673_v45, %v14673_v45  ;;  %v20626_v48 = vpop.f32.mrb[255].mxu0  ;;  %v20650_v46 = vpop.f32.mrb[11].mxu1 }
0x3637   :  { %v15060_v25 = vsel %vm1491_vm2, %v14917_v3, 0  ;;  %20668 = vmatmul.mubr.msk.bf16.vlgmr.msra.gmra.mrb[8].mxu0 %vm1491_vm2, %v14911_v52 }
0x3638   :  { %20678 = vmatpush3.bf16.xpose.msra.mxu0 %v15060_v25  ;;  %20679 = vmatprep.mubr.msk.bf16.mxu0 %vm21433_vm0, %v25134_v10 }
0x3639   :  { %20689 = vmatprep.subr.bf16.mxu0 %v25134_v10 }
0x363a   :  { %v14800_v51 = vpop.f32.mrb[0].mxu0 }
0x363b   :  { %v14801_v19 = vadd.f32 %v24781_v40, %v14800_v51  ;;  %v20641_v9 = vpop.f32.mrb[1].mxu0 }
0x363c   :  { %v14803_v2 = vpop.f32.mrb[2].mxu0 }
0x363d   :  { %v15159_v34 = vpack.c.bf16 %v14801_v19, %v14801_v19  ;;  %v20642_v5 = vpop.f32.mrb[3].mxu0 }
0x363f   :  { %v15212_v55 = vsel %vm1735_vm3, %v15159_v34, 0  ;;  %20680 = vmatmul.mubr.msk.bf16.vlgmr.msra.gmra.mrb[12].mxu0 %vm1491_vm2, %v14913_v35 }
0x3640   :  { %20690 = vmatpush3.bf16.msra.mxu0 %v15212_v55  ;;  %20691 = vmatprep.mubr.msk.bf16.mxu0 %vm21433_vm0, %v25134_v10 }
0x3641   :  { %20701 = vmatprep.subr.bf16.mxu0 %v25134_v10 }
0x3642   :  { %v24793_v41 = vpop.f32.mrb[4].mxu0 }
0x3643   :  { %v20657_v45 = vpop.f32.mrb[5].mxu0 }
0x3644   :  { %v14907_v38 = vpop.f32.mrb[6].mxu0 }
0x3645   :  { %v20658_v37 = vpop.f32.mrb[7].mxu0 }
0x36fa   :  { %v14958_v0 = vpop.f32.mrb[12].mxu1 }
0x36fb   :  { %v15102_v8 = vmul.f32 0.35355338, %v14958_v0  ;;  %v20663_v52 = vpop.f32.mrb[13].mxu1 }
0x36fc   :  { %v14961_v3 = vpop.f32.mrb[14].mxu1 }
0x36fd   :  { %v15106_v48 = vadd.f32 %v15102_v8, %v22991_v7  ;;  %v20664_v46 = vpop.f32.mrb[15].mxu1 }
0x36ff   :  { %v15110_v25 = vsel %vm1491_vm2, %v15106_v48, -inf }
0x3700   :  { %15111 = vmax.xlane.f32.xlu0 %v15110_v25 }
0x3702   :  { %v15050_v23 = vpop.f32.mrb[16].mxu1 }
0x3703   :  { %v15104_v51 = vmul.f32 0.35355338, %v15050_v23  ;;  %v20675_v19 = vpop.f32.mrb[17].mxu1 }
0x3704   :  { %v15053_v9 = vpop.f32.mrb[18].mxu1 }
0x3705   :  { %v15108_v2 = vadd.f32 %v15104_v51, %v22991_v7  ;;  %v20676_v35 = vpop.f32.mrb[19].mxu1 }
0x3707   :  { %v15116_v34 = vsel %vm1491_vm2, %v15108_v2, -inf }
0x3708   :  { %15117 = vmax.xlane.f32.xlu0 %v15116_v34 }
0x370a   :  { %v15004_v5 = vpop.f32.mrb[8].mxu0 }
0x370b   :  { %v15103_v55 = vmul.f32 0.35355338, %v15004_v5  ;;  %v20669_v45 = vpop.f32.mrb[9].mxu0 }
0x370c   :  { %v15007_v38 = vpop.f32.mrb[10].mxu0 }
0x370d   :  { %v15107_v37 = vadd.f32 %v15103_v55, %v22991_v7  ;;  %v20670_v0 = vpop.f32.mrb[11].mxu0 }
0x370f   :  { %v15113_v8 = vsel %vm1491_vm2, %v15107_v37, -inf }
0x3710   :  { %15114 = vmax.xlane.f32.xlu1 %v15113_v8 }
0x3712   :  { %v15096_v52 = vpop.f32.mrb[12].mxu0 }
0x3713   :  { %v15105_v3 = vmul.f32 0.35355338, %v15096_v52  ;;  %v20681_v46 = vpop.f32.mrb[13].mxu0 }
0x3714   :  { %v15099_v25 = vpop.f32.mrb[14].mxu0 }
0x3715   :  { %v15109_v23 = vadd.f32 %v15105_v3, %v22991_v7  ;;  %v20682_v51 = vpop.f32.mrb[15].mxu0  ;;  %v14088_v3 = vadd.f32 %v24495_v47, %v24725_v17 }
0x3717   :  { %v15119_v19 = vsel %vm1491_vm2, %v15109_v23, -inf }
0x3718   :  { %15120 = vmax.xlane.f32.xlu1 %v15119_v19 }
0x378d   :  { %v15112_v9 = vpop.xlane.xlu0 %15111 }
0x378e   :  { %v15122_v35 = vsub.f32 %v15106_v48, %v15112_v9 }
0x3790   :  { %v15126_v34 = vmul.f32 1.442695, %v15122_v35 }
0x3792   :  { %21385 = vpow2.f32 %v15126_v34 }
0x3795   :  { %v15118_v5 = vpop.xlane.xlu0 %15117 }
0x3796   :  { %v15124_v55 = vsub.f32 %v15108_v2, %v15118_v5  ;;  %v14090_v2 = vadd.f32 %v14088_v3, %v24328_v61 }
0x3798   :  { %v15130_v45 = vmul.f32 1.442695, %v15124_v55  ;;  %v14098_v35 = vsel %vm819_vm1, %v14090_v2, 0.0  ;;  %v24812_v55 = vld [vmem:[%s23536_s19 + $0x16] ss:$0 sm:$0xff] }
0x3799   :  { %v14853_v61 = vadd.f32 %v24812_v55, %v24771_v11 }
0x379a   :  { %21387 = vpow2.f32 %v15130_v45 }
0x379c   :  { %v21386_v38 = vpop.eup %21385 }
0x379d   :  { %v15115_v0 = vpop.xlane.xlu1 %15114  ;;  %v15134_v8 = vsel %vm1491_vm2, %v21386_v38, 0.0 }
0x379e   :  { %v15123_v52 = vsub.f32 %v15107_v37, %v15115_v0  ;;  %15135 = vadd.xlane.f32.xlu0 %v15134_v8  ;;  %v15160_v0 = vpack.c.bf16 %v14853_v61, %v14853_v61 }
0x37a0   :  { %v15128_v46 = vmul.f32 1.442695, %v15123_v52 }
0x37a2   :  { %21389 = vpow2.f32 %v15128_v46 }
0x37a4   :  { %v21388_v25 = vpop.eup %21387 }
0x37a5   :  { %v15121_v51 = vpop.xlane.xlu1 %15120  ;;  %v15140_v48 = vsel %vm1491_vm2, %v21388_v25, 0.0 }
0x37a6   :  { %v15125_v19 = vsub.f32 %v15109_v23, %v15121_v51  ;;  %15141 = vadd.xlane.f32.xlu0 %v15140_v48  ;;  %v15258_v48 = vsel %vm1735_vm3, %v15160_v0, 0 }
0x37a8   :  { %v15132_v9 = vmul.f32 1.442695, %v15125_v19 }
0x37aa   :  { %21391 = vpow2.f32 %v15132_v9  ;;  %14099 = vadd.xlane.f32.xlu0 %v14098_v35 }
0x37ac   :  { %v21390_v37 = vpop.eup %21389 }
0x37ad   :  { %v15137_v34 = vsel %vm1491_vm2, %v21390_v37, 0.0 }
0x37ae   :  { %15138 = vadd.xlane.f32.xlu1 %v15137_v34  ;;  %v24823_v34 = vld [vmem:[%s23536_s19 + $0x17] ss:$0 sm:$0xff]  ;;  %s17016_s19 = sld [smem:[%s25125_s0 + %s21469_s9]]  }
0x37b4   :  { %v21392_v47 = vpop.eup %21391 }
0x37b5   :  { %v15143_v17 = vsel %vm1491_vm2, %v21392_v47, 0.0 }
0x37b6   :  { %15144 = vadd.xlane.f32.xlu1 %v15143_v17  ;;  %v14905_v17 = vadd.f32 %v24823_v34, %v24793_v41 }
0x382b   :  { %v15136_v5 = vpop.xlane.xlu0 %15135 }
0x382c   :  { %21393 = vrcp.f32 %v15136_v5 }
0x3833   :  { %v15142_v23 = vpop.xlane.xlu0 %15141 }
0x3834   :  { %21395 = vrcp.f32 %v15142_v23  ;;  %v15161_v23 = vpack.c.bf16 %v14905_v17, %v14905_v17 }
0x3836   :  { %v21394_v45 = vpop.eup %21393  ;;  %v15304_v0 = vsel %vm1735_vm3, %v15161_v23, 0 }
0x3837   :  { %v15150_v8 = vmul.f32 %v21394_v45, %v21386_v38  ;;  %v14100_v52 = vpop.xlane.xlu0 %14099 }
0x3838   :  { %v14102_v46 = vmul.f32 0.03125, %v14100_v52 }
0x3839   :  { %v15154_v3 = vpack.c.bf16 %v15150_v8, %v15150_v8 }
0x383a   :  { %v14104_v51 = vsub.f32 %v14090_v2, %v14102_v46 }
0x383b   :  { %v15139_v19 = vpop.xlane.xlu1 %15138  ;;  %20686 = vmatmul.mubr.msk.bf16.vlgmr.msra.gmra.mrb[20].mxu1 %vm1491_vm2, %v15154_v3  ;;  %v17877_v3 = vld [vmem:[%s23668_s22 + $0x14] sm:$0xf] }
0x383c   :  { %21397 = vrcp.f32 %v15139_v19  ;;  %20696 = vmatpush3.bf16.msra.mxu1 %v15258_v48  ;;  %v14106_v9 = vmul.f32 %v14104_v51, %v14104_v51  ;;  %20697 = vmatprep.mubr.msk.bf16.mxu1 %vm21433_vm0, %v25134_v10  ;;  %v24846_v48 = vsel %vm1735_vm3, %v17877_v3, 0 }
0x383d   :  { %20707 = vmatprep.subr.bf16.mxu1 %v25134_v10 }
0x383e   :  { %v21396_v11 = vpop.eup %21395  ;;  %v14110_v38 = vsel %vm819_vm1, %v14106_v9, 0.0 }
0x383f   :  { %v15152_v35 = vmul.f32 %v21396_v11, %v21388_v25  ;;  %14111 = vadd.xlane.f32.xlu1 %v14110_v38  ;;  %v17878_v11 = vld [vmem:[%s23668_s22 + $0x18] sm:$0xf] }
0x3840   :  { %v24852_v17 = vsel %vm1735_vm3, %v17878_v11, 0 }
0x3841   :  { %v15156_v2 = vpack.c.bf16 %v15152_v35, %v15152_v35 }
0x3843   :  { %v15145_v5 = vpop.xlane.xlu1 %15144  ;;  %20698 = vmatmul.mubr.msk.bf16.vlgmr.msra.gmra.mrb[24].mxu1 %vm1491_vm2, %v15156_v2 }
0x3844   :  { %21399 = vrcp.f32 %v15145_v5  ;;  %20709 = vmatprep.mubr.msk.bf16.mxu1 %vm21433_vm0, %v25134_v10 }
0x3846   :  { %v21398_v61 = vpop.eup %21397 }
0x3847   :  { %v15151_v45 = vmul.f32 %v21398_v61, %v21390_v37  ;;  %v17876_v37 = vld [vmem:[%s23668_s22 + $0x10] sm:$0xf] }
0x3848   :  { %v24840_v46 = vsel %vm1735_vm3, %v17876_v37, 0 }
0x3849   :  { %v15155_v25 = vpack.c.bf16 %v15151_v45, %v15151_v45  ;;  %20708 = vmatpush3.bf16.msra.mxu1 %v24840_v46 }
0x384a   :  { %20719 = vmatprep.subr.bf16.mxu1 %v25134_v10 }
0x384b   :  { %20692 = vmatmul.mubr.msk.bf16.vlgmr.msra.gmra.mrb[16].mxu0 %vm1491_vm2, %v15155_v25 }
0x384c   :  { %20702 = vmatpush3.bf16.msra.mxu0 %v15304_v0  ;;  %20703 = vmatprep.mubr.msk.bf16.mxu0 %vm21433_vm0, %v25134_v10 }
0x384d   :  { %20713 = vmatprep.subr.bf16.mxu0 %v25134_v10 }
0x384e   :  { %v21400_v41 = vpop.eup %21399 }
0x384f   :  { %v15153_v8 = vmul.f32 %v21400_v41, %v21392_v47 }
0x3851   :  { %v15157_v52 = vpack.c.bf16 %v15153_v8, %v15153_v8 }
0x3853   :  { %20704 = vmatmul.mubr.msk.bf16.vlgmr.msra.gmra.mrb[20].mxu0 %vm1491_vm2, %v15157_v52 }
0x3854   :  { %20715 = vmatprep.mubr.msk.bf16.mxu0 %vm21433_vm0, %v25134_v10  ;;  %20714 = vmatpush3.bf16.msra.mxu0 %v24846_v48 }
0x3855   :  { %20725 = vmatprep.subr.bf16.mxu0 %v25134_v10 }
0x38cc   :  { %v14112_v47 = vpop.xlane.xlu1 %14111 }
0x38cd   :  { %v14114_v19 = vmul.f32 0.03125, %v14112_v47 }
0x38cf   :  { %v14116_v9 = vadd.f32 1e-05, %v14114_v19 }
0x38d1   :  { %21401 = vrsqrt.f32 %v14116_v9 }
0x38db   :  { %v21402_v5 = vpop.eup %21401 }
0x38dc   :  { %v14120_v45 = vmul.f32 %v21402_v5, %v14104_v51  ;;  %v17879_v51 = vld [vmem:[%s23668_s22 + $0x1c] sm:$0xf]  ;;  %s21470_s22 = smov 38  }
0x38de   :  { %v14128_v0 = vmul.f32 %v24535_v6, %v14120_v45 }
0x38e0   :  { %v24865_v3 = vadd.f32 %v24542_v62, %v14128_v0 }
0x38e2   :  { %v15548_v6 = vpack.c.bf16 %v24865_v3, %v24865_v3 }
0x390e   :  { %v15202_v38 = vpop.f32.mrb[20].mxu1 }
0x390f   :  { %v15346_v35 = vpack.c.bf16 %v15202_v38, %v15202_v38  ;;  %v20687_v2 = vpop.f32.mrb[21].mxu1 }
0x3910   :  { %v15205_v61 = vpop.f32.mrb[22].mxu1 }
0x3911   :  { %v20688_v23 = vpop.f32.mrb[23].mxu1  ;;  %20710 = vmatmul.mubr.msk.bf16.vlgmr.msra.gmra.mrb[28].mxu1 %vm1491_vm2, %v15346_v35 }
0x3912   :  { %20720 = vmatpush3.bf16.msra.mxu1 %v24852_v17  ;;  %20721 = vmatprep.mubr.msk.bf16.mxu1 %vm21433_vm0, %v25134_v10 }
0x3913   :  { %20731 = vmatprep.subr.bf16.mxu1 %v25134_v10 }
0x3916   :  { %v15294_v25 = vpop.f32.mrb[24].mxu1 }
0x3917   :  { %v15348_v41 = vpack.c.bf16 %v15294_v25, %v15294_v25  ;;  %v20699_v8 = vpop.f32.mrb[25].mxu1 }
0x3918   :  { %v15297_v52 = vpop.f32.mrb[26].mxu1 }
0x3919   :  { %v20700_v37 = vpop.f32.mrb[27].mxu1  ;;  %20722 = vmatmul.mubr.msk.bf16.vlgmr.msra.gmra.mrb[32].mxu1 %vm1491_vm2, %v15348_v41 }
0x391a   :  { %20732 = vmatpush3.bf16.msra.mxu1 %v24538_v31  ;;  %20735 = vmatprep.mubr.msk.bf16.mxu1 %vm21433_vm0, %v25134_v10  ;;  %v24874_v31 = vsel %vm1735_vm3, %v17879_v51, 0 }
0x391b   :  { %20733 = vmatprep.subr.bf16.mxu1 %v25134_v10 }
0x391e   :  { %v15248_v47 = vpop.f32.mrb[16].mxu0  ;;  %20734 = vmatpush3.bf16.msra.mxu1 %v24547_v13 }
0x391f   :  { %v15347_v19 = vpack.c.bf16 %v15248_v47, %v15248_v47  ;;  %v20693_v9 = vpop.f32.mrb[17].mxu0  ;;  %20747 = vmatprep.subr.bf16.mxu1 %v25134_v10 }
0x3920   :  { %v15251_v11 = vpop.f32.mrb[18].mxu0 }
0x3921   :  { %v20694_v38 = vpop.f32.mrb[19].mxu0  ;;  %20716 = vmatmul.mubr.msk.bf16.vlgmr.msra.gmra.mrb[24].mxu0 %vm1491_vm2, %v15347_v19  ;;  %20736 = vmatmul.mubr.msk.bf16.vlgmr.msra.gmra.mrb[36].mxu1 %vm819_vm1, %v15548_v6 }
0x3922   :  { %20726 = vmatpush3.bf16.msra.mxu0 %v24874_v31  ;;  %20748 = vmatpush3.bf16.msra.mxu1 %v24557_v15 }
0x3923   :  { %20749 = vmatprep.subr.bf16.mxu1 %v25134_v10  ;;  %20727 = vmatprep.mubr.msk.bf16.mxu0 %vm21433_vm0, %v25134_v10 }
0x3924   :  { %20751 = vmatprep.mubr.msk.bf16.mxu1 %vm21433_vm0, %v25134_v10  ;;  %20739 = vmatprep.subr.bf16.mxu0 %v25134_v10 }
0x3926   :  { %v15340_v62 = vpop.f32.mrb[20].mxu0  ;;  %20750 = vmatpush3.bf16.msra.mxu1 %v24567_v36 }
0x3927   :  { %v15349_v13 = vpack.c.bf16 %v15340_v62, %v15340_v62  ;;  %v20705_v35 = vpop.f32.mrb[21].mxu0  ;;  %20763 = vmatprep.subr.bf16.mxu1 %v25134_v10 }
0x3928   :  { %v15343_v2 = vpop.f32.mrb[22].mxu0 }
0x3929   :  { %v20706_v5 = vpop.f32.mrb[23].mxu0  ;;  %20728 = vmatmul.mubr.msk.bf16.vlgmr.msra.gmra.mrb[28].mxu0 %vm1491_vm2, %v15349_v13  ;;  %20752 = vmatmul.mubr.msk.bf16.vlgmr.msra.gmra.mrb[40].mxu1 %vm819_vm1, %v15548_v6 }
0x392a   :  { %20740 = vmatpush3.bf16.msra.mxu0 %v24577_v42  ;;  %20764 = vmatpush3.bf16.msra.mxu1 %v24580_v50 }
0x392b   :  { %20741 = vmatprep.subr.bf16.mxu0 %v25134_v10  ;;  %20765 = vmatprep.subr.bf16.mxu1 %v25134_v10 }
0x392c   :  { %20743 = vmatprep.mubr.msk.bf16.mxu0 %vm21433_vm0, %v25134_v10  ;;  %20767 = vmatprep.mubr.msk.bf16.mxu1 %vm21433_vm0, %v25134_v10 }
0x392e   :  { %20742 = vmatpush3.bf16.msra.mxu0 %v24588_v43  ;;  %20766 = vmatpush3.bf16.msra.mxu1 %v24591_v44 }
0x392f   :  { %20755 = vmatprep.subr.bf16.mxu0 %v25134_v10  ;;  %20779 = vmatprep.subr.bf16.mxu1 %v25134_v10 }
0x3931   :  { %20744 = vmatmul.mubr.msk.bf16.vlgmr.msra.gmra.mrb[32].mxu0 %vm819_vm1, %v15548_v6  ;;  %20768 = vmatmul.mubr.msk.bf16.vlgmr.msra.gmra.mrb[44].mxu1 %vm819_vm1, %v23724_v22 }
0x3932   :  { %20756 = vmatpush3.bf16.msra.mxu0 %v24602_v33  ;;  %20780 = vmatpush3.bf16.msra.mxu1 %v24605_v12 }
0x3933   :  { %20757 = vmatprep.subr.bf16.mxu0 %v25134_v10  ;;  %20781 = vmatprep.subr.bf16.mxu1 %v25134_v10 }
0x3934   :  { %20759 = vmatprep.mubr.msk.bf16.mxu0 %vm21433_vm0, %v25134_v10  ;;  %20783 = vmatprep.mubr.msk.bf16.mxu1 %vm21433_vm0, %v25134_v10 }
0x3936   :  { %20758 = vmatpush3.bf16.msra.mxu0 %v24615_v20  ;;  %20782 = vmatpush3.bf16.msra.mxu1 %v24618_v24 }
0x3937   :  { %20771 = vmatprep.subr.bf16.mxu0 %v25134_v10  ;;  %20795 = vmatprep.subr.bf16.mxu1 %v25134_v10 }
0x3939   :  { %20760 = vmatmul.mubr.msk.bf16.vlgmr.msra.gmra.mrb[36].mxu0 %vm819_vm1, %v15548_v6  ;;  %20784 = vmatmul.mubr.msk.bf16.vlgmr.msra.gmra.mrb[48].mxu1 %vm819_vm1, %v23724_v22 }
0x393a   :  { %20772 = vmatpush3.bf16.msra.mxu0 %v24629_v21  ;;  %20796 = vmatpush3.bf16.msra.mxu1 %v24632_v39 }
0x393b   :  { %20773 = vmatprep.subr.bf16.mxu0 %v25134_v10  ;;  %20797 = vmatprep.subr.bf16.mxu1 %v25134_v10 }
0x393c   :  { %20775 = vmatprep.mubr.msk.bf16.mxu0 %vm21433_vm0, %v25134_v10  ;;  %20799 = vmatprep.mubr.msk.bf16.mxu1 %vm21433_vm0, %v25134_v10 }
0x393e   :  { %20774 = vmatpush3.bf16.msra.mxu0 %v24642_v57  ;;  %20798 = vmatpush3.bf16.msra.mxu1 %v24645_v27 }
0x393f   :  { %20787 = vmatprep.subr.bf16.mxu0 %v25134_v10  ;;  %20811 = vmatprep.subr.bf16.mxu1 %v25134_v10 }
0x3941   :  { %20776 = vmatmul.mubr.msk.bf16.vlgmr.msra.gmra.mrb[40].mxu0 %vm819_vm1, %v23724_v22  ;;  %20800 = vmatmul.mubr.msk.bf16.vlgmr.msra.gmra.mrb[52].mxu1 %vm819_vm1, %v23724_v22 }
0x3942   :  { %20788 = vmatpush3.bf16.msra.mxu0 %v24656_v63  ;;  %20812 = vmatpush3.bf16.msra.mxu1 %v24659_v56 }
0x3943   :  { %20789 = vmatprep.subr.bf16.mxu0 %v25134_v10  ;;  %20813 = vmatprep.subr.bf16.mxu1 %v25134_v10 }
0x3944   :  { %20791 = vmatprep.mubr.msk.bf16.mxu0 %vm21433_vm0, %v25134_v10  ;;  %20815 = vmatprep.mubr.msk.bf16.mxu1 %vm21433_vm0, %v25134_v10 }
0x3946   :  { %20790 = vmatpush3.bf16.msra.mxu0 %v24670_v59  ;;  %20814 = vmatpush3.bf16.msra.mxu1 %v24673_v54 }
0x3947   :  { %20803 = vmatprep.subr.bf16.mxu0 %v25134_v10  ;;  %20827 = vmatprep.subr.bf16.mxu1 %v25134_v10 }
0x3949   :  { %20792 = vmatmul.mubr.msk.bf16.vlgmr.msra.gmra.mrb[44].mxu0 %vm819_vm1, %v23724_v22  ;;  %20816 = vmatmul.mubr.msk.bf16.vlgmr.msra.gmra.mrb[56].mxu1 %vm819_vm1, %v23724_v22 }
0x394a   :  { %20804 = vmatpush3.bf16.msra.mxu0 %v24684_v28  ;;  %20807 = vmatprep.mubr.msk.bf16.mxu0 %vm21433_vm0, %v25134_v10 }
0x394b   :  { %20805 = vmatprep.subr.bf16.mxu0 %v25134_v10  ;;  %20829 = vmatprep.mubr.msk.bf16.mxu1 %vm21433_vm0, %v25134_v10 }
0x394e   :  { %20806 = vmatpush3.bf16.msra.mxu0 %v24694_v49 }
0x394f   :  { %20819 = vmatprep.subr.bf16.mxu0 %v25134_v10 }
0x3951   :  { %20808 = vmatmul.mubr.msk.bf16.vlgmr.msra.gmra.mrb[48].mxu0 %vm819_vm1, %v23724_v22 }
0x3952   :  { %20820 = vmatpush3.bf16.msra.mxu0 %v24703_v30  ;;  %20823 = vmatprep.mubr.msk.bf16.mxu0 %vm21433_vm0, %v25134_v10 }
0x3953   :  { %20821 = vmatprep.subr.bf16.mxu0 %v25134_v10 }
0x3956   :  { %20822 = vmatpush3.bf16.msra.mxu0 %v24710_v4 }
0x3957   :  { %20833 = vmatprep.subr.bf16.mxu0 %v25134_v10 }
0x3959   :  { %20824 = vmatmul.mubr.msk.bf16.vlgmr.msra.gmra.mrb[52].mxu0 %vm819_vm1, %v23724_v22 }
0x395a   :  { %20835 = vmatprep.mubr.msk.bf16.mxu0 %vm21433_vm0, %v25134_v10 }
0x39e4   :  { %v15390_v15 = vpop.f32.mrb[28].mxu1 }
0x39e5   :  { %v20711_v36 = vpop.f32.mrb[29].mxu1  ;;  %v15534_v21 = vsel %vm819_vm1, %v15390_v15, 0.0 }
0x39e6   :  { %v15393_v42 = vpop.f32.mrb[30].mxu1 }
0x39e7   :  { %v20712_v50 = vpop.f32.mrb[31].mxu1 }
0x39ec   :  { %v15482_v43 = vpop.f32.mrb[32].mxu1 }
0x39ed   :  { %v20723_v44 = vpop.f32.mrb[33].mxu1  ;;  %v15537_v59 = vsel %vm819_vm1, %v15482_v43, 0.0 }
0x39ee   :  { %v15485_v33 = vpop.f32.mrb[34].mxu1 }
0x39ef   :  { %v20724_v12 = vpop.f32.mrb[35].mxu1 }
0x39f4   :  { %v15436_v20 = vpop.f32.mrb[24].mxu0  ;;  %v15586_v24 = vpop.f32.mrb[36].mxu1 }
0x39f5   :  { %v15535_v39 = vsel %vm819_vm1, %v15436_v20, 0.0  ;;  %v20717_v57 = vpop.f32.mrb[25].mxu0  ;;  %v20737_v27 = vpop.f32.mrb[37].mxu1  ;;  %v15587_v2 = vadd.f32 %v24732_v29, %v15586_v24 }
0x39f6   :  { %v15536_v22 = vadd.f32 %v15535_v39, %v15534_v21  ;;  %v15439_v63 = vpop.f32.mrb[26].mxu0  ;;  %v15589_v56 = vpop.f32.mrb[38].mxu1 }
0x39f7   :  { %v20718_v54 = vpop.f32.mrb[27].mxu0  ;;  %v20738_v28 = vpop.f32.mrb[39].mxu1  ;;  %v16032_v44 = vpack.c.bf16 %v15587_v2, %v15587_v2 }
0x39f8   :  { %v15538_v49 = vadd.f32 %v15537_v59, %v15536_v22 }
0x39fc   :  { %v15528_v30 = vpop.f32.mrb[28].mxu0  ;;  %v15666_v4 = vpop.f32.mrb[40].mxu1 }
0x39fd   :  { %v15539_v61 = vsel %vm819_vm1, %v15528_v30, 0.0  ;;  %v20729_v23 = vpop.f32.mrb[29].mxu0  ;;  %v20753_v45 = vpop.f32.mrb[41].mxu1  ;;  %v15667_v29 = vadd.f32 %v24742_v32, %v15666_v4 }
0x39fe   :  { %v24976_v25 = vadd.f32 %v15539_v61, %v15538_v49  ;;  %v15531_v0 = vpop.f32.mrb[30].mxu0  ;;  %v15669_v41 = vpop.f32.mrb[42].mxu1 }
0x39ff   :  { %v20730_v8 = vpop.f32.mrb[31].mxu0  ;;  %v20754_v52 = vpop.f32.mrb[43].mxu1  ;;  %v16034_v59 = vpack.c.bf16 %v15667_v29, %v15667_v29 }
0x3a04   :  { %v15626_v37 = vpop.f32.mrb[32].mxu0  ;;  %v15746_v51 = vpop.f32.mrb[44].mxu1 }
0x3a05   :  { %v15747_v47 = vadd.f32 %v24728_v14, %v15746_v51  ;;  %v20745_v6 = vpop.f32.mrb[33].mxu0  ;;  %v20769_v19 = vpop.f32.mrb[45].mxu1 }
0x3a06   :  { %v15629_v9 = vpop.f32.mrb[34].mxu0  ;;  %v15749_v11 = vpop.f32.mrb[46].mxu1 }
0x3a07   :  { %v16036_v38 = vpack.c.bf16 %v15747_v47, %v15747_v47  ;;  %v20746_v62 = vpop.f32.mrb[35].mxu0  ;;  %v20770_v13 = vpop.f32.mrb[47].mxu1 }
0x3a09   :  { %v16044_v35 = vsel %vm1491_vm2, %v16036_v38, 0 }
0x3a0a   :  { %20828 = vmatpush3.bf16.xpose.msra.mxu1 %v16044_v35 }
0x3a0b   :  { %20839 = vmatprep.subr.bf16.mxu1 %v25134_v10 }
0x3a0c   :  { %v15706_v5 = vpop.f32.mrb[36].mxu0  ;;  %v15826_v15 = vpop.f32.mrb[48].mxu1 }
0x3a0d   :  { %v15827_v36 = vadd.f32 %v24736_v18, %v15826_v15  ;;  %v20761_v42 = vpop.f32.mrb[37].mxu0  ;;  %v20785_v14 = vpop.f32.mrb[49].mxu1  ;;  %v15707_v6 = vadd.f32 %v24776_v60, %v15706_v5 }
0x3a0e   :  { %v15709_v50 = vpop.f32.mrb[38].mxu0  ;;  %v15829_v43 = vpop.f32.mrb[50].mxu1 }
0x3a0f   :  { %v16038_v33 = vpack.c.bf16 %v15827_v36, %v15827_v36  ;;  %v20762_v12 = vpop.f32.mrb[39].mxu0  ;;  %v20786_v20 = vpop.f32.mrb[51].mxu1  ;;  %v16035_v38 = vpack.c.bf16 %v15707_v6, %v15707_v6 }
0x3a11   :  { %v16136_v21 = vsel %vm1491_vm2, %v16038_v33, 0  ;;  %20830 = vmatmul.mubr.msk.bf16.vlgmr.msra.gmra.mrb[60].mxu1 %vm1491_vm2, %v16032_v44 }
0x3a12   :  { %20840 = vmatpush3.bf16.xpose.msra.mxu1 %v16136_v21  ;;  %20841 = vmatprep.mubr.msk.bf16.mxu1 %vm21433_vm0, %v25134_v10 }
0x3a13   :  { %20851 = vmatprep.subr.bf16.mxu1 %v25134_v10 }
0x3a14   :  { %v15786_v18 = vpop.f32.mrb[40].mxu0  ;;  %v15906_v24 = vpop.f32.mrb[52].mxu1 }
0x3a15   :  { %v15787_v39 = vadd.f32 %v24747_v26, %v15786_v18  ;;  %v15907_v57 = vadd.f32 %v24750_v16, %v15906_v24  ;;  %v20777_v27 = vpop.f32.mrb[41].mxu0  ;;  %v20801_v22 = vpop.f32.mrb[53].mxu1  ;;  %v15627_v26 = vadd.f32 %v24759_v53, %v15626_v37 }
0x3a16   :  { %v15789_v63 = vpop.f32.mrb[42].mxu0  ;;  %v15909_v56 = vpop.f32.mrb[54].mxu1 }
0x3a17   :  { %v16037_v54 = vpack.c.bf16 %v15787_v39, %v15787_v39  ;;  %v16280_v28 = vpack.c.bf16 %v15907_v57, %v15907_v57  ;;  %v20778_v49 = vpop.f32.mrb[43].mxu0  ;;  %v20802_v30 = vpop.f32.mrb[55].mxu1  ;;  %v16033_v52 = vpack.c.bf16 %v15627_v26, %v15627_v26 }
0x3a19   :  { %v16090_v61 = vsel %vm1491_vm2, %v16037_v54, 0  ;;  %v16288_v32 = vsel %vm1735_vm3, %v16280_v28, 0  ;;  %20842 = vmatmul.mubr.msk.bf16.vlgmr.msra.gmra.mrb[64].mxu1 %vm1491_vm2, %v16034_v59 }
0x3a1a   :  { %20834 = vmatpush3.bf16.xpose.msra.mxu0 %v16090_v61  ;;  %20852 = vmatpush3.bf16.msra.mxu1 %v16288_v32 }
0x3a1b   :  { %20845 = vmatprep.subr.bf16.mxu0 %v25134_v10  ;;  %20853 = vmatprep.mubr.msk.bf16.mxu1 %vm21433_vm0, %v25134_v10 }
0x3a1c   :  { %v15866_v16 = vpop.f32.mrb[44].mxu0  ;;  %v24998_v4 = vpop.f32.mrb[56].mxu1  ;;  %20863 = vmatprep.subr.bf16.mxu1 %v25134_v10 }
0x3a1d   :  { %v15867_v23 = vadd.f32 %v24765_v1, %v15866_v16  ;;  %v20793_v45 = vpop.f32.mrb[45].mxu0  ;;  %v20817_v0 = vpop.f32.mrb[57].mxu1 }
0x3a1e   :  { %v15869_v41 = vpop.f32.mrb[46].mxu0  ;;  %v15989_v8 = vpop.f32.mrb[58].mxu1 }
0x3a1f   :  { %v16039_v51 = vpack.c.bf16 %v15867_v23, %v15867_v23  ;;  %v20794_v47 = vpop.f32.mrb[47].mxu0  ;;  %v20818_v53 = vpop.f32.mrb[59].mxu1 }
0x3a20   :  { %v25026_v53 = vld [vmem:[%s23875_s28 + $0x1] ss:$0 sm:$0xff] }
0x3a21   :  { %v16182_v37 = vsel %vm1491_vm2, %v16039_v51, 0  ;;  %20836 = vmatmul.mubr.msk.bf16.vlgmr.msra.gmra.mrb[56].mxu0 %vm1491_vm2, %v16033_v52  ;;  %v15547_v6 = vadd.f32 %v25026_v53, %v24976_v25 }
0x3a22   :  { %20846 = vmatpush3.bf16.xpose.msra.mxu0 %v16182_v37  ;;  %20847 = vmatprep.mubr.msk.bf16.mxu0 %vm21433_vm0, %v25134_v10 }
0x3a23   :  { %20857 = vmatprep.subr.bf16.mxu0 %v25134_v10 }
0x3a24   :  { %v15946_v1 = vpop.f32.mrb[48].mxu0 }
0x3a25   :  { %v15947_v19 = vadd.f32 %v24781_v40, %v15946_v1  ;;  %v20809_v9 = vpop.f32.mrb[49].mxu0 }
0x3a26   :  { %v15949_v11 = vpop.f32.mrb[50].mxu0 }
0x3a27   :  { %v16281_v62 = vpack.c.bf16 %v15947_v19, %v15947_v19  ;;  %v20810_v13 = vpop.f32.mrb[51].mxu0  ;;  %v16652_v11 = vadd.f32 %v15547_v6, %v24552_v58  ;;  %v15987_v58 = vadd.f32 %v24812_v55, %v24998_v4 }
0x3a29   :  { %v16334_v35 = vsel %vm1735_vm3, %v16281_v62, 0  ;;  %20848 = vmatmul.mubr.msk.bf16.vlgmr.msra.gmra.mrb[60].mxu0 %vm1491_vm2, %v16035_v38  ;;  %v16658_v13 = vsel %vm819_vm1, %v16652_v11, 0.0 }
0x3a2a   :  { %20858 = vmatpush3.bf16.msra.mxu0 %v16334_v35  ;;  %20859 = vmatprep.mubr.msk.bf16.mxu0 %vm21433_vm0, %v25134_v10 }
0x3a2b   :  { %20869 = vmatprep.subr.bf16.mxu0 %v25134_v10 }
0x3a2c   :  { %v25014_v60 = vpop.f32.mrb[52].mxu0 }
0x3a2d   :  { %v20825_v2 = vpop.f32.mrb[53].mxu0 }
0x3a2e   :  { %v16029_v5 = vpop.f32.mrb[54].mxu0 }
0x3a2f   :  { %v20826_v40 = vpop.f32.mrb[55].mxu0 }
0x3ae4   :  { %v16080_v15 = vpop.f32.mrb[60].mxu1 }
0x3ae5   :  { %v16224_v36 = vmul.f32 0.35355338, %v16080_v15  ;;  %v20831_v42 = vpop.f32.mrb[61].mxu1 }
0x3ae6   :  { %v16083_v14 = vpop.f32.mrb[62].mxu1  ;;  %v16282_v42 = vpack.c.bf16 %v15987_v58, %v15987_v58 }
0x3ae7   :  { %v16228_v50 = vadd.f32 %v16224_v36, %v22991_v7  ;;  %v20832_v43 = vpop.f32.mrb[63].mxu1 }
0x3ae9   :  { %v16232_v44 = vsel %vm1491_vm2, %v16228_v50, -inf }
0x3aea   :  { %16233 = vmax.xlane.f32.xlu0 %v16232_v44 }
0x3aec   :  { %v16172_v33 = vpop.f32.mrb[64].mxu1 }
0x3aed   :  { %v16226_v12 = vmul.f32 0.35355338, %v16172_v33  ;;  %v20843_v20 = vpop.f32.mrb[65].mxu1 }
0x3aee   :  { %v16175_v21 = vpop.f32.mrb[66].mxu1 }
0x3aef   :  { %v16230_v29 = vadd.f32 %v16226_v12, %v22991_v7  ;;  %v20844_v18 = vpop.f32.mrb[67].mxu1  ;;  %v16380_v12 = vsel %vm1735_vm3, %v16282_v42, 0 }
0x3af1   :  { %v16238_v24 = vsel %vm1491_vm2, %v16230_v29, -inf }
0x3af2   :  { %16239 = vmax.xlane.f32.xlu0 %v16238_v24  ;;  %v16027_v24 = vadd.f32 %v24823_v34, %v25014_v60 }
0x3af4   :  { %v16126_v39 = vpop.f32.mrb[56].mxu0 }
0x3af5   :  { %v16225_v57 = vmul.f32 0.35355338, %v16126_v39  ;;  %v20837_v27 = vpop.f32.mrb[57].mxu0 }
0x3af6   :  { %v16129_v22 = vpop.f32.mrb[58].mxu0  ;;  %v16283_v27 = vpack.c.bf16 %v16027_v24, %v16027_v24 }
0x3af7   :  { %v16229_v63 = vadd.f32 %v16225_v57, %v22991_v7  ;;  %v20838_v56 = vpop.f32.mrb[59].mxu0 }
0x3af8   :  { %v16426_v56 = vsel %vm1735_vm3, %v16283_v27, 0 }
0x3af9   :  { %v16235_v59 = vsel %vm1491_vm2, %v16229_v63, -inf }
0x3afa   :  { %16236 = vmax.xlane.f32.xlu1 %v16235_v59 }
0x3afc   :  { %v16218_v54 = vpop.f32.mrb[60].mxu0 }
0x3afd   :  { %v16227_v28 = vmul.f32 0.35355338, %v16218_v54  ;;  %v20849_v49 = vpop.f32.mrb[61].mxu0 }
0x3afe   :  { %v16221_v30 = vpop.f32.mrb[62].mxu0 }
0x3aff   :  { %v16231_v61 = vadd.f32 %v16227_v28, %v22991_v7  ;;  %v20850_v32 = vpop.f32.mrb[63].mxu0 }
0x3b01   :  { %v16241_v26 = vsel %vm1491_vm2, %v16231_v61, -inf }
0x3b02   :  { %16242 = vmax.xlane.f32.xlu1 %v16241_v26 }
0x3b77   :  { %v16234_v16 = vpop.xlane.xlu0 %16233 }
0x3b78   :  { %v16244_v23 = vsub.f32 %v16228_v50, %v16234_v16 }
0x3b7a   :  { %v16248_v45 = vmul.f32 1.442695, %v16244_v23 }
0x3b7c   :  { %21403 = vpow2.f32 %v16248_v45 }
0x3b7f   :  { %v16240_v0 = vpop.xlane.xlu0 %16239 }
0x3b80   :  { %v16246_v41 = vsub.f32 %v16230_v29, %v16240_v0 }
0x3b82   :  { %v16252_v8 = vmul.f32 1.442695, %v16246_v41 }
0x3b84   :  { %21405 = vpow2.f32 %v16252_v8 }
0x3b86   :  { %v21404_v52 = vpop.eup %21403 }
0x3b87   :  { %v16237_v51 = vpop.xlane.xlu1 %16236  ;;  %v16256_v47 = vsel %vm1491_vm2, %v21404_v52, 0.0 }
0x3b88   :  { %v16245_v37 = vsub.f32 %v16229_v63, %v16237_v51  ;;  %16257 = vadd.xlane.f32.xlu0 %v16256_v47 }
0x3b8a   :  { %v16250_v7 = vmul.f32 1.442695, %v16245_v37 }
0x3b8c   :  { %21407 = vpow2.f32 %v16250_v7 }
0x3b8e   :  { %v21406_v1 = vpop.eup %21405 }
0x3b8f   :  { %v16243_v19 = vpop.xlane.xlu1 %16242  ;;  %v16262_v9 = vsel %vm1491_vm2, %v21406_v1, 0.0 }
0x3b90   :  { %v16247_v38 = vsub.f32 %v16231_v61, %v16243_v19  ;;  %16263 = vadd.xlane.f32.xlu0 %v16262_v9 }
0x3b92   :  { %v16254_v62 = vmul.f32 1.442695, %v16247_v38 }
0x3b94   :  { %21409 = vpow2.f32 %v16254_v62  ;;  %16659 = vadd.xlane.f32.xlu0 %v16658_v13 }
0x3b96   :  { %v21408_v35 = vpop.eup %21407 }
0x3b97   :  { %v16259_v2 = vsel %vm1491_vm2, %v21408_v35, 0.0 }
0x3b98   :  { %16260 = vadd.xlane.f32.xlu1 %v16259_v2 }
0x3b9e   :  { %v21410_v5 = vpop.eup %21409 }
0x3b9f   :  { %v16265_v25 = vsel %vm1491_vm2, %v21410_v5, 0.0 }
0x3ba0   :  { %16266 = vadd.xlane.f32.xlu1 %v16265_v25 }
0x3c15   :  { %v16258_v40 = vpop.xlane.xlu0 %16257 }
0x3c16   :  { %21411 = vrcp.f32 %v16258_v40 }
0x3c1d   :  { %v16264_v15 = vpop.xlane.xlu0 %16263 }
0x3c1e   :  { %21413 = vrcp.f32 %v16264_v15 }
0x3c20   :  { %v21412_v36 = vpop.eup %21411 }
0x3c21   :  { %v16272_v14 = vmul.f32 %v21412_v36, %v21404_v52  ;;  %v16660_v50 = vpop.xlane.xlu0 %16659 }
0x3c22   :  { %v16664_v43 = vmul.f32 0.03125, %v16660_v50 }
0x3c23   :  { %v16276_v44 = vpack.c.bf16 %v16272_v14, %v16272_v14 }
0x3c24   :  { %v25037_v33 = vsub.f32 %v16652_v11, %v16664_v43 }
0x3c25   :  { %v16261_v20 = vpop.xlane.xlu1 %16260  ;;  %20854 = vmatmul.mubr.msk.bf16.vlgmr.msra.gmra.mrb[68].mxu1 %vm1491_vm2, %v16276_v44 }
0x3c26   :  { %21415 = vrcp.f32 %v16261_v20  ;;  %20864 = vmatpush3.bf16.msra.mxu1 %v16380_v12  ;;  %v16668_v55 = vmul.f32 %v25037_v33, %v25037_v33  ;;  %20865 = vmatprep.mubr.msk.bf16.mxu1 %vm21433_vm0, %v25134_v10 }
0x3c27   :  { %20875 = vmatprep.subr.bf16.mxu1 %v25134_v10 }
0x3c28   :  { %v21414_v4 = vpop.eup %21413  ;;  %v16670_v21 = vsel %vm819_vm1, %v16668_v55, 0.0 }
0x3c29   :  { %v16274_v29 = vmul.f32 %v21414_v4, %v21406_v1  ;;  %16671 = vadd.xlane.f32.xlu0 %v16670_v21 }
0x3c2b   :  { %v16278_v18 = vpack.c.bf16 %v16274_v29, %v16274_v29 }
0x3c2d   :  { %v16267_v39 = vpop.xlane.xlu1 %16266  ;;  %20866 = vmatmul.mubr.msk.bf16.vlgmr.msra.gmra.mrb[72].mxu1 %vm1491_vm2, %v16278_v18 }
0x3c2e   :  { %21417 = vrcp.f32 %v16267_v39  ;;  %20876 = vmatpush3.bf16.msra.mxu1 %v24840_v46  ;;  %20877 = vmatprep.mubr.msk.bf16.mxu1 %vm21433_vm0, %v25134_v10  ;;  %v21187_v39 = vld [vmem:[%s23942_s6 + $0x10] sm:$0xff]  }
0x3c2f   :  { %20887 = vmatprep.subr.bf16.mxu1 %v25134_v10 }
0x3c30   :  { %v21416_v57 = vpop.eup %21415 }
0x3c31   :  { %v16273_v22 = vmul.f32 %v21416_v57, %v21408_v35  ;;  %v21188_v57 = vld [vmem:[%s23942_s6 + $0x18] sm:$0xff]  }
0x3c33   :  { %v16277_v63 = vpack.c.bf16 %v16273_v22, %v16273_v22 }
0x3c35   :  { %20860 = vmatmul.mubr.msk.bf16.vlgmr.msra.gmra.mrb[64].mxu0 %vm1491_vm2, %v16277_v63 }
0x3c36   :  { %20870 = vmatpush3.bf16.msra.mxu0 %v16426_v56  ;;  %20871 = vmatprep.mubr.msk.bf16.mxu0 %vm21433_vm0, %v25134_v10 }
0x3c37   :  { %20881 = vmatprep.subr.bf16.mxu0 %v25134_v10 }
0x3c38   :  { %v21418_v34 = vpop.eup %21417 }
0x3c39   :  { %v16275_v46 = vmul.f32 %v21418_v34, %v21410_v5 }
0x3c3b   :  { %v16279_v60 = vpack.c.bf16 %v16275_v46, %v16275_v46 }
0x3c3d   :  { %20872 = vmatmul.mubr.msk.bf16.vlgmr.msra.gmra.mrb[68].mxu0 %vm1491_vm2, %v16279_v60 }
0x3c3e   :  { %20882 = vmatpush3.bf16.msra.mxu0 %v24846_v48  ;;  %20883 = vmatprep.mubr.msk.bf16.mxu0 %vm21433_vm0, %v25134_v10 }
0x3c3f   :  { %20893 = vmatprep.subr.bf16.mxu0 %v25134_v10 }
0x3cb6   :  { %v16672_v27 = vpop.xlane.xlu0 %16671 }
0x3cb7   :  { %v16676_v22 = vmul.f32 0.03125, %v16672_v27 }
0x3cb9   :  { %v16678_v63 = vadd.f32 1e-05, %v16676_v22  ;;  %v17997_v22 = vld [vmem:[%s24027_s15 + $0x1] ss:$0 sm:$0xff] }
0x3cbb   :  { %21419 = vrsqrt.f32 %v16678_v63 }
0x3cc5   :  { %v21420_v60 = vpop.eup %21419 }
0x3cf8   :  { %v16324_v59 = vpop.f32.mrb[68].mxu1 }
0x3cf9   :  { %v16468_v54 = vpack.c.bf16 %v16324_v59, %v16324_v59  ;;  %v20855_v28 = vpop.f32.mrb[69].mxu1  ;;  %v16682_v59 = vmul.f32 %v21420_v60, %v25037_v33  ;;  %v21192_v33 = vld [vmem:[%s23951_s29 + $0x38] sm:$0xff]  }
0x3cfa   :  { %v16327_v49 = vpop.f32.mrb[70].mxu1 }
0x3cfb   :  { %v20856_v30 = vpop.f32.mrb[71].mxu1  ;;  %20878 = vmatmul.mubr.msk.bf16.vlgmr.msra.gmra.mrb[76].mxu1 %vm1491_vm2, %v16468_v54  ;;  %v17968_v54 = vld [vmem:[%s23960_s5 + $0x1] ss:$0 sm:$0xff] }
0x3cfc   :  { %20888 = vmatpush3.bf16.msra.mxu1 %v24852_v17  ;;  %20889 = vmatprep.mubr.msk.bf16.mxu1 %vm21433_vm0, %v25134_v10  ;;  %v16690_v49 = vmul.f32 %v17968_v54, %v16682_v59 }
0x3cfd   :  { %20899 = vmatprep.subr.bf16.mxu1 %v25134_v10 }
0x3d00   :  { %v16416_v48 = vpop.f32.mrb[72].mxu1 }
0x3d01   :  { %v16470_v61 = vpack.c.bf16 %v16416_v48, %v16416_v48  ;;  %v20867_v32 = vpop.f32.mrb[73].mxu1  ;;  %v17969_v48 = vld [vmem:[%s23965_s20 + $0x1] ss:$0 sm:$0xff] }
0x3d02   :  { %v16419_v26 = vpop.f32.mrb[74].mxu1  ;;  %v16698_v32 = vadd.f32 %v17969_v48, %v16690_v49 }
0x3d03   :  { %v20868_v16 = vpop.f32.mrb[75].mxu1  ;;  %20890 = vmatmul.mubr.msk.bf16.vlgmr.msra.gmra.mrb[80].mxu1 %vm1491_vm2, %v16470_v61 }
0x3d04   :  { %20903 = vmatprep.mubr.msk.bf16.mxu1 %vm21433_vm0, %v25134_v10  ;;  %20900 = vmatpush3.bf16.msra.mxu1 %v21187_v39  ;;  %v17996_v39 = vld [vmem:[%s24022_s14 + $0x1] ss:$0 sm:$0xff] }
0x3d05   :  { %20901 = vmatprep.subr.bf16.mxu1 %v25134_v10 }
0x3d08   :  { %v16370_v23 = vpop.f32.mrb[64].mxu0  ;;  %20902 = vmatpush3.bf16.msra.mxu1 %v21188_v57 }
0x3d09   :  { %v16469_v45 = vpack.c.bf16 %v16370_v23, %v16370_v23  ;;  %v20861_v0 = vpop.f32.mrb[65].mxu0  ;;  %20919 = vmatprep.subr.bf16.mxu1 %v25134_v10  ;;  %v21191_v23 = vld [vmem:[%s23951_s29 + $0x30] sm:$0xff]  }
0x3d0a   :  { %v16373_v41 = vpop.f32.mrb[66].mxu0 }
0x3d0b   :  { %v20862_v17 = vpop.f32.mrb[67].mxu0  ;;  %20884 = vmatmul.mubr.msk.bf16.vlgmr.msra.gmra.mrb[72].mxu0 %vm1491_vm2, %v16469_v45  ;;  %v17975_v45 = vld [vmem:[%s23983_s26 + $0x1] ss:$0 sm:$0xff] }
0x3d0c   :  { %20894 = vmatpush3.bf16.msra.mxu0 %v24874_v31  ;;  %20895 = vmatprep.mubr.msk.bf16.mxu0 %vm21433_vm0, %v25134_v10 }
0x3d0d   :  { %20907 = vmatprep.subr.bf16.mxu0 %v25134_v10 }
0x3d10   :  { %v16462_v8 = vpop.f32.mrb[68].mxu0 }
0x3d11   :  { %v16471_v52 = vpack.c.bf16 %v16462_v8, %v16462_v8  ;;  %v20873_v51 = vpop.f32.mrb[69].mxu0 }
0x3d12   :  { %v16465_v47 = vpop.f32.mrb[70].mxu0 }
0x3d13   :  { %v20874_v37 = vpop.f32.mrb[71].mxu0  ;;  %20896 = vmatmul.mubr.msk.bf16.vlgmr.msra.gmra.mrb[76].mxu0 %vm1491_vm2, %v16471_v52 }
0x3d14   :  { %20915 = vmatprep.mubr.msk.bf16.mxu0 %vm21433_vm0, %v25134_v10 }
0x3dce   :  { %v16509_v7 = vpop.f32.mrb[76].mxu1 }
0x3dcf   :  { %v20879_v6 = vpop.f32.mrb[77].mxu1  ;;  %v16644_v13 = vsel %vm819_vm1, %v16509_v7, 0.0 }
0x3dd0   :  { %v16512_v1 = vpop.f32.mrb[78].mxu1  ;;  %v17988_v6 = vld [vmem:[%s23992_s8 + $0x1] ss:$0 sm:$0xff] }
0x3dd1   :  { %v20880_v19 = vpop.f32.mrb[79].mxu1 }
0x3dd6   :  { %v16595_v31 = vpop.f32.mrb[80].mxu1 }
0x3dd7   :  { %v20891_v9 = vpop.f32.mrb[81].mxu1  ;;  %v16647_v40 = vsel %vm819_vm1, %v16595_v31, 0.0 }
0x3dd8   :  { %v16598_v11 = vpop.f32.mrb[82].mxu1 }
0x3dd9   :  { %v20892_v38 = vpop.f32.mrb[83].mxu1 }
0x3dde   :  { %v16552_v62 = vpop.f32.mrb[72].mxu0 }
0x3ddf   :  { %v16645_v35 = vsel %vm819_vm1, %v16552_v62, 0.0  ;;  %v20885_v2 = vpop.f32.mrb[73].mxu0 }
0x3de0   :  { %v16646_v5 = vadd.f32 %v16645_v35, %v16644_v13  ;;  %v16555_v25 = vpop.f32.mrb[74].mxu0 }
0x3de1   :  { %v20886_v58 = vpop.f32.mrb[75].mxu0 }
0x3de2   :  { %v16648_v15 = vadd.f32 %v16647_v40, %v16646_v5 }
0x3de6   :  { %v16638_v36 = vpop.f32.mrb[76].mxu0 }
0x3de7   :  { %v16649_v42 = vsel %vm819_vm1, %v16638_v36, 0.0  ;;  %v20897_v14 = vpop.f32.mrb[77].mxu0 }
0x3de8   :  { %v16650_v50 = vadd.f32 %v16649_v42, %v16648_v15  ;;  %v16641_v43 = vpop.f32.mrb[78].mxu0 }
0x3de9   :  { %v20898_v44 = vpop.f32.mrb[79].mxu0 }
0x3dea   :  { %v16651_v12 = vadd.f32 %v25026_v53, %v16650_v50  ;;  %v21190_v53 = vld [vmem:[%s23951_s29 + $0x28] sm:$0xff]   ;;  %v21193_v44 = vld [vmem:[%s17015_s2] sm:$0xff]  }
0x3dec   :  { %v16653_v20 = vadd.f32 %v16651_v12, %v24865_v3  ;;  %v21189_v3 = vld [vmem:[%s23951_s29 + $0x20] sm:$0xff]   ;;  %v21194_v12 = vld [vmem:[%s17015_s2 + $0x8] sm:$0xff]   ;;  %s17017_s29 = sld [smem:[%s25125_s0 + %s21470_s22]]  }
0x3ded   :  { %20908 = vmatpush3.bf16.msra.mxu0 %v21189_v3 }
0x3dee   :  { %v16661_v55 = vsel %vm819_vm1, %v16653_v20, 0.0  ;;  %20909 = vmatprep.subr.bf16.mxu0 %v25134_v10 }
0x3def   :  { %16662 = vadd.xlane.f32.xlu1 %v16661_v55 }
0x3df1   :  { %20910 = vmatpush3.bf16.msra.mxu0 %v21190_v53 }
0x3df2   :  { %20911 = vmatprep.subr.bf16.mxu0 %v25134_v10 }
0x3df5   :  { %20912 = vmatpush3.bf16.msra.mxu0 %v21191_v23 }
0x3df6   :  { %20913 = vmatprep.subr.bf16.mxu0 %v25134_v10 }
0x3df9   :  { %20914 = vmatpush3.bf16.msra.mxu0 %v21192_v33 }
0x3e7c   :  { %v16663_v4 = vpop.xlane.xlu1 %16662 }
0x3e7d   :  { %v16665_v21 = vmul.f32 0.03125, %v16663_v4 }
0x3e7f   :  { %v16667_v29 = vsub.f32 %v16653_v20, %v16665_v21 }
0x3e81   :  { %v16669_v18 = vmul.f32 %v16667_v29, %v16667_v29 }
0x3e83   :  { %v16673_v24 = vsel %vm819_vm1, %v16669_v18, 0.0 }
0x3e84   :  { %16674 = vadd.xlane.f32.xlu1 %v16673_v24 }
0x3f11   :  { %v16675_v56 = vpop.xlane.xlu1 %16674 }
0x3f12   :  { %v16677_v34 = vmul.f32 0.03125, %v16675_v56 }
0x3f14   :  { %v16679_v46 = vadd.f32 1e-05, %v16677_v34 }
0x3f16   :  { %21421 = vrsqrt.f32 %v16679_v46  ;;  %v17998_v46 = vld [vmem:[%s17016_s19] ss:$0 sm:$0xff] }
0x3f20   :  { %v21422_v28 = vpop.eup %21421 }
0x3f21   :  { %v16683_v30 = vmul.f32 %v21422_v28, %v16667_v29 }
0x3f23   :  { %v16691_v61 = vmul.f32 %v17968_v54, %v16683_v30 }
0x3f25   :  { %v16699_v26 = vadd.f32 %v17969_v48, %v16691_v61 }
0x3f27   :  { %v16700_v16 = vpack.c.bf16 %v16699_v26, %v16698_v32 }
0x3f29   :  { %20904 = vmatmul.mubr.msk.bf16.vlgmr.msra.gmra.mrb[84].mxu1 %vm819_vm1, %v16700_v16 }
0x3f2a   :  { %20923 = vmatprep.mubr.msk.bf16.mxu1 %vm21433_vm0, %v25134_v10  ;;  %20920 = vmatpush3.bf16.msra.mxu1 %v21193_v44 }
0x3f2b   :  { %20921 = vmatprep.subr.bf16.mxu1 %v25134_v10 }
0x3f2e   :  { %20922 = vmatpush3.bf16.msra.mxu1 %v21194_v12 }
0x3ffc   :  { %v16763_v0 = vpop.f32.mrb[84].mxu1 }
0x3ffd   :  { %v16764_v41 = vadd.f32 %v17975_v45, %v16763_v0  ;;  %v20905_v17 = vpop.f32.mrb[85].mxu1 }
0x3ffe   :  { %v16766_v8 = vpop.f32.mrb[86].mxu1 }
0x3fff   :  { %v16767_v52 = vadd.f32 %v17975_v45, %v16766_v8  ;;  %v20906_v51 = vpop.f32.mrb[87].mxu1  ;;  %v16770_v47 = vmax.f32 %v16764_v41, 0.0 }
0x4001   :  { %v16771_v37 = vmax.f32 %v16767_v52, 0.0 }
0x4003   :  { %v16772_v7 = vpack.c.bf16 %v16771_v37, %v16770_v47 }
0x4005   :  { %20916 = vmatmul.mubr.msk.bf16.vlgmr.msra.gmra.mrb[80].mxu0 %vm3376_vm4, %v16772_v7 }
0x40d8   :  { %v16851_v1 = vpop.f32.mrb[80].mxu0 }
0x40d9   :  { %v16852_v19 = vadd.f32 %v17988_v6, %v16851_v1  ;;  %v20917_v31 = vpop.f32.mrb[81].mxu0 }
0x40da   :  { %v16854_v9 = vpop.f32.mrb[82].mxu0 }
0x40db   :  { %v16858_v11 = vadd.f32 %v16852_v19, %v16698_v32  ;;  %v16855_v38 = vadd.f32 %v17988_v6, %v16854_v9  ;;  %v20918_v62 = vpop.f32.mrb[83].mxu0 }
0x40dd   :  { %v16859_v13 = vadd.f32 %v16855_v38, %v16699_v26  ;;  %v16864_v35 = vsel %vm819_vm1, %v16858_v11, 0.0 }
0x40de   :  { %16865 = vadd.xlane.f32.xlu0 %v16864_v35 }
0x40df   :  { %v16867_v2 = vsel %vm819_vm1, %v16859_v13, 0.0 }
0x40e0   :  { %16868 = vadd.xlane.f32.xlu1 %v16867_v2 }
0x416b   :  { %v16866_v5 = vpop.xlane.xlu0 %16865 }
0x416c   :  { %v16870_v25 = vmul.f32 0.03125, %v16866_v5 }
0x416d   :  { %v16869_v40 = vpop.xlane.xlu1 %16868 }
0x416e   :  { %v16872_v58 = vsub.f32 %v16858_v11, %v16870_v25  ;;  %v16871_v15 = vmul.f32 0.03125, %v16869_v40 }
0x4170   :  { %v16873_v36 = vsub.f32 %v16859_v13, %v16871_v15  ;;  %v16874_v42 = vmul.f32 %v16872_v58, %v16872_v58 }
0x4172   :  { %v16876_v14 = vsel %vm819_vm1, %v16874_v42, 0.0  ;;  %v16875_v50 = vmul.f32 %v16873_v36, %v16873_v36 }
0x4173   :  { %16877 = vadd.xlane.f32.xlu0 %v16876_v14 }
0x4174   :  { %v16879_v43 = vsel %vm819_vm1, %v16875_v50, 0.0 }
0x4175   :  { %16880 = vadd.xlane.f32.xlu1 %v16879_v43 }
0x4200   :  { %v16878_v20 = vpop.xlane.xlu0 %16877 }
0x4201   :  { %v16882_v55 = vmul.f32 0.03125, %v16878_v20 }
0x4202   :  { %v16881_v4 = vpop.xlane.xlu1 %16880 }
0x4203   :  { %v16884_v21 = vadd.f32 1e-05, %v16882_v55  ;;  %v16883_v29 = vmul.f32 0.03125, %v16881_v4 }
0x4205   :  { %21423 = vrsqrt.f32 %v16884_v21  ;;  %v16885_v18 = vadd.f32 1e-05, %v16883_v29 }
0x4207   :  { %21425 = vrsqrt.f32 %v16885_v18 }
0x420f   :  { %v21424_v24 = vpop.eup %21423 }
0x4210   :  { %v16888_v57 = vmul.f32 %v21424_v24, %v16872_v58 }
0x4211   :  { %v21426_v3 = vpop.eup %21425 }
0x4212   :  { %v16896_v53 = vmul.f32 %v17996_v39, %v16888_v57  ;;  %v16889_v27 = vmul.f32 %v21426_v3, %v16873_v36 }
0x4214   :  { %v16897_v63 = vmul.f32 %v17996_v39, %v16889_v27  ;;  %v16904_v10 = vadd.f32 %v17997_v22, %v16896_v53 }
0x4216   :  { %v16905_v56 = vadd.f32 %v17997_v22, %v16897_v63 }
0x4218   :  { %v16906_v34 = vpack.c.bf16 %v16905_v56, %v16904_v10 }
0x421a   :  { %20924 = vmatmul.mubr.msk.bf16.vlgmr.msra.gmra.mrb[88].mxu1 %vm819_vm1, %v16906_v34 }
0x42ed   :  { %v16967_v60 = vpop.f32.mrb[88].mxu1 }
0x42ee   :  { %v16968_v59 = vadd.f32 %v17998_v46, %v16967_v60  ;;  %v20925_v54 = vpop.f32.mrb[89].mxu1 }
0x42ef   :  { %v16970_v28 = vpop.f32.mrb[90].mxu1 }
0x42f0   :  { %16974 = vst [vmem:[%s17017_s29] sm:$0xff] %v16968_v59  ;;  %v16971_v49 = vadd.f32 %v17998_v46, %v16970_v28  ;;  %v20926_v30 = vpop.f32.mrb[91].mxu1 }
0x42f2   :  { %16975 = vst [vmem:[%s17017_s29 + $0x8] sm:$0xff] %v16971_v49 }

</bundles_post_ra>
